<compile_context>
chip_gen: v5e
topology: v5e:2x2
jax: 0.10.0
libtpu: 0.0.40
codegen_flags: <defaults>
</compile_context>

<pallas_src>
import functools
import math

import jax
import jax.numpy as jnp
from jax import lax
from jax.experimental import pallas as pl
from jax.experimental.pallas import tpu as pltpu

_LN_EPS = 1e-5
_MASK_VALUE = -1e30   # finite "minus infinity": fully-masked rows stay NaN-free


@functools.lru_cache(maxsize=None)
def _vmem_limit_bytes():
    """Generation-aware scoped-VMEM budget (~75% of physical, clamped 32..100 MiB)."""
    cap = 128 * 1024 * 1024
    try:
        cap = int(pltpu.get_tpu_info().vmem_capacity_bytes)
    except Exception:
        pass
    return max(min(int(cap * 3 // 4), 100 * 1024 * 1024), 32 * 1024 * 1024)


def _pick_tile(n, target=512, min_steps=1):
    """Largest divisor of n <= target that is sublane-aligned (or the full dim)
    and leaves at least `min_steps` grid steps (keeps both v7x cores busy)."""
    for t in range(min(n, target), 0, -1):
        if n % t:
            continue
        if n // t < min_steps:
            continue
        if t % 8 == 0 or t == n:
            return t
    return n


def _pick_lane_tile(n, target=512):
    """Divisor of n usable as a lane (last) block dim: multiple of 128 or full."""
    for t in range(min(n, target), 0, -1):
        if n % t == 0 and t % 128 == 0:
            return t
    return n


# ----------------------------------------------------------------------------
# Kernel 1: fused multi-output projection  y_i = x @ W_i + b_i   (i = 1..n_out)
#           grid = (M tiles, d_in reduction tiles); x is read from HBM once.
# ----------------------------------------------------------------------------
def _make_proj_kernel(n_out):
    def kernel(x_ref, *refs):
        w_refs = refs[:n_out]
        b_refs = refs[n_out:2 * n_out]
        o_refs = refs[2 * n_out:3 * n_out]
        acc_refs = refs[3 * n_out:]
        k_i = pl.program_id(1)
        nk = pl.num_programs(1)

        @pl.when(k_i == 0)
        def _():
            for acc in acc_refs:
                acc[...] = jnp.zeros_like(acc)

        x_bf = x_ref[...].astype(jnp.bfloat16)
        for w_ref, acc in zip(w_refs, acc_refs):
            acc[...] += jnp.dot(x_bf, w_ref[...].astype(jnp.bfloat16),
                                preferred_element_type=jnp.float32)

        @pl.when(k_i == nk - 1)
        def _():
            for b_ref, o_ref, acc in zip(b_refs, o_refs, acc_refs):
                o_ref[...] = (acc[...] + b_ref[...]).astype(o_ref.dtype)

    return kernel


def fused_projections(x, ws, bs, *, tile_m=512, tile_k=512):
    """x: (M, d_in); ws[i]: (d_in, d_out_i); bs[i]: (d_out_i,).  Returns list of (M, d_out_i)."""
    M, d_in = x.shape
    n_out = len(ws)
    d_outs = [int(w.shape[1]) for w in ws]
    TM = _pick_tile(M, target=tile_m, min_steps=2)
    TK = _pick_lane_tile(d_in, target=tile_k)

    in_specs = [pl.BlockSpec((TM, TK), lambda m, k: (m, k))]
    in_specs += [pl.BlockSpec((TK, d), lambda m, k: (k, 0)) for d in d_outs]
    in_specs += [pl.BlockSpec((1, d), lambda m, k: (0, 0)) for d in d_outs]
    out_specs = [pl.BlockSpec((TM, d), lambda m, k: (m, 0)) for d in d_outs]
    out_shape = [jax.ShapeDtypeStruct((M, d), x.dtype) for d in d_outs]
    scratch = [pltpu.VMEM((TM, d), jnp.float32) for d in d_outs]

    return pl.pallas_call(
        _make_proj_kernel(n_out),
        out_shape=out_shape,
        grid_spec=pltpu.PrefetchScalarGridSpec(
            num_scalar_prefetch=0,
            grid=(M // TM, d_in // TK),
            in_specs=in_specs,
            out_specs=out_specs,
            scratch_shapes=scratch),
        compiler_params=pltpu.CompilerParams(
            dimension_semantics=("parallel", "arbitrary"),
            vmem_limit_bytes=_vmem_limit_bytes()),
    )(x, *ws, *[b.reshape(1, -1) for b in bs])


# ----------------------------------------------------------------------------
# Kernel 2: fused attention sub-layer
#   per (batch, Q-tile): per-head QK^T, softmax, [attn dropout], PV, W_O,
#   bias, [output dropout], residual add, LayerNorm.  Lane-dense (TQ, D) store.
# ----------------------------------------------------------------------------
def _make_attn_kernel(*, n_heads, d_k, scale, p_drop, seed, eps):
    inv_keep = 1.0 / (1.0 - p_drop) if p_drop > 0.0 else 1.0
    thresh = int(round((1.0 - p_drop) * (2 ** 32 - 1)))

    def kernel(q_ref, k_ref, v_ref, mask_ref, wo_ref, bo_ref, res_ref,
               g_ref, be_ref, o_ref):
        q = q_ref[...] * scale                       # (TQ, D) f32, scale folded in
        kf = k_ref[...]                              # (Tk, D) f32
        vf = v_ref[...]
        wo = wo_ref[...]
        mask = mask_ref[...]                         # (1|TQ, Tk) int

        # TODO(synk): for very long Tk add a K grid axis with flash-style online
        # softmax (running max/sum scratch, 'arbitrary') so k/v/scores are tiled.
        out = None
        for h in range(n_heads):
            sl = slice(h * d_k, (h + 1) * d_k)
            qh = q[:, sl].astype(jnp.bfloat16)
            kh = kf[:, sl].astype(jnp.bfloat16)
            vh = vf[:, sl].astype(jnp.bfloat16)
            # scores = q_h @ k_h^T without an explicit transpose.
            s = lax.dot_general(qh, kh, (((1,), (1,)), ((), ())),
                                preferred_element_type=jnp.float32)   # (TQ, Tk)
            s = jnp.where(mask == 0, _MASK_VALUE, s)
            m = jnp.max(s, axis=-1, keepdims=True)
            p = jnp.exp(s - m)
            denom = jnp.sum(p, axis=-1, keepdims=True)
            inv = pl.reciprocal(denom, approx=True)
            inv = inv * (2.0 - denom * inv)          # one NR step -> full f32 accuracy
            if p_drop > 0.0:                         # attention-weights dropout
                pltpu.prng_seed(seed + 613 * h
                                + 7919 * pl.program_id(0)
                                + 104729 * pl.program_id(1))
                bits = pltpu.bitcast(pltpu.prng_random_bits(p.shape), jnp.uint32)
                keep = bits <= jnp.uint32(thresh)
                pw = jnp.where(keep, p * (inv * inv_keep), 0.0)
            else:
                pw = p * inv
            ctx = jnp.dot(pw.astype(jnp.bfloat16), vh,
                          preferred_element_type=jnp.float32)         # (TQ, d_k)
            part = jnp.dot(ctx.astype(jnp.bfloat16),
                           wo[sl, :].astype(jnp.bfloat16),
                           preferred_element_type=jnp.float32)        # (TQ, D)
            out = part if out is None else out + part

        y = out + bo_ref[...]
        if p_drop > 0.0:                             # residual-path dropout
            pltpu.prng_seed(seed + 15485863
                            + 7919 * pl.program_id(0)
                            + 104729 * pl.program_id(1))
            bits = pltpu.bitcast(pltpu.prng_random_bits(y.shape), jnp.uint32)
            keep = bits <= jnp.uint32(thresh)
            y = jnp.where(keep, y * inv_keep, 0.0)
        y = y + res_ref[...]
        mean = jnp.mean(y, axis=-1, keepdims=True)
        var = jnp.mean(jnp.square(y - mean), axis=-1, keepdims=True)
        o_ref[...] = ((y - mean) * lax.rsqrt(var + eps) * g_ref[...]
                      + be_ref[...]).astype(o_ref.dtype)

    return kernel


def attention_block(q, k, v, mask, wo, bo, residual, gamma, beta, *,
                    n_heads, p_drop=0.0, seed=0):
    """q/residual: (B,Tq,D); k,v: (B,Tk,D); mask: (B,MQ,Tk) with MQ in {1,Tq}."""
    B, Tq, D = q.shape
    Tk = k.shape[1]
    MQ = mask.shape[1]
    d_k = D // n_heads
    scale = 1.0 / math.sqrt(d_k)
    TQ = _pick_tile(Tq, target=512, min_steps=1)     # batch axis already parallel
    nq = Tq // TQ

    if MQ == 1:
        mask_spec = pl.BlockSpec((None, 1, Tk), lambda b, qi: (b, 0, 0))
    else:
        mask_spec = pl.BlockSpec((None, TQ, Tk), lambda b, qi: (b, qi, 0))

    kernel = _make_attn_kernel(n_heads=n_heads, d_k=d_k, scale=scale,
                               p_drop=float(p_drop), seed=int(seed), eps=_LN_EPS)

    return pl.pallas_call(
        kernel,
        out_shape=jax.ShapeDtypeStruct((B, Tq, D), q.dtype),
        grid_spec=pltpu.PrefetchScalarGridSpec(
            num_scalar_prefetch=0,
            grid=(B, nq),
            in_specs=[
                pl.BlockSpec((None, TQ, D), lambda b, qi: (b, qi, 0)),   # q
                pl.BlockSpec((None, Tk, D), lambda b, qi: (b, 0, 0)),    # k
                pl.BlockSpec((None, Tk, D), lambda b, qi: (b, 0, 0)),    # v
                mask_spec,
                pl.BlockSpec((D, D), lambda b, qi: (0, 0)),              # W_O
                pl.BlockSpec((1, D), lambda b, qi: (0, 0)),              # b_O
                pl.BlockSpec((None, TQ, D), lambda b, qi: (b, qi, 0)),   # residual
                pl.BlockSpec((1, D), lambda b, qi: (0, 0)),              # LN gamma
                pl.BlockSpec((1, D), lambda b, qi: (0, 0)),              # LN beta
            ],
            out_specs=pl.BlockSpec((None, TQ, D), lambda b, qi: (b, qi, 0)),
        ),
        compiler_params=pltpu.CompilerParams(
            dimension_semantics=("parallel", "parallel"),
            vmem_limit_bytes=_vmem_limit_bytes()),
    )(q, k, v, mask, wo, bo.reshape(1, D), residual,
      gamma.reshape(1, D), beta.reshape(1, D))


# ----------------------------------------------------------------------------
# Kernel 3: fused FFN sub-layer (d_ff reduction grid axis)
#   per (M tile, d_ff tile): relu(x@w1_f + b1_f) [dropout] @ w2_f accumulated;
#   epilogue: + b2, [dropout], + residual, LayerNorm.
# ----------------------------------------------------------------------------
def _make_ffn_kernel(*, p_drop, seed, eps):
    inv_keep = 1.0 / (1.0 - p_drop) if p_drop > 0.0 else 1.0
    thresh = int(round((1.0 - p_drop) * (2 ** 32 - 1)))

    def kernel(x_ref, w1_ref, b1_ref, w2_ref, b2_ref, g_ref, be_ref,
               o_ref, acc_ref):
        f_i = pl.program_id(1)
        nf = pl.num_programs(1)

        @pl.when(f_i == 0)
        def _():
            acc_ref[...] = jnp.zeros_like(acc_ref)

        x_bf = x_ref[...].astype(jnp.bfloat16)
        h = jnp.dot(x_bf, w1_ref[...].astype(jnp.bfloat16),
                    preferred_element_type=jnp.float32) + b1_ref[...]
        h = jnp.maximum(h, 0.0)
        if p_drop > 0.0:                             # hidden-layer dropout
            pltpu.prng_seed(seed + 7919 * pl.program_id(0) + 104729 * f_i)
            bits = pltpu.bitcast(pltpu.prng_random_bits(h.shape), jnp.uint32)
            keep = bits <= jnp.uint32(thresh)
            h = jnp.where(keep, h * inv_keep, 0.0)
        acc_ref[...] += jnp.dot(h.astype(jnp.bfloat16),
                                w2_ref[...].astype(jnp.bfloat16),
                                preferred_element_type=jnp.float32)

        @pl.when(f_i == nf - 1)
        def _():
            y = acc_ref[...] + b2_ref[...]
            if p_drop > 0.0:                         # residual-path dropout
                pltpu.prng_seed(seed + 32452843 + 7919 * pl.program_id(0))
                bits = pltpu.bitcast(pltpu.prng_random_bits(y.shape), jnp.uint32)
                keep = bits <= jnp.uint32(thresh)
                y = jnp.where(keep, y * inv_keep, 0.0)
            y = y + x_ref[...]
            mean = jnp.mean(y, axis=-1, keepdims=True)
            var = jnp.mean(jnp.square(y - mean), axis=-1, keepdims=True)
            o_ref[...] = ((y - mean) * lax.rsqrt(var + eps) * g_ref[...]
                          + be_ref[...]).astype(o_ref.dtype)

    return kernel


def ffn_block(x2d, w1, b1, w2, b2, gamma, beta, *, p_drop=0.0, seed=0):
    M, d_model = x2d.shape
    d_ff = w1.shape[1]
    TM = _pick_tile(M, target=512, min_steps=2)
    TF = _pick_lane_tile(d_ff, target=512)
    kernel = _make_ffn_kernel(p_drop=float(p_drop), seed=int(seed), eps=_LN_EPS)
    return pl.pallas_call(
        kernel,
        out_shape=jax.ShapeDtypeStruct((M, d_model), x2d.dtype),
        grid_spec=pltpu.PrefetchScalarGridSpec(
            num_scalar_prefetch=0,
            grid=(M // TM, d_ff // TF),
            in_specs=[
                pl.BlockSpec((TM, d_model), lambda m, f: (m, 0)),   # x (also residual)
                pl.BlockSpec((d_model, TF), lambda m, f: (0, f)),   # w1 tile
                pl.BlockSpec((1, TF), lambda m, f: (0, f)),         # b1 tile
                pl.BlockSpec((TF, d_model), lambda m, f: (f, 0)),   # w2 tile
                pl.BlockSpec((1, d_model), lambda m, f: (0, 0)),    # b2
                pl.BlockSpec((1, d_model), lambda m, f: (0, 0)),    # LN gamma
                pl.BlockSpec((1, d_model), lambda m, f: (0, 0)),    # LN beta
            ],
            out_specs=pl.BlockSpec((TM, d_model), lambda m, f: (m, 0)),
            scratch_shapes=[pltpu.VMEM((TM, d_model), jnp.float32)],
        ),
        compiler_params=pltpu.CompilerParams(
            dimension_semantics=("parallel", "arbitrary"),
            vmem_limit_bytes=_vmem_limit_bytes()),
    )(x2d, w1, b1.reshape(1, d_ff), w2, b2.reshape(1, d_model),
      gamma.reshape(1, d_model), beta.reshape(1, d_model))


# ----------------------------------------------------------------------------
# Decoder forward (wrappers around the kernels)
# ----------------------------------------------------------------------------
def decoder_layer(lp, x, enc_out, self_mask, enc_mask, *, n_heads,
                  p_drop=0.0, seed=0):
    B, T, D = x.shape
    S = enc_out.shape[1]

    # --- self-attention sub-layer: fused QKV projection -> fused attn+Wo+add+LN
    sa = lp["self_attn"]
    q, k, v = fused_projections(x.reshape(B * T, D),
                                [sa["wq"], sa["wk"], sa["wv"]],
                                [sa["bq"], sa["bk"], sa["bv"]])
    x = attention_block(q.reshape(B, T, D), k.reshape(B, T, D), v.reshape(B, T, D),
                        self_mask, sa["wo"], sa["bo"], x,
                        lp["ln1_g"], lp["ln1_b"],
                        n_heads=n_heads, p_drop=p_drop, seed=seed + 1)

    # --- cross-attention sub-layer
    ca = lp["cross_attn"]
    (qc,) = fused_projections(x.reshape(B * T, D), [ca["wq"]], [ca["bq"]])
    kc, vc = fused_projections(enc_out.reshape(B * S, D),
                               [ca["wk"], ca["wv"]], [ca["bk"], ca["bv"]])
    x = attention_block(qc.reshape(B, T, D), kc.reshape(B, S, D), vc.reshape(B, S, D),
                        enc_mask, ca["wo"], ca["bo"], x,
                        lp["ln2_g"], lp["ln2_b"],
                        n_heads=n_heads, p_drop=p_drop, seed=seed + 2)

    # --- feed-forward sub-layer (fc1+relu+drop+fc2+drop+residual+LN fused)
    f = lp["ffn"]
    x = ffn_block(x.reshape(B * T, D), f["w1"], f["b1"], f["w2"], f["b2"],
                  lp["ln3_g"], lp["ln3_b"],
                  p_drop=p_drop, seed=seed + 3).reshape(B, T, D)
    return x


def decoder_forward(params, token_ids, encoder_output, self_mask, encoder_mask,
                    *, n_heads, p_drop=0.0, seed=0):
    T = token_ids.shape[1]
    # TODO(synk): the nn.Embedding row-gather + positional add + input dropout
    # stay in XLA; a Pallas scalar-prefetch gather kernel only pays off for
    # very large embedding tables.
    x = jnp.take(params["embedding"], token_ids, axis=0) + params["pe"][None, :T, :]
    if p_drop > 0.0:
        keep = jax.random.bernoulli(jax.random.PRNGKey(seed), 1.0 - p_drop, x.shape)
        x = jnp.where(keep, x / (1.0 - p_drop), 0.0)
    for li, lp in enumerate(params["layers"]):
        x = decoder_layer(lp, x, encoder_output, self_mask, encoder_mask,
                          n_heads=n_heads, p_drop=p_drop,
                          seed=seed + 1000003 * (li + 1))
    return x


# ----------------------------------------------------------------------------
# Parameter construction
# ----------------------------------------------------------------------------
def _positional_encoding(max_len, d_model):
    position = jnp.arange(max_len, dtype=jnp.float32)[:, None]
    div_term = jnp.exp(jnp.arange(0, d_model, 2, dtype=jnp.float32)
                       * (-math.log(10000.0) / d_model))
    pe = jnp.zeros((max_len, d_model), dtype=jnp.float32)
    pe = pe.at[:, 0::2].set(jnp.sin(position * div_term))
    pe = pe.at[:, 1::2].set(jnp.cos(position * div_term))
    return pe


def init_decoder_params(key, vocab_size, n_heads, n_layers, d_model, d_ff, max_len):
    def dense(k, d_in, d_out):
        kw, kb = jax.random.split(k)
        w = jax.random.normal(kw, (d_in, d_out), dtype=jnp.float32) / math.sqrt(d_in)
        b = 0.01 * jax.random.normal(kb, (d_out,), dtype=jnp.float32)
        return w, b

    def ln(k, d):
        kg, kb = jax.random.split(k)
        return (1.0 + 0.1 * jax.random.normal(kg, (d,), dtype=jnp.float32),
                0.1 * jax.random.normal(kb, (d,), dtype=jnp.float32))

    keys = jax.random.split(key, n_layers + 1)
    embedding = jax.random.normal(keys[0], (vocab_size, d_model), dtype=jnp.float32)
    layers = []
    for li in range(n_layers):
        lk = jax.random.split(keys[li + 1], 13)

        def mha_params(ks):
            wq, bq = dense(ks[0], d_model, d_model)
            wk, bk = dense(ks[1], d_model, d_model)
            wv, bv = dense(ks[2], d_model, d_model)
            wo, bo = dense(ks[3], d_model, d_model)
            return dict(wq=wq, bq=bq, wk=wk, bk=bk, wv=wv, bv=bv, wo=wo, bo=bo)

        w1, b1 = dense(lk[8], d_model, d_ff)
        w2, b2 = dense(lk[9], d_ff, d_model)
        g1, be1 = ln(lk[10], d_model)
        g2, be2 = ln(lk[11], d_model)
        g3, be3 = ln(lk[12], d_model)
        layers.append(dict(self_attn=mha_params(lk[0:4]),
                           cross_attn=mha_params(lk[4:8]),
                           ffn=dict(w1=w1, b1=b1, w2=w2, b2=b2),
                           ln1_g=g1, ln1_b=be1, ln2_g=g2, ln2_b=be2,
                           ln3_g=g3, ln3_b=be3))
    return dict(embedding=embedding, pe=_positional_encoding(max_len, d_model),
                layers=layers)


# ----------------------------------------------------------------------------
# Plain-JAX reference (eval mode, dropout off) mirroring the kernels' bf16-MXU
# numerics (bf16 operands, f32 accumulation) for a tight correctness check.
# ----------------------------------------------------------------------------
def _ref_layer_norm(x, g, b, eps=_LN_EPS):
    m = x.mean(-1, keepdims=True)
    v = jnp.square(x - m).mean(-1, keepdims=True)
    return (x - m) / jnp.sqrt(v + eps) * g + b


def _bf16_dot(a, b):
    return jnp.dot(a.astype(jnp.bfloat16), b.astype(jnp.bfloat16),
                   preferred_element_type=jnp.float32)


def _ref_attn(p, q_in, k_in, v_in, mask, residual, gamma, beta, n_heads):
    B, Tq, D = q_in.shape
    Tk = k_in.shape[1]
    d_k = D // n_heads
    scale = 1.0 / math.sqrt(d_k)
    q = _bf16_dot(q_in.reshape(-1, D), p["wq"]).reshape(B, Tq, D) + p["bq"]
    k = _bf16_dot(k_in.reshape(-1, D), p["wk"]).reshape(B, Tk, D) + p["bk"]
    v = _bf16_dot(v_in.reshape(-1, D), p["wv"]).reshape(B, Tk, D) + p["bv"]
    qs = q * scale
    out = jnp.zeros((B, Tq, D), jnp.float32)
    for h in range(n_heads):
        sl = slice(h * d_k, (h + 1) * d_k)
        s = jnp.einsum("bqd,bkd->bqk",
                       qs[..., sl].astype(jnp.bfloat16),
                       k[..., sl].astype(jnp.bfloat16),
                       preferred_element_type=jnp.float32)
        s = jnp.where(mask == 0, _MASK_VALUE, s)
        w = jax.nn.softmax(s, axis=-1)
        ctx = jnp.einsum("bqk,bkd->bqd",
                         w.astype(jnp.bfloat16),
                         v[..., sl].astype(jnp.bfloat16),
                         preferred_element_type=jnp.float32)
        out = out + jnp.einsum("bqd,de->bqe",
                               ctx.astype(jnp.bfloat16),
                               p["wo"][sl].astype(jnp.bfloat16),
                               preferred_element_type=jnp.float32)
    y = out + p["bo"] + residual
    return _ref_layer_norm(y, gamma, beta)


def _ref_decoder(params, token_ids, encoder_output, self_mask, encoder_mask, n_heads):
    T = token_ids.shape[1]
    x = jnp.take(params["embedding"], token_ids, axis=0) + params["pe"][None, :T, :]
    for lp in params["layers"]:
        x = _ref_attn(lp["self_attn"], x, x, x, self_mask, x,
                      lp["ln1_g"], lp["ln1_b"], n_heads)
        x = _ref_attn(lp["cross_attn"], x, encoder_output, encoder_output,
                      encoder_mask, x, lp["ln2_g"], lp["ln2_b"], n_heads)
        f = lp["ffn"]
        B, Tq, D = x.shape
        h = jnp.maximum(_bf16_dot(x.reshape(-1, D), f["w1"]) + f["b1"], 0.0)
        y = (_bf16_dot(h, f["w2"]) + f["b2"]).reshape(B, Tq, D)
        x = _ref_layer_norm(x + y, lp["ln3_g"], lp["ln3_b"])
    return x


if __name__ == "__main__":
    vocab_size, n_heads, n_layers = 100, 4, 2
    d_model, d_ff, max_len, p_drop = 32, 64, 32, 0.0
    B, T, S = 2, 8, 16          # batch, target seq len, source seq len

    root = jax.random.PRNGKey(0)
    k_par, k_ids, k_enc = jax.random.split(root, 3)

    params = init_decoder_params(k_par, vocab_size, n_heads, n_layers,
                                 d_model, d_ff, max_len)
    token_ids = jax.random.randint(k_ids, (B, T), 0, vocab_size, dtype=jnp.int32)
    encoder_output = jax.random.normal(k_enc, (B, S, d_model), dtype=jnp.float32)

    # Causal target mask [B, T, T]; source padding mask [B, 1, S] (batch 1 pads last 4).
    self_mask = jnp.tile(jnp.tril(jnp.ones((T, T), dtype=jnp.int32))[None], (B, 1, 1))
    encoder_mask = jnp.ones((B, 1, S), dtype=jnp.int32).at[1, 0, S - 4:].set(0)

    fwd = jax.jit(functools.partial(decoder_forward, n_heads=n_heads,
                                    p_drop=p_drop, seed=0))
    out = jax.block_until_ready(fwd(params, token_ids, encoder_output,
                                    self_mask, encoder_mask))

    ref = _ref_decoder(params, token_ids, encoder_output, self_mask,
                       encoder_mask, n_heads)
    assert out.shape == (B, T, d_model)
    assert bool(jnp.all(jnp.isfinite(out)))
    max_diff = float(jnp.max(jnp.abs(out - ref)))
    assert jnp.allclose(out, ref, atol=2e-2, rtol=2e-2), \
        f"max abs diff = {max_diff}"

    print("KERNEL_OK")
</pallas_src>

<mosaic_0001>
module attributes {stable_mosaic.version = 11 : i64} {
  func.func @kernel(%arg0: i32, %arg1: i32, %arg2: memref<8x32xf32, #tpu.memory_space<vmem>>, %arg3: memref<32x32xf32, #tpu.memory_space<vmem>>, %arg4: memref<32x32xf32, #tpu.memory_space<vmem>>, %arg5: memref<32x32xf32, #tpu.memory_space<vmem>>, %arg6: memref<1x32xf32, #tpu.memory_space<vmem>>, %arg7: memref<1x32xf32, #tpu.memory_space<vmem>>, %arg8: memref<1x32xf32, #tpu.memory_space<vmem>>, %arg9: memref<8x32xf32, #tpu.memory_space<vmem>>, %arg10: memref<8x32xf32, #tpu.memory_space<vmem>>, %arg11: memref<8x32xf32, #tpu.memory_space<vmem>>, %arg12: memref<8x32xf32, #tpu.memory_space<vmem>>, %arg13: memref<8x32xf32, #tpu.memory_space<vmem>>, %arg14: memref<8x32xf32, #tpu.memory_space<vmem>>) attributes {dimension_semantics = [#tpu.dimension_semantics<parallel>, #tpu.dimension_semantics<arbitrary>], iteration_bounds = array<i64: 2, 1>, scalar_prefetch = 0 : i64, scratch_operands = 3 : i64, tpu.core_type = #tpu.core_type<tc>, window_params = [{transform_indices = @transform_0, window_bounds = array<i64: 8, 32>}, {transform_indices = @transform_1, window_bounds = array<i64: 32, 32>}, {transform_indices = @transform_2, window_bounds = array<i64: 32, 32>}, {transform_indices = @transform_3, window_bounds = array<i64: 32, 32>}, {pipeline_mode = #tpu.pipeline_mode<synchronous>, transform_indices = @transform_4, window_bounds = array<i64: 1, 32>}, {pipeline_mode = #tpu.pipeline_mode<synchronous>, transform_indices = @transform_5, window_bounds = array<i64: 1, 32>}, {pipeline_mode = #tpu.pipeline_mode<synchronous>, transform_indices = @transform_6, window_bounds = array<i64: 1, 32>}, {transform_indices = @transform_7, window_bounds = array<i64: 8, 32>}, {transform_indices = @transform_8, window_bounds = array<i64: 8, 32>}, {transform_indices = @transform_9, window_bounds = array<i64: 8, 32>}]} {
    %c0_i32 = arith.constant 0 : i32
    %0 = arith.cmpi eq, %arg1, %c0_i32 : i32
    %1 = arith.extui %0 : i1 to i32
    %c0_i32_0 = arith.constant 0 : i32
    %2 = arith.cmpi ne, %1, %c0_i32_0 : i32
    scf.if %2 {
      %cst_24 = arith.constant 0.000000e+00 : f32
      %26 = vector.broadcast %cst_24 : f32 to vector<8x32xf32>
      %c0_25 = arith.constant 0 : index
      %c0_26 = arith.constant 0 : index
      %27 = vector.load %arg12[%c0_25, %c0_26] : memref<8x32xf32, #tpu.memory_space<vmem>>, vector<8x32xf32>
      tpu.vector_store %arg12[%c0_25, %c0_26], %26 {strides = array<i32>} : memref<8x32xf32, #tpu.memory_space<vmem>>, vector<8x32xf32>,
      %cst_27 = arith.constant 0.000000e+00 : f32
      %28 = vector.broadcast %cst_27 : f32 to vector<8x32xf32>
      %c0_28 = arith.constant 0 : index
      %c0_29 = arith.constant 0 : index
      %29 = vector.load %arg13[%c0_28, %c0_29] : memref<8x32xf32, #tpu.memory_space<vmem>>, vector<8x32xf32>
      tpu.vector_store %arg13[%c0_28, %c0_29], %28 {strides = array<i32>} : memref<8x32xf32, #tpu.memory_space<vmem>>, vector<8x32xf32>,
      %cst_30 = arith.constant 0.000000e+00 : f32
      %30 = vector.broadcast %cst_30 : f32 to vector<8x32xf32>
      %c0_31 = arith.constant 0 : index
      %c0_32 = arith.constant 0 : index
      %31 = vector.load %arg14[%c0_31, %c0_32] : memref<8x32xf32, #tpu.memory_space<vmem>>, vector<8x32xf32>
      tpu.vector_store %arg14[%c0_31, %c0_32], %30 {strides = array<i32>} : memref<8x32xf32, #tpu.memory_space<vmem>>, vector<8x32xf32>,
    } else {
    }
    %c0 = arith.constant 0 : index
    %c0_1 = arith.constant 0 : index
    %3 = vector.load %arg2[%c0, %c0_1] : memref<8x32xf32, #tpu.memory_space<vmem>>, vector<8x32xf32>
    %4 = arith.truncf %3 : vector<8x32xf32> to vector<8x32xbf16>
    %c0_2 = arith.constant 0 : index
    %c0_3 = arith.constant 0 : index
    %5 = vector.load %arg12[%c0_2, %c0_3] : memref<8x32xf32, #tpu.memory_space<vmem>>, vector<8x32xf32>
    %c0_4 = arith.constant 0 : index
    %c0_5 = arith.constant 0 : index
    %6 = vector.load %arg3[%c0_4, %c0_5] : memref<32x32xf32, #tpu.memory_space<vmem>>, vector<32x32xf32>
    %7 = arith.truncf %6 : vector<32x32xf32> to vector<32x32xbf16>
    %cst = arith.constant dense<0.000000e+00> : vector<8x32xf32>
    %8 = tpu.matmul %4, %7, %cst {dimension_numbers = #tpu.dot_dimension_numbers<[1], [0], [0], [1], [0, 0, 1, 1], [], []>} : vector<8x32xbf16>, vector<32x32xbf16>, vector<8x32xf32> -> vector<8x32xf32>
    %9 = arith.addf %5, %8 : vector<8x32xf32>
    %c0_6 = arith.constant 0 : index
    %c0_7 = arith.constant 0 : index
    %10 = vector.load %arg12[%c0_6, %c0_7] : memref<8x32xf32, #tpu.memory_space<vmem>>, vector<8x32xf32>
    tpu.vector_store %arg12[%c0_6, %c0_7], %9 {strides = array<i32>} : memref<8x32xf32, #tpu.memory_space<vmem>>, vector<8x32xf32>,
    %c0_8 = arith.constant 0 : index
    %c0_9 = arith.constant 0 : index
    %11 = vector.load %arg13[%c0_8, %c0_9] : memref<8x32xf32, #tpu.memory_space<vmem>>, vector<8x32xf32>
    %c0_10 = arith.constant 0 : index
    %c0_11 = arith.constant 0 : index
    %12 = vector.load %arg4[%c0_10, %c0_11] : memref<32x32xf32, #tpu.memory_space<vmem>>, vector<32x32xf32>
    %13 = arith.truncf %12 : vector<32x32xf32> to vector<32x32xbf16>
    %cst_12 = arith.constant dense<0.000000e+00> : vector<8x32xf32>
    %14 = tpu.matmul %4, %13, %cst_12 {dimension_numbers = #tpu.dot_dimension_numbers<[1], [0], [0], [1], [0, 0, 1, 1], [], []>} : vector<8x32xbf16>, vector<32x32xbf16>, vector<8x32xf32> -> vector<8x32xf32>
    %15 = arith.addf %11, %14 : vector<8x32xf32>
    %c0_13 = arith.constant 0 : index
    %c0_14 = arith.constant 0 : index
    %16 = vector.load %arg13[%c0_13, %c0_14] : memref<8x32xf32, #tpu.memory_space<vmem>>, vector<8x32xf32>
    tpu.vector_store %arg13[%c0_13, %c0_14], %15 {strides = array<i32>} : memref<8x32xf32, #tpu.memory_space<vmem>>, vector<8x32xf32>,
    %c0_15 = arith.constant 0 : index
    %c0_16 = arith.constant 0 : index
    %17 = vector.load %arg14[%c0_15, %c0_16] : memref<8x32xf32, #tpu.memory_space<vmem>>, vector<8x32xf32>
    %c0_17 = arith.constant 0 : index
    %c0_18 = arith.constant 0 : index
    %18 = vector.load %arg5[%c0_17, %c0_18] : memref<32x32xf32, #tpu.memory_space<vmem>>, vector<32x32xf32>
    %19 = arith.truncf %18 : vector<32x32xf32> to vector<32x32xbf16>
    %cst_19 = arith.constant dense<0.000000e+00> : vector<8x32xf32>
    %20 = tpu.matmul %4, %19, %cst_19 {dimension_numbers = #tpu.dot_dimension_numbers<[1], [0], [0], [1], [0, 0, 1, 1], [], []>} : vector<8x32xbf16>, vector<32x32xbf16>, vector<8x32xf32> -> vector<8x32xf32>
    %21 = arith.addf %17, %20 : vector<8x32xf32>
    %c0_20 = arith.constant 0 : index
    %c0_21 = arith.constant 0 : index
    %22 = vector.load %arg14[%c0_20, %c0_21] : memref<8x32xf32, #tpu.memory_space<vmem>>, vector<8x32xf32>
    tpu.vector_store %arg14[%c0_20, %c0_21], %21 {strides = array<i32>} : memref<8x32xf32, #tpu.memory_space<vmem>>, vector<8x32xf32>,
    %c0_i32_22 = arith.constant 0 : i32
    %23 = arith.cmpi eq, %arg1, %c0_i32_22 : i32
    %24 = arith.extui %23 : i1 to i32
    %c0_i32_23 = arith.constant 0 : i32
    %25 = arith.cmpi ne, %24, %c0_i32_23 : i32
    scf.if %25 {
      %c0_24 = arith.constant 0 : index
      %c0_25 = arith.constant 0 : index
      %26 = vector.load %arg12[%c0_24, %c0_25] : memref<8x32xf32, #tpu.memory_space<vmem>>, vector<8x32xf32>
      %c0_26 = arith.constant 0 : index
      %c0_27 = arith.constant 0 : index
      %27 = vector.load %arg6[%c0_26, %c0_27] : memref<1x32xf32, #tpu.memory_space<vmem>>, vector<1x32xf32>
      %28 = vector.broadcast %27 : vector<1x32xf32> to vector<8x32xf32>
      %29 = arith.addf %26, %28 : vector<8x32xf32>
      %c0_28 = arith.constant 0 : index
      %c0_29 = arith.constant 0 : index
      %30 = vector.load %arg9[%c0_28, %c0_29] : memref<8x32xf32, #tpu.memory_space<vmem>>, vector<8x32xf32>
      tpu.vector_store %arg9[%c0_28, %c0_29], %29 {strides = array<i32>} : memref<8x32xf32, #tpu.memory_space<vmem>>, vector<8x32xf32>,
      %c0_30 = arith.constant 0 : index
      %c0_31 = arith.constant 0 : index
      %31 = vector.load %arg13[%c0_30, %c0_31] : memref<8x32xf32, #tpu.memory_space<vmem>>, vector<8x32xf32>
      %c0_32 = arith.constant 0 : index
      %c0_33 = arith.constant 0 : index
      %32 = vector.load %arg7[%c0_32, %c0_33] : memref<1x32xf32, #tpu.memory_space<vmem>>, vector<1x32xf32>
      %33 = vector.broadcast %32 : vector<1x32xf32> to vector<8x32xf32>
      %34 = arith.addf %31, %33 : vector<8x32xf32>
      %c0_34 = arith.constant 0 : index
      %c0_35 = arith.constant 0 : index
      %35 = vector.load %arg10[%c0_34, %c0_35] : memref<8x32xf32, #tpu.memory_space<vmem>>, vector<8x32xf32>
      tpu.vector_store %arg10[%c0_34, %c0_35], %34 {strides = array<i32>} : memref<8x32xf32, #tpu.memory_space<vmem>>, vector<8x32xf32>,
      %c0_36 = arith.constant 0 : index
      %c0_37 = arith.constant 0 : index
      %36 = vector.load %arg14[%c0_36, %c0_37] : memref<8x32xf32, #tpu.memory_space<vmem>>, vector<8x32xf32>
      %c0_38 = arith.constant 0 : index
      %c0_39 = arith.constant 0 : index
      %37 = vector.load %arg8[%c0_38, %c0_39] : memref<1x32xf32, #tpu.memory_space<vmem>>, vector<1x32xf32>
      %38 = vector.broadcast %37 : vector<1x32xf32> to vector<8x32xf32>
      %39 = arith.addf %36, %38 : vector<8x32xf32>
      %c0_40 = arith.constant 0 : index
      %c0_41 = arith.constant 0 : index
      %40 = vector.load %arg11[%c0_40, %c0_41] : memref<8x32xf32, #tpu.memory_space<vmem>>, vector<8x32xf32>
      tpu.vector_store %arg11[%c0_40, %c0_41], %39 {strides = array<i32>} : memref<8x32xf32, #tpu.memory_space<vmem>>, vector<8x32xf32>,
    } else {
    }
    return
  }
  func.func @transform_0(%arg0: i32, %arg1: i32) -> (i32, i32) {
    %c0_i32 = arith.constant 0 : i32
    return %arg0, %arg1 : i32, i32
  }
  func.func @transform_1(%arg0: i32, %arg1: i32) -> (i32, i32) {
    %c0_i32 = arith.constant 0 : i32
    %c0_i32_0 = arith.constant 0 : i32
    return %arg1, %c0_i32 : i32, i32
  }
  func.func @transform_2(%arg0: i32, %arg1: i32) -> (i32, i32) {
    %c0_i32 = arith.constant 0 : i32
    %c0_i32_0 = arith.constant 0 : i32
    return %arg1, %c0_i32 : i32, i32
  }
  func.func @transform_3(%arg0: i32, %arg1: i32) -> (i32, i32) {
    %c0_i32 = arith.constant 0 : i32
    %c0_i32_0 = arith.constant 0 : i32
    return %arg1, %c0_i32 : i32, i32
  }
  func.func @transform_4(%arg0: i32, %arg1: i32) -> (i32, i32) {
    %c0_i32 = arith.constant 0 : i32
    %c0_i32_0 = arith.constant 0 : i32
    %c0_i32_1 = arith.constant 0 : i32
    return %c0_i32, %c0_i32_0 : i32, i32
  }
  func.func @transform_5(%arg0: i32, %arg1: i32) -> (i32, i32) {
    %c0_i32 = arith.constant 0 : i32
    %c0_i32_0 = arith.constant 0 : i32
    %c0_i32_1 = arith.constant 0 : i32
    return %c0_i32, %c0_i32_0 : i32, i32
  }
  func.func @transform_6(%arg0: i32, %arg1: i32) -> (i32, i32) {
    %c0_i32 = arith.constant 0 : i32
    %c0_i32_0 = arith.constant 0 : i32
    %c0_i32_1 = arith.constant 0 : i32
    return %c0_i32, %c0_i32_0 : i32, i32
  }
  func.func @transform_7(%arg0: i32, %arg1: i32) -> (i32, i32) {
    %c0_i32 = arith.constant 0 : i32
    %c0_i32_0 = arith.constant 0 : i32
    return %arg0, %c0_i32 : i32, i32
  }
  func.func @transform_8(%arg0: i32, %arg1: i32) -> (i32, i32) {
    %c0_i32 = arith.constant 0 : i32
    %c0_i32_0 = arith.constant 0 : i32
    return %arg0, %c0_i32 : i32, i32
  }
  func.func @transform_9(%arg0: i32, %arg1: i32) -> (i32, i32) {
    %c0_i32 = arith.constant 0 : i32
    %c0_i32_0 = arith.constant 0 : i32
    return %arg0, %c0_i32 : i32, i32
  }
}

module attributes {stable_mosaic.version = 11 : i64} {
  func.func @kernel(%arg0: i32, %arg1: i32, %arg2: memref<8x32xf32, #tpu.memory_space<vmem>>, %arg3: memref<32x32xf32, #tpu.memory_space<vmem>>, %arg4: memref<1x32xf32, #tpu.memory_space<vmem>>, %arg5: memref<8x32xf32, #tpu.memory_space<vmem>>, %arg6: memref<8x32xf32, #tpu.memory_space<vmem>>) attributes {dimension_semantics = [#tpu.dimension_semantics<parallel>, #tpu.dimension_semantics<arbitrary>], iteration_bounds = array<i64: 2, 1>, scalar_prefetch = 0 : i64, scratch_operands = 1 : i64, tpu.core_type = #tpu.core_type<tc>, window_params = [{transform_indices = @transform_0, window_bounds = array<i64: 8, 32>}, {transform_indices = @transform_1, window_bounds = array<i64: 32, 32>}, {pipeline_mode = #tpu.pipeline_mode<synchronous>, transform_indices = @transform_2, window_bounds = array<i64: 1, 32>}, {transform_indices = @transform_3, window_bounds = array<i64: 8, 32>}]} {
    %c0_i32 = arith.constant 0 : i32
    %0 = arith.cmpi eq, %arg1, %c0_i32 : i32
    %1 = arith.extui %0 : i1 to i32
    %c0_i32_0 = arith.constant 0 : i32
    %2 = arith.cmpi ne, %1, %c0_i32_0 : i32
    scf.if %2 {
      %cst_10 = arith.constant 0.000000e+00 : f32
      %14 = vector.broadcast %cst_10 : f32 to vector<8x32xf32>
      %c0_11 = arith.constant 0 : index
      %c0_12 = arith.constant 0 : index
      %15 = vector.load %arg6[%c0_11, %c0_12] : memref<8x32xf32, #tpu.memory_space<vmem>>, vector<8x32xf32>
      tpu.vector_store %arg6[%c0_11, %c0_12], %14 {strides = array<i32>} : memref<8x32xf32, #tpu.memory_space<vmem>>, vector<8x32xf32>,
    } else {
    }
    %c0 = arith.constant 0 : index
    %c0_1 = arith.constant 0 : index
    %3 = vector.load %arg2[%c0, %c0_1] : memref<8x32xf32, #tpu.memory_space<vmem>>, vector<8x32xf32>
    %4 = arith.truncf %3 : vector<8x32xf32> to vector<8x32xbf16>
    %c0_2 = arith.constant 0 : index
    %c0_3 = arith.constant 0 : index
    %5 = vector.load %arg6[%c0_2, %c0_3] : memref<8x32xf32, #tpu.memory_space<vmem>>, vector<8x32xf32>
    %c0_4 = arith.constant 0 : index
    %c0_5 = arith.constant 0 : index
    %6 = vector.load %arg3[%c0_4, %c0_5] : memref<32x32xf32, #tpu.memory_space<vmem>>, vector<32x32xf32>
    %7 = arith.truncf %6 : vector<32x32xf32> to vector<32x32xbf16>
    %cst = arith.constant dense<0.000000e+00> : vector<8x32xf32>
    %8 = tpu.matmul %4, %7, %cst {dimension_numbers = #tpu.dot_dimension_numbers<[1], [0], [0], [1], [0, 0, 1, 1], [], []>} : vector<8x32xbf16>, vector<32x32xbf16>, vector<8x32xf32> -> vector<8x32xf32>
    %9 = arith.addf %5, %8 : vector<8x32xf32>
    %c0_6 = arith.constant 0 : index
    %c0_7 = arith.constant 0 : index
    %10 = vector.load %arg6[%c0_6, %c0_7] : memref<8x32xf32, #tpu.memory_space<vmem>>, vector<8x32xf32>
    tpu.vector_store %arg6[%c0_6, %c0_7], %9 {strides = array<i32>} : memref<8x32xf32, #tpu.memory_space<vmem>>, vector<8x32xf32>,
    %c0_i32_8 = arith.constant 0 : i32
    %11 = arith.cmpi eq, %arg1, %c0_i32_8 : i32
    %12 = arith.extui %11 : i1 to i32
    %c0_i32_9 = arith.constant 0 : i32
    %13 = arith.cmpi ne, %12, %c0_i32_9 : i32
    scf.if %13 {
      %c0_10 = arith.constant 0 : index
      %c0_11 = arith.constant 0 : index
      %14 = vector.load %arg6[%c0_10, %c0_11] : memref<8x32xf32, #tpu.memory_space<vmem>>, vector<8x32xf32>
      %c0_12 = arith.constant 0 : index
      %c0_13 = arith.constant 0 : index
      %15 = vector.load %arg4[%c0_12, %c0_13] : memref<1x32xf32, #tpu.memory_space<vmem>>, vector<1x32xf32>
      %16 = vector.broadcast %15 : vector<1x32xf32> to vector<8x32xf32>
      %17 = arith.addf %14, %16 : vector<8x32xf32>
      %c0_14 = arith.constant 0 : index
      %c0_15 = arith.constant 0 : index
      %18 = vector.load %arg5[%c0_14, %c0_15] : memref<8x32xf32, #tpu.memory_space<vmem>>, vector<8x32xf32>
      tpu.vector_store %arg5[%c0_14, %c0_15], %17 {strides = array<i32>} : memref<8x32xf32, #tpu.memory_space<vmem>>, vector<8x32xf32>,
    } else {
    }
    return
  }
  func.func @transform_0(%arg0: i32, %arg1: i32) -> (i32, i32) {
    %c0_i32 = arith.constant 0 : i32
    return %arg0, %arg1 : i32, i32
  }
  func.func @transform_1(%arg0: i32, %arg1: i32) -> (i32, i32) {
    %c0_i32 = arith.constant 0 : i32
    %c0_i32_0 = arith.constant 0 : i32
    return %arg1, %c0_i32 : i32, i32
  }
  func.func @transform_2(%arg0: i32, %arg1: i32) -> (i32, i32) {
    %c0_i32 = arith.constant 0 : i32
    %c0_i32_0 = arith.constant 0 : i32
    %c0_i32_1 = arith.constant 0 : i32
    return %c0_i32, %c0_i32_0 : i32, i32
  }
  func.func @transform_3(%arg0: i32, %arg1: i32) -> (i32, i32) {
    %c0_i32 = arith.constant 0 : i32
    %c0_i32_0 = arith.constant 0 : i32
    return %arg0, %c0_i32 : i32, i32
  }
}

module attributes {stable_mosaic.version = 11 : i64} {
  func.func @kernel(%arg0: i32, %arg1: i32, %arg2: memref<16x32xf32, #tpu.memory_space<vmem>>, %arg3: memref<32x32xf32, #tpu.memory_space<vmem>>, %arg4: memref<32x32xf32, #tpu.memory_space<vmem>>, %arg5: memref<1x32xf32, #tpu.memory_space<vmem>>, %arg6: memref<1x32xf32, #tpu.memory_space<vmem>>, %arg7: memref<16x32xf32, #tpu.memory_space<vmem>>, %arg8: memref<16x32xf32, #tpu.memory_space<vmem>>, %arg9: memref<16x32xf32, #tpu.memory_space<vmem>>, %arg10: memref<16x32xf32, #tpu.memory_space<vmem>>) attributes {dimension_semantics = [#tpu.dimension_semantics<parallel>, #tpu.dimension_semantics<arbitrary>], iteration_bounds = array<i64: 2, 1>, scalar_prefetch = 0 : i64, scratch_operands = 2 : i64, tpu.core_type = #tpu.core_type<tc>, window_params = [{transform_indices = @transform_0, window_bounds = array<i64: 16, 32>}, {transform_indices = @transform_1, window_bounds = array<i64: 32, 32>}, {transform_indices = @transform_2, window_bounds = array<i64: 32, 32>}, {pipeline_mode = #tpu.pipeline_mode<synchronous>, transform_indices = @transform_3, window_bounds = array<i64: 1, 32>}, {pipeline_mode = #tpu.pipeline_mode<synchronous>, transform_indices = @transform_4, window_bounds = array<i64: 1, 32>}, {transform_indices = @transform_5, window_bounds = array<i64: 16, 32>}, {transform_indices = @transform_6, window_bounds = array<i64: 16, 32>}]} {
    %c0_i32 = arith.constant 0 : i32
    %0 = arith.cmpi eq, %arg1, %c0_i32 : i32
    %1 = arith.extui %0 : i1 to i32
    %c0_i32_0 = arith.constant 0 : i32
    %2 = arith.cmpi ne, %1, %c0_i32_0 : i32
    scf.if %2 {
      %cst_17 = arith.constant 0.000000e+00 : f32
      %20 = vector.broadcast %cst_17 : f32 to vector<16x32xf32>
      %c0_18 = arith.constant 0 : index
      %c0_19 = arith.constant 0 : index
      %21 = vector.load %arg9[%c0_18, %c0_19] : memref<16x32xf32, #tpu.memory_space<vmem>>, vector<16x32xf32>
      tpu.vector_store %arg9[%c0_18, %c0_19], %20 {strides = array<i32>} : memref<16x32xf32, #tpu.memory_space<vmem>>, vector<16x32xf32>,
      %cst_20 = arith.constant 0.000000e+00 : f32
      %22 = vector.broadcast %cst_20 : f32 to vector<16x32xf32>
      %c0_21 = arith.constant 0 : index
      %c0_22 = arith.constant 0 : index
      %23 = vector.load %arg10[%c0_21, %c0_22] : memref<16x32xf32, #tpu.memory_space<vmem>>, vector<16x32xf32>
      tpu.vector_store %arg10[%c0_21, %c0_22], %22 {strides = array<i32>} : memref<16x32xf32, #tpu.memory_space<vmem>>, vector<16x32xf32>,
    } else {
    }
    %c0 = arith.constant 0 : index
    %c0_1 = arith.constant 0 : index
    %3 = vector.load %arg2[%c0, %c0_1] : memref<16x32xf32, #tpu.memory_space<vmem>>, vector<16x32xf32>
    %4 = arith.truncf %3 : vector<16x32xf32> to vector<16x32xbf16>
    %c0_2 = arith.constant 0 : index
    %c0_3 = arith.constant 0 : index
    %5 = vector.load %arg9[%c0_2, %c0_3] : memref<16x32xf32, #tpu.memory_space<vmem>>, vector<16x32xf32>
    %c0_4 = arith.constant 0 : index
    %c0_5 = arith.constant 0 : index
    %6 = vector.load %arg3[%c0_4, %c0_5] : memref<32x32xf32, #tpu.memory_space<vmem>>, vector<32x32xf32>
    %7 = arith.truncf %6 : vector<32x32xf32> to vector<32x32xbf16>
    %cst = arith.constant dense<0.000000e+00> : vector<16x32xf32>
    %8 = tpu.matmul %4, %7, %cst {dimension_numbers = #tpu.dot_dimension_numbers<[1], [0], [0], [1], [0, 0, 1, 1], [], []>} : vector<16x32xbf16>, vector<32x32xbf16>, vector<16x32xf32> -> vector<16x32xf32>
    %9 = arith.addf %5, %8 : vector<16x32xf32>
    %c0_6 = arith.constant 0 : index
    %c0_7 = arith.constant 0 : index
    %10 = vector.load %arg9[%c0_6, %c0_7] : memref<16x32xf32, #tpu.memory_space<vmem>>, vector<16x32xf32>
    tpu.vector_store %arg9[%c0_6, %c0_7], %9 {strides = array<i32>} : memref<16x32xf32, #tpu.memory_space<vmem>>, vector<16x32xf32>,
    %c0_8 = arith.constant 0 : index
    %c0_9 = arith.constant 0 : index
    %11 = vector.load %arg10[%c0_8, %c0_9] : memref<16x32xf32, #tpu.memory_space<vmem>>, vector<16x32xf32>
    %c0_10 = arith.constant 0 : index
    %c0_11 = arith.constant 0 : index
    %12 = vector.load %arg4[%c0_10, %c0_11] : memref<32x32xf32, #tpu.memory_space<vmem>>, vector<32x32xf32>
    %13 = arith.truncf %12 : vector<32x32xf32> to vector<32x32xbf16>
    %cst_12 = arith.constant dense<0.000000e+00> : vector<16x32xf32>
    %14 = tpu.matmul %4, %13, %cst_12 {dimension_numbers = #tpu.dot_dimension_numbers<[1], [0], [0], [1], [0, 0, 1, 1], [], []>} : vector<16x32xbf16>, vector<32x32xbf16>, vector<16x32xf32> -> vector<16x32xf32>
    %15 = arith.addf %11, %14 : vector<16x32xf32>
    %c0_13 = arith.constant 0 : index
    %c0_14 = arith.constant 0 : index
    %16 = vector.load %arg10[%c0_13, %c0_14] : memref<16x32xf32, #tpu.memory_space<vmem>>, vector<16x32xf32>
    tpu.vector_store %arg10[%c0_13, %c0_14], %15 {strides = array<i32>} : memref<16x32xf32, #tpu.memory_space<vmem>>, vector<16x32xf32>,
    %c0_i32_15 = arith.constant 0 : i32
    %17 = arith.cmpi eq, %arg1, %c0_i32_15 : i32
    %18 = arith.extui %17 : i1 to i32
    %c0_i32_16 = arith.constant 0 : i32
    %19 = arith.cmpi ne, %18, %c0_i32_16 : i32
    scf.if %19 {
      %c0_17 = arith.constant 0 : index
      %c0_18 = arith.constant 0 : index
      %20 = vector.load %arg9[%c0_17, %c0_18] : memref<16x32xf32, #tpu.memory_space<vmem>>, vector<16x32xf32>
      %c0_19 = arith.constant 0 : index
      %c0_20 = arith.constant 0 : index
      %21 = vector.load %arg5[%c0_19, %c0_20] : memref<1x32xf32, #tpu.memory_space<vmem>>, vector<1x32xf32>
      %22 = vector.broadcast %21 : vector<1x32xf32> to vector<16x32xf32>
      %23 = arith.addf %20, %22 : vector<16x32xf32>
      %c0_21 = arith.constant 0 : index
      %c0_22 = arith.constant 0 : index
      %24 = vector.load %arg7[%c0_21, %c0_22] : memref<16x32xf32, #tpu.memory_space<vmem>>, vector<16x32xf32>
      tpu.vector_store %arg7[%c0_21, %c0_22], %23 {strides = array<i32>} : memref<16x32xf32, #tpu.memory_space<vmem>>, vector<16x32xf32>,
      %c0_23 = arith.constant 0 : index
      %c0_24 = arith.constant 0 : index
      %25 = vector.load %arg10[%c0_23, %c0_24] : memref<16x32xf32, #tpu.memory_space<vmem>>, vector<16x32xf32>
      %c0_25 = arith.constant 0 : index
      %c0_26 = arith.constant 0 : index
      %26 = vector.load %arg6[%c0_25, %c0_26] : memref<1x32xf32, #tpu.memory_space<vmem>>, vector<1x32xf32>
      %27 = vector.broadcast %26 : vector<1x32xf32> to vector<16x32xf32>
      %28 = arith.addf %25, %27 : vector<16x32xf32>
      %c0_27 = arith.constant 0 : index
      %c0_28 = arith.constant 0 : index
      %29 = vector.load %arg8[%c0_27, %c0_28] : memref<16x32xf32, #tpu.memory_space<vmem>>, vector<16x32xf32>
      tpu.vector_store %arg8[%c0_27, %c0_28], %28 {strides = array<i32>} : memref<16x32xf32, #tpu.memory_space<vmem>>, vector<16x32xf32>,
    } else {
    }
    return
  }
  func.func @transform_0(%arg0: i32, %arg1: i32) -> (i32, i32) {
    %c0_i32 = arith.constant 0 : i32
    return %arg0, %arg1 : i32, i32
  }
  func.func @transform_1(%arg0: i32, %arg1: i32) -> (i32, i32) {
    %c0_i32 = arith.constant 0 : i32
    %c0_i32_0 = arith.constant 0 : i32
    return %arg1, %c0_i32 : i32, i32
  }
  func.func @transform_2(%arg0: i32, %arg1: i32) -> (i32, i32) {
    %c0_i32 = arith.constant 0 : i32
    %c0_i32_0 = arith.constant 0 : i32
    return %arg1, %c0_i32 : i32, i32
  }
  func.func @transform_3(%arg0: i32, %arg1: i32) -> (i32, i32) {
    %c0_i32 = arith.constant 0 : i32
    %c0_i32_0 = arith.constant 0 : i32
    %c0_i32_1 = arith.constant 0 : i32
    return %c0_i32, %c0_i32_0 : i32, i32
  }
  func.func @transform_4(%arg0: i32, %arg1: i32) -> (i32, i32) {
    %c0_i32 = arith.constant 0 : i32
    %c0_i32_0 = arith.constant 0 : i32
    %c0_i32_1 = arith.constant 0 : i32
    return %c0_i32, %c0_i32_0 : i32, i32
  }
  func.func @transform_5(%arg0: i32, %arg1: i32) -> (i32, i32) {
    %c0_i32 = arith.constant 0 : i32
    %c0_i32_0 = arith.constant 0 : i32
    return %arg0, %c0_i32 : i32, i32
  }
  func.func @transform_6(%arg0: i32, %arg1: i32) -> (i32, i32) {
    %c0_i32 = arith.constant 0 : i32
    %c0_i32_0 = arith.constant 0 : i32
    return %arg0, %c0_i32 : i32, i32
  }
}

module attributes {stable_mosaic.version = 11 : i64} {
  func.func @kernel(%arg0: i32, %arg1: i32, %arg2: memref<1x8x32xf32, #tpu.memory_space<vmem>>, %arg3: memref<1x8x32xf32, #tpu.memory_space<vmem>>, %arg4: memref<1x8x32xf32, #tpu.memory_space<vmem>>, %arg5: memref<1x8x8xi32, #tpu.memory_space<vmem>>, %arg6: memref<32x32xf32, #tpu.memory_space<vmem>>, %arg7: memref<1x32xf32, #tpu.memory_space<vmem>>, %arg8: memref<1x8x32xf32, #tpu.memory_space<vmem>>, %arg9: memref<1x32xf32, #tpu.memory_space<vmem>>, %arg10: memref<1x32xf32, #tpu.memory_space<vmem>>, %arg11: memref<1x8x32xf32, #tpu.memory_space<vmem>>) attributes {dimension_semantics = [#tpu.dimension_semantics<parallel>, #tpu.dimension_semantics<parallel>], iteration_bounds = array<i64: 2, 1>, scalar_prefetch = 0 : i64, scratch_operands = 0 : i64, tpu.core_type = #tpu.core_type<tc>, window_params = [{transform_indices = @transform_0, window_bounds = array<i64: 1, 8, 32>}, {transform_indices = @transform_1, window_bounds = array<i64: 1, 8, 32>}, {transform_indices = @transform_2, window_bounds = array<i64: 1, 8, 32>}, {transform_indices = @transform_3, window_bounds = array<i64: 1, 8, 8>}, {pipeline_mode = #tpu.pipeline_mode<synchronous>, transform_indices = @transform_4, window_bounds = array<i64: 32, 32>}, {pipeline_mode = #tpu.pipeline_mode<synchronous>, transform_indices = @transform_5, window_bounds = array<i64: 1, 32>}, {transform_indices = @transform_6, window_bounds = array<i64: 1, 8, 32>}, {pipeline_mode = #tpu.pipeline_mode<synchronous>, transform_indices = @transform_7, window_bounds = array<i64: 1, 32>}, {pipeline_mode = #tpu.pipeline_mode<synchronous>, transform_indices = @transform_8, window_bounds = array<i64: 1, 32>}, {transform_indices = @transform_9, window_bounds = array<i64: 1, 8, 32>}]} {
    %c0 = arith.constant 0 : index
    %c0_0 = arith.constant 0 : index
    %c0_1 = arith.constant 0 : index
    %0 = vector.load %arg2[%c0, %c0_0, %c0_1] : memref<1x8x32xf32, #tpu.memory_space<vmem>>, vector<1x8x32xf32>
    %1 = vector.shape_cast %0 : vector<1x8x32xf32> to vector<8x32xf32>
    %cst = arith.constant 0.353553385 : f32
    %2 = vector.broadcast %cst : f32 to vector<8x32xf32>
    %3 = arith.mulf %1, %2 : vector<8x32xf32>
    %c0_2 = arith.constant 0 : index
    %c0_3 = arith.constant 0 : index
    %c0_4 = arith.constant 0 : index
    %4 = vector.load %arg3[%c0_2, %c0_3, %c0_4] : memref<1x8x32xf32, #tpu.memory_space<vmem>>, vector<1x8x32xf32>
    %5 = vector.shape_cast %4 : vector<1x8x32xf32> to vector<8x32xf32>
    %c0_5 = arith.constant 0 : index
    %c0_6 = arith.constant 0 : index
    %c0_7 = arith.constant 0 : index
    %6 = vector.load %arg4[%c0_5, %c0_6, %c0_7] : memref<1x8x32xf32, #tpu.memory_space<vmem>>, vector<1x8x32xf32>
    %7 = vector.shape_cast %6 : vector<1x8x32xf32> to vector<8x32xf32>
    %c0_8 = arith.constant 0 : index
    %c0_9 = arith.constant 0 : index
    %8 = vector.load %arg6[%c0_8, %c0_9] : memref<32x32xf32, #tpu.memory_space<vmem>>, vector<32x32xf32>
    %c0_10 = arith.constant 0 : index
    %c0_11 = arith.constant 0 : index
    %c0_12 = arith.constant 0 : index
    %9 = vector.load %arg5[%c0_10, %c0_11, %c0_12] : memref<1x8x8xi32, #tpu.memory_space<vmem>>, vector<1x8x8xi32>
    %10 = vector.shape_cast %9 : vector<1x8x8xi32> to vector<8x8xi32>
    %11 = vector.extract_strided_slice %3 {offsets = [0, 0], sizes = [8, 8], strides = [1, 1]} : vector<8x32xf32> to vector<8x8xf32>
    %12 = arith.truncf %11 : vector<8x8xf32> to vector<8x8xbf16>
    %13 = vector.extract_strided_slice %5 {offsets = [0, 0], sizes = [8, 8], strides = [1, 1]} : vector<8x32xf32> to vector<8x8xf32>
    %14 = arith.truncf %13 : vector<8x8xf32> to vector<8x8xbf16>
    %15 = vector.extract_strided_slice %7 {offsets = [0, 0], sizes = [8, 8], strides = [1, 1]} : vector<8x32xf32> to vector<8x8xf32>
    %16 = arith.truncf %15 : vector<8x8xf32> to vector<8x8xbf16>
    %cst_13 = arith.constant dense<0.000000e+00> : vector<8x8xf32>
    %17 = tpu.matmul %12, %14, %cst_13 {dimension_numbers = #tpu.dot_dimension_numbers<[1], [1], [0], [0], [0, 0, 1, 0], [], []>} : vector<8x8xbf16>, vector<8x8xbf16>, vector<8x8xf32> -> vector<8x8xf32>
    %c0_i32 = arith.constant 0 : i32
    %18 = vector.broadcast %c0_i32 : i32 to vector<8x8xi32>
    %19 = arith.cmpi eq, %10, %18 : vector<8x8xi32>
    %cst_14 = arith.constant -1.000000e+30 : f32
    %20 = vector.broadcast %cst_14 : f32 to vector<8x8xf32>
    %21 = arith.select %19, %20, %17 : vector<8x8xi1>, vector<8x8xf32>
    %cst_15 = arith.constant dense<0xFF800000> : vector<8xf32>
    %22 = vector.multi_reduction <maximumf>, %21, %cst_15 [1] : vector<8x8xf32> to vector<8xf32>
    %23 = vector.shape_cast %22 : vector<8xf32> to vector<8x1xf32>
    %24 = vector.broadcast %23 : vector<8x1xf32> to vector<8x8xf32>
    %25 = arith.subf %21, %24 : vector<8x8xf32>
    %26 = math.exp %25 : vector<8x8xf32>
    %cst_16 = arith.constant dense<0.000000e+00> : vector<8xf32>
    %27 = vector.multi_reduction <add>, %26, %cst_16 [1] : vector<8x8xf32> to vector<8xf32>
    %28 = vector.shape_cast %27 : vector<8xf32> to vector<8x1xf32>
    %29 = tpu.reciprocal %28 {approx = true} : vector<8x1xf32> -> vector<8x1xf32>
    %30 = arith.mulf %28, %29 : vector<8x1xf32>
    %cst_17 = arith.constant 2.000000e+00 : f32
    %31 = vector.broadcast %cst_17 : f32 to vector<8x1xf32>
    %32 = arith.subf %31, %30 : vector<8x1xf32>
    %33 = arith.mulf %29, %32 : vector<8x1xf32>
    %34 = vector.broadcast %33 : vector<8x1xf32> to vector<8x8xf32>
    %35 = arith.mulf %26, %34 : vector<8x8xf32>
    %36 = arith.truncf %35 : vector<8x8xf32> to vector<8x8xbf16>
    %cst_18 = arith.constant dense<0.000000e+00> : vector<8x8xf32>
    %37 = tpu.matmul %36, %16, %cst_18 {dimension_numbers = #tpu.dot_dimension_numbers<[1], [0], [0], [1], [0, 0, 1, 1], [], []>} : vector<8x8xbf16>, vector<8x8xbf16>, vector<8x8xf32> -> vector<8x8xf32>
    %38 = arith.truncf %37 : vector<8x8xf32> to vector<8x8xbf16>
    %39 = vector.extract_strided_slice %8 {offsets = [0, 0], sizes = [8, 32], strides = [1, 1]} : vector<32x32xf32> to vector<8x32xf32>
    %40 = arith.truncf %39 : vector<8x32xf32> to vector<8x32xbf16>
    %cst_19 = arith.constant dense<0.000000e+00> : vector<8x32xf32>
    %41 = tpu.matmul %38, %40, %cst_19 {dimension_numbers = #tpu.dot_dimension_numbers<[1], [0], [0], [1], [0, 0, 1, 1], [], []>} : vector<8x8xbf16>, vector<8x32xbf16>, vector<8x32xf32> -> vector<8x32xf32>
    %42 = vector.extract_strided_slice %3 {offsets = [0, 8], sizes = [8, 8], strides = [1, 1]} : vector<8x32xf32> to vector<8x8xf32>
    %43 = arith.truncf %42 : vector<8x8xf32> to vector<8x8xbf16>
    %44 = vector.extract_strided_slice %5 {offsets = [0, 8], sizes = [8, 8], strides = [1, 1]} : vector<8x32xf32> to vector<8x8xf32>
    %45 = arith.truncf %44 : vector<8x8xf32> to vector<8x8xbf16>
    %46 = vector.extract_strided_slice %7 {offsets = [0, 8], sizes = [8, 8], strides = [1, 1]} : vector<8x32xf32> to vector<8x8xf32>
    %47 = arith.truncf %46 : vector<8x8xf32> to vector<8x8xbf16>
    %cst_20 = arith.constant dense<0.000000e+00> : vector<8x8xf32>
    %48 = tpu.matmul %43, %45, %cst_20 {dimension_numbers = #tpu.dot_dimension_numbers<[1], [1], [0], [0], [0, 0, 1, 0], [], []>} : vector<8x8xbf16>, vector<8x8xbf16>, vector<8x8xf32> -> vector<8x8xf32>
    %c0_i32_21 = arith.constant 0 : i32
    %49 = vector.broadcast %c0_i32_21 : i32 to vector<8x8xi32>
    %50 = arith.cmpi eq, %10, %49 : vector<8x8xi32>
    %cst_22 = arith.constant -1.000000e+30 : f32
    %51 = vector.broadcast %cst_22 : f32 to vector<8x8xf32>
    %52 = arith.select %50, %51, %48 : vector<8x8xi1>, vector<8x8xf32>
    %cst_23 = arith.constant dense<0xFF800000> : vector<8xf32>
    %53 = vector.multi_reduction <maximumf>, %52, %cst_23 [1] : vector<8x8xf32> to vector<8xf32>
    %54 = vector.shape_cast %53 : vector<8xf32> to vector<8x1xf32>
    %55 = vector.broadcast %54 : vector<8x1xf32> to vector<8x8xf32>
    %56 = arith.subf %52, %55 : vector<8x8xf32>
    %57 = math.exp %56 : vector<8x8xf32>
    %cst_24 = arith.constant dense<0.000000e+00> : vector<8xf32>
    %58 = vector.multi_reduction <add>, %57, %cst_24 [1] : vector<8x8xf32> to vector<8xf32>
    %59 = vector.shape_cast %58 : vector<8xf32> to vector<8x1xf32>
    %60 = tpu.reciprocal %59 {approx = true} : vector<8x1xf32> -> vector<8x1xf32>
    %61 = arith.mulf %59, %60 : vector<8x1xf32>
    %cst_25 = arith.constant 2.000000e+00 : f32
    %62 = vector.broadcast %cst_25 : f32 to vector<8x1xf32>
    %63 = arith.subf %62, %61 : vector<8x1xf32>
    %64 = arith.mulf %60, %63 : vector<8x1xf32>
    %65 = vector.broadcast %64 : vector<8x1xf32> to vector<8x8xf32>
    %66 = arith.mulf %57, %65 : vector<8x8xf32>
    %67 = arith.truncf %66 : vector<8x8xf32> to vector<8x8xbf16>
    %cst_26 = arith.constant dense<0.000000e+00> : vector<8x8xf32>
    %68 = tpu.matmul %67, %47, %cst_26 {dimension_numbers = #tpu.dot_dimension_numbers<[1], [0], [0], [1], [0, 0, 1, 1], [], []>} : vector<8x8xbf16>, vector<8x8xbf16>, vector<8x8xf32> -> vector<8x8xf32>
    %69 = arith.truncf %68 : vector<8x8xf32> to vector<8x8xbf16>
    %70 = vector.extract_strided_slice %8 {offsets = [8, 0], sizes = [8, 32], strides = [1, 1]} : vector<32x32xf32> to vector<8x32xf32>
    %71 = arith.truncf %70 : vector<8x32xf32> to vector<8x32xbf16>
    %cst_27 = arith.constant dense<0.000000e+00> : vector<8x32xf32>
    %72 = tpu.matmul %69, %71, %cst_27 {dimension_numbers = #tpu.dot_dimension_numbers<[1], [0], [0], [1], [0, 0, 1, 1], [], []>} : vector<8x8xbf16>, vector<8x32xbf16>, vector<8x32xf32> -> vector<8x32xf32>
    %73 = arith.addf %41, %72 : vector<8x32xf32>
    %74 = vector.extract_strided_slice %3 {offsets = [0, 16], sizes = [8, 8], strides = [1, 1]} : vector<8x32xf32> to vector<8x8xf32>
    %75 = arith.truncf %74 : vector<8x8xf32> to vector<8x8xbf16>
    %76 = vector.extract_strided_slice %5 {offsets = [0, 16], sizes = [8, 8], strides = [1, 1]} : vector<8x32xf32> to vector<8x8xf32>
    %77 = arith.truncf %76 : vector<8x8xf32> to vector<8x8xbf16>
    %78 = vector.extract_strided_slice %7 {offsets = [0, 16], sizes = [8, 8], strides = [1, 1]} : vector<8x32xf32> to vector<8x8xf32>
    %79 = arith.truncf %78 : vector<8x8xf32> to vector<8x8xbf16>
    %cst_28 = arith.constant dense<0.000000e+00> : vector<8x8xf32>
    %80 = tpu.matmul %75, %77, %cst_28 {dimension_numbers = #tpu.dot_dimension_numbers<[1], [1], [0], [0], [0, 0, 1, 0], [], []>} : vector<8x8xbf16>, vector<8x8xbf16>, vector<8x8xf32> -> vector<8x8xf32>
    %c0_i32_29 = arith.constant 0 : i32
    %81 = vector.broadcast %c0_i32_29 : i32 to vector<8x8xi32>
    %82 = arith.cmpi eq, %10, %81 : vector<8x8xi32>
    %cst_30 = arith.constant -1.000000e+30 : f32
    %83 = vector.broadcast %cst_30 : f32 to vector<8x8xf32>
    %84 = arith.select %82, %83, %80 : vector<8x8xi1>, vector<8x8xf32>
    %cst_31 = arith.constant dense<0xFF800000> : vector<8xf32>
    %85 = vector.multi_reduction <maximumf>, %84, %cst_31 [1] : vector<8x8xf32> to vector<8xf32>
    %86 = vector.shape_cast %85 : vector<8xf32> to vector<8x1xf32>
    %87 = vector.broadcast %86 : vector<8x1xf32> to vector<8x8xf32>
    %88 = arith.subf %84, %87 : vector<8x8xf32>
    %89 = math.exp %88 : vector<8x8xf32>
    %cst_32 = arith.constant dense<0.000000e+00> : vector<8xf32>
    %90 = vector.multi_reduction <add>, %89, %cst_32 [1] : vector<8x8xf32> to vector<8xf32>
    %91 = vector.shape_cast %90 : vector<8xf32> to vector<8x1xf32>
    %92 = tpu.reciprocal %91 {approx = true} : vector<8x1xf32> -> vector<8x1xf32>
    %93 = arith.mulf %91, %92 : vector<8x1xf32>
    %cst_33 = arith.constant 2.000000e+00 : f32
    %94 = vector.broadcast %cst_33 : f32 to vector<8x1xf32>
    %95 = arith.subf %94, %93 : vector<8x1xf32>
    %96 = arith.mulf %92, %95 : vector<8x1xf32>
    %97 = vector.broadcast %96 : vector<8x1xf32> to vector<8x8xf32>
    %98 = arith.mulf %89, %97 : vector<8x8xf32>
    %99 = arith.truncf %98 : vector<8x8xf32> to vector<8x8xbf16>
    %cst_34 = arith.constant dense<0.000000e+00> : vector<8x8xf32>
    %100 = tpu.matmul %99, %79, %cst_34 {dimension_numbers = #tpu.dot_dimension_numbers<[1], [0], [0], [1], [0, 0, 1, 1], [], []>} : vector<8x8xbf16>, vector<8x8xbf16>, vector<8x8xf32> -> vector<8x8xf32>
    %101 = arith.truncf %100 : vector<8x8xf32> to vector<8x8xbf16>
    %102 = vector.extract_strided_slice %8 {offsets = [16, 0], sizes = [8, 32], strides = [1, 1]} : vector<32x32xf32> to vector<8x32xf32>
    %103 = arith.truncf %102 : vector<8x32xf32> to vector<8x32xbf16>
    %cst_35 = arith.constant dense<0.000000e+00> : vector<8x32xf32>
    %104 = tpu.matmul %101, %103, %cst_35 {dimension_numbers = #tpu.dot_dimension_numbers<[1], [0], [0], [1], [0, 0, 1, 1], [], []>} : vector<8x8xbf16>, vector<8x32xbf16>, vector<8x32xf32> -> vector<8x32xf32>
    %105 = arith.addf %73, %104 : vector<8x32xf32>
    %106 = vector.extract_strided_slice %3 {offsets = [0, 24], sizes = [8, 8], strides = [1, 1]} : vector<8x32xf32> to vector<8x8xf32>
    %107 = arith.truncf %106 : vector<8x8xf32> to vector<8x8xbf16>
    %108 = vector.extract_strided_slice %5 {offsets = [0, 24], sizes = [8, 8], strides = [1, 1]} : vector<8x32xf32> to vector<8x8xf32>
    %109 = arith.truncf %108 : vector<8x8xf32> to vector<8x8xbf16>
    %110 = vector.extract_strided_slice %7 {offsets = [0, 24], sizes = [8, 8], strides = [1, 1]} : vector<8x32xf32> to vector<8x8xf32>
    %111 = arith.truncf %110 : vector<8x8xf32> to vector<8x8xbf16>
    %cst_36 = arith.constant dense<0.000000e+00> : vector<8x8xf32>
    %112 = tpu.matmul %107, %109, %cst_36 {dimension_numbers = #tpu.dot_dimension_numbers<[1], [1], [0], [0], [0, 0, 1, 0], [], []>} : vector<8x8xbf16>, vector<8x8xbf16>, vector<8x8xf32> -> vector<8x8xf32>
    %c0_i32_37 = arith.constant 0 : i32
    %113 = vector.broadcast %c0_i32_37 : i32 to vector<8x8xi32>
    %114 = arith.cmpi eq, %10, %113 : vector<8x8xi32>
    %cst_38 = arith.constant -1.000000e+30 : f32
    %115 = vector.broadcast %cst_38 : f32 to vector<8x8xf32>
    %116 = arith.select %114, %115, %112 : vector<8x8xi1>, vector<8x8xf32>
    %cst_39 = arith.constant dense<0xFF800000> : vector<8xf32>
    %117 = vector.multi_reduction <maximumf>, %116, %cst_39 [1] : vector<8x8xf32> to vector<8xf32>
    %118 = vector.shape_cast %117 : vector<8xf32> to vector<8x1xf32>
    %119 = vector.broadcast %118 : vector<8x1xf32> to vector<8x8xf32>
    %120 = arith.subf %116, %119 : vector<8x8xf32>
    %121 = math.exp %120 : vector<8x8xf32>
    %cst_40 = arith.constant dense<0.000000e+00> : vector<8xf32>
    %122 = vector.multi_reduction <add>, %121, %cst_40 [1] : vector<8x8xf32> to vector<8xf32>
    %123 = vector.shape_cast %122 : vector<8xf32> to vector<8x1xf32>
    %124 = tpu.reciprocal %123 {approx = true} : vector<8x1xf32> -> vector<8x1xf32>
    %125 = arith.mulf %123, %124 : vector<8x1xf32>
    %cst_41 = arith.constant 2.000000e+00 : f32
    %126 = vector.broadcast %cst_41 : f32 to vector<8x1xf32>
    %127 = arith.subf %126, %125 : vector<8x1xf32>
    %128 = arith.mulf %124, %127 : vector<8x1xf32>
    %129 = vector.broadcast %128 : vector<8x1xf32> to vector<8x8xf32>
    %130 = arith.mulf %121, %129 : vector<8x8xf32>
    %131 = arith.truncf %130 : vector<8x8xf32> to vector<8x8xbf16>
    %cst_42 = arith.constant dense<0.000000e+00> : vector<8x8xf32>
    %132 = tpu.matmul %131, %111, %cst_42 {dimension_numbers = #tpu.dot_dimension_numbers<[1], [0], [0], [1], [0, 0, 1, 1], [], []>} : vector<8x8xbf16>, vector<8x8xbf16>, vector<8x8xf32> -> vector<8x8xf32>
    %133 = arith.truncf %132 : vector<8x8xf32> to vector<8x8xbf16>
    %134 = vector.extract_strided_slice %8 {offsets = [24, 0], sizes = [8, 32], strides = [1, 1]} : vector<32x32xf32> to vector<8x32xf32>
    %135 = arith.truncf %134 : vector<8x32xf32> to vector<8x32xbf16>
    %cst_43 = arith.constant dense<0.000000e+00> : vector<8x32xf32>
    %136 = tpu.matmul %133, %135, %cst_43 {dimension_numbers = #tpu.dot_dimension_numbers<[1], [0], [0], [1], [0, 0, 1, 1], [], []>} : vector<8x8xbf16>, vector<8x32xbf16>, vector<8x32xf32> -> vector<8x32xf32>
    %137 = arith.addf %105, %136 : vector<8x32xf32>
    %c0_44 = arith.constant 0 : index
    %c0_45 = arith.constant 0 : index
    %138 = vector.load %arg7[%c0_44, %c0_45] : memref<1x32xf32, #tpu.memory_space<vmem>>, vector<1x32xf32>
    %139 = vector.broadcast %138 : vector<1x32xf32> to vector<8x32xf32>
    %140 = arith.addf %137, %139 : vector<8x32xf32>
    %c0_46 = arith.constant 0 : index
    %c0_47 = arith.constant 0 : index
    %c0_48 = arith.constant 0 : index
    %141 = vector.load %arg8[%c0_46, %c0_47, %c0_48] : memref<1x8x32xf32, #tpu.memory_space<vmem>>, vector<1x8x32xf32>
    %142 = vector.shape_cast %141 : vector<1x8x32xf32> to vector<8x32xf32>
    %143 = arith.addf %140, %142 : vector<8x32xf32>
    %cst_49 = arith.constant dense<0.000000e+00> : vector<8xf32>
    %144 = vector.multi_reduction <add>, %143, %cst_49 [1] : vector<8x32xf32> to vector<8xf32>
    %145 = vector.shape_cast %144 : vector<8xf32> to vector<8x1xf32>
    %cst_50 = arith.constant 3.200000e+01 : f32
    %146 = vector.broadcast %cst_50 : f32 to vector<8x1xf32>
    %147 = arith.divf %145, %146 : vector<8x1xf32>
    %148 = vector.broadcast %147 : vector<8x1xf32> to vector<8x32xf32>
    %149 = arith.subf %143, %148 : vector<8x32xf32>
    %150 = arith.mulf %149, %149 : vector<8x32xf32>
    %cst_51 = arith.constant dense<0.000000e+00> : vector<8xf32>
    %151 = vector.multi_reduction <add>, %150, %cst_51 [1] : vector<8x32xf32> to vector<8xf32>
    %152 = vector.shape_cast %151 : vector<8xf32> to vector<8x1xf32>
    %cst_52 = arith.constant 3.200000e+01 : f32
    %153 = vector.broadcast %cst_52 : f32 to vector<8x1xf32>
    %154 = arith.divf %152, %153 : vector<8x1xf32>
    %155 = vector.broadcast %147 : vector<8x1xf32> to vector<8x32xf32>
    %156 = arith.subf %143, %155 : vector<8x32xf32>
    %cst_53 = arith.constant 9.99999974E-6 : f32
    %157 = vector.broadcast %cst_53 : f32 to vector<8x1xf32>
    %158 = arith.addf %154, %157 : vector<8x1xf32>
    %159 = math.rsqrt %158 : vector<8x1xf32>
    %160 = vector.broadcast %159 : vector<8x1xf32> to vector<8x32xf32>
    %161 = arith.mulf %156, %160 : vector<8x32xf32>
    %c0_54 = arith.constant 0 : index
    %c0_55 = arith.constant 0 : index
    %162 = vector.load %arg9[%c0_54, %c0_55] : memref<1x32xf32, #tpu.memory_space<vmem>>, vector<1x32xf32>
    %163 = vector.broadcast %162 : vector<1x32xf32> to vector<8x32xf32>
    %164 = arith.mulf %161, %163 : vector<8x32xf32>
    %c0_56 = arith.constant 0 : index
    %c0_57 = arith.constant 0 : index
    %165 = vector.load %arg10[%c0_56, %c0_57] : memref<1x32xf32, #tpu.memory_space<vmem>>, vector<1x32xf32>
    %166 = vector.broadcast %165 : vector<1x32xf32> to vector<8x32xf32>
    %167 = arith.addf %164, %166 : vector<8x32xf32>
    %c0_58 = arith.constant 0 : index
    %c0_59 = arith.constant 0 : index
    %c0_60 = arith.constant 0 : index
    %168 = vector.load %arg11[%c0_58, %c0_59, %c0_60] : memref<1x8x32xf32, #tpu.memory_space<vmem>>, vector<1x8x32xf32>
    %169 = vector.shape_cast %168 : vector<1x8x32xf32> to vector<8x32xf32>
    %170 = vector.shape_cast %167 : vector<8x32xf32> to vector<1x8x32xf32>
    tpu.vector_store %arg11[%c0_58, %c0_59, %c0_60], %170 {strides = array<i32>} : memref<1x8x32xf32, #tpu.memory_space<vmem>>, vector<1x8x32xf32>,
    return
  }
  func.func @transform_0(%arg0: i32, %arg1: i32) -> (i32, i32, i32) {
    %c0_i32 = arith.constant 0 : i32
    %c0_i32_0 = arith.constant 0 : i32
    return %arg0, %arg1, %c0_i32 : i32, i32, i32
  }
  func.func @transform_1(%arg0: i32, %arg1: i32) -> (i32, i32, i32) {
    %c0_i32 = arith.constant 0 : i32
    %c0_i32_0 = arith.constant 0 : i32
    %c0_i32_1 = arith.constant 0 : i32
    return %arg0, %c0_i32, %c0_i32_0 : i32, i32, i32
  }
  func.func @transform_2(%arg0: i32, %arg1: i32) -> (i32, i32, i32) {
    %c0_i32 = arith.constant 0 : i32
    %c0_i32_0 = arith.constant 0 : i32
    %c0_i32_1 = arith.constant 0 : i32
    return %arg0, %c0_i32, %c0_i32_0 : i32, i32, i32
  }
  func.func @transform_3(%arg0: i32, %arg1: i32) -> (i32, i32, i32) {
    %c0_i32 = arith.constant 0 : i32
    %c0_i32_0 = arith.constant 0 : i32
    return %arg0, %arg1, %c0_i32 : i32, i32, i32
  }
  func.func @transform_4(%arg0: i32, %arg1: i32) -> (i32, i32) {
    %c0_i32 = arith.constant 0 : i32
    %c0_i32_0 = arith.constant 0 : i32
    %c0_i32_1 = arith.constant 0 : i32
    return %c0_i32, %c0_i32_0 : i32, i32
  }
  func.func @transform_5(%arg0: i32, %arg1: i32) -> (i32, i32) {
    %c0_i32 = arith.constant 0 : i32
    %c0_i32_0 = arith.constant 0 : i32
    %c0_i32_1 = arith.constant 0 : i32
    return %c0_i32, %c0_i32_0 : i32, i32
  }
  func.func @transform_6(%arg0: i32, %arg1: i32) -> (i32, i32, i32) {
    %c0_i32 = arith.constant 0 : i32
    %c0_i32_0 = arith.constant 0 : i32
    return %arg0, %arg1, %c0_i32 : i32, i32, i32
  }
  func.func @transform_7(%arg0: i32, %arg1: i32) -> (i32, i32) {
    %c0_i32 = arith.constant 0 : i32
    %c0_i32_0 = arith.constant 0 : i32
    %c0_i32_1 = arith.constant 0 : i32
    return %c0_i32, %c0_i32_0 : i32, i32
  }
  func.func @transform_8(%arg0: i32, %arg1: i32) -> (i32, i32) {
    %c0_i32 = arith.constant 0 : i32
    %c0_i32_0 = arith.constant 0 : i32
    %c0_i32_1 = arith.constant 0 : i32
    return %c0_i32, %c0_i32_0 : i32, i32
  }
  func.func @transform_9(%arg0: i32, %arg1: i32) -> (i32, i32, i32) {
    %c0_i32 = arith.constant 0 : i32
    %c0_i32_0 = arith.constant 0 : i32
    return %arg0, %arg1, %c0_i32 : i32, i32, i32
  }
}

module attributes {stable_mosaic.version = 11 : i64} {
  func.func @kernel(%arg0: i32, %arg1: i32, %arg2: memref<8x32xf32, #tpu.memory_space<vmem>>, %arg3: memref<32x32xf32, #tpu.memory_space<vmem>>, %arg4: memref<32x32xf32, #tpu.memory_space<vmem>>, %arg5: memref<32x32xf32, #tpu.memory_space<vmem>>, %arg6: memref<1x32xf32, #tpu.memory_space<vmem>>, %arg7: memref<1x32xf32, #tpu.memory_space<vmem>>, %arg8: memref<1x32xf32, #tpu.memory_space<vmem>>, %arg9: memref<8x32xf32, #tpu.memory_space<vmem>>, %arg10: memref<8x32xf32, #tpu.memory_space<vmem>>, %arg11: memref<8x32xf32, #tpu.memory_space<vmem>>, %arg12: memref<8x32xf32, #tpu.memory_space<vmem>>, %arg13: memref<8x32xf32, #tpu.memory_space<vmem>>, %arg14: memref<8x32xf32, #tpu.memory_space<vmem>>) attributes {dimension_semantics = [#tpu.dimension_semantics<parallel>, #tpu.dimension_semantics<arbitrary>], iteration_bounds = array<i64: 2, 1>, scalar_prefetch = 0 : i64, scratch_operands = 3 : i64, tpu.core_type = #tpu.core_type<tc>, window_params = [{transform_indices = @transform_0, window_bounds = array<i64: 8, 32>}, {transform_indices = @transform_1, window_bounds = array<i64: 32, 32>}, {transform_indices = @transform_2, window_bounds = array<i64: 32, 32>}, {transform_indices = @transform_3, window_bounds = array<i64: 32, 32>}, {pipeline_mode = #tpu.pipeline_mode<synchronous>, transform_indices = @transform_4, window_bounds = array<i64: 1, 32>}, {pipeline_mode = #tpu.pipeline_mode<synchronous>, transform_indices = @transform_5, window_bounds = array<i64: 1, 32>}, {pipeline_mode = #tpu.pipeline_mode<synchronous>, transform_indices = @transform_6, window_bounds = array<i64: 1, 32>}, {transform_indices = @transform_7, window_bounds = array<i64: 8, 32>}, {transform_indices = @transform_8, window_bounds = array<i64: 8, 32>}, {transform_indices = @transform_9, window_bounds = array<i64: 8, 32>}]} {
    %c0_i32 = arith.constant 0 : i32
    %0 = arith.cmpi eq, %arg1, %c0_i32 : i32
    %1 = arith.extui %0 : i1 to i32
    %c0_i32_0 = arith.constant 0 : i32
    %2 = arith.cmpi ne, %1, %c0_i32_0 : i32
    scf.if %2 {
      %cst_24 = arith.constant 0.000000e+00 : f32
      %26 = vector.broadcast %cst_24 : f32 to vector<8x32xf32>
      %c0_25 = arith.constant 0 : index
      %c0_26 = arith.constant 0 : index
      %27 = vector.load %arg12[%c0_25, %c0_26] : memref<8x32xf32, #tpu.memory_space<vmem>>, vector<8x32xf32>
      tpu.vector_store %arg12[%c0_25, %c0_26], %26 {strides = array<i32>} : memref<8x32xf32, #tpu.memory_space<vmem>>, vector<8x32xf32>,
      %cst_27 = arith.constant 0.000000e+00 : f32
      %28 = vector.broadcast %cst_27 : f32 to vector<8x32xf32>
      %c0_28 = arith.constant 0 : index
      %c0_29 = arith.constant 0 : index
      %29 = vector.load %arg13[%c0_28, %c0_29] : memref<8x32xf32, #tpu.memory_space<vmem>>, vector<8x32xf32>
      tpu.vector_store %arg13[%c0_28, %c0_29], %28 {strides = array<i32>} : memref<8x32xf32, #tpu.memory_space<vmem>>, vector<8x32xf32>,
      %cst_30 = arith.constant 0.000000e+00 : f32
      %30 = vector.broadcast %cst_30 : f32 to vector<8x32xf32>
      %c0_31 = arith.constant 0 : index
      %c0_32 = arith.constant 0 : index
      %31 = vector.load %arg14[%c0_31, %c0_32] : memref<8x32xf32, #tpu.memory_space<vmem>>, vector<8x32xf32>
      tpu.vector_store %arg14[%c0_31, %c0_32], %30 {strides = array<i32>} : memref<8x32xf32, #tpu.memory_space<vmem>>, vector<8x32xf32>,
    } else {
    }
    %c0 = arith.constant 0 : index
    %c0_1 = arith.constant 0 : index
    %3 = vector.load %arg2[%c0, %c0_1] : memref<8x32xf32, #tpu.memory_space<vmem>>, vector<8x32xf32>
    %4 = arith.truncf %3 : vector<8x32xf32> to vector<8x32xbf16>
    %c0_2 = arith.constant 0 : index
    %c0_3 = arith.constant 0 : index
    %5 = vector.load %arg12[%c0_2, %c0_3] : memref<8x32xf32, #tpu.memory_space<vmem>>, vector<8x32xf32>
    %c0_4 = arith.constant 0 : index
    %c0_5 = arith.constant 0 : index
    %6 = vector.load %arg3[%c0_4, %c0_5] : memref<32x32xf32, #tpu.memory_space<vmem>>, vector<32x32xf32>
    %7 = arith.truncf %6 : vector<32x32xf32> to vector<32x32xbf16>
    %cst = arith.constant dense<0.000000e+00> : vector<8x32xf32>
    %8 = tpu.matmul %4, %7, %cst {dimension_numbers = #tpu.dot_dimension_numbers<[1], [0], [0], [1], [0, 0, 1, 1], [], []>} : vector<8x32xbf16>, vector<32x32xbf16>, vector<8x32xf32> -> vector<8x32xf32>
    %9 = arith.addf %5, %8 : vector<8x32xf32>
    %c0_6 = arith.constant 0 : index
    %c0_7 = arith.constant 0 : index
    %10 = vector.load %arg12[%c0_6, %c0_7] : memref<8x32xf32, #tpu.memory_space<vmem>>, vector<8x32xf32>
    tpu.vector_store %arg12[%c0_6, %c0_7], %9 {strides = array<i32>} : memref<8x32xf32, #tpu.memory_space<vmem>>, vector<8x32xf32>,
    %c0_8 = arith.constant 0 : index
    %c0_9 = arith.constant 0 : index
    %11 = vector.load %arg13[%c0_8, %c0_9] : memref<8x32xf32, #tpu.memory_space<vmem>>, vector<8x32xf32>
    %c0_10 = arith.constant 0 : index
    %c0_11 = arith.constant 0 : index
    %12 = vector.load %arg4[%c0_10, %c0_11] : memref<32x32xf32, #tpu.memory_space<vmem>>, vector<32x32xf32>
    %13 = arith.truncf %12 : vector<32x32xf32> to vector<32x32xbf16>
    %cst_12 = arith.constant dense<0.000000e+00> : vector<8x32xf32>
    %14 = tpu.matmul %4, %13, %cst_12 {dimension_numbers = #tpu.dot_dimension_numbers<[1], [0], [0], [1], [0, 0, 1, 1], [], []>} : vector<8x32xbf16>, vector<32x32xbf16>, vector<8x32xf32> -> vector<8x32xf32>
    %15 = arith.addf %11, %14 : vector<8x32xf32>
    %c0_13 = arith.constant 0 : index
    %c0_14 = arith.constant 0 : index
    %16 = vector.load %arg13[%c0_13, %c0_14] : memref<8x32xf32, #tpu.memory_space<vmem>>, vector<8x32xf32>
    tpu.vector_store %arg13[%c0_13, %c0_14], %15 {strides = array<i32>} : memref<8x32xf32, #tpu.memory_space<vmem>>, vector<8x32xf32>,
    %c0_15 = arith.constant 0 : index
    %c0_16 = arith.constant 0 : index
    %17 = vector.load %arg14[%c0_15, %c0_16] : memref<8x32xf32, #tpu.memory_space<vmem>>, vector<8x32xf32>
    %c0_17 = arith.constant 0 : index
    %c0_18 = arith.constant 0 : index
    %18 = vector.load %arg5[%c0_17, %c0_18] : memref<32x32xf32, #tpu.memory_space<vmem>>, vector<32x32xf32>
    %19 = arith.truncf %18 : vector<32x32xf32> to vector<32x32xbf16>
    %cst_19 = arith.constant dense<0.000000e+00> : vector<8x32xf32>
    %20 = tpu.matmul %4, %19, %cst_19 {dimension_numbers = #tpu.dot_dimension_numbers<[1], [0], [0], [1], [0, 0, 1, 1], [], []>} : vector<8x32xbf16>, vector<32x32xbf16>, vector<8x32xf32> -> vector<8x32xf32>
    %21 = arith.addf %17, %20 : vector<8x32xf32>
    %c0_20 = arith.constant 0 : index
    %c0_21 = arith.constant 0 : index
    %22 = vector.load %arg14[%c0_20, %c0_21] : memref<8x32xf32, #tpu.memory_space<vmem>>, vector<8x32xf32>
    tpu.vector_store %arg14[%c0_20, %c0_21], %21 {strides = array<i32>} : memref<8x32xf32, #tpu.memory_space<vmem>>, vector<8x32xf32>,
    %c0_i32_22 = arith.constant 0 : i32
    %23 = arith.cmpi eq, %arg1, %c0_i32_22 : i32
    %24 = arith.extui %23 : i1 to i32
    %c0_i32_23 = arith.constant 0 : i32
    %25 = arith.cmpi ne, %24, %c0_i32_23 : i32
    scf.if %25 {
      %c0_24 = arith.constant 0 : index
      %c0_25 = arith.constant 0 : index
      %26 = vector.load %arg12[%c0_24, %c0_25] : memref<8x32xf32, #tpu.memory_space<vmem>>, vector<8x32xf32>
      %c0_26 = arith.constant 0 : index
      %c0_27 = arith.constant 0 : index
      %27 = vector.load %arg6[%c0_26, %c0_27] : memref<1x32xf32, #tpu.memory_space<vmem>>, vector<1x32xf32>
      %28 = vector.broadcast %27 : vector<1x32xf32> to vector<8x32xf32>
      %29 = arith.addf %26, %28 : vector<8x32xf32>
      %c0_28 = arith.constant 0 : index
      %c0_29 = arith.constant 0 : index
      %30 = vector.load %arg9[%c0_28, %c0_29] : memref<8x32xf32, #tpu.memory_space<vmem>>, vector<8x32xf32>
      tpu.vector_store %arg9[%c0_28, %c0_29], %29 {strides = array<i32>} : memref<8x32xf32, #tpu.memory_space<vmem>>, vector<8x32xf32>,
      %c0_30 = arith.constant 0 : index
      %c0_31 = arith.constant 0 : index
      %31 = vector.load %arg13[%c0_30, %c0_31] : memref<8x32xf32, #tpu.memory_space<vmem>>, vector<8x32xf32>
      %c0_32 = arith.constant 0 : index
      %c0_33 = arith.constant 0 : index
      %32 = vector.load %arg7[%c0_32, %c0_33] : memref<1x32xf32, #tpu.memory_space<vmem>>, vector<1x32xf32>
      %33 = vector.broadcast %32 : vector<1x32xf32> to vector<8x32xf32>
      %34 = arith.addf %31, %33 : vector<8x32xf32>
      %c0_34 = arith.constant 0 : index
      %c0_35 = arith.constant 0 : index
      %35 = vector.load %arg10[%c0_34, %c0_35] : memref<8x32xf32, #tpu.memory_space<vmem>>, vector<8x32xf32>
      tpu.vector_store %arg10[%c0_34, %c0_35], %34 {strides = array<i32>} : memref<8x32xf32, #tpu.memory_space<vmem>>, vector<8x32xf32>,
      %c0_36 = arith.constant 0 : index
      %c0_37 = arith.constant 0 : index
      %36 = vector.load %arg14[%c0_36, %c0_37] : memref<8x32xf32, #tpu.memory_space<vmem>>, vector<8x32xf32>
      %c0_38 = arith.constant 0 : index
      %c0_39 = arith.constant 0 : index
      %37 = vector.load %arg8[%c0_38, %c0_39] : memref<1x32xf32, #tpu.memory_space<vmem>>, vector<1x32xf32>
      %38 = vector.broadcast %37 : vector<1x32xf32> to vector<8x32xf32>
      %39 = arith.addf %36, %38 : vector<8x32xf32>
      %c0_40 = arith.constant 0 : index
      %c0_41 = arith.constant 0 : index
      %40 = vector.load %arg11[%c0_40, %c0_41] : memref<8x32xf32, #tpu.memory_space<vmem>>, vector<8x32xf32>
      tpu.vector_store %arg11[%c0_40, %c0_41], %39 {strides = array<i32>} : memref<8x32xf32, #tpu.memory_space<vmem>>, vector<8x32xf32>,
    } else {
    }
    return
  }
  func.func @transform_0(%arg0: i32, %arg1: i32) -> (i32, i32) {
    %c0_i32 = arith.constant 0 : i32
    return %arg0, %arg1 : i32, i32
  }
  func.func @transform_1(%arg0: i32, %arg1: i32) -> (i32, i32) {
    %c0_i32 = arith.constant 0 : i32
    %c0_i32_0 = arith.constant 0 : i32
    return %arg1, %c0_i32 : i32, i32
  }
  func.func @transform_2(%arg0: i32, %arg1: i32) -> (i32, i32) {
    %c0_i32 = arith.constant 0 : i32
    %c0_i32_0 = arith.constant 0 : i32
    return %arg1, %c0_i32 : i32, i32
  }
  func.func @transform_3(%arg0: i32, %arg1: i32) -> (i32, i32) {
    %c0_i32 = arith.constant 0 : i32
    %c0_i32_0 = arith.constant 0 : i32
    return %arg1, %c0_i32 : i32, i32
  }
  func.func @transform_4(%arg0: i32, %arg1: i32) -> (i32, i32) {
    %c0_i32 = arith.constant 0 : i32
    %c0_i32_0 = arith.constant 0 : i32
    %c0_i32_1 = arith.constant 0 : i32
    return %c0_i32, %c0_i32_0 : i32, i32
  }
  func.func @transform_5(%arg0: i32, %arg1: i32) -> (i32, i32) {
    %c0_i32 = arith.constant 0 : i32
    %c0_i32_0 = arith.constant 0 : i32
    %c0_i32_1 = arith.constant 0 : i32
    return %c0_i32, %c0_i32_0 : i32, i32
  }
  func.func @transform_6(%arg0: i32, %arg1: i32) -> (i32, i32) {
    %c0_i32 = arith.constant 0 : i32
    %c0_i32_0 = arith.constant 0 : i32
    %c0_i32_1 = arith.constant 0 : i32
    return %c0_i32, %c0_i32_0 : i32, i32
  }
  func.func @transform_7(%arg0: i32, %arg1: i32) -> (i32, i32) {
    %c0_i32 = arith.constant 0 : i32
    %c0_i32_0 = arith.constant 0 : i32
    return %arg0, %c0_i32 : i32, i32
  }
  func.func @transform_8(%arg0: i32, %arg1: i32) -> (i32, i32) {
    %c0_i32 = arith.constant 0 : i32
    %c0_i32_0 = arith.constant 0 : i32
    return %arg0, %c0_i32 : i32, i32
  }
  func.func @transform_9(%arg0: i32, %arg1: i32) -> (i32, i32) {
    %c0_i32 = arith.constant 0 : i32
    %c0_i32_0 = arith.constant 0 : i32
    return %arg0, %c0_i32 : i32, i32
  }
}

module attributes {stable_mosaic.version = 11 : i64} {
  func.func @kernel(%arg0: i32, %arg1: i32, %arg2: memref<8x32xf32, #tpu.memory_space<vmem>>, %arg3: memref<32x64xf32, #tpu.memory_space<vmem>>, %arg4: memref<1x64xf32, #tpu.memory_space<vmem>>, %arg5: memref<64x32xf32, #tpu.memory_space<vmem>>, %arg6: memref<1x32xf32, #tpu.memory_space<vmem>>, %arg7: memref<1x32xf32, #tpu.memory_space<vmem>>, %arg8: memref<1x32xf32, #tpu.memory_space<vmem>>, %arg9: memref<8x32xf32, #tpu.memory_space<vmem>>, %arg10: memref<8x32xf32, #tpu.memory_space<vmem>>) attributes {dimension_semantics = [#tpu.dimension_semantics<parallel>, #tpu.dimension_semantics<arbitrary>], iteration_bounds = array<i64: 2, 1>, scalar_prefetch = 0 : i64, scratch_operands = 1 : i64, tpu.core_type = #tpu.core_type<tc>, window_params = [{transform_indices = @transform_0, window_bounds = array<i64: 8, 32>}, {transform_indices = @transform_1, window_bounds = array<i64: 32, 64>}, {transform_indices = @transform_2, window_bounds = array<i64: 1, 64>}, {transform_indices = @transform_3, window_bounds = array<i64: 64, 32>}, {pipeline_mode = #tpu.pipeline_mode<synchronous>, transform_indices = @transform_4, window_bounds = array<i64: 1, 32>}, {pipeline_mode = #tpu.pipeline_mode<synchronous>, transform_indices = @transform_5, window_bounds = array<i64: 1, 32>}, {pipeline_mode = #tpu.pipeline_mode<synchronous>, transform_indices = @transform_6, window_bounds = array<i64: 1, 32>}, {transform_indices = @transform_7, window_bounds = array<i64: 8, 32>}]} {
    %c0_i32 = arith.constant 0 : i32
    %0 = arith.cmpi eq, %arg1, %c0_i32 : i32
    %1 = arith.extui %0 : i1 to i32
    %c0_i32_0 = arith.constant 0 : i32
    %2 = arith.cmpi ne, %1, %c0_i32_0 : i32
    scf.if %2 {
      %cst_16 = arith.constant 0.000000e+00 : f32
      %23 = vector.broadcast %cst_16 : f32 to vector<8x32xf32>
      %c0_17 = arith.constant 0 : index
      %c0_18 = arith.constant 0 : index
      %24 = vector.load %arg10[%c0_17, %c0_18] : memref<8x32xf32, #tpu.memory_space<vmem>>, vector<8x32xf32>
      tpu.vector_store %arg10[%c0_17, %c0_18], %23 {strides = array<i32>} : memref<8x32xf32, #tpu.memory_space<vmem>>, vector<8x32xf32>,
    } else {
    }
    %c0 = arith.constant 0 : index
    %c0_1 = arith.constant 0 : index
    %3 = vector.load %arg2[%c0, %c0_1] : memref<8x32xf32, #tpu.memory_space<vmem>>, vector<8x32xf32>
    %4 = arith.truncf %3 : vector<8x32xf32> to vector<8x32xbf16>
    %c0_2 = arith.constant 0 : index
    %c0_3 = arith.constant 0 : index
    %5 = vector.load %arg3[%c0_2, %c0_3] : memref<32x64xf32, #tpu.memory_space<vmem>>, vector<32x64xf32>
    %6 = arith.truncf %5 : vector<32x64xf32> to vector<32x64xbf16>
    %cst = arith.constant dense<0.000000e+00> : vector<8x64xf32>
    %7 = tpu.matmul %4, %6, %cst {dimension_numbers = #tpu.dot_dimension_numbers<[1], [0], [0], [1], [0, 0, 1, 1], [], []>} : vector<8x32xbf16>, vector<32x64xbf16>, vector<8x64xf32> -> vector<8x64xf32>
    %c0_4 = arith.constant 0 : index
    %c0_5 = arith.constant 0 : index
    %8 = vector.load %arg4[%c0_4, %c0_5] : memref<1x64xf32, #tpu.memory_space<vmem>>, vector<1x64xf32>
    %9 = vector.broadcast %8 : vector<1x64xf32> to vector<8x64xf32>
    %10 = arith.addf %7, %9 : vector<8x64xf32>
    %cst_6 = arith.constant 0.000000e+00 : f32
    %11 = vector.broadcast %cst_6 : f32 to vector<8x64xf32>
    %12 = arith.maximumf %10, %11 : vector<8x64xf32>
    %c0_7 = arith.constant 0 : index
    %c0_8 = arith.constant 0 : index
    %13 = vector.load %arg10[%c0_7, %c0_8] : memref<8x32xf32, #tpu.memory_space<vmem>>, vector<8x32xf32>
    %14 = arith.truncf %12 : vector<8x64xf32> to vector<8x64xbf16>
    %c0_9 = arith.constant 0 : index
    %c0_10 = arith.constant 0 : index
    %15 = vector.load %arg5[%c0_9, %c0_10] : memref<64x32xf32, #tpu.memory_space<vmem>>, vector<64x32xf32>
    %16 = arith.truncf %15 : vector<64x32xf32> to vector<64x32xbf16>
    %cst_11 = arith.constant dense<0.000000e+00> : vector<8x32xf32>
    %17 = tpu.matmul %14, %16, %cst_11 {dimension_numbers = #tpu.dot_dimension_numbers<[1], [0], [0], [1], [0, 0, 1, 1], [], []>} : vector<8x64xbf16>, vector<64x32xbf16>, vector<8x32xf32> -> vector<8x32xf32>
    %18 = arith.addf %13, %17 : vector<8x32xf32>
    %c0_12 = arith.constant 0 : index
    %c0_13 = arith.constant 0 : index
    %19 = vector.load %arg10[%c0_12, %c0_13] : memref<8x32xf32, #tpu.memory_space<vmem>>, vector<8x32xf32>
    tpu.vector_store %arg10[%c0_12, %c0_13], %18 {strides = array<i32>} : memref<8x32xf32, #tpu.memory_space<vmem>>, vector<8x32xf32>,
    %c0_i32_14 = arith.constant 0 : i32
    %20 = arith.cmpi eq, %arg1, %c0_i32_14 : i32
    %21 = arith.extui %20 : i1 to i32
    %c0_i32_15 = arith.constant 0 : i32
    %22 = arith.cmpi ne, %21, %c0_i32_15 : i32
    scf.if %22 {
      %c0_16 = arith.constant 0 : index
      %c0_17 = arith.constant 0 : index
      %23 = vector.load %arg10[%c0_16, %c0_17] : memref<8x32xf32, #tpu.memory_space<vmem>>, vector<8x32xf32>
      %c0_18 = arith.constant 0 : index
      %c0_19 = arith.constant 0 : index
      %24 = vector.load %arg6[%c0_18, %c0_19] : memref<1x32xf32, #tpu.memory_space<vmem>>, vector<1x32xf32>
      %25 = vector.broadcast %24 : vector<1x32xf32> to vector<8x32xf32>
      %26 = arith.addf %23, %25 : vector<8x32xf32>
      %c0_20 = arith.constant 0 : index
      %c0_21 = arith.constant 0 : index
      %27 = vector.load %arg2[%c0_20, %c0_21] : memref<8x32xf32, #tpu.memory_space<vmem>>, vector<8x32xf32>
      %28 = arith.addf %26, %27 : vector<8x32xf32>
      %cst_22 = arith.constant dense<0.000000e+00> : vector<8xf32>
      %29 = vector.multi_reduction <add>, %28, %cst_22 [1] : vector<8x32xf32> to vector<8xf32>
      %30 = vector.shape_cast %29 : vector<8xf32> to vector<8x1xf32>
      %cst_23 = arith.constant 3.200000e+01 : f32
      %31 = vector.broadcast %cst_23 : f32 to vector<8x1xf32>
      %32 = arith.divf %30, %31 : vector<8x1xf32>
      %33 = vector.broadcast %32 : vector<8x1xf32> to vector<8x32xf32>
      %34 = arith.subf %28, %33 : vector<8x32xf32>
      %35 = arith.mulf %34, %34 : vector<8x32xf32>
      %cst_24 = arith.constant dense<0.000000e+00> : vector<8xf32>
      %36 = vector.multi_reduction <add>, %35, %cst_24 [1] : vector<8x32xf32> to vector<8xf32>
      %37 = vector.shape_cast %36 : vector<8xf32> to vector<8x1xf32>
      %cst_25 = arith.constant 3.200000e+01 : f32
      %38 = vector.broadcast %cst_25 : f32 to vector<8x1xf32>
      %39 = arith.divf %37, %38 : vector<8x1xf32>
      %40 = vector.broadcast %32 : vector<8x1xf32> to vector<8x32xf32>
      %41 = arith.subf %28, %40 : vector<8x32xf32>
      %cst_26 = arith.constant 9.99999974E-6 : f32
      %42 = vector.broadcast %cst_26 : f32 to vector<8x1xf32>
      %43 = arith.addf %39, %42 : vector<8x1xf32>
      %44 = math.rsqrt %43 : vector<8x1xf32>
      %45 = vector.broadcast %44 : vector<8x1xf32> to vector<8x32xf32>
      %46 = arith.mulf %41, %45 : vector<8x32xf32>
      %c0_27 = arith.constant 0 : index
      %c0_28 = arith.constant 0 : index
      %47 = vector.load %arg7[%c0_27, %c0_28] : memref<1x32xf32, #tpu.memory_space<vmem>>, vector<1x32xf32>
      %48 = vector.broadcast %47 : vector<1x32xf32> to vector<8x32xf32>
      %49 = arith.mulf %46, %48 : vector<8x32xf32>
      %c0_29 = arith.constant 0 : index
      %c0_30 = arith.constant 0 : index
      %50 = vector.load %arg8[%c0_29, %c0_30] : memref<1x32xf32, #tpu.memory_space<vmem>>, vector<1x32xf32>
      %51 = vector.broadcast %50 : vector<1x32xf32> to vector<8x32xf32>
      %52 = arith.addf %49, %51 : vector<8x32xf32>
      %c0_31 = arith.constant 0 : index
      %c0_32 = arith.constant 0 : index
      %53 = vector.load %arg9[%c0_31, %c0_32] : memref<8x32xf32, #tpu.memory_space<vmem>>, vector<8x32xf32>
      tpu.vector_store %arg9[%c0_31, %c0_32], %52 {strides = array<i32>} : memref<8x32xf32, #tpu.memory_space<vmem>>, vector<8x32xf32>,
    } else {
    }
    return
  }
  func.func @transform_0(%arg0: i32, %arg1: i32) -> (i32, i32) {
    %c0_i32 = arith.constant 0 : i32
    %c0_i32_0 = arith.constant 0 : i32
    return %arg0, %c0_i32 : i32, i32
  }
  func.func @transform_1(%arg0: i32, %arg1: i32) -> (i32, i32) {
    %c0_i32 = arith.constant 0 : i32
    %c0_i32_0 = arith.constant 0 : i32
    return %c0_i32, %arg1 : i32, i32
  }
  func.func @transform_2(%arg0: i32, %arg1: i32) -> (i32, i32) {
    %c0_i32 = arith.constant 0 : i32
    %c0_i32_0 = arith.constant 0 : i32
    return %c0_i32, %arg1 : i32, i32
  }
  func.func @transform_3(%arg0: i32, %arg1: i32) -> (i32, i32) {
    %c0_i32 = arith.constant 0 : i32
    %c0_i32_0 = arith.constant 0 : i32
    return %arg1, %c0_i32 : i32, i32
  }
  func.func @transform_4(%arg0: i32, %arg1: i32) -> (i32, i32) {
    %c0_i32 = arith.constant 0 : i32
    %c0_i32_0 = arith.constant 0 : i32
    %c0_i32_1 = arith.constant 0 : i32
    return %c0_i32, %c0_i32_0 : i32, i32
  }
  func.func @transform_5(%arg0: i32, %arg1: i32) -> (i32, i32) {
    %c0_i32 = arith.constant 0 : i32
    %c0_i32_0 = arith.constant 0 : i32
    %c0_i32_1 = arith.constant 0 : i32
    return %c0_i32, %c0_i32_0 : i32, i32
  }
  func.func @transform_6(%arg0: i32, %arg1: i32) -> (i32, i32) {
    %c0_i32 = arith.constant 0 : i32
    %c0_i32_0 = arith.constant 0 : i32
    %c0_i32_1 = arith.constant 0 : i32
    return %c0_i32, %c0_i32_0 : i32, i32
  }
  func.func @transform_7(%arg0: i32, %arg1: i32) -> (i32, i32) {
    %c0_i32 = arith.constant 0 : i32
    %c0_i32_0 = arith.constant 0 : i32
    return %arg0, %c0_i32 : i32, i32
  }
}

module attributes {stable_mosaic.version = 11 : i64} {
  func.func @kernel(%arg0: i32, %arg1: i32, %arg2: memref<1x8x32xf32, #tpu.memory_space<vmem>>, %arg3: memref<1x16x32xf32, #tpu.memory_space<vmem>>, %arg4: memref<1x16x32xf32, #tpu.memory_space<vmem>>, %arg5: memref<1x1x16xi32, #tpu.memory_space<vmem>>, %arg6: memref<32x32xf32, #tpu.memory_space<vmem>>, %arg7: memref<1x32xf32, #tpu.memory_space<vmem>>, %arg8: memref<1x8x32xf32, #tpu.memory_space<vmem>>, %arg9: memref<1x32xf32, #tpu.memory_space<vmem>>, %arg10: memref<1x32xf32, #tpu.memory_space<vmem>>, %arg11: memref<1x8x32xf32, #tpu.memory_space<vmem>>) attributes {dimension_semantics = [#tpu.dimension_semantics<parallel>, #tpu.dimension_semantics<parallel>], iteration_bounds = array<i64: 2, 1>, scalar_prefetch = 0 : i64, scratch_operands = 0 : i64, tpu.core_type = #tpu.core_type<tc>, window_params = [{transform_indices = @transform_0, window_bounds = array<i64: 1, 8, 32>}, {transform_indices = @transform_1, window_bounds = array<i64: 1, 16, 32>}, {transform_indices = @transform_2, window_bounds = array<i64: 1, 16, 32>}, {transform_indices = @transform_3, window_bounds = array<i64: 1, 1, 16>}, {pipeline_mode = #tpu.pipeline_mode<synchronous>, transform_indices = @transform_4, window_bounds = array<i64: 32, 32>}, {pipeline_mode = #tpu.pipeline_mode<synchronous>, transform_indices = @transform_5, window_bounds = array<i64: 1, 32>}, {transform_indices = @transform_6, window_bounds = array<i64: 1, 8, 32>}, {pipeline_mode = #tpu.pipeline_mode<synchronous>, transform_indices = @transform_7, window_bounds = array<i64: 1, 32>}, {pipeline_mode = #tpu.pipeline_mode<synchronous>, transform_indices = @transform_8, window_bounds = array<i64: 1, 32>}, {transform_indices = @transform_9, window_bounds = array<i64: 1, 8, 32>}]} {
    %c0 = arith.constant 0 : index
    %c0_0 = arith.constant 0 : index
    %c0_1 = arith.constant 0 : index
    %0 = vector.load %arg2[%c0, %c0_0, %c0_1] : memref<1x8x32xf32, #tpu.memory_space<vmem>>, vector<1x8x32xf32>
    %1 = vector.shape_cast %0 : vector<1x8x32xf32> to vector<8x32xf32>
    %cst = arith.constant 0.353553385 : f32
    %2 = vector.broadcast %cst : f32 to vector<8x32xf32>
    %3 = arith.mulf %1, %2 : vector<8x32xf32>
    %c0_2 = arith.constant 0 : index
    %c0_3 = arith.constant 0 : index
    %c0_4 = arith.constant 0 : index
    %4 = vector.load %arg3[%c0_2, %c0_3, %c0_4] : memref<1x16x32xf32, #tpu.memory_space<vmem>>, vector<1x16x32xf32>
    %5 = vector.shape_cast %4 : vector<1x16x32xf32> to vector<16x32xf32>
    %c0_5 = arith.constant 0 : index
    %c0_6 = arith.constant 0 : index
    %c0_7 = arith.constant 0 : index
    %6 = vector.load %arg4[%c0_5, %c0_6, %c0_7] : memref<1x16x32xf32, #tpu.memory_space<vmem>>, vector<1x16x32xf32>
    %7 = vector.shape_cast %6 : vector<1x16x32xf32> to vector<16x32xf32>
    %c0_8 = arith.constant 0 : index
    %c0_9 = arith.constant 0 : index
    %8 = vector.load %arg6[%c0_8, %c0_9] : memref<32x32xf32, #tpu.memory_space<vmem>>, vector<32x32xf32>
    %c0_10 = arith.constant 0 : index
    %c0_11 = arith.constant 0 : index
    %c0_12 = arith.constant 0 : index
    %9 = vector.load %arg5[%c0_10, %c0_11, %c0_12] : memref<1x1x16xi32, #tpu.memory_space<vmem>>, vector<1x1x16xi32>
    %10 = vector.shape_cast %9 : vector<1x1x16xi32> to vector<1x16xi32>
    %11 = vector.extract_strided_slice %3 {offsets = [0, 0], sizes = [8, 8], strides = [1, 1]} : vector<8x32xf32> to vector<8x8xf32>
    %12 = arith.truncf %11 : vector<8x8xf32> to vector<8x8xbf16>
    %13 = vector.extract_strided_slice %5 {offsets = [0, 0], sizes = [16, 8], strides = [1, 1]} : vector<16x32xf32> to vector<16x8xf32>
    %14 = arith.truncf %13 : vector<16x8xf32> to vector<16x8xbf16>
    %15 = vector.extract_strided_slice %7 {offsets = [0, 0], sizes = [16, 8], strides = [1, 1]} : vector<16x32xf32> to vector<16x8xf32>
    %16 = arith.truncf %15 : vector<16x8xf32> to vector<16x8xbf16>
    %cst_13 = arith.constant dense<0.000000e+00> : vector<8x16xf32>
    %17 = tpu.matmul %12, %14, %cst_13 {dimension_numbers = #tpu.dot_dimension_numbers<[1], [1], [0], [0], [0, 0, 1, 0], [], []>} : vector<8x8xbf16>, vector<16x8xbf16>, vector<8x16xf32> -> vector<8x16xf32>
    %c0_i32 = arith.constant 0 : i32
    %18 = vector.broadcast %c0_i32 : i32 to vector<1x16xi32>
    %19 = arith.cmpi eq, %10, %18 : vector<1x16xi32>
    %cst_14 = arith.constant -1.000000e+30 : f32
    %20 = vector.shape_cast %19 : vector<1x16xi1> to vector<1x16xi1>
    %21 = vector.broadcast %20 : vector<1x16xi1> to vector<8x16xi1>
    %22 = vector.broadcast %cst_14 : f32 to vector<8x16xf32>
    %23 = arith.select %21, %22, %17 : vector<8x16xi1>, vector<8x16xf32>
    %cst_15 = arith.constant dense<0xFF800000> : vector<8xf32>
    %24 = vector.multi_reduction <maximumf>, %23, %cst_15 [1] : vector<8x16xf32> to vector<8xf32>
    %25 = vector.shape_cast %24 : vector<8xf32> to vector<8x1xf32>
    %26 = vector.broadcast %25 : vector<8x1xf32> to vector<8x16xf32>
    %27 = arith.subf %23, %26 : vector<8x16xf32>
    %28 = math.exp %27 : vector<8x16xf32>
    %cst_16 = arith.constant dense<0.000000e+00> : vector<8xf32>
    %29 = vector.multi_reduction <add>, %28, %cst_16 [1] : vector<8x16xf32> to vector<8xf32>
    %30 = vector.shape_cast %29 : vector<8xf32> to vector<8x1xf32>
    %31 = tpu.reciprocal %30 {approx = true} : vector<8x1xf32> -> vector<8x1xf32>
    %32 = arith.mulf %30, %31 : vector<8x1xf32>
    %cst_17 = arith.constant 2.000000e+00 : f32
    %33 = vector.broadcast %cst_17 : f32 to vector<8x1xf32>
    %34 = arith.subf %33, %32 : vector<8x1xf32>
    %35 = arith.mulf %31, %34 : vector<8x1xf32>
    %36 = vector.broadcast %35 : vector<8x1xf32> to vector<8x16xf32>
    %37 = arith.mulf %28, %36 : vector<8x16xf32>
    %38 = arith.truncf %37 : vector<8x16xf32> to vector<8x16xbf16>
    %cst_18 = arith.constant dense<0.000000e+00> : vector<8x8xf32>
    %39 = tpu.matmul %38, %16, %cst_18 {dimension_numbers = #tpu.dot_dimension_numbers<[1], [0], [0], [1], [0, 0, 1, 1], [], []>} : vector<8x16xbf16>, vector<16x8xbf16>, vector<8x8xf32> -> vector<8x8xf32>
    %40 = arith.truncf %39 : vector<8x8xf32> to vector<8x8xbf16>
    %41 = vector.extract_strided_slice %8 {offsets = [0, 0], sizes = [8, 32], strides = [1, 1]} : vector<32x32xf32> to vector<8x32xf32>
    %42 = arith.truncf %41 : vector<8x32xf32> to vector<8x32xbf16>
    %cst_19 = arith.constant dense<0.000000e+00> : vector<8x32xf32>
    %43 = tpu.matmul %40, %42, %cst_19 {dimension_numbers = #tpu.dot_dimension_numbers<[1], [0], [0], [1], [0, 0, 1, 1], [], []>} : vector<8x8xbf16>, vector<8x32xbf16>, vector<8x32xf32> -> vector<8x32xf32>
    %44 = vector.extract_strided_slice %3 {offsets = [0, 8], sizes = [8, 8], strides = [1, 1]} : vector<8x32xf32> to vector<8x8xf32>
    %45 = arith.truncf %44 : vector<8x8xf32> to vector<8x8xbf16>
    %46 = vector.extract_strided_slice %5 {offsets = [0, 8], sizes = [16, 8], strides = [1, 1]} : vector<16x32xf32> to vector<16x8xf32>
    %47 = arith.truncf %46 : vector<16x8xf32> to vector<16x8xbf16>
    %48 = vector.extract_strided_slice %7 {offsets = [0, 8], sizes = [16, 8], strides = [1, 1]} : vector<16x32xf32> to vector<16x8xf32>
    %49 = arith.truncf %48 : vector<16x8xf32> to vector<16x8xbf16>
    %cst_20 = arith.constant dense<0.000000e+00> : vector<8x16xf32>
    %50 = tpu.matmul %45, %47, %cst_20 {dimension_numbers = #tpu.dot_dimension_numbers<[1], [1], [0], [0], [0, 0, 1, 0], [], []>} : vector<8x8xbf16>, vector<16x8xbf16>, vector<8x16xf32> -> vector<8x16xf32>
    %c0_i32_21 = arith.constant 0 : i32
    %51 = vector.broadcast %c0_i32_21 : i32 to vector<1x16xi32>
    %52 = arith.cmpi eq, %10, %51 : vector<1x16xi32>
    %cst_22 = arith.constant -1.000000e+30 : f32
    %53 = vector.shape_cast %52 : vector<1x16xi1> to vector<1x16xi1>
    %54 = vector.broadcast %53 : vector<1x16xi1> to vector<8x16xi1>
    %55 = vector.broadcast %cst_22 : f32 to vector<8x16xf32>
    %56 = arith.select %54, %55, %50 : vector<8x16xi1>, vector<8x16xf32>
    %cst_23 = arith.constant dense<0xFF800000> : vector<8xf32>
    %57 = vector.multi_reduction <maximumf>, %56, %cst_23 [1] : vector<8x16xf32> to vector<8xf32>
    %58 = vector.shape_cast %57 : vector<8xf32> to vector<8x1xf32>
    %59 = vector.broadcast %58 : vector<8x1xf32> to vector<8x16xf32>
    %60 = arith.subf %56, %59 : vector<8x16xf32>
    %61 = math.exp %60 : vector<8x16xf32>
    %cst_24 = arith.constant dense<0.000000e+00> : vector<8xf32>
    %62 = vector.multi_reduction <add>, %61, %cst_24 [1] : vector<8x16xf32> to vector<8xf32>
    %63 = vector.shape_cast %62 : vector<8xf32> to vector<8x1xf32>
    %64 = tpu.reciprocal %63 {approx = true} : vector<8x1xf32> -> vector<8x1xf32>
    %65 = arith.mulf %63, %64 : vector<8x1xf32>
    %cst_25 = arith.constant 2.000000e+00 : f32
    %66 = vector.broadcast %cst_25 : f32 to vector<8x1xf32>
    %67 = arith.subf %66, %65 : vector<8x1xf32>
    %68 = arith.mulf %64, %67 : vector<8x1xf32>
    %69 = vector.broadcast %68 : vector<8x1xf32> to vector<8x16xf32>
    %70 = arith.mulf %61, %69 : vector<8x16xf32>
    %71 = arith.truncf %70 : vector<8x16xf32> to vector<8x16xbf16>
    %cst_26 = arith.constant dense<0.000000e+00> : vector<8x8xf32>
    %72 = tpu.matmul %71, %49, %cst_26 {dimension_numbers = #tpu.dot_dimension_numbers<[1], [0], [0], [1], [0, 0, 1, 1], [], []>} : vector<8x16xbf16>, vector<16x8xbf16>, vector<8x8xf32> -> vector<8x8xf32>
    %73 = arith.truncf %72 : vector<8x8xf32> to vector<8x8xbf16>
    %74 = vector.extract_strided_slice %8 {offsets = [8, 0], sizes = [8, 32], strides = [1, 1]} : vector<32x32xf32> to vector<8x32xf32>
    %75 = arith.truncf %74 : vector<8x32xf32> to vector<8x32xbf16>
    %cst_27 = arith.constant dense<0.000000e+00> : vector<8x32xf32>
    %76 = tpu.matmul %73, %75, %cst_27 {dimension_numbers = #tpu.dot_dimension_numbers<[1], [0], [0], [1], [0, 0, 1, 1], [], []>} : vector<8x8xbf16>, vector<8x32xbf16>, vector<8x32xf32> -> vector<8x32xf32>
    %77 = arith.addf %43, %76 : vector<8x32xf32>
    %78 = vector.extract_strided_slice %3 {offsets = [0, 16], sizes = [8, 8], strides = [1, 1]} : vector<8x32xf32> to vector<8x8xf32>
    %79 = arith.truncf %78 : vector<8x8xf32> to vector<8x8xbf16>
    %80 = vector.extract_strided_slice %5 {offsets = [0, 16], sizes = [16, 8], strides = [1, 1]} : vector<16x32xf32> to vector<16x8xf32>
    %81 = arith.truncf %80 : vector<16x8xf32> to vector<16x8xbf16>
    %82 = vector.extract_strided_slice %7 {offsets = [0, 16], sizes = [16, 8], strides = [1, 1]} : vector<16x32xf32> to vector<16x8xf32>
    %83 = arith.truncf %82 : vector<16x8xf32> to vector<16x8xbf16>
    %cst_28 = arith.constant dense<0.000000e+00> : vector<8x16xf32>
    %84 = tpu.matmul %79, %81, %cst_28 {dimension_numbers = #tpu.dot_dimension_numbers<[1], [1], [0], [0], [0, 0, 1, 0], [], []>} : vector<8x8xbf16>, vector<16x8xbf16>, vector<8x16xf32> -> vector<8x16xf32>
    %c0_i32_29 = arith.constant 0 : i32
    %85 = vector.broadcast %c0_i32_29 : i32 to vector<1x16xi32>
    %86 = arith.cmpi eq, %10, %85 : vector<1x16xi32>
    %cst_30 = arith.constant -1.000000e+30 : f32
    %87 = vector.shape_cast %86 : vector<1x16xi1> to vector<1x16xi1>
    %88 = vector.broadcast %87 : vector<1x16xi1> to vector<8x16xi1>
    %89 = vector.broadcast %cst_30 : f32 to vector<8x16xf32>
    %90 = arith.select %88, %89, %84 : vector<8x16xi1>, vector<8x16xf32>
    %cst_31 = arith.constant dense<0xFF800000> : vector<8xf32>
    %91 = vector.multi_reduction <maximumf>, %90, %cst_31 [1] : vector<8x16xf32> to vector<8xf32>
    %92 = vector.shape_cast %91 : vector<8xf32> to vector<8x1xf32>
    %93 = vector.broadcast %92 : vector<8x1xf32> to vector<8x16xf32>
    %94 = arith.subf %90, %93 : vector<8x16xf32>
    %95 = math.exp %94 : vector<8x16xf32>
    %cst_32 = arith.constant dense<0.000000e+00> : vector<8xf32>
    %96 = vector.multi_reduction <add>, %95, %cst_32 [1] : vector<8x16xf32> to vector<8xf32>
    %97 = vector.shape_cast %96 : vector<8xf32> to vector<8x1xf32>
    %98 = tpu.reciprocal %97 {approx = true} : vector<8x1xf32> -> vector<8x1xf32>
    %99 = arith.mulf %97, %98 : vector<8x1xf32>
    %cst_33 = arith.constant 2.000000e+00 : f32
    %100 = vector.broadcast %cst_33 : f32 to vector<8x1xf32>
    %101 = arith.subf %100, %99 : vector<8x1xf32>
    %102 = arith.mulf %98, %101 : vector<8x1xf32>
    %103 = vector.broadcast %102 : vector<8x1xf32> to vector<8x16xf32>
    %104 = arith.mulf %95, %103 : vector<8x16xf32>
    %105 = arith.truncf %104 : vector<8x16xf32> to vector<8x16xbf16>
    %cst_34 = arith.constant dense<0.000000e+00> : vector<8x8xf32>
    %106 = tpu.matmul %105, %83, %cst_34 {dimension_numbers = #tpu.dot_dimension_numbers<[1], [0], [0], [1], [0, 0, 1, 1], [], []>} : vector<8x16xbf16>, vector<16x8xbf16>, vector<8x8xf32> -> vector<8x8xf32>
    %107 = arith.truncf %106 : vector<8x8xf32> to vector<8x8xbf16>
    %108 = vector.extract_strided_slice %8 {offsets = [16, 0], sizes = [8, 32], strides = [1, 1]} : vector<32x32xf32> to vector<8x32xf32>
    %109 = arith.truncf %108 : vector<8x32xf32> to vector<8x32xbf16>
    %cst_35 = arith.constant dense<0.000000e+00> : vector<8x32xf32>
    %110 = tpu.matmul %107, %109, %cst_35 {dimension_numbers = #tpu.dot_dimension_numbers<[1], [0], [0], [1], [0, 0, 1, 1], [], []>} : vector<8x8xbf16>, vector<8x32xbf16>, vector<8x32xf32> -> vector<8x32xf32>
    %111 = arith.addf %77, %110 : vector<8x32xf32>
    %112 = vector.extract_strided_slice %3 {offsets = [0, 24], sizes = [8, 8], strides = [1, 1]} : vector<8x32xf32> to vector<8x8xf32>
    %113 = arith.truncf %112 : vector<8x8xf32> to vector<8x8xbf16>
    %114 = vector.extract_strided_slice %5 {offsets = [0, 24], sizes = [16, 8], strides = [1, 1]} : vector<16x32xf32> to vector<16x8xf32>
    %115 = arith.truncf %114 : vector<16x8xf32> to vector<16x8xbf16>
    %116 = vector.extract_strided_slice %7 {offsets = [0, 24], sizes = [16, 8], strides = [1, 1]} : vector<16x32xf32> to vector<16x8xf32>
    %117 = arith.truncf %116 : vector<16x8xf32> to vector<16x8xbf16>
    %cst_36 = arith.constant dense<0.000000e+00> : vector<8x16xf32>
    %118 = tpu.matmul %113, %115, %cst_36 {dimension_numbers = #tpu.dot_dimension_numbers<[1], [1], [0], [0], [0, 0, 1, 0], [], []>} : vector<8x8xbf16>, vector<16x8xbf16>, vector<8x16xf32> -> vector<8x16xf32>
    %c0_i32_37 = arith.constant 0 : i32
    %119 = vector.broadcast %c0_i32_37 : i32 to vector<1x16xi32>
    %120 = arith.cmpi eq, %10, %119 : vector<1x16xi32>
    %cst_38 = arith.constant -1.000000e+30 : f32
    %121 = vector.shape_cast %120 : vector<1x16xi1> to vector<1x16xi1>
    %122 = vector.broadcast %121 : vector<1x16xi1> to vector<8x16xi1>
    %123 = vector.broadcast %cst_38 : f32 to vector<8x16xf32>
    %124 = arith.select %122, %123, %118 : vector<8x16xi1>, vector<8x16xf32>
    %cst_39 = arith.constant dense<0xFF800000> : vector<8xf32>
    %125 = vector.multi_reduction <maximumf>, %124, %cst_39 [1] : vector<8x16xf32> to vector<8xf32>
    %126 = vector.shape_cast %125 : vector<8xf32> to vector<8x1xf32>
    %127 = vector.broadcast %126 : vector<8x1xf32> to vector<8x16xf32>
    %128 = arith.subf %124, %127 : vector<8x16xf32>
    %129 = math.exp %128 : vector<8x16xf32>
    %cst_40 = arith.constant dense<0.000000e+00> : vector<8xf32>
    %130 = vector.multi_reduction <add>, %129, %cst_40 [1] : vector<8x16xf32> to vector<8xf32>
    %131 = vector.shape_cast %130 : vector<8xf32> to vector<8x1xf32>
    %132 = tpu.reciprocal %131 {approx = true} : vector<8x1xf32> -> vector<8x1xf32>
    %133 = arith.mulf %131, %132 : vector<8x1xf32>
    %cst_41 = arith.constant 2.000000e+00 : f32
    %134 = vector.broadcast %cst_41 : f32 to vector<8x1xf32>
    %135 = arith.subf %134, %133 : vector<8x1xf32>
    %136 = arith.mulf %132, %135 : vector<8x1xf32>
    %137 = vector.broadcast %136 : vector<8x1xf32> to vector<8x16xf32>
    %138 = arith.mulf %129, %137 : vector<8x16xf32>
    %139 = arith.truncf %138 : vector<8x16xf32> to vector<8x16xbf16>
    %cst_42 = arith.constant dense<0.000000e+00> : vector<8x8xf32>
    %140 = tpu.matmul %139, %117, %cst_42 {dimension_numbers = #tpu.dot_dimension_numbers<[1], [0], [0], [1], [0, 0, 1, 1], [], []>} : vector<8x16xbf16>, vector<16x8xbf16>, vector<8x8xf32> -> vector<8x8xf32>
    %141 = arith.truncf %140 : vector<8x8xf32> to vector<8x8xbf16>
    %142 = vector.extract_strided_slice %8 {offsets = [24, 0], sizes = [8, 32], strides = [1, 1]} : vector<32x32xf32> to vector<8x32xf32>
    %143 = arith.truncf %142 : vector<8x32xf32> to vector<8x32xbf16>
    %cst_43 = arith.constant dense<0.000000e+00> : vector<8x32xf32>
    %144 = tpu.matmul %141, %143, %cst_43 {dimension_numbers = #tpu.dot_dimension_numbers<[1], [0], [0], [1], [0, 0, 1, 1], [], []>} : vector<8x8xbf16>, vector<8x32xbf16>, vector<8x32xf32> -> vector<8x32xf32>
    %145 = arith.addf %111, %144 : vector<8x32xf32>
    %c0_44 = arith.constant 0 : index
    %c0_45 = arith.constant 0 : index
    %146 = vector.load %arg7[%c0_44, %c0_45] : memref<1x32xf32, #tpu.memory_space<vmem>>, vector<1x32xf32>
    %147 = vector.broadcast %146 : vector<1x32xf32> to vector<8x32xf32>
    %148 = arith.addf %145, %147 : vector<8x32xf32>
    %c0_46 = arith.constant 0 : index
    %c0_47 = arith.constant 0 : index
    %c0_48 = arith.constant 0 : index
    %149 = vector.load %arg8[%c0_46, %c0_47, %c0_48] : memref<1x8x32xf32, #tpu.memory_space<vmem>>, vector<1x8x32xf32>
    %150 = vector.shape_cast %149 : vector<1x8x32xf32> to vector<8x32xf32>
    %151 = arith.addf %148, %150 : vector<8x32xf32>
    %cst_49 = arith.constant dense<0.000000e+00> : vector<8xf32>
    %152 = vector.multi_reduction <add>, %151, %cst_49 [1] : vector<8x32xf32> to vector<8xf32>
    %153 = vector.shape_cast %152 : vector<8xf32> to vector<8x1xf32>
    %cst_50 = arith.constant 3.200000e+01 : f32
    %154 = vector.broadcast %cst_50 : f32 to vector<8x1xf32>
    %155 = arith.divf %153, %154 : vector<8x1xf32>
    %156 = vector.broadcast %155 : vector<8x1xf32> to vector<8x32xf32>
    %157 = arith.subf %151, %156 : vector<8x32xf32>
    %158 = arith.mulf %157, %157 : vector<8x32xf32>
    %cst_51 = arith.constant dense<0.000000e+00> : vector<8xf32>
    %159 = vector.multi_reduction <add>, %158, %cst_51 [1] : vector<8x32xf32> to vector<8xf32>
    %160 = vector.shape_cast %159 : vector<8xf32> to vector<8x1xf32>
    %cst_52 = arith.constant 3.200000e+01 : f32
    %161 = vector.broadcast %cst_52 : f32 to vector<8x1xf32>
    %162 = arith.divf %160, %161 : vector<8x1xf32>
    %163 = vector.broadcast %155 : vector<8x1xf32> to vector<8x32xf32>
    %164 = arith.subf %151, %163 : vector<8x32xf32>
    %cst_53 = arith.constant 9.99999974E-6 : f32
    %165 = vector.broadcast %cst_53 : f32 to vector<8x1xf32>
    %166 = arith.addf %162, %165 : vector<8x1xf32>
    %167 = math.rsqrt %166 : vector<8x1xf32>
    %168 = vector.broadcast %167 : vector<8x1xf32> to vector<8x32xf32>
    %169 = arith.mulf %164, %168 : vector<8x32xf32>
    %c0_54 = arith.constant 0 : index
    %c0_55 = arith.constant 0 : index
    %170 = vector.load %arg9[%c0_54, %c0_55] : memref<1x32xf32, #tpu.memory_space<vmem>>, vector<1x32xf32>
    %171 = vector.broadcast %170 : vector<1x32xf32> to vector<8x32xf32>
    %172 = arith.mulf %169, %171 : vector<8x32xf32>
    %c0_56 = arith.constant 0 : index
    %c0_57 = arith.constant 0 : index
    %173 = vector.load %arg10[%c0_56, %c0_57] : memref<1x32xf32, #tpu.memory_space<vmem>>, vector<1x32xf32>
    %174 = vector.broadcast %173 : vector<1x32xf32> to vector<8x32xf32>
    %175 = arith.addf %172, %174 : vector<8x32xf32>
    %c0_58 = arith.constant 0 : index
    %c0_59 = arith.constant 0 : index
    %c0_60 = arith.constant 0 : index
    %176 = vector.load %arg11[%c0_58, %c0_59, %c0_60] : memref<1x8x32xf32, #tpu.memory_space<vmem>>, vector<1x8x32xf32>
    %177 = vector.shape_cast %176 : vector<1x8x32xf32> to vector<8x32xf32>
    %178 = vector.shape_cast %175 : vector<8x32xf32> to vector<1x8x32xf32>
    tpu.vector_store %arg11[%c0_58, %c0_59, %c0_60], %178 {strides = array<i32>} : memref<1x8x32xf32, #tpu.memory_space<vmem>>, vector<1x8x32xf32>,
    return
  }
  func.func @transform_0(%arg0: i32, %arg1: i32) -> (i32, i32, i32) {
    %c0_i32 = arith.constant 0 : i32
    %c0_i32_0 = arith.constant 0 : i32
    return %arg0, %arg1, %c0_i32 : i32, i32, i32
  }
  func.func @transform_1(%arg0: i32, %arg1: i32) -> (i32, i32, i32) {
    %c0_i32 = arith.constant 0 : i32
    %c0_i32_0 = arith.constant 0 : i32
    %c0_i32_1 = arith.constant 0 : i32
    return %arg0, %c0_i32, %c0_i32_0 : i32, i32, i32
  }
  func.func @transform_2(%arg0: i32, %arg1: i32) -> (i32, i32, i32) {
    %c0_i32 = arith.constant 0 : i32
    %c0_i32_0 = arith.constant 0 : i32
    %c0_i32_1 = arith.constant 0 : i32
    return %arg0, %c0_i32, %c0_i32_0 : i32, i32, i32
  }
  func.func @transform_3(%arg0: i32, %arg1: i32) -> (i32, i32, i32) {
    %c0_i32 = arith.constant 0 : i32
    %c0_i32_0 = arith.constant 0 : i32
    %c0_i32_1 = arith.constant 0 : i32
    return %arg0, %c0_i32, %c0_i32_0 : i32, i32, i32
  }
  func.func @transform_4(%arg0: i32, %arg1: i32) -> (i32, i32) {
    %c0_i32 = arith.constant 0 : i32
    %c0_i32_0 = arith.constant 0 : i32
    %c0_i32_1 = arith.constant 0 : i32
    return %c0_i32, %c0_i32_0 : i32, i32
  }
  func.func @transform_5(%arg0: i32, %arg1: i32) -> (i32, i32) {
    %c0_i32 = arith.constant 0 : i32
    %c0_i32_0 = arith.constant 0 : i32
    %c0_i32_1 = arith.constant 0 : i32
    return %c0_i32, %c0_i32_0 : i32, i32
  }
  func.func @transform_6(%arg0: i32, %arg1: i32) -> (i32, i32, i32) {
    %c0_i32 = arith.constant 0 : i32
    %c0_i32_0 = arith.constant 0 : i32
    return %arg0, %arg1, %c0_i32 : i32, i32, i32
  }
  func.func @transform_7(%arg0: i32, %arg1: i32) -> (i32, i32) {
    %c0_i32 = arith.constant 0 : i32
    %c0_i32_0 = arith.constant 0 : i32
    %c0_i32_1 = arith.constant 0 : i32
    return %c0_i32, %c0_i32_0 : i32, i32
  }
  func.func @transform_8(%arg0: i32, %arg1: i32) -> (i32, i32) {
    %c0_i32 = arith.constant 0 : i32
    %c0_i32_0 = arith.constant 0 : i32
    %c0_i32_1 = arith.constant 0 : i32
    return %c0_i32, %c0_i32_0 : i32, i32
  }
  func.func @transform_9(%arg0: i32, %arg1: i32) -> (i32, i32, i32) {
    %c0_i32 = arith.constant 0 : i32
    %c0_i32_0 = arith.constant 0 : i32
    return %arg0, %arg1, %c0_i32 : i32, i32, i32
  }
}

module attributes {stable_mosaic.version = 11 : i64} {
  func.func @kernel(%arg0: i32, %arg1: i32, %arg2: memref<1x8x32xf32, #tpu.memory_space<vmem>>, %arg3: memref<1x8x32xf32, #tpu.memory_space<vmem>>, %arg4: memref<1x8x32xf32, #tpu.memory_space<vmem>>, %arg5: memref<1x8x8xi32, #tpu.memory_space<vmem>>, %arg6: memref<32x32xf32, #tpu.memory_space<vmem>>, %arg7: memref<1x32xf32, #tpu.memory_space<vmem>>, %arg8: memref<1x8x32xf32, #tpu.memory_space<vmem>>, %arg9: memref<1x32xf32, #tpu.memory_space<vmem>>, %arg10: memref<1x32xf32, #tpu.memory_space<vmem>>, %arg11: memref<1x8x32xf32, #tpu.memory_space<vmem>>) attributes {dimension_semantics = [#tpu.dimension_semantics<parallel>, #tpu.dimension_semantics<parallel>], iteration_bounds = array<i64: 2, 1>, scalar_prefetch = 0 : i64, scratch_operands = 0 : i64, tpu.core_type = #tpu.core_type<tc>, window_params = [{transform_indices = @transform_0, window_bounds = array<i64: 1, 8, 32>}, {transform_indices = @transform_1, window_bounds = array<i64: 1, 8, 32>}, {transform_indices = @transform_2, window_bounds = array<i64: 1, 8, 32>}, {transform_indices = @transform_3, window_bounds = array<i64: 1, 8, 8>}, {pipeline_mode = #tpu.pipeline_mode<synchronous>, transform_indices = @transform_4, window_bounds = array<i64: 32, 32>}, {pipeline_mode = #tpu.pipeline_mode<synchronous>, transform_indices = @transform_5, window_bounds = array<i64: 1, 32>}, {transform_indices = @transform_6, window_bounds = array<i64: 1, 8, 32>}, {pipeline_mode = #tpu.pipeline_mode<synchronous>, transform_indices = @transform_7, window_bounds = array<i64: 1, 32>}, {pipeline_mode = #tpu.pipeline_mode<synchronous>, transform_indices = @transform_8, window_bounds = array<i64: 1, 32>}, {transform_indices = @transform_9, window_bounds = array<i64: 1, 8, 32>}]} {
    %c0 = arith.constant 0 : index
    %c0_0 = arith.constant 0 : index
    %c0_1 = arith.constant 0 : index
    %0 = vector.load %arg2[%c0, %c0_0, %c0_1] : memref<1x8x32xf32, #tpu.memory_space<vmem>>, vector<1x8x32xf32>
    %1 = vector.shape_cast %0 : vector<1x8x32xf32> to vector<8x32xf32>
    %cst = arith.constant 0.353553385 : f32
    %2 = vector.broadcast %cst : f32 to vector<8x32xf32>
    %3 = arith.mulf %1, %2 : vector<8x32xf32>
    %c0_2 = arith.constant 0 : index
    %c0_3 = arith.constant 0 : index
    %c0_4 = arith.constant 0 : index
    %4 = vector.load %arg3[%c0_2, %c0_3, %c0_4] : memref<1x8x32xf32, #tpu.memory_space<vmem>>, vector<1x8x32xf32>
    %5 = vector.shape_cast %4 : vector<1x8x32xf32> to vector<8x32xf32>
    %c0_5 = arith.constant 0 : index
    %c0_6 = arith.constant 0 : index
    %c0_7 = arith.constant 0 : index
    %6 = vector.load %arg4[%c0_5, %c0_6, %c0_7] : memref<1x8x32xf32, #tpu.memory_space<vmem>>, vector<1x8x32xf32>
    %7 = vector.shape_cast %6 : vector<1x8x32xf32> to vector<8x32xf32>
    %c0_8 = arith.constant 0 : index
    %c0_9 = arith.constant 0 : index
    %8 = vector.load %arg6[%c0_8, %c0_9] : memref<32x32xf32, #tpu.memory_space<vmem>>, vector<32x32xf32>
    %c0_10 = arith.constant 0 : index
    %c0_11 = arith.constant 0 : index
    %c0_12 = arith.constant 0 : index
    %9 = vector.load %arg5[%c0_10, %c0_11, %c0_12] : memref<1x8x8xi32, #tpu.memory_space<vmem>>, vector<1x8x8xi32>
    %10 = vector.shape_cast %9 : vector<1x8x8xi32> to vector<8x8xi32>
    %11 = vector.extract_strided_slice %3 {offsets = [0, 0], sizes = [8, 8], strides = [1, 1]} : vector<8x32xf32> to vector<8x8xf32>
    %12 = arith.truncf %11 : vector<8x8xf32> to vector<8x8xbf16>
    %13 = vector.extract_strided_slice %5 {offsets = [0, 0], sizes = [8, 8], strides = [1, 1]} : vector<8x32xf32> to vector<8x8xf32>
    %14 = arith.truncf %13 : vector<8x8xf32> to vector<8x8xbf16>
    %15 = vector.extract_strided_slice %7 {offsets = [0, 0], sizes = [8, 8], strides = [1, 1]} : vector<8x32xf32> to vector<8x8xf32>
    %16 = arith.truncf %15 : vector<8x8xf32> to vector<8x8xbf16>
    %cst_13 = arith.constant dense<0.000000e+00> : vector<8x8xf32>
    %17 = tpu.matmul %12, %14, %cst_13 {dimension_numbers = #tpu.dot_dimension_numbers<[1], [1], [0], [0], [0, 0, 1, 0], [], []>} : vector<8x8xbf16>, vector<8x8xbf16>, vector<8x8xf32> -> vector<8x8xf32>
    %c0_i32 = arith.constant 0 : i32
    %18 = vector.broadcast %c0_i32 : i32 to vector<8x8xi32>
    %19 = arith.cmpi eq, %10, %18 : vector<8x8xi32>
    %cst_14 = arith.constant -1.000000e+30 : f32
    %20 = vector.broadcast %cst_14 : f32 to vector<8x8xf32>
    %21 = arith.select %19, %20, %17 : vector<8x8xi1>, vector<8x8xf32>
    %cst_15 = arith.constant dense<0xFF800000> : vector<8xf32>
    %22 = vector.multi_reduction <maximumf>, %21, %cst_15 [1] : vector<8x8xf32> to vector<8xf32>
    %23 = vector.shape_cast %22 : vector<8xf32> to vector<8x1xf32>
    %24 = vector.broadcast %23 : vector<8x1xf32> to vector<8x8xf32>
    %25 = arith.subf %21, %24 : vector<8x8xf32>
    %26 = math.exp %25 : vector<8x8xf32>
    %cst_16 = arith.constant dense<0.000000e+00> : vector<8xf32>
    %27 = vector.multi_reduction <add>, %26, %cst_16 [1] : vector<8x8xf32> to vector<8xf32>
    %28 = vector.shape_cast %27 : vector<8xf32> to vector<8x1xf32>
    %29 = tpu.reciprocal %28 {approx = true} : vector<8x1xf32> -> vector<8x1xf32>
    %30 = arith.mulf %28, %29 : vector<8x1xf32>
    %cst_17 = arith.constant 2.000000e+00 : f32
    %31 = vector.broadcast %cst_17 : f32 to vector<8x1xf32>
    %32 = arith.subf %31, %30 : vector<8x1xf32>
    %33 = arith.mulf %29, %32 : vector<8x1xf32>
    %34 = vector.broadcast %33 : vector<8x1xf32> to vector<8x8xf32>
    %35 = arith.mulf %26, %34 : vector<8x8xf32>
    %36 = arith.truncf %35 : vector<8x8xf32> to vector<8x8xbf16>
    %cst_18 = arith.constant dense<0.000000e+00> : vector<8x8xf32>
    %37 = tpu.matmul %36, %16, %cst_18 {dimension_numbers = #tpu.dot_dimension_numbers<[1], [0], [0], [1], [0, 0, 1, 1], [], []>} : vector<8x8xbf16>, vector<8x8xbf16>, vector<8x8xf32> -> vector<8x8xf32>
    %38 = arith.truncf %37 : vector<8x8xf32> to vector<8x8xbf16>
    %39 = vector.extract_strided_slice %8 {offsets = [0, 0], sizes = [8, 32], strides = [1, 1]} : vector<32x32xf32> to vector<8x32xf32>
    %40 = arith.truncf %39 : vector<8x32xf32> to vector<8x32xbf16>
    %cst_19 = arith.constant dense<0.000000e+00> : vector<8x32xf32>
    %41 = tpu.matmul %38, %40, %cst_19 {dimension_numbers = #tpu.dot_dimension_numbers<[1], [0], [0], [1], [0, 0, 1, 1], [], []>} : vector<8x8xbf16>, vector<8x32xbf16>, vector<8x32xf32> -> vector<8x32xf32>
    %42 = vector.extract_strided_slice %3 {offsets = [0, 8], sizes = [8, 8], strides = [1, 1]} : vector<8x32xf32> to vector<8x8xf32>
    %43 = arith.truncf %42 : vector<8x8xf32> to vector<8x8xbf16>
    %44 = vector.extract_strided_slice %5 {offsets = [0, 8], sizes = [8, 8], strides = [1, 1]} : vector<8x32xf32> to vector<8x8xf32>
    %45 = arith.truncf %44 : vector<8x8xf32> to vector<8x8xbf16>
    %46 = vector.extract_strided_slice %7 {offsets = [0, 8], sizes = [8, 8], strides = [1, 1]} : vector<8x32xf32> to vector<8x8xf32>
    %47 = arith.truncf %46 : vector<8x8xf32> to vector<8x8xbf16>
    %cst_20 = arith.constant dense<0.000000e+00> : vector<8x8xf32>
    %48 = tpu.matmul %43, %45, %cst_20 {dimension_numbers = #tpu.dot_dimension_numbers<[1], [1], [0], [0], [0, 0, 1, 0], [], []>} : vector<8x8xbf16>, vector<8x8xbf16>, vector<8x8xf32> -> vector<8x8xf32>
    %c0_i32_21 = arith.constant 0 : i32
    %49 = vector.broadcast %c0_i32_21 : i32 to vector<8x8xi32>
    %50 = arith.cmpi eq, %10, %49 : vector<8x8xi32>
    %cst_22 = arith.constant -1.000000e+30 : f32
    %51 = vector.broadcast %cst_22 : f32 to vector<8x8xf32>
    %52 = arith.select %50, %51, %48 : vector<8x8xi1>, vector<8x8xf32>
    %cst_23 = arith.constant dense<0xFF800000> : vector<8xf32>
    %53 = vector.multi_reduction <maximumf>, %52, %cst_23 [1] : vector<8x8xf32> to vector<8xf32>
    %54 = vector.shape_cast %53 : vector<8xf32> to vector<8x1xf32>
    %55 = vector.broadcast %54 : vector<8x1xf32> to vector<8x8xf32>
    %56 = arith.subf %52, %55 : vector<8x8xf32>
    %57 = math.exp %56 : vector<8x8xf32>
    %cst_24 = arith.constant dense<0.000000e+00> : vector<8xf32>
    %58 = vector.multi_reduction <add>, %57, %cst_24 [1] : vector<8x8xf32> to vector<8xf32>
    %59 = vector.shape_cast %58 : vector<8xf32> to vector<8x1xf32>
    %60 = tpu.reciprocal %59 {approx = true} : vector<8x1xf32> -> vector<8x1xf32>
    %61 = arith.mulf %59, %60 : vector<8x1xf32>
    %cst_25 = arith.constant 2.000000e+00 : f32
    %62 = vector.broadcast %cst_25 : f32 to vector<8x1xf32>
    %63 = arith.subf %62, %61 : vector<8x1xf32>
    %64 = arith.mulf %60, %63 : vector<8x1xf32>
    %65 = vector.broadcast %64 : vector<8x1xf32> to vector<8x8xf32>
    %66 = arith.mulf %57, %65 : vector<8x8xf32>
    %67 = arith.truncf %66 : vector<8x8xf32> to vector<8x8xbf16>
    %cst_26 = arith.constant dense<0.000000e+00> : vector<8x8xf32>
    %68 = tpu.matmul %67, %47, %cst_26 {dimension_numbers = #tpu.dot_dimension_numbers<[1], [0], [0], [1], [0, 0, 1, 1], [], []>} : vector<8x8xbf16>, vector<8x8xbf16>, vector<8x8xf32> -> vector<8x8xf32>
    %69 = arith.truncf %68 : vector<8x8xf32> to vector<8x8xbf16>
    %70 = vector.extract_strided_slice %8 {offsets = [8, 0], sizes = [8, 32], strides = [1, 1]} : vector<32x32xf32> to vector<8x32xf32>
    %71 = arith.truncf %70 : vector<8x32xf32> to vector<8x32xbf16>
    %cst_27 = arith.constant dense<0.000000e+00> : vector<8x32xf32>
    %72 = tpu.matmul %69, %71, %cst_27 {dimension_numbers = #tpu.dot_dimension_numbers<[1], [0], [0], [1], [0, 0, 1, 1], [], []>} : vector<8x8xbf16>, vector<8x32xbf16>, vector<8x32xf32> -> vector<8x32xf32>
    %73 = arith.addf %41, %72 : vector<8x32xf32>
    %74 = vector.extract_strided_slice %3 {offsets = [0, 16], sizes = [8, 8], strides = [1, 1]} : vector<8x32xf32> to vector<8x8xf32>
    %75 = arith.truncf %74 : vector<8x8xf32> to vector<8x8xbf16>
    %76 = vector.extract_strided_slice %5 {offsets = [0, 16], sizes = [8, 8], strides = [1, 1]} : vector<8x32xf32> to vector<8x8xf32>
    %77 = arith.truncf %76 : vector<8x8xf32> to vector<8x8xbf16>
    %78 = vector.extract_strided_slice %7 {offsets = [0, 16], sizes = [8, 8], strides = [1, 1]} : vector<8x32xf32> to vector<8x8xf32>
    %79 = arith.truncf %78 : vector<8x8xf32> to vector<8x8xbf16>
    %cst_28 = arith.constant dense<0.000000e+00> : vector<8x8xf32>
    %80 = tpu.matmul %75, %77, %cst_28 {dimension_numbers = #tpu.dot_dimension_numbers<[1], [1], [0], [0], [0, 0, 1, 0], [], []>} : vector<8x8xbf16>, vector<8x8xbf16>, vector<8x8xf32> -> vector<8x8xf32>
    %c0_i32_29 = arith.constant 0 : i32
    %81 = vector.broadcast %c0_i32_29 : i32 to vector<8x8xi32>
    %82 = arith.cmpi eq, %10, %81 : vector<8x8xi32>
    %cst_30 = arith.constant -1.000000e+30 : f32
    %83 = vector.broadcast %cst_30 : f32 to vector<8x8xf32>
    %84 = arith.select %82, %83, %80 : vector<8x8xi1>, vector<8x8xf32>
    %cst_31 = arith.constant dense<0xFF800000> : vector<8xf32>
    %85 = vector.multi_reduction <maximumf>, %84, %cst_31 [1] : vector<8x8xf32> to vector<8xf32>
    %86 = vector.shape_cast %85 : vector<8xf32> to vector<8x1xf32>
    %87 = vector.broadcast %86 : vector<8x1xf32> to vector<8x8xf32>
    %88 = arith.subf %84, %87 : vector<8x8xf32>
    %89 = math.exp %88 : vector<8x8xf32>
    %cst_32 = arith.constant dense<0.000000e+00> : vector<8xf32>
    %90 = vector.multi_reduction <add>, %89, %cst_32 [1] : vector<8x8xf32> to vector<8xf32>
    %91 = vector.shape_cast %90 : vector<8xf32> to vector<8x1xf32>
    %92 = tpu.reciprocal %91 {approx = true} : vector<8x1xf32> -> vector<8x1xf32>
    %93 = arith.mulf %91, %92 : vector<8x1xf32>
    %cst_33 = arith.constant 2.000000e+00 : f32
    %94 = vector.broadcast %cst_33 : f32 to vector<8x1xf32>
    %95 = arith.subf %94, %93 : vector<8x1xf32>
    %96 = arith.mulf %92, %95 : vector<8x1xf32>
    %97 = vector.broadcast %96 : vector<8x1xf32> to vector<8x8xf32>
    %98 = arith.mulf %89, %97 : vector<8x8xf32>
    %99 = arith.truncf %98 : vector<8x8xf32> to vector<8x8xbf16>
    %cst_34 = arith.constant dense<0.000000e+00> : vector<8x8xf32>
    %100 = tpu.matmul %99, %79, %cst_34 {dimension_numbers = #tpu.dot_dimension_numbers<[1], [0], [0], [1], [0, 0, 1, 1], [], []>} : vector<8x8xbf16>, vector<8x8xbf16>, vector<8x8xf32> -> vector<8x8xf32>
    %101 = arith.truncf %100 : vector<8x8xf32> to vector<8x8xbf16>
    %102 = vector.extract_strided_slice %8 {offsets = [16, 0], sizes = [8, 32], strides = [1, 1]} : vector<32x32xf32> to vector<8x32xf32>
    %103 = arith.truncf %102 : vector<8x32xf32> to vector<8x32xbf16>
    %cst_35 = arith.constant dense<0.000000e+00> : vector<8x32xf32>
    %104 = tpu.matmul %101, %103, %cst_35 {dimension_numbers = #tpu.dot_dimension_numbers<[1], [0], [0], [1], [0, 0, 1, 1], [], []>} : vector<8x8xbf16>, vector<8x32xbf16>, vector<8x32xf32> -> vector<8x32xf32>
    %105 = arith.addf %73, %104 : vector<8x32xf32>
    %106 = vector.extract_strided_slice %3 {offsets = [0, 24], sizes = [8, 8], strides = [1, 1]} : vector<8x32xf32> to vector<8x8xf32>
    %107 = arith.truncf %106 : vector<8x8xf32> to vector<8x8xbf16>
    %108 = vector.extract_strided_slice %5 {offsets = [0, 24], sizes = [8, 8], strides = [1, 1]} : vector<8x32xf32> to vector<8x8xf32>
    %109 = arith.truncf %108 : vector<8x8xf32> to vector<8x8xbf16>
    %110 = vector.extract_strided_slice %7 {offsets = [0, 24], sizes = [8, 8], strides = [1, 1]} : vector<8x32xf32> to vector<8x8xf32>
    %111 = arith.truncf %110 : vector<8x8xf32> to vector<8x8xbf16>
    %cst_36 = arith.constant dense<0.000000e+00> : vector<8x8xf32>
    %112 = tpu.matmul %107, %109, %cst_36 {dimension_numbers = #tpu.dot_dimension_numbers<[1], [1], [0], [0], [0, 0, 1, 0], [], []>} : vector<8x8xbf16>, vector<8x8xbf16>, vector<8x8xf32> -> vector<8x8xf32>
    %c0_i32_37 = arith.constant 0 : i32
    %113 = vector.broadcast %c0_i32_37 : i32 to vector<8x8xi32>
    %114 = arith.cmpi eq, %10, %113 : vector<8x8xi32>
    %cst_38 = arith.constant -1.000000e+30 : f32
    %115 = vector.broadcast %cst_38 : f32 to vector<8x8xf32>
    %116 = arith.select %114, %115, %112 : vector<8x8xi1>, vector<8x8xf32>
    %cst_39 = arith.constant dense<0xFF800000> : vector<8xf32>
    %117 = vector.multi_reduction <maximumf>, %116, %cst_39 [1] : vector<8x8xf32> to vector<8xf32>
    %118 = vector.shape_cast %117 : vector<8xf32> to vector<8x1xf32>
    %119 = vector.broadcast %118 : vector<8x1xf32> to vector<8x8xf32>
    %120 = arith.subf %116, %119 : vector<8x8xf32>
    %121 = math.exp %120 : vector<8x8xf32>
    %cst_40 = arith.constant dense<0.000000e+00> : vector<8xf32>
    %122 = vector.multi_reduction <add>, %121, %cst_40 [1] : vector<8x8xf32> to vector<8xf32>
    %123 = vector.shape_cast %122 : vector<8xf32> to vector<8x1xf32>
    %124 = tpu.reciprocal %123 {approx = true} : vector<8x1xf32> -> vector<8x1xf32>
    %125 = arith.mulf %123, %124 : vector<8x1xf32>
    %cst_41 = arith.constant 2.000000e+00 : f32
    %126 = vector.broadcast %cst_41 : f32 to vector<8x1xf32>
    %127 = arith.subf %126, %125 : vector<8x1xf32>
    %128 = arith.mulf %124, %127 : vector<8x1xf32>
    %129 = vector.broadcast %128 : vector<8x1xf32> to vector<8x8xf32>
    %130 = arith.mulf %121, %129 : vector<8x8xf32>
    %131 = arith.truncf %130 : vector<8x8xf32> to vector<8x8xbf16>
    %cst_42 = arith.constant dense<0.000000e+00> : vector<8x8xf32>
    %132 = tpu.matmul %131, %111, %cst_42 {dimension_numbers = #tpu.dot_dimension_numbers<[1], [0], [0], [1], [0, 0, 1, 1], [], []>} : vector<8x8xbf16>, vector<8x8xbf16>, vector<8x8xf32> -> vector<8x8xf32>
    %133 = arith.truncf %132 : vector<8x8xf32> to vector<8x8xbf16>
    %134 = vector.extract_strided_slice %8 {offsets = [24, 0], sizes = [8, 32], strides = [1, 1]} : vector<32x32xf32> to vector<8x32xf32>
    %135 = arith.truncf %134 : vector<8x32xf32> to vector<8x32xbf16>
    %cst_43 = arith.constant dense<0.000000e+00> : vector<8x32xf32>
    %136 = tpu.matmul %133, %135, %cst_43 {dimension_numbers = #tpu.dot_dimension_numbers<[1], [0], [0], [1], [0, 0, 1, 1], [], []>} : vector<8x8xbf16>, vector<8x32xbf16>, vector<8x32xf32> -> vector<8x32xf32>
    %137 = arith.addf %105, %136 : vector<8x32xf32>
    %c0_44 = arith.constant 0 : index
    %c0_45 = arith.constant 0 : index
    %138 = vector.load %arg7[%c0_44, %c0_45] : memref<1x32xf32, #tpu.memory_space<vmem>>, vector<1x32xf32>
    %139 = vector.broadcast %138 : vector<1x32xf32> to vector<8x32xf32>
    %140 = arith.addf %137, %139 : vector<8x32xf32>
    %c0_46 = arith.constant 0 : index
    %c0_47 = arith.constant 0 : index
    %c0_48 = arith.constant 0 : index
    %141 = vector.load %arg8[%c0_46, %c0_47, %c0_48] : memref<1x8x32xf32, #tpu.memory_space<vmem>>, vector<1x8x32xf32>
    %142 = vector.shape_cast %141 : vector<1x8x32xf32> to vector<8x32xf32>
    %143 = arith.addf %140, %142 : vector<8x32xf32>
    %cst_49 = arith.constant dense<0.000000e+00> : vector<8xf32>
    %144 = vector.multi_reduction <add>, %143, %cst_49 [1] : vector<8x32xf32> to vector<8xf32>
    %145 = vector.shape_cast %144 : vector<8xf32> to vector<8x1xf32>
    %cst_50 = arith.constant 3.200000e+01 : f32
    %146 = vector.broadcast %cst_50 : f32 to vector<8x1xf32>
    %147 = arith.divf %145, %146 : vector<8x1xf32>
    %148 = vector.broadcast %147 : vector<8x1xf32> to vector<8x32xf32>
    %149 = arith.subf %143, %148 : vector<8x32xf32>
    %150 = arith.mulf %149, %149 : vector<8x32xf32>
    %cst_51 = arith.constant dense<0.000000e+00> : vector<8xf32>
    %151 = vector.multi_reduction <add>, %150, %cst_51 [1] : vector<8x32xf32> to vector<8xf32>
    %152 = vector.shape_cast %151 : vector<8xf32> to vector<8x1xf32>
    %cst_52 = arith.constant 3.200000e+01 : f32
    %153 = vector.broadcast %cst_52 : f32 to vector<8x1xf32>
    %154 = arith.divf %152, %153 : vector<8x1xf32>
    %155 = vector.broadcast %147 : vector<8x1xf32> to vector<8x32xf32>
    %156 = arith.subf %143, %155 : vector<8x32xf32>
    %cst_53 = arith.constant 9.99999974E-6 : f32
    %157 = vector.broadcast %cst_53 : f32 to vector<8x1xf32>
    %158 = arith.addf %154, %157 : vector<8x1xf32>
    %159 = math.rsqrt %158 : vector<8x1xf32>
    %160 = vector.broadcast %159 : vector<8x1xf32> to vector<8x32xf32>
    %161 = arith.mulf %156, %160 : vector<8x32xf32>
    %c0_54 = arith.constant 0 : index
    %c0_55 = arith.constant 0 : index
    %162 = vector.load %arg9[%c0_54, %c0_55] : memref<1x32xf32, #tpu.memory_space<vmem>>, vector<1x32xf32>
    %163 = vector.broadcast %162 : vector<1x32xf32> to vector<8x32xf32>
    %164 = arith.mulf %161, %163 : vector<8x32xf32>
    %c0_56 = arith.constant 0 : index
    %c0_57 = arith.constant 0 : index
    %165 = vector.load %arg10[%c0_56, %c0_57] : memref<1x32xf32, #tpu.memory_space<vmem>>, vector<1x32xf32>
    %166 = vector.broadcast %165 : vector<1x32xf32> to vector<8x32xf32>
    %167 = arith.addf %164, %166 : vector<8x32xf32>
    %c0_58 = arith.constant 0 : index
    %c0_59 = arith.constant 0 : index
    %c0_60 = arith.constant 0 : index
    %168 = vector.load %arg11[%c0_58, %c0_59, %c0_60] : memref<1x8x32xf32, #tpu.memory_space<vmem>>, vector<1x8x32xf32>
    %169 = vector.shape_cast %168 : vector<1x8x32xf32> to vector<8x32xf32>
    %170 = vector.shape_cast %167 : vector<8x32xf32> to vector<1x8x32xf32>
    tpu.vector_store %arg11[%c0_58, %c0_59, %c0_60], %170 {strides = array<i32>} : memref<1x8x32xf32, #tpu.memory_space<vmem>>, vector<1x8x32xf32>,
    return
  }
  func.func @transform_0(%arg0: i32, %arg1: i32) -> (i32, i32, i32) {
    %c0_i32 = arith.constant 0 : i32
    %c0_i32_0 = arith.constant 0 : i32
    return %arg0, %arg1, %c0_i32 : i32, i32, i32
  }
  func.func @transform_1(%arg0: i32, %arg1: i32) -> (i32, i32, i32) {
    %c0_i32 = arith.constant 0 : i32
    %c0_i32_0 = arith.constant 0 : i32
    %c0_i32_1 = arith.constant 0 : i32
    return %arg0, %c0_i32, %c0_i32_0 : i32, i32, i32
  }
  func.func @transform_2(%arg0: i32, %arg1: i32) -> (i32, i32, i32) {
    %c0_i32 = arith.constant 0 : i32
    %c0_i32_0 = arith.constant 0 : i32
    %c0_i32_1 = arith.constant 0 : i32
    return %arg0, %c0_i32, %c0_i32_0 : i32, i32, i32
  }
  func.func @transform_3(%arg0: i32, %arg1: i32) -> (i32, i32, i32) {
    %c0_i32 = arith.constant 0 : i32
    %c0_i32_0 = arith.constant 0 : i32
    return %arg0, %arg1, %c0_i32 : i32, i32, i32
  }
  func.func @transform_4(%arg0: i32, %arg1: i32) -> (i32, i32) {
    %c0_i32 = arith.constant 0 : i32
    %c0_i32_0 = arith.constant 0 : i32
    %c0_i32_1 = arith.constant 0 : i32
    return %c0_i32, %c0_i32_0 : i32, i32
  }
  func.func @transform_5(%arg0: i32, %arg1: i32) -> (i32, i32) {
    %c0_i32 = arith.constant 0 : i32
    %c0_i32_0 = arith.constant 0 : i32
    %c0_i32_1 = arith.constant 0 : i32
    return %c0_i32, %c0_i32_0 : i32, i32
  }
  func.func @transform_6(%arg0: i32, %arg1: i32) -> (i32, i32, i32) {
    %c0_i32 = arith.constant 0 : i32
    %c0_i32_0 = arith.constant 0 : i32
    return %arg0, %arg1, %c0_i32 : i32, i32, i32
  }
  func.func @transform_7(%arg0: i32, %arg1: i32) -> (i32, i32) {
    %c0_i32 = arith.constant 0 : i32
    %c0_i32_0 = arith.constant 0 : i32
    %c0_i32_1 = arith.constant 0 : i32
    return %c0_i32, %c0_i32_0 : i32, i32
  }
  func.func @transform_8(%arg0: i32, %arg1: i32) -> (i32, i32) {
    %c0_i32 = arith.constant 0 : i32
    %c0_i32_0 = arith.constant 0 : i32
    %c0_i32_1 = arith.constant 0 : i32
    return %c0_i32, %c0_i32_0 : i32, i32
  }
  func.func @transform_9(%arg0: i32, %arg1: i32) -> (i32, i32, i32) {
    %c0_i32 = arith.constant 0 : i32
    %c0_i32_0 = arith.constant 0 : i32
    return %arg0, %arg1, %c0_i32 : i32, i32, i32
  }
}

module attributes {stable_mosaic.version = 11 : i64} {
  func.func @kernel(%arg0: i32, %arg1: i32, %arg2: memref<16x32xf32, #tpu.memory_space<vmem>>, %arg3: memref<32x32xf32, #tpu.memory_space<vmem>>, %arg4: memref<32x32xf32, #tpu.memory_space<vmem>>, %arg5: memref<1x32xf32, #tpu.memory_space<vmem>>, %arg6: memref<1x32xf32, #tpu.memory_space<vmem>>, %arg7: memref<16x32xf32, #tpu.memory_space<vmem>>, %arg8: memref<16x32xf32, #tpu.memory_space<vmem>>, %arg9: memref<16x32xf32, #tpu.memory_space<vmem>>, %arg10: memref<16x32xf32, #tpu.memory_space<vmem>>) attributes {dimension_semantics = [#tpu.dimension_semantics<parallel>, #tpu.dimension_semantics<arbitrary>], iteration_bounds = array<i64: 2, 1>, scalar_prefetch = 0 : i64, scratch_operands = 2 : i64, tpu.core_type = #tpu.core_type<tc>, window_params = [{transform_indices = @transform_0, window_bounds = array<i64: 16, 32>}, {transform_indices = @transform_1, window_bounds = array<i64: 32, 32>}, {transform_indices = @transform_2, window_bounds = array<i64: 32, 32>}, {pipeline_mode = #tpu.pipeline_mode<synchronous>, transform_indices = @transform_3, window_bounds = array<i64: 1, 32>}, {pipeline_mode = #tpu.pipeline_mode<synchronous>, transform_indices = @transform_4, window_bounds = array<i64: 1, 32>}, {transform_indices = @transform_5, window_bounds = array<i64: 16, 32>}, {transform_indices = @transform_6, window_bounds = array<i64: 16, 32>}]} {
    %c0_i32 = arith.constant 0 : i32
    %0 = arith.cmpi eq, %arg1, %c0_i32 : i32
    %1 = arith.extui %0 : i1 to i32
    %c0_i32_0 = arith.constant 0 : i32
    %2 = arith.cmpi ne, %1, %c0_i32_0 : i32
    scf.if %2 {
      %cst_17 = arith.constant 0.000000e+00 : f32
      %20 = vector.broadcast %cst_17 : f32 to vector<16x32xf32>
      %c0_18 = arith.constant 0 : index
      %c0_19 = arith.constant 0 : index
      %21 = vector.load %arg9[%c0_18, %c0_19] : memref<16x32xf32, #tpu.memory_space<vmem>>, vector<16x32xf32>
      tpu.vector_store %arg9[%c0_18, %c0_19], %20 {strides = array<i32>} : memref<16x32xf32, #tpu.memory_space<vmem>>, vector<16x32xf32>,
      %cst_20 = arith.constant 0.000000e+00 : f32
      %22 = vector.broadcast %cst_20 : f32 to vector<16x32xf32>
      %c0_21 = arith.constant 0 : index
      %c0_22 = arith.constant 0 : index
      %23 = vector.load %arg10[%c0_21, %c0_22] : memref<16x32xf32, #tpu.memory_space<vmem>>, vector<16x32xf32>
      tpu.vector_store %arg10[%c0_21, %c0_22], %22 {strides = array<i32>} : memref<16x32xf32, #tpu.memory_space<vmem>>, vector<16x32xf32>,
    } else {
    }
    %c0 = arith.constant 0 : index
    %c0_1 = arith.constant 0 : index
    %3 = vector.load %arg2[%c0, %c0_1] : memref<16x32xf32, #tpu.memory_space<vmem>>, vector<16x32xf32>
    %4 = arith.truncf %3 : vector<16x32xf32> to vector<16x32xbf16>
    %c0_2 = arith.constant 0 : index
    %c0_3 = arith.constant 0 : index
    %5 = vector.load %arg9[%c0_2, %c0_3] : memref<16x32xf32, #tpu.memory_space<vmem>>, vector<16x32xf32>
    %c0_4 = arith.constant 0 : index
    %c0_5 = arith.constant 0 : index
    %6 = vector.load %arg3[%c0_4, %c0_5] : memref<32x32xf32, #tpu.memory_space<vmem>>, vector<32x32xf32>
    %7 = arith.truncf %6 : vector<32x32xf32> to vector<32x32xbf16>
    %cst = arith.constant dense<0.000000e+00> : vector<16x32xf32>
    %8 = tpu.matmul %4, %7, %cst {dimension_numbers = #tpu.dot_dimension_numbers<[1], [0], [0], [1], [0, 0, 1, 1], [], []>} : vector<16x32xbf16>, vector<32x32xbf16>, vector<16x32xf32> -> vector<16x32xf32>
    %9 = arith.addf %5, %8 : vector<16x32xf32>
    %c0_6 = arith.constant 0 : index
    %c0_7 = arith.constant 0 : index
    %10 = vector.load %arg9[%c0_6, %c0_7] : memref<16x32xf32, #tpu.memory_space<vmem>>, vector<16x32xf32>
    tpu.vector_store %arg9[%c0_6, %c0_7], %9 {strides = array<i32>} : memref<16x32xf32, #tpu.memory_space<vmem>>, vector<16x32xf32>,
    %c0_8 = arith.constant 0 : index
    %c0_9 = arith.constant 0 : index
    %11 = vector.load %arg10[%c0_8, %c0_9] : memref<16x32xf32, #tpu.memory_space<vmem>>, vector<16x32xf32>
    %c0_10 = arith.constant 0 : index
    %c0_11 = arith.constant 0 : index
    %12 = vector.load %arg4[%c0_10, %c0_11] : memref<32x32xf32, #tpu.memory_space<vmem>>, vector<32x32xf32>
    %13 = arith.truncf %12 : vector<32x32xf32> to vector<32x32xbf16>
    %cst_12 = arith.constant dense<0.000000e+00> : vector<16x32xf32>
    %14 = tpu.matmul %4, %13, %cst_12 {dimension_numbers = #tpu.dot_dimension_numbers<[1], [0], [0], [1], [0, 0, 1, 1], [], []>} : vector<16x32xbf16>, vector<32x32xbf16>, vector<16x32xf32> -> vector<16x32xf32>
    %15 = arith.addf %11, %14 : vector<16x32xf32>
    %c0_13 = arith.constant 0 : index
    %c0_14 = arith.constant 0 : index
    %16 = vector.load %arg10[%c0_13, %c0_14] : memref<16x32xf32, #tpu.memory_space<vmem>>, vector<16x32xf32>
    tpu.vector_store %arg10[%c0_13, %c0_14], %15 {strides = array<i32>} : memref<16x32xf32, #tpu.memory_space<vmem>>, vector<16x32xf32>,
    %c0_i32_15 = arith.constant 0 : i32
    %17 = arith.cmpi eq, %arg1, %c0_i32_15 : i32
    %18 = arith.extui %17 : i1 to i32
    %c0_i32_16 = arith.constant 0 : i32
    %19 = arith.cmpi ne, %18, %c0_i32_16 : i32
    scf.if %19 {
      %c0_17 = arith.constant 0 : index
      %c0_18 = arith.constant 0 : index
      %20 = vector.load %arg9[%c0_17, %c0_18] : memref<16x32xf32, #tpu.memory_space<vmem>>, vector<16x32xf32>
      %c0_19 = arith.constant 0 : index
      %c0_20 = arith.constant 0 : index
      %21 = vector.load %arg5[%c0_19, %c0_20] : memref<1x32xf32, #tpu.memory_space<vmem>>, vector<1x32xf32>
      %22 = vector.broadcast %21 : vector<1x32xf32> to vector<16x32xf32>
      %23 = arith.addf %20, %22 : vector<16x32xf32>
      %c0_21 = arith.constant 0 : index
      %c0_22 = arith.constant 0 : index
      %24 = vector.load %arg7[%c0_21, %c0_22] : memref<16x32xf32, #tpu.memory_space<vmem>>, vector<16x32xf32>
      tpu.vector_store %arg7[%c0_21, %c0_22], %23 {strides = array<i32>} : memref<16x32xf32, #tpu.memory_space<vmem>>, vector<16x32xf32>,
      %c0_23 = arith.constant 0 : index
      %c0_24 = arith.constant 0 : index
      %25 = vector.load %arg10[%c0_23, %c0_24] : memref<16x32xf32, #tpu.memory_space<vmem>>, vector<16x32xf32>
      %c0_25 = arith.constant 0 : index
      %c0_26 = arith.constant 0 : index
      %26 = vector.load %arg6[%c0_25, %c0_26] : memref<1x32xf32, #tpu.memory_space<vmem>>, vector<1x32xf32>
      %27 = vector.broadcast %26 : vector<1x32xf32> to vector<16x32xf32>
      %28 = arith.addf %25, %27 : vector<16x32xf32>
      %c0_27 = arith.constant 0 : index
      %c0_28 = arith.constant 0 : index
      %29 = vector.load %arg8[%c0_27, %c0_28] : memref<16x32xf32, #tpu.memory_space<vmem>>, vector<16x32xf32>
      tpu.vector_store %arg8[%c0_27, %c0_28], %28 {strides = array<i32>} : memref<16x32xf32, #tpu.memory_space<vmem>>, vector<16x32xf32>,
    } else {
    }
    return
  }
  func.func @transform_0(%arg0: i32, %arg1: i32) -> (i32, i32) {
    %c0_i32 = arith.constant 0 : i32
    return %arg0, %arg1 : i32, i32
  }
  func.func @transform_1(%arg0: i32, %arg1: i32) -> (i32, i32) {
    %c0_i32 = arith.constant 0 : i32
    %c0_i32_0 = arith.constant 0 : i32
    return %arg1, %c0_i32 : i32, i32
  }
  func.func @transform_2(%arg0: i32, %arg1: i32) -> (i32, i32) {
    %c0_i32 = arith.constant 0 : i32
    %c0_i32_0 = arith.constant 0 : i32
    return %arg1, %c0_i32 : i32, i32
  }
  func.func @transform_3(%arg0: i32, %arg1: i32) -> (i32, i32) {
    %c0_i32 = arith.constant 0 : i32
    %c0_i32_0 = arith.constant 0 : i32
    %c0_i32_1 = arith.constant 0 : i32
    return %c0_i32, %c0_i32_0 : i32, i32
  }
  func.func @transform_4(%arg0: i32, %arg1: i32) -> (i32, i32) {
    %c0_i32 = arith.constant 0 : i32
    %c0_i32_0 = arith.constant 0 : i32
    %c0_i32_1 = arith.constant 0 : i32
    return %c0_i32, %c0_i32_0 : i32, i32
  }
  func.func @transform_5(%arg0: i32, %arg1: i32) -> (i32, i32) {
    %c0_i32 = arith.constant 0 : i32
    %c0_i32_0 = arith.constant 0 : i32
    return %arg0, %c0_i32 : i32, i32
  }
  func.func @transform_6(%arg0: i32, %arg1: i32) -> (i32, i32) {
    %c0_i32 = arith.constant 0 : i32
    %c0_i32_0 = arith.constant 0 : i32
    return %arg0, %c0_i32 : i32, i32
  }
}

module attributes {stable_mosaic.version = 11 : i64} {
  func.func @kernel(%arg0: i32, %arg1: i32, %arg2: memref<8x32xf32, #tpu.memory_space<vmem>>, %arg3: memref<32x32xf32, #tpu.memory_space<vmem>>, %arg4: memref<1x32xf32, #tpu.memory_space<vmem>>, %arg5: memref<8x32xf32, #tpu.memory_space<vmem>>, %arg6: memref<8x32xf32, #tpu.memory_space<vmem>>) attributes {dimension_semantics = [#tpu.dimension_semantics<parallel>, #tpu.dimension_semantics<arbitrary>], iteration_bounds = array<i64: 2, 1>, scalar_prefetch = 0 : i64, scratch_operands = 1 : i64, tpu.core_type = #tpu.core_type<tc>, window_params = [{transform_indices = @transform_0, window_bounds = array<i64: 8, 32>}, {transform_indices = @transform_1, window_bounds = array<i64: 32, 32>}, {pipeline_mode = #tpu.pipeline_mode<synchronous>, transform_indices = @transform_2, window_bounds = array<i64: 1, 32>}, {transform_indices = @transform_3, window_bounds = array<i64: 8, 32>}]} {
    %c0_i32 = arith.constant 0 : i32
    %0 = arith.cmpi eq, %arg1, %c0_i32 : i32
    %1 = arith.extui %0 : i1 to i32
    %c0_i32_0 = arith.constant 0 : i32
    %2 = arith.cmpi ne, %1, %c0_i32_0 : i32
    scf.if %2 {
      %cst_10 = arith.constant 0.000000e+00 : f32
      %14 = vector.broadcast %cst_10 : f32 to vector<8x32xf32>
      %c0_11 = arith.constant 0 : index
      %c0_12 = arith.constant 0 : index
      %15 = vector.load %arg6[%c0_11, %c0_12] : memref<8x32xf32, #tpu.memory_space<vmem>>, vector<8x32xf32>
      tpu.vector_store %arg6[%c0_11, %c0_12], %14 {strides = array<i32>} : memref<8x32xf32, #tpu.memory_space<vmem>>, vector<8x32xf32>,
    } else {
    }
    %c0 = arith.constant 0 : index
    %c0_1 = arith.constant 0 : index
    %3 = vector.load %arg2[%c0, %c0_1] : memref<8x32xf32, #tpu.memory_space<vmem>>, vector<8x32xf32>
    %4 = arith.truncf %3 : vector<8x32xf32> to vector<8x32xbf16>
    %c0_2 = arith.constant 0 : index
    %c0_3 = arith.constant 0 : index
    %5 = vector.load %arg6[%c0_2, %c0_3] : memref<8x32xf32, #tpu.memory_space<vmem>>, vector<8x32xf32>
    %c0_4 = arith.constant 0 : index
    %c0_5 = arith.constant 0 : index
    %6 = vector.load %arg3[%c0_4, %c0_5] : memref<32x32xf32, #tpu.memory_space<vmem>>, vector<32x32xf32>
    %7 = arith.truncf %6 : vector<32x32xf32> to vector<32x32xbf16>
    %cst = arith.constant dense<0.000000e+00> : vector<8x32xf32>
    %8 = tpu.matmul %4, %7, %cst {dimension_numbers = #tpu.dot_dimension_numbers<[1], [0], [0], [1], [0, 0, 1, 1], [], []>} : vector<8x32xbf16>, vector<32x32xbf16>, vector<8x32xf32> -> vector<8x32xf32>
    %9 = arith.addf %5, %8 : vector<8x32xf32>
    %c0_6 = arith.constant 0 : index
    %c0_7 = arith.constant 0 : index
    %10 = vector.load %arg6[%c0_6, %c0_7] : memref<8x32xf32, #tpu.memory_space<vmem>>, vector<8x32xf32>
    tpu.vector_store %arg6[%c0_6, %c0_7], %9 {strides = array<i32>} : memref<8x32xf32, #tpu.memory_space<vmem>>, vector<8x32xf32>,
    %c0_i32_8 = arith.constant 0 : i32
    %11 = arith.cmpi eq, %arg1, %c0_i32_8 : i32
    %12 = arith.extui %11 : i1 to i32
    %c0_i32_9 = arith.constant 0 : i32
    %13 = arith.cmpi ne, %12, %c0_i32_9 : i32
    scf.if %13 {
      %c0_10 = arith.constant 0 : index
      %c0_11 = arith.constant 0 : index
      %14 = vector.load %arg6[%c0_10, %c0_11] : memref<8x32xf32, #tpu.memory_space<vmem>>, vector<8x32xf32>
      %c0_12 = arith.constant 0 : index
      %c0_13 = arith.constant 0 : index
      %15 = vector.load %arg4[%c0_12, %c0_13] : memref<1x32xf32, #tpu.memory_space<vmem>>, vector<1x32xf32>
      %16 = vector.broadcast %15 : vector<1x32xf32> to vector<8x32xf32>
      %17 = arith.addf %14, %16 : vector<8x32xf32>
      %c0_14 = arith.constant 0 : index
      %c0_15 = arith.constant 0 : index
      %18 = vector.load %arg5[%c0_14, %c0_15] : memref<8x32xf32, #tpu.memory_space<vmem>>, vector<8x32xf32>
      tpu.vector_store %arg5[%c0_14, %c0_15], %17 {strides = array<i32>} : memref<8x32xf32, #tpu.memory_space<vmem>>, vector<8x32xf32>,
    } else {
    }
    return
  }
  func.func @transform_0(%arg0: i32, %arg1: i32) -> (i32, i32) {
    %c0_i32 = arith.constant 0 : i32
    return %arg0, %arg1 : i32, i32
  }
  func.func @transform_1(%arg0: i32, %arg1: i32) -> (i32, i32) {
    %c0_i32 = arith.constant 0 : i32
    %c0_i32_0 = arith.constant 0 : i32
    return %arg1, %c0_i32 : i32, i32
  }
  func.func @transform_2(%arg0: i32, %arg1: i32) -> (i32, i32) {
    %c0_i32 = arith.constant 0 : i32
    %c0_i32_0 = arith.constant 0 : i32
    %c0_i32_1 = arith.constant 0 : i32
    return %c0_i32, %c0_i32_0 : i32, i32
  }
  func.func @transform_3(%arg0: i32, %arg1: i32) -> (i32, i32) {
    %c0_i32 = arith.constant 0 : i32
    %c0_i32_0 = arith.constant 0 : i32
    return %arg0, %c0_i32 : i32, i32
  }
}

module attributes {stable_mosaic.version = 11 : i64} {
  func.func @kernel(%arg0: i32, %arg1: i32, %arg2: memref<1x8x32xf32, #tpu.memory_space<vmem>>, %arg3: memref<1x16x32xf32, #tpu.memory_space<vmem>>, %arg4: memref<1x16x32xf32, #tpu.memory_space<vmem>>, %arg5: memref<1x1x16xi32, #tpu.memory_space<vmem>>, %arg6: memref<32x32xf32, #tpu.memory_space<vmem>>, %arg7: memref<1x32xf32, #tpu.memory_space<vmem>>, %arg8: memref<1x8x32xf32, #tpu.memory_space<vmem>>, %arg9: memref<1x32xf32, #tpu.memory_space<vmem>>, %arg10: memref<1x32xf32, #tpu.memory_space<vmem>>, %arg11: memref<1x8x32xf32, #tpu.memory_space<vmem>>) attributes {dimension_semantics = [#tpu.dimension_semantics<parallel>, #tpu.dimension_semantics<parallel>], iteration_bounds = array<i64: 2, 1>, scalar_prefetch = 0 : i64, scratch_operands = 0 : i64, tpu.core_type = #tpu.core_type<tc>, window_params = [{transform_indices = @transform_0, window_bounds = array<i64: 1, 8, 32>}, {transform_indices = @transform_1, window_bounds = array<i64: 1, 16, 32>}, {transform_indices = @transform_2, window_bounds = array<i64: 1, 16, 32>}, {transform_indices = @transform_3, window_bounds = array<i64: 1, 1, 16>}, {pipeline_mode = #tpu.pipeline_mode<synchronous>, transform_indices = @transform_4, window_bounds = array<i64: 32, 32>}, {pipeline_mode = #tpu.pipeline_mode<synchronous>, transform_indices = @transform_5, window_bounds = array<i64: 1, 32>}, {transform_indices = @transform_6, window_bounds = array<i64: 1, 8, 32>}, {pipeline_mode = #tpu.pipeline_mode<synchronous>, transform_indices = @transform_7, window_bounds = array<i64: 1, 32>}, {pipeline_mode = #tpu.pipeline_mode<synchronous>, transform_indices = @transform_8, window_bounds = array<i64: 1, 32>}, {transform_indices = @transform_9, window_bounds = array<i64: 1, 8, 32>}]} {
    %c0 = arith.constant 0 : index
    %c0_0 = arith.constant 0 : index
    %c0_1 = arith.constant 0 : index
    %0 = vector.load %arg2[%c0, %c0_0, %c0_1] : memref<1x8x32xf32, #tpu.memory_space<vmem>>, vector<1x8x32xf32>
    %1 = vector.shape_cast %0 : vector<1x8x32xf32> to vector<8x32xf32>
    %cst = arith.constant 0.353553385 : f32
    %2 = vector.broadcast %cst : f32 to vector<8x32xf32>
    %3 = arith.mulf %1, %2 : vector<8x32xf32>
    %c0_2 = arith.constant 0 : index
    %c0_3 = arith.constant 0 : index
    %c0_4 = arith.constant 0 : index
    %4 = vector.load %arg3[%c0_2, %c0_3, %c0_4] : memref<1x16x32xf32, #tpu.memory_space<vmem>>, vector<1x16x32xf32>
    %5 = vector.shape_cast %4 : vector<1x16x32xf32> to vector<16x32xf32>
    %c0_5 = arith.constant 0 : index
    %c0_6 = arith.constant 0 : index
    %c0_7 = arith.constant 0 : index
    %6 = vector.load %arg4[%c0_5, %c0_6, %c0_7] : memref<1x16x32xf32, #tpu.memory_space<vmem>>, vector<1x16x32xf32>
    %7 = vector.shape_cast %6 : vector<1x16x32xf32> to vector<16x32xf32>
    %c0_8 = arith.constant 0 : index
    %c0_9 = arith.constant 0 : index
    %8 = vector.load %arg6[%c0_8, %c0_9] : memref<32x32xf32, #tpu.memory_space<vmem>>, vector<32x32xf32>
    %c0_10 = arith.constant 0 : index
    %c0_11 = arith.constant 0 : index
    %c0_12 = arith.constant 0 : index
    %9 = vector.load %arg5[%c0_10, %c0_11, %c0_12] : memref<1x1x16xi32, #tpu.memory_space<vmem>>, vector<1x1x16xi32>
    %10 = vector.shape_cast %9 : vector<1x1x16xi32> to vector<1x16xi32>
    %11 = vector.extract_strided_slice %3 {offsets = [0, 0], sizes = [8, 8], strides = [1, 1]} : vector<8x32xf32> to vector<8x8xf32>
    %12 = arith.truncf %11 : vector<8x8xf32> to vector<8x8xbf16>
    %13 = vector.extract_strided_slice %5 {offsets = [0, 0], sizes = [16, 8], strides = [1, 1]} : vector<16x32xf32> to vector<16x8xf32>
    %14 = arith.truncf %13 : vector<16x8xf32> to vector<16x8xbf16>
    %15 = vector.extract_strided_slice %7 {offsets = [0, 0], sizes = [16, 8], strides = [1, 1]} : vector<16x32xf32> to vector<16x8xf32>
    %16 = arith.truncf %15 : vector<16x8xf32> to vector<16x8xbf16>
    %cst_13 = arith.constant dense<0.000000e+00> : vector<8x16xf32>
    %17 = tpu.matmul %12, %14, %cst_13 {dimension_numbers = #tpu.dot_dimension_numbers<[1], [1], [0], [0], [0, 0, 1, 0], [], []>} : vector<8x8xbf16>, vector<16x8xbf16>, vector<8x16xf32> -> vector<8x16xf32>
    %c0_i32 = arith.constant 0 : i32
    %18 = vector.broadcast %c0_i32 : i32 to vector<1x16xi32>
    %19 = arith.cmpi eq, %10, %18 : vector<1x16xi32>
    %cst_14 = arith.constant -1.000000e+30 : f32
    %20 = vector.shape_cast %19 : vector<1x16xi1> to vector<1x16xi1>
    %21 = vector.broadcast %20 : vector<1x16xi1> to vector<8x16xi1>
    %22 = vector.broadcast %cst_14 : f32 to vector<8x16xf32>
    %23 = arith.select %21, %22, %17 : vector<8x16xi1>, vector<8x16xf32>
    %cst_15 = arith.constant dense<0xFF800000> : vector<8xf32>
    %24 = vector.multi_reduction <maximumf>, %23, %cst_15 [1] : vector<8x16xf32> to vector<8xf32>
    %25 = vector.shape_cast %24 : vector<8xf32> to vector<8x1xf32>
    %26 = vector.broadcast %25 : vector<8x1xf32> to vector<8x16xf32>
    %27 = arith.subf %23, %26 : vector<8x16xf32>
    %28 = math.exp %27 : vector<8x16xf32>
    %cst_16 = arith.constant dense<0.000000e+00> : vector<8xf32>
    %29 = vector.multi_reduction <add>, %28, %cst_16 [1] : vector<8x16xf32> to vector<8xf32>
    %30 = vector.shape_cast %29 : vector<8xf32> to vector<8x1xf32>
    %31 = tpu.reciprocal %30 {approx = true} : vector<8x1xf32> -> vector<8x1xf32>
    %32 = arith.mulf %30, %31 : vector<8x1xf32>
    %cst_17 = arith.constant 2.000000e+00 : f32
    %33 = vector.broadcast %cst_17 : f32 to vector<8x1xf32>
    %34 = arith.subf %33, %32 : vector<8x1xf32>
    %35 = arith.mulf %31, %34 : vector<8x1xf32>
    %36 = vector.broadcast %35 : vector<8x1xf32> to vector<8x16xf32>
    %37 = arith.mulf %28, %36 : vector<8x16xf32>
    %38 = arith.truncf %37 : vector<8x16xf32> to vector<8x16xbf16>
    %cst_18 = arith.constant dense<0.000000e+00> : vector<8x8xf32>
    %39 = tpu.matmul %38, %16, %cst_18 {dimension_numbers = #tpu.dot_dimension_numbers<[1], [0], [0], [1], [0, 0, 1, 1], [], []>} : vector<8x16xbf16>, vector<16x8xbf16>, vector<8x8xf32> -> vector<8x8xf32>
    %40 = arith.truncf %39 : vector<8x8xf32> to vector<8x8xbf16>
    %41 = vector.extract_strided_slice %8 {offsets = [0, 0], sizes = [8, 32], strides = [1, 1]} : vector<32x32xf32> to vector<8x32xf32>
    %42 = arith.truncf %41 : vector<8x32xf32> to vector<8x32xbf16>
    %cst_19 = arith.constant dense<0.000000e+00> : vector<8x32xf32>
    %43 = tpu.matmul %40, %42, %cst_19 {dimension_numbers = #tpu.dot_dimension_numbers<[1], [0], [0], [1], [0, 0, 1, 1], [], []>} : vector<8x8xbf16>, vector<8x32xbf16>, vector<8x32xf32> -> vector<8x32xf32>
    %44 = vector.extract_strided_slice %3 {offsets = [0, 8], sizes = [8, 8], strides = [1, 1]} : vector<8x32xf32> to vector<8x8xf32>
    %45 = arith.truncf %44 : vector<8x8xf32> to vector<8x8xbf16>
    %46 = vector.extract_strided_slice %5 {offsets = [0, 8], sizes = [16, 8], strides = [1, 1]} : vector<16x32xf32> to vector<16x8xf32>
    %47 = arith.truncf %46 : vector<16x8xf32> to vector<16x8xbf16>
    %48 = vector.extract_strided_slice %7 {offsets = [0, 8], sizes = [16, 8], strides = [1, 1]} : vector<16x32xf32> to vector<16x8xf32>
    %49 = arith.truncf %48 : vector<16x8xf32> to vector<16x8xbf16>
    %cst_20 = arith.constant dense<0.000000e+00> : vector<8x16xf32>
    %50 = tpu.matmul %45, %47, %cst_20 {dimension_numbers = #tpu.dot_dimension_numbers<[1], [1], [0], [0], [0, 0, 1, 0], [], []>} : vector<8x8xbf16>, vector<16x8xbf16>, vector<8x16xf32> -> vector<8x16xf32>
    %c0_i32_21 = arith.constant 0 : i32
    %51 = vector.broadcast %c0_i32_21 : i32 to vector<1x16xi32>
    %52 = arith.cmpi eq, %10, %51 : vector<1x16xi32>
    %cst_22 = arith.constant -1.000000e+30 : f32
    %53 = vector.shape_cast %52 : vector<1x16xi1> to vector<1x16xi1>
    %54 = vector.broadcast %53 : vector<1x16xi1> to vector<8x16xi1>
    %55 = vector.broadcast %cst_22 : f32 to vector<8x16xf32>
    %56 = arith.select %54, %55, %50 : vector<8x16xi1>, vector<8x16xf32>
    %cst_23 = arith.constant dense<0xFF800000> : vector<8xf32>
    %57 = vector.multi_reduction <maximumf>, %56, %cst_23 [1] : vector<8x16xf32> to vector<8xf32>
    %58 = vector.shape_cast %57 : vector<8xf32> to vector<8x1xf32>
    %59 = vector.broadcast %58 : vector<8x1xf32> to vector<8x16xf32>
    %60 = arith.subf %56, %59 : vector<8x16xf32>
    %61 = math.exp %60 : vector<8x16xf32>
    %cst_24 = arith.constant dense<0.000000e+00> : vector<8xf32>
    %62 = vector.multi_reduction <add>, %61, %cst_24 [1] : vector<8x16xf32> to vector<8xf32>
    %63 = vector.shape_cast %62 : vector<8xf32> to vector<8x1xf32>
    %64 = tpu.reciprocal %63 {approx = true} : vector<8x1xf32> -> vector<8x1xf32>
    %65 = arith.mulf %63, %64 : vector<8x1xf32>
    %cst_25 = arith.constant 2.000000e+00 : f32
    %66 = vector.broadcast %cst_25 : f32 to vector<8x1xf32>
    %67 = arith.subf %66, %65 : vector<8x1xf32>
    %68 = arith.mulf %64, %67 : vector<8x1xf32>
    %69 = vector.broadcast %68 : vector<8x1xf32> to vector<8x16xf32>
    %70 = arith.mulf %61, %69 : vector<8x16xf32>
    %71 = arith.truncf %70 : vector<8x16xf32> to vector<8x16xbf16>
    %cst_26 = arith.constant dense<0.000000e+00> : vector<8x8xf32>
    %72 = tpu.matmul %71, %49, %cst_26 {dimension_numbers = #tpu.dot_dimension_numbers<[1], [0], [0], [1], [0, 0, 1, 1], [], []>} : vector<8x16xbf16>, vector<16x8xbf16>, vector<8x8xf32> -> vector<8x8xf32>
    %73 = arith.truncf %72 : vector<8x8xf32> to vector<8x8xbf16>
    %74 = vector.extract_strided_slice %8 {offsets = [8, 0], sizes = [8, 32], strides = [1, 1]} : vector<32x32xf32> to vector<8x32xf32>
    %75 = arith.truncf %74 : vector<8x32xf32> to vector<8x32xbf16>
    %cst_27 = arith.constant dense<0.000000e+00> : vector<8x32xf32>
    %76 = tpu.matmul %73, %75, %cst_27 {dimension_numbers = #tpu.dot_dimension_numbers<[1], [0], [0], [1], [0, 0, 1, 1], [], []>} : vector<8x8xbf16>, vector<8x32xbf16>, vector<8x32xf32> -> vector<8x32xf32>
    %77 = arith.addf %43, %76 : vector<8x32xf32>
    %78 = vector.extract_strided_slice %3 {offsets = [0, 16], sizes = [8, 8], strides = [1, 1]} : vector<8x32xf32> to vector<8x8xf32>
    %79 = arith.truncf %78 : vector<8x8xf32> to vector<8x8xbf16>
    %80 = vector.extract_strided_slice %5 {offsets = [0, 16], sizes = [16, 8], strides = [1, 1]} : vector<16x32xf32> to vector<16x8xf32>
    %81 = arith.truncf %80 : vector<16x8xf32> to vector<16x8xbf16>
    %82 = vector.extract_strided_slice %7 {offsets = [0, 16], sizes = [16, 8], strides = [1, 1]} : vector<16x32xf32> to vector<16x8xf32>
    %83 = arith.truncf %82 : vector<16x8xf32> to vector<16x8xbf16>
    %cst_28 = arith.constant dense<0.000000e+00> : vector<8x16xf32>
    %84 = tpu.matmul %79, %81, %cst_28 {dimension_numbers = #tpu.dot_dimension_numbers<[1], [1], [0], [0], [0, 0, 1, 0], [], []>} : vector<8x8xbf16>, vector<16x8xbf16>, vector<8x16xf32> -> vector<8x16xf32>
    %c0_i32_29 = arith.constant 0 : i32
    %85 = vector.broadcast %c0_i32_29 : i32 to vector<1x16xi32>
    %86 = arith.cmpi eq, %10, %85 : vector<1x16xi32>
    %cst_30 = arith.constant -1.000000e+30 : f32
    %87 = vector.shape_cast %86 : vector<1x16xi1> to vector<1x16xi1>
    %88 = vector.broadcast %87 : vector<1x16xi1> to vector<8x16xi1>
    %89 = vector.broadcast %cst_30 : f32 to vector<8x16xf32>
    %90 = arith.select %88, %89, %84 : vector<8x16xi1>, vector<8x16xf32>
    %cst_31 = arith.constant dense<0xFF800000> : vector<8xf32>
    %91 = vector.multi_reduction <maximumf>, %90, %cst_31 [1] : vector<8x16xf32> to vector<8xf32>
    %92 = vector.shape_cast %91 : vector<8xf32> to vector<8x1xf32>
    %93 = vector.broadcast %92 : vector<8x1xf32> to vector<8x16xf32>
    %94 = arith.subf %90, %93 : vector<8x16xf32>
    %95 = math.exp %94 : vector<8x16xf32>
    %cst_32 = arith.constant dense<0.000000e+00> : vector<8xf32>
    %96 = vector.multi_reduction <add>, %95, %cst_32 [1] : vector<8x16xf32> to vector<8xf32>
    %97 = vector.shape_cast %96 : vector<8xf32> to vector<8x1xf32>
    %98 = tpu.reciprocal %97 {approx = true} : vector<8x1xf32> -> vector<8x1xf32>
    %99 = arith.mulf %97, %98 : vector<8x1xf32>
    %cst_33 = arith.constant 2.000000e+00 : f32
    %100 = vector.broadcast %cst_33 : f32 to vector<8x1xf32>
    %101 = arith.subf %100, %99 : vector<8x1xf32>
    %102 = arith.mulf %98, %101 : vector<8x1xf32>
    %103 = vector.broadcast %102 : vector<8x1xf32> to vector<8x16xf32>
    %104 = arith.mulf %95, %103 : vector<8x16xf32>
    %105 = arith.truncf %104 : vector<8x16xf32> to vector<8x16xbf16>
    %cst_34 = arith.constant dense<0.000000e+00> : vector<8x8xf32>
    %106 = tpu.matmul %105, %83, %cst_34 {dimension_numbers = #tpu.dot_dimension_numbers<[1], [0], [0], [1], [0, 0, 1, 1], [], []>} : vector<8x16xbf16>, vector<16x8xbf16>, vector<8x8xf32> -> vector<8x8xf32>
    %107 = arith.truncf %106 : vector<8x8xf32> to vector<8x8xbf16>
    %108 = vector.extract_strided_slice %8 {offsets = [16, 0], sizes = [8, 32], strides = [1, 1]} : vector<32x32xf32> to vector<8x32xf32>
    %109 = arith.truncf %108 : vector<8x32xf32> to vector<8x32xbf16>
    %cst_35 = arith.constant dense<0.000000e+00> : vector<8x32xf32>
    %110 = tpu.matmul %107, %109, %cst_35 {dimension_numbers = #tpu.dot_dimension_numbers<[1], [0], [0], [1], [0, 0, 1, 1], [], []>} : vector<8x8xbf16>, vector<8x32xbf16>, vector<8x32xf32> -> vector<8x32xf32>
    %111 = arith.addf %77, %110 : vector<8x32xf32>
    %112 = vector.extract_strided_slice %3 {offsets = [0, 24], sizes = [8, 8], strides = [1, 1]} : vector<8x32xf32> to vector<8x8xf32>
    %113 = arith.truncf %112 : vector<8x8xf32> to vector<8x8xbf16>
    %114 = vector.extract_strided_slice %5 {offsets = [0, 24], sizes = [16, 8], strides = [1, 1]} : vector<16x32xf32> to vector<16x8xf32>
    %115 = arith.truncf %114 : vector<16x8xf32> to vector<16x8xbf16>
    %116 = vector.extract_strided_slice %7 {offsets = [0, 24], sizes = [16, 8], strides = [1, 1]} : vector<16x32xf32> to vector<16x8xf32>
    %117 = arith.truncf %116 : vector<16x8xf32> to vector<16x8xbf16>
    %cst_36 = arith.constant dense<0.000000e+00> : vector<8x16xf32>
    %118 = tpu.matmul %113, %115, %cst_36 {dimension_numbers = #tpu.dot_dimension_numbers<[1], [1], [0], [0], [0, 0, 1, 0], [], []>} : vector<8x8xbf16>, vector<16x8xbf16>, vector<8x16xf32> -> vector<8x16xf32>
    %c0_i32_37 = arith.constant 0 : i32
    %119 = vector.broadcast %c0_i32_37 : i32 to vector<1x16xi32>
    %120 = arith.cmpi eq, %10, %119 : vector<1x16xi32>
    %cst_38 = arith.constant -1.000000e+30 : f32
    %121 = vector.shape_cast %120 : vector<1x16xi1> to vector<1x16xi1>
    %122 = vector.broadcast %121 : vector<1x16xi1> to vector<8x16xi1>
    %123 = vector.broadcast %cst_38 : f32 to vector<8x16xf32>
    %124 = arith.select %122, %123, %118 : vector<8x16xi1>, vector<8x16xf32>
    %cst_39 = arith.constant dense<0xFF800000> : vector<8xf32>
    %125 = vector.multi_reduction <maximumf>, %124, %cst_39 [1] : vector<8x16xf32> to vector<8xf32>
    %126 = vector.shape_cast %125 : vector<8xf32> to vector<8x1xf32>
    %127 = vector.broadcast %126 : vector<8x1xf32> to vector<8x16xf32>
    %128 = arith.subf %124, %127 : vector<8x16xf32>
    %129 = math.exp %128 : vector<8x16xf32>
    %cst_40 = arith.constant dense<0.000000e+00> : vector<8xf32>
    %130 = vector.multi_reduction <add>, %129, %cst_40 [1] : vector<8x16xf32> to vector<8xf32>
    %131 = vector.shape_cast %130 : vector<8xf32> to vector<8x1xf32>
    %132 = tpu.reciprocal %131 {approx = true} : vector<8x1xf32> -> vector<8x1xf32>
    %133 = arith.mulf %131, %132 : vector<8x1xf32>
    %cst_41 = arith.constant 2.000000e+00 : f32
    %134 = vector.broadcast %cst_41 : f32 to vector<8x1xf32>
    %135 = arith.subf %134, %133 : vector<8x1xf32>
    %136 = arith.mulf %132, %135 : vector<8x1xf32>
    %137 = vector.broadcast %136 : vector<8x1xf32> to vector<8x16xf32>
    %138 = arith.mulf %129, %137 : vector<8x16xf32>
    %139 = arith.truncf %138 : vector<8x16xf32> to vector<8x16xbf16>
    %cst_42 = arith.constant dense<0.000000e+00> : vector<8x8xf32>
    %140 = tpu.matmul %139, %117, %cst_42 {dimension_numbers = #tpu.dot_dimension_numbers<[1], [0], [0], [1], [0, 0, 1, 1], [], []>} : vector<8x16xbf16>, vector<16x8xbf16>, vector<8x8xf32> -> vector<8x8xf32>
    %141 = arith.truncf %140 : vector<8x8xf32> to vector<8x8xbf16>
    %142 = vector.extract_strided_slice %8 {offsets = [24, 0], sizes = [8, 32], strides = [1, 1]} : vector<32x32xf32> to vector<8x32xf32>
    %143 = arith.truncf %142 : vector<8x32xf32> to vector<8x32xbf16>
    %cst_43 = arith.constant dense<0.000000e+00> : vector<8x32xf32>
    %144 = tpu.matmul %141, %143, %cst_43 {dimension_numbers = #tpu.dot_dimension_numbers<[1], [0], [0], [1], [0, 0, 1, 1], [], []>} : vector<8x8xbf16>, vector<8x32xbf16>, vector<8x32xf32> -> vector<8x32xf32>
    %145 = arith.addf %111, %144 : vector<8x32xf32>
    %c0_44 = arith.constant 0 : index
    %c0_45 = arith.constant 0 : index
    %146 = vector.load %arg7[%c0_44, %c0_45] : memref<1x32xf32, #tpu.memory_space<vmem>>, vector<1x32xf32>
    %147 = vector.broadcast %146 : vector<1x32xf32> to vector<8x32xf32>
    %148 = arith.addf %145, %147 : vector<8x32xf32>
    %c0_46 = arith.constant 0 : index
    %c0_47 = arith.constant 0 : index
    %c0_48 = arith.constant 0 : index
    %149 = vector.load %arg8[%c0_46, %c0_47, %c0_48] : memref<1x8x32xf32, #tpu.memory_space<vmem>>, vector<1x8x32xf32>
    %150 = vector.shape_cast %149 : vector<1x8x32xf32> to vector<8x32xf32>
    %151 = arith.addf %148, %150 : vector<8x32xf32>
    %cst_49 = arith.constant dense<0.000000e+00> : vector<8xf32>
    %152 = vector.multi_reduction <add>, %151, %cst_49 [1] : vector<8x32xf32> to vector<8xf32>
    %153 = vector.shape_cast %152 : vector<8xf32> to vector<8x1xf32>
    %cst_50 = arith.constant 3.200000e+01 : f32
    %154 = vector.broadcast %cst_50 : f32 to vector<8x1xf32>
    %155 = arith.divf %153, %154 : vector<8x1xf32>
    %156 = vector.broadcast %155 : vector<8x1xf32> to vector<8x32xf32>
    %157 = arith.subf %151, %156 : vector<8x32xf32>
    %158 = arith.mulf %157, %157 : vector<8x32xf32>
    %cst_51 = arith.constant dense<0.000000e+00> : vector<8xf32>
    %159 = vector.multi_reduction <add>, %158, %cst_51 [1] : vector<8x32xf32> to vector<8xf32>
    %160 = vector.shape_cast %159 : vector<8xf32> to vector<8x1xf32>
    %cst_52 = arith.constant 3.200000e+01 : f32
    %161 = vector.broadcast %cst_52 : f32 to vector<8x1xf32>
    %162 = arith.divf %160, %161 : vector<8x1xf32>
    %163 = vector.broadcast %155 : vector<8x1xf32> to vector<8x32xf32>
    %164 = arith.subf %151, %163 : vector<8x32xf32>
    %cst_53 = arith.constant 9.99999974E-6 : f32
    %165 = vector.broadcast %cst_53 : f32 to vector<8x1xf32>
    %166 = arith.addf %162, %165 : vector<8x1xf32>
    %167 = math.rsqrt %166 : vector<8x1xf32>
    %168 = vector.broadcast %167 : vector<8x1xf32> to vector<8x32xf32>
    %169 = arith.mulf %164, %168 : vector<8x32xf32>
    %c0_54 = arith.constant 0 : index
    %c0_55 = arith.constant 0 : index
    %170 = vector.load %arg9[%c0_54, %c0_55] : memref<1x32xf32, #tpu.memory_space<vmem>>, vector<1x32xf32>
    %171 = vector.broadcast %170 : vector<1x32xf32> to vector<8x32xf32>
    %172 = arith.mulf %169, %171 : vector<8x32xf32>
    %c0_56 = arith.constant 0 : index
    %c0_57 = arith.constant 0 : index
    %173 = vector.load %arg10[%c0_56, %c0_57] : memref<1x32xf32, #tpu.memory_space<vmem>>, vector<1x32xf32>
    %174 = vector.broadcast %173 : vector<1x32xf32> to vector<8x32xf32>
    %175 = arith.addf %172, %174 : vector<8x32xf32>
    %c0_58 = arith.constant 0 : index
    %c0_59 = arith.constant 0 : index
    %c0_60 = arith.constant 0 : index
    %176 = vector.load %arg11[%c0_58, %c0_59, %c0_60] : memref<1x8x32xf32, #tpu.memory_space<vmem>>, vector<1x8x32xf32>
    %177 = vector.shape_cast %176 : vector<1x8x32xf32> to vector<8x32xf32>
    %178 = vector.shape_cast %175 : vector<8x32xf32> to vector<1x8x32xf32>
    tpu.vector_store %arg11[%c0_58, %c0_59, %c0_60], %178 {strides = array<i32>} : memref<1x8x32xf32, #tpu.memory_space<vmem>>, vector<1x8x32xf32>,
    return
  }
  func.func @transform_0(%arg0: i32, %arg1: i32) -> (i32, i32, i32) {
    %c0_i32 = arith.constant 0 : i32
    %c0_i32_0 = arith.constant 0 : i32
    return %arg0, %arg1, %c0_i32 : i32, i32, i32
  }
  func.func @transform_1(%arg0: i32, %arg1: i32) -> (i32, i32, i32) {
    %c0_i32 = arith.constant 0 : i32
    %c0_i32_0 = arith.constant 0 : i32
    %c0_i32_1 = arith.constant 0 : i32
    return %arg0, %c0_i32, %c0_i32_0 : i32, i32, i32
  }
  func.func @transform_2(%arg0: i32, %arg1: i32) -> (i32, i32, i32) {
    %c0_i32 = arith.constant 0 : i32
    %c0_i32_0 = arith.constant 0 : i32
    %c0_i32_1 = arith.constant 0 : i32
    return %arg0, %c0_i32, %c0_i32_0 : i32, i32, i32
  }
  func.func @transform_3(%arg0: i32, %arg1: i32) -> (i32, i32, i32) {
    %c0_i32 = arith.constant 0 : i32
    %c0_i32_0 = arith.constant 0 : i32
    %c0_i32_1 = arith.constant 0 : i32
    return %arg0, %c0_i32, %c0_i32_0 : i32, i32, i32
  }
  func.func @transform_4(%arg0: i32, %arg1: i32) -> (i32, i32) {
    %c0_i32 = arith.constant 0 : i32
    %c0_i32_0 = arith.constant 0 : i32
    %c0_i32_1 = arith.constant 0 : i32
    return %c0_i32, %c0_i32_0 : i32, i32
  }
  func.func @transform_5(%arg0: i32, %arg1: i32) -> (i32, i32) {
    %c0_i32 = arith.constant 0 : i32
    %c0_i32_0 = arith.constant 0 : i32
    %c0_i32_1 = arith.constant 0 : i32
    return %c0_i32, %c0_i32_0 : i32, i32
  }
  func.func @transform_6(%arg0: i32, %arg1: i32) -> (i32, i32, i32) {
    %c0_i32 = arith.constant 0 : i32
    %c0_i32_0 = arith.constant 0 : i32
    return %arg0, %arg1, %c0_i32 : i32, i32, i32
  }
  func.func @transform_7(%arg0: i32, %arg1: i32) -> (i32, i32) {
    %c0_i32 = arith.constant 0 : i32
    %c0_i32_0 = arith.constant 0 : i32
    %c0_i32_1 = arith.constant 0 : i32
    return %c0_i32, %c0_i32_0 : i32, i32
  }
  func.func @transform_8(%arg0: i32, %arg1: i32) -> (i32, i32) {
    %c0_i32 = arith.constant 0 : i32
    %c0_i32_0 = arith.constant 0 : i32
    %c0_i32_1 = arith.constant 0 : i32
    return %c0_i32, %c0_i32_0 : i32, i32
  }
  func.func @transform_9(%arg0: i32, %arg1: i32) -> (i32, i32, i32) {
    %c0_i32 = arith.constant 0 : i32
    %c0_i32_0 = arith.constant 0 : i32
    return %arg0, %arg1, %c0_i32 : i32, i32, i32
  }
}

module attributes {stable_mosaic.version = 11 : i64} {
  func.func @kernel(%arg0: i32, %arg1: i32, %arg2: memref<8x32xf32, #tpu.memory_space<vmem>>, %arg3: memref<32x64xf32, #tpu.memory_space<vmem>>, %arg4: memref<1x64xf32, #tpu.memory_space<vmem>>, %arg5: memref<64x32xf32, #tpu.memory_space<vmem>>, %arg6: memref<1x32xf32, #tpu.memory_space<vmem>>, %arg7: memref<1x32xf32, #tpu.memory_space<vmem>>, %arg8: memref<1x32xf32, #tpu.memory_space<vmem>>, %arg9: memref<8x32xf32, #tpu.memory_space<vmem>>, %arg10: memref<8x32xf32, #tpu.memory_space<vmem>>) attributes {dimension_semantics = [#tpu.dimension_semantics<parallel>, #tpu.dimension_semantics<arbitrary>], iteration_bounds = array<i64: 2, 1>, scalar_prefetch = 0 : i64, scratch_operands = 1 : i64, tpu.core_type = #tpu.core_type<tc>, window_params = [{transform_indices = @transform_0, window_bounds = array<i64: 8, 32>}, {transform_indices = @transform_1, window_bounds = array<i64: 32, 64>}, {transform_indices = @transform_2, window_bounds = array<i64: 1, 64>}, {transform_indices = @transform_3, window_bounds = array<i64: 64, 32>}, {pipeline_mode = #tpu.pipeline_mode<synchronous>, transform_indices = @transform_4, window_bounds = array<i64: 1, 32>}, {pipeline_mode = #tpu.pipeline_mode<synchronous>, transform_indices = @transform_5, window_bounds = array<i64: 1, 32>}, {pipeline_mode = #tpu.pipeline_mode<synchronous>, transform_indices = @transform_6, window_bounds = array<i64: 1, 32>}, {transform_indices = @transform_7, window_bounds = array<i64: 8, 32>}]} {
    %c0_i32 = arith.constant 0 : i32
    %0 = arith.cmpi eq, %arg1, %c0_i32 : i32
    %1 = arith.extui %0 : i1 to i32
    %c0_i32_0 = arith.constant 0 : i32
    %2 = arith.cmpi ne, %1, %c0_i32_0 : i32
    scf.if %2 {
      %cst_16 = arith.constant 0.000000e+00 : f32
      %23 = vector.broadcast %cst_16 : f32 to vector<8x32xf32>
      %c0_17 = arith.constant 0 : index
      %c0_18 = arith.constant 0 : index
      %24 = vector.load %arg10[%c0_17, %c0_18] : memref<8x32xf32, #tpu.memory_space<vmem>>, vector<8x32xf32>
      tpu.vector_store %arg10[%c0_17, %c0_18], %23 {strides = array<i32>} : memref<8x32xf32, #tpu.memory_space<vmem>>, vector<8x32xf32>,
    } else {
    }
    %c0 = arith.constant 0 : index
    %c0_1 = arith.constant 0 : index
    %3 = vector.load %arg2[%c0, %c0_1] : memref<8x32xf32, #tpu.memory_space<vmem>>, vector<8x32xf32>
    %4 = arith.truncf %3 : vector<8x32xf32> to vector<8x32xbf16>
    %c0_2 = arith.constant 0 : index
    %c0_3 = arith.constant 0 : index
    %5 = vector.load %arg3[%c0_2, %c0_3] : memref<32x64xf32, #tpu.memory_space<vmem>>, vector<32x64xf32>
    %6 = arith.truncf %5 : vector<32x64xf32> to vector<32x64xbf16>
    %cst = arith.constant dense<0.000000e+00> : vector<8x64xf32>
    %7 = tpu.matmul %4, %6, %cst {dimension_numbers = #tpu.dot_dimension_numbers<[1], [0], [0], [1], [0, 0, 1, 1], [], []>} : vector<8x32xbf16>, vector<32x64xbf16>, vector<8x64xf32> -> vector<8x64xf32>
    %c0_4 = arith.constant 0 : index
    %c0_5 = arith.constant 0 : index
    %8 = vector.load %arg4[%c0_4, %c0_5] : memref<1x64xf32, #tpu.memory_space<vmem>>, vector<1x64xf32>
    %9 = vector.broadcast %8 : vector<1x64xf32> to vector<8x64xf32>
    %10 = arith.addf %7, %9 : vector<8x64xf32>
    %cst_6 = arith.constant 0.000000e+00 : f32
    %11 = vector.broadcast %cst_6 : f32 to vector<8x64xf32>
    %12 = arith.maximumf %10, %11 : vector<8x64xf32>
    %c0_7 = arith.constant 0 : index
    %c0_8 = arith.constant 0 : index
    %13 = vector.load %arg10[%c0_7, %c0_8] : memref<8x32xf32, #tpu.memory_space<vmem>>, vector<8x32xf32>
    %14 = arith.truncf %12 : vector<8x64xf32> to vector<8x64xbf16>
    %c0_9 = arith.constant 0 : index
    %c0_10 = arith.constant 0 : index
    %15 = vector.load %arg5[%c0_9, %c0_10] : memref<64x32xf32, #tpu.memory_space<vmem>>, vector<64x32xf32>
    %16 = arith.truncf %15 : vector<64x32xf32> to vector<64x32xbf16>
    %cst_11 = arith.constant dense<0.000000e+00> : vector<8x32xf32>
    %17 = tpu.matmul %14, %16, %cst_11 {dimension_numbers = #tpu.dot_dimension_numbers<[1], [0], [0], [1], [0, 0, 1, 1], [], []>} : vector<8x64xbf16>, vector<64x32xbf16>, vector<8x32xf32> -> vector<8x32xf32>
    %18 = arith.addf %13, %17 : vector<8x32xf32>
    %c0_12 = arith.constant 0 : index
    %c0_13 = arith.constant 0 : index
    %19 = vector.load %arg10[%c0_12, %c0_13] : memref<8x32xf32, #tpu.memory_space<vmem>>, vector<8x32xf32>
    tpu.vector_store %arg10[%c0_12, %c0_13], %18 {strides = array<i32>} : memref<8x32xf32, #tpu.memory_space<vmem>>, vector<8x32xf32>,
    %c0_i32_14 = arith.constant 0 : i32
    %20 = arith.cmpi eq, %arg1, %c0_i32_14 : i32
    %21 = arith.extui %20 : i1 to i32
    %c0_i32_15 = arith.constant 0 : i32
    %22 = arith.cmpi ne, %21, %c0_i32_15 : i32
    scf.if %22 {
      %c0_16 = arith.constant 0 : index
      %c0_17 = arith.constant 0 : index
      %23 = vector.load %arg10[%c0_16, %c0_17] : memref<8x32xf32, #tpu.memory_space<vmem>>, vector<8x32xf32>
      %c0_18 = arith.constant 0 : index
      %c0_19 = arith.constant 0 : index
      %24 = vector.load %arg6[%c0_18, %c0_19] : memref<1x32xf32, #tpu.memory_space<vmem>>, vector<1x32xf32>
      %25 = vector.broadcast %24 : vector<1x32xf32> to vector<8x32xf32>
      %26 = arith.addf %23, %25 : vector<8x32xf32>
      %c0_20 = arith.constant 0 : index
      %c0_21 = arith.constant 0 : index
      %27 = vector.load %arg2[%c0_20, %c0_21] : memref<8x32xf32, #tpu.memory_space<vmem>>, vector<8x32xf32>
      %28 = arith.addf %26, %27 : vector<8x32xf32>
      %cst_22 = arith.constant dense<0.000000e+00> : vector<8xf32>
      %29 = vector.multi_reduction <add>, %28, %cst_22 [1] : vector<8x32xf32> to vector<8xf32>
      %30 = vector.shape_cast %29 : vector<8xf32> to vector<8x1xf32>
      %cst_23 = arith.constant 3.200000e+01 : f32
      %31 = vector.broadcast %cst_23 : f32 to vector<8x1xf32>
      %32 = arith.divf %30, %31 : vector<8x1xf32>
      %33 = vector.broadcast %32 : vector<8x1xf32> to vector<8x32xf32>
      %34 = arith.subf %28, %33 : vector<8x32xf32>
      %35 = arith.mulf %34, %34 : vector<8x32xf32>
      %cst_24 = arith.constant dense<0.000000e+00> : vector<8xf32>
      %36 = vector.multi_reduction <add>, %35, %cst_24 [1] : vector<8x32xf32> to vector<8xf32>
      %37 = vector.shape_cast %36 : vector<8xf32> to vector<8x1xf32>
      %cst_25 = arith.constant 3.200000e+01 : f32
      %38 = vector.broadcast %cst_25 : f32 to vector<8x1xf32>
      %39 = arith.divf %37, %38 : vector<8x1xf32>
      %40 = vector.broadcast %32 : vector<8x1xf32> to vector<8x32xf32>
      %41 = arith.subf %28, %40 : vector<8x32xf32>
      %cst_26 = arith.constant 9.99999974E-6 : f32
      %42 = vector.broadcast %cst_26 : f32 to vector<8x1xf32>
      %43 = arith.addf %39, %42 : vector<8x1xf32>
      %44 = math.rsqrt %43 : vector<8x1xf32>
      %45 = vector.broadcast %44 : vector<8x1xf32> to vector<8x32xf32>
      %46 = arith.mulf %41, %45 : vector<8x32xf32>
      %c0_27 = arith.constant 0 : index
      %c0_28 = arith.constant 0 : index
      %47 = vector.load %arg7[%c0_27, %c0_28] : memref<1x32xf32, #tpu.memory_space<vmem>>, vector<1x32xf32>
      %48 = vector.broadcast %47 : vector<1x32xf32> to vector<8x32xf32>
      %49 = arith.mulf %46, %48 : vector<8x32xf32>
      %c0_29 = arith.constant 0 : index
      %c0_30 = arith.constant 0 : index
      %50 = vector.load %arg8[%c0_29, %c0_30] : memref<1x32xf32, #tpu.memory_space<vmem>>, vector<1x32xf32>
      %51 = vector.broadcast %50 : vector<1x32xf32> to vector<8x32xf32>
      %52 = arith.addf %49, %51 : vector<8x32xf32>
      %c0_31 = arith.constant 0 : index
      %c0_32 = arith.constant 0 : index
      %53 = vector.load %arg9[%c0_31, %c0_32] : memref<8x32xf32, #tpu.memory_space<vmem>>, vector<8x32xf32>
      tpu.vector_store %arg9[%c0_31, %c0_32], %52 {strides = array<i32>} : memref<8x32xf32, #tpu.memory_space<vmem>>, vector<8x32xf32>,
    } else {
    }
    return
  }
  func.func @transform_0(%arg0: i32, %arg1: i32) -> (i32, i32) {
    %c0_i32 = arith.constant 0 : i32
    %c0_i32_0 = arith.constant 0 : i32
    return %arg0, %c0_i32 : i32, i32
  }
  func.func @transform_1(%arg0: i32, %arg1: i32) -> (i32, i32) {
    %c0_i32 = arith.constant 0 : i32
    %c0_i32_0 = arith.constant 0 : i32
    return %c0_i32, %arg1 : i32, i32
  }
  func.func @transform_2(%arg0: i32, %arg1: i32) -> (i32, i32) {
    %c0_i32 = arith.constant 0 : i32
    %c0_i32_0 = arith.constant 0 : i32
    return %c0_i32, %arg1 : i32, i32
  }
  func.func @transform_3(%arg0: i32, %arg1: i32) -> (i32, i32) {
    %c0_i32 = arith.constant 0 : i32
    %c0_i32_0 = arith.constant 0 : i32
    return %arg1, %c0_i32 : i32, i32
  }
  func.func @transform_4(%arg0: i32, %arg1: i32) -> (i32, i32) {
    %c0_i32 = arith.constant 0 : i32
    %c0_i32_0 = arith.constant 0 : i32
    %c0_i32_1 = arith.constant 0 : i32
    return %c0_i32, %c0_i32_0 : i32, i32
  }
  func.func @transform_5(%arg0: i32, %arg1: i32) -> (i32, i32) {
    %c0_i32 = arith.constant 0 : i32
    %c0_i32_0 = arith.constant 0 : i32
    %c0_i32_1 = arith.constant 0 : i32
    return %c0_i32, %c0_i32_0 : i32, i32
  }
  func.func @transform_6(%arg0: i32, %arg1: i32) -> (i32, i32) {
    %c0_i32 = arith.constant 0 : i32
    %c0_i32_0 = arith.constant 0 : i32
    %c0_i32_1 = arith.constant 0 : i32
    return %c0_i32, %c0_i32_0 : i32, i32
  }
  func.func @transform_7(%arg0: i32, %arg1: i32) -> (i32, i32) {
    %c0_i32 = arith.constant 0 : i32
    %c0_i32_0 = arith.constant 0 : i32
    return %arg0, %c0_i32 : i32, i32
  }
}

</mosaic_0001>

<bundles_post_ra>
// kernel: decoder_forward.14
= control target key start
LH: loop header
LB: loop body
LE: loop exit
PB: predicated region body
PF: predicated region fallthrough
CT: control target
= control target key end

     0   :  { %s418_s12 = smov 0   ;;  %s420_s13 = smov 0   ;;  %s470_s0 = inlined_call_operand.vmem [shape: f32[16,32], index: 0, kind: input, shape index: {}]   ;;  %s471_s1 = inlined_call_operand.vmem [shape: f32[32,32], index: 1, kind: input, shape index: {}]   ;;  %s472_s2 = inlined_call_operand.vmem [shape: f32[1,32], index: 2, kind: input, shape index: {}]   ;;  %s473_s3 = inlined_call_operand.vmem [shape: f32[16,32], index: 3, kind: output, shape index: {}]  }
   0x1   :  { %s422_s14 = smov 0  }
   0x2 LB: > { %s25_s15 = sadd.s32 1, %s391_s13  ;;  %p341_p0 = scmp.ge.s32.totalorder %s395_s14, 1  ;;  %s395_s14 = sphi %s422_s14, %s13_s14   ;;  %s391_s13 = sphi %s420_s13, %s475_s13   ;;  %s387_s12 = sphi %s418_s12, %s474_s12  }
   0x3   : > { %p27_p1 = scmp.ge.s32.totalorder %s25_s15, 2  ;;  %p164_p2 = scmp.lt.s32.totalorder %s395_s14, 3 }
   0x5   : > { %s477_s15 = smov (%p27_p1, %s25_s15), 0  ;;  %p165_p3 = pnand %p341_p0, %p164_p2 }
   0x6   : > { %p194_p4 = scmp.lt.s32.totalorder (!%p165_p3), %s387_s12, 1 }
   0x7   : > { %168 = sbr.rel (%p165_p3) target bundleno = 161 (0xa1), region = 32 }
   0xc   : > { %v223_v0 = vld [vmem:[%s471_s1 + $0x10] sm:$0xff]  ;;  %v224_v1 = vld [vmem:[%s471_s1 + $0x18] sm:$0xff]  ;;  %v221_v2 = vld [vmem:[%s471_s1] sm:$0xff]  ;;  %vm216_vm0 = vcmask 261120   ;;  %v397_v5 = vmov 0.0   ;;  %s479_s12 = smov (!%p194_p4, %s387_s12), 1 }
   0xd   : > { %v226_v3 = vpack.c.bf16 %v224_v1, %v223_v0  ;;  %v222_v4 = vld [vmem:[%s471_s1 + $0x8] sm:$0xff]  ;;  %217 = vst.msk [vmem:[#allocation2] sm:$0xff] %vm216_vm0, %v397_v5  ;;  %s342_s24 = sshll.u32 %s479_s12, 3  ;;  %v372_v12 = vld [vmem:[%s472_s2] ss:$0 sm:$0xff] }
   0xe   : > { %v225_v6 = vpack.c.bf16 %v222_v4, %v221_v2  ;;  %s200_s27 = scalar_lea.vmem %s470_s0, %s342_s24  ;;  %s210_s5 = scalar_lea.vmem %s473_s3, %s342_s24 }
   0xf   : > { %237 = vmatpush.bf16.msra.mxu0 %v226_v3  ;;  %v218_v7 = vld [vmem:[%s200_s27] sm:$0xff] }
  0x10   : > { %v219_v8 = vpack.c.bf16 %v218_v7, %v218_v7 }
  0x13   : > { %238 = vmatpush.bf16.msra.mxu0 %v225_v6 }
  0x14   : > { %v220_v9 = vld [vmem:[#allocation2] sm:$0xff] }
  0x16   : > { %344 = vmatmul.msk.bf16.vlgmr.msra.gmra.mxu0 %vm216_vm0, %v219_v8 }
  0x93   : > { %v240_v10 = vpop.f32.mrf.mxu0 }
  0x94   : > { %v244_v11 = vadd.f32 %v240_v10, %v220_v9 }
  0x96   : > { %245 = vst.msk [vmem:[#allocation2] sm:$0xff] %vm216_vm0, %v244_v11 }
  0x9b   : > { %v242_v13 = vpop.f32.mrf.mxu0 }
  0x9d   : > { %v249_v14 = vld [vmem:[#allocation2] sm:$0xff] }
  0x9e   : > { %v254_v15 = vadd.f32 %v372_v12, %v249_v14 }
  0xa0   : > { %255 = vst.msk [vmem:[%s210_s5] sm:$0xff] %vm216_vm0, %v254_v15 }
  0xa1 PF: > { %s13_s14 = sadd.s32 1, %s395_s14   ;;  %s474_s12 = smov %s391_s13 }
  0xa2   : > { %p10_p5 = scmp.ge.s32.totalorder %s13_s14, 4   ;;  %s475_s13 = smov %s477_s15 }
  0xa4   :  { %12 = sbr.rel (!%p10_p5) target bundleno = 2 (0x2), region = 73 }

// kernel: decoder_forward.12
= control target key start
LH: loop header
LB: loop body
LE: loop exit
PB: predicated region body
PF: predicated region fallthrough
CT: control target
= control target key end

     0   :  { %s835_s30 = smov 0   ;;  %s837_s10 = smov 0   ;;  %s937_s0 = inlined_call_operand.vmem [shape: f32[16,32], index: 0, kind: input, shape index: {}]   ;;  %s938_s1 = inlined_call_operand.vmem [shape: f32[32,32], index: 1, kind: input, shape index: {}]   ;;  %s939_s2 = inlined_call_operand.vmem [shape: f32[32,32], index: 2, kind: input, shape index: {}]   ;;  %s940_s3 = inlined_call_operand.vmem [shape: f32[32,32], index: 3, kind: input, shape index: {}]   ;;  %s941_s4 = inlined_call_operand.vmem [shape: f32[1,32], index: 4, kind: input, shape index: {}]   ;;  %s942_s5 = inlined_call_operand.vmem [shape: f32[1,32], index: 5, kind: input, shape index: {}]   ;;  %s943_s6 = inlined_call_operand.vmem [shape: f32[1,32], index: 6, kind: input, shape index: {}]   ;;  %s944_s7 = inlined_call_operand.vmem [shape: f32[16,32], index: 7, kind: output, shape index: {0}]   ;;  %s945_s8 = inlined_call_operand.vmem [shape: f32[16,32], index: 8, kind: output, shape index: {1}]   ;;  %s946_s9 = inlined_call_operand.vmem [shape: f32[16,32], index: 9, kind: output, shape index: {2}]  }
   0x1   :  { %s839_s11 = smov 0  }
   0x2 LB: > { %s32_s12 = sadd.s32 1, %s778_s10  ;;  %p722_p0 = scmp.ge.s32.totalorder %s782_s11, 1  ;;  %s782_s11 = sphi %s839_s11, %s20_s11   ;;  %s778_s10 = sphi %s837_s10, %s948_s10   ;;  %s774_s30 = sphi %s835_s30, %s947_s30  }
   0x3   : > { %p34_p1 = scmp.ge.s32.totalorder %s32_s12, 2  ;;  %p341_p2 = scmp.lt.s32.totalorder %s782_s11, 3 }
   0x5   : > { %s950_s12 = smov (%p34_p1, %s32_s12), 0  ;;  %p342_p3 = pnand %p722_p0, %p341_p2 }
   0x6   : > { %p401_p4 = scmp.lt.s32.totalorder (!%p342_p3), %s774_s30, 1 }
   0x7   : > { %345 = sbr.rel (%p342_p3) target bundleno = 169 (0xa9), region = 48 }
   0xc   : > { %v452_v0 = vld [vmem:[%s938_s1 + $0x10] sm:$0xff]  ;;  %v453_v1 = vld [vmem:[%s938_s1 + $0x18] sm:$0xff]  ;;  %vm443_vm0 = vcmask 261120   ;;  %v784_v7 = vmov 0.0   ;;  %v450_v10 = vld [vmem:[%s938_s1] sm:$0xff]  ;;  %s952_s30 = smov (!%p401_p4, %s774_s30), 1 }
   0xd   : > { %v478_v2 = vld [vmem:[%s939_s2 + $0x10] sm:$0xff]  ;;  %v455_v3 = vpack.c.bf16 %v453_v1, %v452_v0  ;;  %v479_v4 = vld [vmem:[%s939_s2 + $0x18] sm:$0xff]  ;;  %444 = vst.msk [vmem:[#allocation2] sm:$0xff] %vm443_vm0, %v784_v7  ;;  %v451_v11 = vld [vmem:[%s938_s1 + $0x8] sm:$0xff]  ;;  %s892_s20 = sshll.u32 %s952_s30, 3 }
   0xe   : > { %v500_v5 = vld [vmem:[%s940_s3 + $0x10] sm:$0xff]  ;;  %v501_v6 = vld [vmem:[%s940_s3 + $0x18] sm:$0xff]  ;;  %v481_v8 = vpack.c.bf16 %v479_v4, %v478_v2  ;;  %v476_v12 = vld [vmem:[%s939_s2] sm:$0xff]  ;;  %445 = vst.msk [vmem:[#allocation3] sm:$0xff] %vm443_vm0, %v784_v7  ;;  %v454_v13 = vpack.c.bf16 %v451_v11, %v450_v10  ;;  %s407_s23 = scalar_lea.vmem %s937_s0, %s892_s20  ;;  %s429_s29 = scalar_lea.vmem %s944_s7, %s892_s20 }
   0xf   : > { %v503_v9 = vpack.c.bf16 %v501_v6, %v500_v5  ;;  %466 = vmatpush.bf16.msra.mxu0 %v455_v3  ;;  %v477_v14 = vld [vmem:[%s939_s2 + $0x8] sm:$0xff]  ;;  %v498_v15 = vld [vmem:[%s940_s3] sm:$0xff]  ;;  %446 = vst.msk [vmem:[#allocation4] sm:$0xff] %vm443_vm0, %v784_v7  ;;  %s433_s15 = scalar_lea.vmem %s945_s8, %s892_s20  ;;  %s437_s21 = scalar_lea.vmem %s946_s9, %s892_s20 }
  0x10   : > { %v499_v16 = vld [vmem:[%s940_s3 + $0x8] sm:$0xff]  ;;  %488 = vmatpush.bf16.msra.mxu1 %v481_v8  ;;  %v480_v17 = vpack.c.bf16 %v477_v14, %v476_v12  ;;  %v447_v19 = vld [vmem:[%s407_s23] sm:$0xff] }
  0x11   : > { %510 = vmatpush.bf16.msra.mxu2 %v503_v9  ;;  %v502_v18 = vpack.c.bf16 %v499_v16, %v498_v15  ;;  %v448_v20 = vpack.c.bf16 %v447_v19, %v447_v19  ;;  %v757_v28 = vld [vmem:[%s941_s4] ss:$0 sm:$0xff] }
  0x12   : > { %v758_v30 = vld [vmem:[%s942_s5] ss:$0 sm:$0xff] }
  0x13   : > { %467 = vmatpush.bf16.msra.mxu0 %v454_v13  ;;  %v759_v38 = vld [vmem:[%s943_s6] ss:$0 sm:$0xff] }
  0x14   : > { %489 = vmatpush.bf16.msra.mxu1 %v480_v17  ;;  %v449_v21 = vld [vmem:[#allocation2] sm:$0xff] }
  0x15   : > { %511 = vmatpush.bf16.msra.mxu2 %v502_v18  ;;  %v475_v22 = vld [vmem:[#allocation3] sm:$0xff] }
  0x16   : > { %727 = vmatmul.msk.bf16.vlgmr.msra.gmra.mxu0 %vm443_vm0, %v448_v20  ;;  %v497_v27 = vld [vmem:[#allocation4] sm:$0xff] }
  0x17   : > { %728 = vmatmul.msk.bf16.vlgmr.msra.gmra.mxu1 %vm443_vm0, %v448_v20 }
  0x18   : > { %729 = vmatmul.msk.bf16.vlgmr.msra.gmra.mxu2 %vm443_vm0, %v448_v20 }
  0x93   : > { %v469_v23 = vpop.f32.mrf.mxu0 }
  0x94   : > { %v473_v24 = vadd.f32 %v469_v23, %v449_v21  ;;  %v491_v25 = vpop.f32.mrf.mxu1 }
  0x95   : > { %v495_v26 = vadd.f32 %v491_v25, %v475_v22 }
  0x96   : > { %474 = vst.msk [vmem:[#allocation2] sm:$0xff] %vm443_vm0, %v473_v24 }
  0x97   : > { %496 = vst.msk [vmem:[#allocation3] sm:$0xff] %vm443_vm0, %v495_v26 }
  0x9b   : > { %v513_v29 = vpop.f32.mrf.mxu2  ;;  %v471_v32 = vpop.f32.mrf.mxu0 }
  0x9c   : > { %v517_v31 = vadd.f32 %v513_v29, %v497_v27  ;;  %v493_v33 = vpop.f32.mrf.mxu1 }
  0x9d   : > { %v522_v34 = vld [vmem:[#allocation2] sm:$0xff] }
  0x9e   : > { %518 = vst.msk [vmem:[#allocation4] sm:$0xff] %vm443_vm0, %v517_v31  ;;  %v527_v35 = vadd.f32 %v757_v28, %v522_v34  ;;  %v529_v36 = vld [vmem:[#allocation3] sm:$0xff] }
  0x9f   : > { %v534_v37 = vadd.f32 %v758_v30, %v529_v36 }
  0xa0   : > { %528 = vst.msk [vmem:[%s429_s29] sm:$0xff] %vm443_vm0, %v527_v35 }
  0xa1   : > { %535 = vst.msk [vmem:[%s433_s15] sm:$0xff] %vm443_vm0, %v534_v37 }
  0xa3   : > { %v515_v39 = vpop.f32.mrf.mxu2 }
  0xa5   : > { %v536_v40 = vld [vmem:[#allocation4] sm:$0xff] }
  0xa6   : > { %v541_v41 = vadd.f32 %v759_v38, %v536_v40 }
  0xa8   : > { %542 = vst.msk [vmem:[%s437_s21] sm:$0xff] %vm443_vm0, %v541_v41 }
  0xa9 PF: > { %s20_s11 = sadd.s32 1, %s782_s11   ;;  %s947_s30 = smov %s778_s10 }
  0xaa   : > { %p17_p5 = scmp.ge.s32.totalorder %s20_s11, 4   ;;  %s948_s10 = smov %s950_s12 }
  0xac   :  { %19 = sbr.rel (!%p17_p5) target bundleno = 2 (0x2), region = 119 }

// kernel: decoder_forward.15
= control target key start
LH: loop header
LB: loop body
LE: loop exit
PB: predicated region body
PF: predicated region fallthrough
CT: control target
= control target key end

     0   :  { %s664_s21 = smov 0   ;;  %s666_s22 = smov 0   ;;  %s744_s0 = inlined_call_operand.vmem [shape: f32[32,32], index: 0, kind: input, shape index: {}]   ;;  %s745_s1 = inlined_call_operand.vmem [shape: f32[32,32], index: 1, kind: input, shape index: {}]   ;;  %s746_s2 = inlined_call_operand.vmem [shape: f32[32,32], index: 2, kind: input, shape index: {}]   ;;  %s747_s3 = inlined_call_operand.vmem [shape: f32[1,32], index: 3, kind: input, shape index: {}]   ;;  %s748_s4 = inlined_call_operand.vmem [shape: f32[1,32], index: 4, kind: input, shape index: {}]   ;;  %s749_s5 = inlined_call_operand.vmem [shape: f32[32,32], index: 5, kind: output, shape index: {0}]   ;;  %s750_s6 = inlined_call_operand.vmem [shape: f32[32,32], index: 6, kind: output, shape index: {1}]  }
   0x1   :  { %s668_s23 = smov 0  }
   0x2 LB: > { %s29_s24 = sadd.s32 1, %s622_s22  ;;  %p566_p0 = scmp.ge.s32.totalorder %s626_s23, 1  ;;  %s626_s23 = sphi %s668_s23, %s17_s23   ;;  %s622_s22 = sphi %s666_s22, %s752_s22   ;;  %s618_s21 = sphi %s664_s21, %s751_s21  }
   0x3   : > { %p31_p1 = scmp.ge.s32.totalorder %s29_s24, 2  ;;  %p255_p2 = scmp.lt.s32.totalorder %s626_s23, 3 }
   0x5   : > { %s754_s24 = smov (%p31_p1, %s29_s24), 0  ;;  %p256_p3 = pnand %p566_p0, %p255_p2 }
   0x6   : > { %s567_s7 = sshll.u32 (!%p256_p3), %s618_s21, 1 }
   0x7   : > { %259 = sbr.rel (%p256_p3) target bundleno = 170 (0xaa), region = 40  ;;  %p304_p4 = scmp.lt.s32.totalorder (!%p256_p3), %s567_s7, 3 }
   0xc   : > { %v353_v0 = vld [vmem:[%s745_s1 + $0x10] sm:$0xff]  ;;  %v354_v1 = vld [vmem:[%s745_s1 + $0x18] sm:$0xff]  ;;  %vm341_vm0 = vcmask 261120   ;;  %v351_v5 = vld [vmem:[%s745_s1] sm:$0xff]  ;;  %v628_v7 = vmov 0.0   ;;  %s756_s7 = smov (!%p304_p4, %s567_s7), 3 }
   0xd   : > { %v383_v2 = vld [vmem:[%s746_s2 + $0x10] sm:$0xff]  ;;  %v356_v3 = vpack.c.bf16 %v354_v1, %v353_v0  ;;  %v384_v4 = vld [vmem:[%s746_s2 + $0x18] sm:$0xff]  ;;  %v352_v6 = vld [vmem:[%s745_s1 + $0x8] sm:$0xff]  ;;  %342 = vst.msk [vmem:[#allocation2] sm:$0xff] %vm341_vm0, %v628_v7  ;;  %s568_s18 = sshll.u32 %s756_s7, 3 }
   0xe   : > { %v386_v8 = vpack.c.bf16 %v384_v4, %v383_v2  ;;  %v381_v9 = vld [vmem:[%s746_s2] sm:$0xff]  ;;  %v382_v10 = vld [vmem:[%s746_s2 + $0x8] sm:$0xff]  ;;  %343 = vst.msk [vmem:[#allocation2 + $0x8] sm:$0xff] %vm341_vm0, %v628_v7  ;;  %v355_v11 = vpack.c.bf16 %v352_v6, %v351_v5  ;;  %s310_s21 = scalar_lea.vmem %s744_s0, %s568_s18  ;;  %s328_s7 = scalar_lea.vmem %s749_s5, %s568_s18 }
   0xf   : > { %367 = vmatpush.bf16.msra.mxu0 %v356_v3  ;;  %344 = vst.msk [vmem:[#allocation3] sm:$0xff] %vm341_vm0, %v628_v7  ;;  %v385_v12 = vpack.c.bf16 %v382_v10, %v381_v9  ;;  %v346_v13 = vld [vmem:[%s310_s21] sm:$0xff]  ;;  %v347_v14 = vld [vmem:[%s310_s21 + $0x8] sm:$0xff]  ;;  %s334_s10 = scalar_lea.vmem %s750_s6, %s568_s18 }
  0x10   : > { %393 = vmatpush.bf16.msra.mxu1 %v386_v8  ;;  %345 = vst.msk [vmem:[#allocation3 + $0x8] sm:$0xff] %vm341_vm0, %v628_v7  ;;  %v348_v15 = vpack.c.bf16 %v347_v14, %v346_v13  ;;  %v602_v23 = vld [vmem:[%s747_s3] ss:$0 sm:$0xff] }
  0x11   : > { %v603_v25 = vld [vmem:[%s748_s4] ss:$0 sm:$0xff] }
  0x13   : > { %368 = vmatpush.bf16.msra.mxu0 %v355_v11 }
  0x14   : > { %394 = vmatpush.bf16.msra.mxu1 %v385_v12  ;;  %v349_v16 = vld [vmem:[#allocation2] sm:$0xff] }
  0x15   : > { %v350_v22 = vld [vmem:[#allocation2 + $0x8] sm:$0xff] }
  0x16   : > { %573 = vmatmul.msk.bf16.vlgmr.msra.gmra.mxu0 %vm341_vm0, %v348_v15  ;;  %v379_v17 = vld [vmem:[#allocation3] sm:$0xff] }
  0x17   : > { %574 = vmatmul.msk.bf16.vlgmr.msra.gmra.mxu1 %vm341_vm0, %v348_v15  ;;  %v380_v24 = vld [vmem:[#allocation3 + $0x8] sm:$0xff] }
  0x93   : > { %v370_v18 = vpop.f32.mrf.mxu0 }
  0x94   : > { %v375_v19 = vadd.f32 %v370_v18, %v349_v16  ;;  %v396_v20 = vpop.f32.mrf.mxu1 }
  0x95   : > { %v401_v21 = vadd.f32 %v396_v20, %v379_v17 }
  0x96   : > { %377 = vst.msk [vmem:[#allocation2] sm:$0xff] %vm341_vm0, %v375_v19 }
  0x97   : > { %403 = vst.msk [vmem:[#allocation3] sm:$0xff] %vm341_vm0, %v401_v21 }
  0x9b   : > { %v372_v26 = vpop.f32.mrf.mxu0 }
  0x9c   : > { %v376_v27 = vadd.f32 %v372_v26, %v350_v22  ;;  %v398_v28 = vpop.f32.mrf.mxu1 }
  0x9d   : > { %v408_v29 = vld [vmem:[#allocation2] sm:$0xff]  ;;  %v402_v30 = vadd.f32 %v398_v28, %v380_v24 }
  0x9e   : > { %v414_v31 = vadd.f32 %v602_v23, %v408_v29  ;;  %v418_v32 = vld [vmem:[#allocation3] sm:$0xff]  ;;  %378 = vst.msk [vmem:[#allocation2 + $0x8] sm:$0xff] %vm341_vm0, %v376_v27 }
  0x9f   : > { %v424_v33 = vadd.f32 %v603_v25, %v418_v32  ;;  %404 = vst.msk [vmem:[#allocation3 + $0x8] sm:$0xff] %vm341_vm0, %v402_v30 }
  0xa0   : > { %416 = vst.msk [vmem:[%s328_s7] sm:$0xff] %vm341_vm0, %v414_v31 }
  0xa1   : > { %426 = vst.msk [vmem:[%s334_s10] sm:$0xff] %vm341_vm0, %v424_v33 }
  0xa5   : > { %v409_v34 = vld [vmem:[#allocation2 + $0x8] sm:$0xff] }
  0xa6   : > { %v415_v35 = vadd.f32 %v602_v23, %v409_v34  ;;  %v419_v36 = vld [vmem:[#allocation3 + $0x8] sm:$0xff] }
  0xa7   : > { %v425_v37 = vadd.f32 %v603_v25, %v419_v36 }
  0xa8   : > { %417 = vst.msk [vmem:[%s328_s7 + $0x8] sm:$0xff] %vm341_vm0, %v415_v35 }
  0xa9   : > { %427 = vst.msk [vmem:[%s334_s10 + $0x8] sm:$0xff] %vm341_vm0, %v425_v37 }
  0xaa PF: > { %s17_s23 = sadd.s32 1, %s626_s23   ;;  %s751_s21 = smov %s622_s22 }
  0xab   : > { %p14_p5 = scmp.ge.s32.totalorder %s17_s23, 4   ;;  %s752_s22 = smov %s754_s24 }
  0xad   :  { %16 = sbr.rel (!%p14_p5) target bundleno = 2 (0x2), region = 96 }

// kernel: decoder_forward.13
= control target key start
LH: loop header
LB: loop body
LE: loop exit
PB: predicated region body
PF: predicated region fallthrough
CT: control target
= control target key end

     0   :  { %s1118_s30 = smov 0   ;;  %s1120_s10 = smov 0   ;;  %s1256_s0 = inlined_call_operand.vmem [shape: f32[2,8,32], index: 0, kind: input, shape index: {}]   ;;  %s1257_s1 = inlined_call_operand.vmem [shape: f32[2,8,32], index: 1, kind: input, shape index: {}]   ;;  %s1258_s2 = inlined_call_operand.vmem [shape: f32[2,8,32], index: 2, kind: input, shape index: {}]   ;;  %s1259_s3 = inlined_call_operand.vmem [shape: s32[2,8,8], index: 3, kind: input, shape index: {}]   ;;  %s1260_s4 = inlined_call_operand.vmem [shape: f32[32,32], index: 4, kind: input, shape index: {}]   ;;  %s1261_s5 = inlined_call_operand.vmem [shape: f32[1,32], index: 5, kind: input, shape index: {}]   ;;  %s1262_s6 = inlined_call_operand.vmem [shape: f32[2,8,32], index: 6, kind: input, shape index: {}]   ;;  %s1263_s7 = inlined_call_operand.vmem [shape: f32[1,32], index: 7, kind: input, shape index: {}]   ;;  %s1264_s8 = inlined_call_operand.vmem [shape: f32[1,32], index: 8, kind: input, shape index: {}]   ;;  %s1265_s9 = inlined_call_operand.vmem [shape: f32[2,8,32], index: 9, kind: output, shape index: {}]  }
   0x1   :  { %s1122_s11 = smov 0  }
   0x2 LB: > { %s31_s12 = sadd.s32 1, %s1058_s10  ;;  %p968_p0 = scmp.ge.s32.totalorder %s1062_s11, 1  ;;  %s1062_s11 = sphi %s1122_s11, %s19_s11   ;;  %s1058_s10 = sphi %s1120_s10, %s1267_s10   ;;  %s1054_s30 = sphi %s1118_s30, %s1266_s30  }
   0x3   : > { %p33_p1 = scmp.ge.s32.totalorder %s31_s12, 2  ;;  %p351_p2 = scmp.lt.s32.totalorder %s1062_s11, 3 }
   0x5   : > { %s1269_s12 = smov (%p33_p1, %s31_s12), 0  ;;  %p352_p3 = pnand %p968_p0, %p351_p2 }
   0x6   : > { %p413_p4 = scmp.lt.s32.totalorder (!%p352_p3), %s1054_s30, 1  ;;  %s1064_s20 = smov (!%p352_p3), 120  }
   0x7   : > { %355 = sbr.rel (%p352_p3) target bundleno = 1498 (0x5da), region = 56  ;;  %s1065_s24 = smov (!%p352_p3), 104  }
   0x8   : > { %s1066_s28 = smov (!%p352_p3), 112  }
   0xc   : > { %s1271_s30 = smov (!%p413_p4, %s1054_s30), 1  ;;  %vm462_vm0 = vcmask 64512   ;;  %vm502_vm2 = vcmask 1043456   ;;  %v454_v40 = vld [vmem:[%s1260_s4] sm:$0xff]  ;;  %v455_v59 = vld [vmem:[%s1260_s4 + $0x8] sm:$0xff]  ;;  %vm795_vm3 = vcmask 261120  }
   0xd   : > { %s1136_s13 = sshll.u32 %s1271_s30, 3  ;;  %v520_v41 = vpack.c.bf16 %v454_v40, %v454_v40  ;;  %v585_v60 = vpack.c.bf16 %v455_v59, %v455_v59 }
   0xe   : > { %s423_s16 = scalar_lea.vmem %s1257_s1, %s1136_s13  ;;  %s419_s19 = scalar_lea.vmem %s1256_s0, %s1136_s13 }
   0xf   : > { %v452_v0 = vld [vmem:[%s423_s16] sm:$0xff]  ;;  %s434_s23 = scalar_lea.vmem %s1259_s3, %s1136_s13  ;;  %s427_s27 = scalar_lea.vmem %s1258_s2, %s1136_s13  ;;  %v609_v42 = vsel %vm502_vm2, %v520_v41, 0  ;;  %v590_v61 = vsel %vm502_vm2, %v585_v60, 0  ;;  %v456_v41 = vld [vmem:[%s1260_s4 + $0x10] sm:$0xff] }
  0x10   : > { %v450_v1 = vld [vmem:[%s419_s19] sm:$0xff]  ;;  %v460_v2 = vpack.c.bf16 %v452_v0, %v452_v0  ;;  %s448_s14 = scalar_lea.vmem %s1265_s9, %s1136_s13 }
  0x11   : > { %v451_v4 = vmul.f32 0.35355338, %v450_v1  ;;  %v1156_v9 = vld [vmem:[%s434_s23] sm:$0xff] }
  0x12   : > { %525 = vrot.lane.b32.xlu0 %v460_v2, %s1064_s20  ;;  %v467_v3 = vsel %vm462_vm0, %v460_v2, 0  ;;  %vm482_vm1 = vcmp.eq.s32.totalorder %v1156_v9, 0  ;;  %v453_v23 = vld [vmem:[%s427_s27] sm:$0xff] }
  0x13   : > { %476 = vmatpush.bf16.xpose.msra.mxu0 %v467_v3  ;;  %v459_v5 = vpack.c.bf16 %v451_v4, %v451_v4  ;;  %v1171_v24 = vpack.c.bf16 %v453_v23, %v453_v23 }
  0x15   : > { %v504_v25 = vsel %vm502_vm2, %v1171_v24, 0 }
  0x16   : > { %513 = vmatpush.bf16.msra.mxu1 %v504_v25 }
  0x1a   : > { %522 = vrot.lane.b32.xlu0 %v459_v5, %s1064_s20  ;;  %975 = vmatmul.msk.bf16.vlgmr.msra.gmra.mxu0 %vm462_vm0, %v459_v5 }
  0x1b   : > { %599 = vmatpush.bf16.msrb.mxu1 %v590_v61 }
  0x22   : > { %563 = vrot.lane.b32.xlu0 %v1171_v24, %s1064_s20 }
  0x2a   : > { %706 = vrot.lane.b32.xlu0 %v459_v5, %s1065_s24 }
  0x32   : > { %624 = vrot.lane.b32.xlu0 %v459_v5, %s1066_s28 }
  0x84   : > { %v526_v6 = vpop.permute.xlu0 %525 }
  0x85   : > { %v531_v7 = vsel %vm462_vm0, %v526_v6, 0 }
  0x86   : > { %540 = vmatpush.bf16.xpose.msra.mxu2 %v531_v7 }
  0x8c   : > { %v523_v8 = vpop.permute.xlu0 %522 }
  0x8d   : > { %977 = vmatmul.msk.bf16.vlgmr.msra.gmra.mxu2 %vm462_vm0, %v523_v8 }
  0x94   : > { %v564_v38 = vpop.permute.xlu0 %563 }
  0x95   : > { %v569_v39 = vsel %vm502_vm2, %v564_v38, 0 }
  0x96   : > { %578 = vmatpush.bf16.msra.mxu3 %v569_v39 }
  0x97   : > { %v478_v10 = vpop.f32.mrf.mxu0 }
  0x98   : > { %v483_v11 = vsel %vm482_vm1, -1e+30, %v478_v10 }
  0x99   : > { %v484_v12 = vsel %vm462_vm0, %v483_v11, -inf }
  0x9a   : > { %485 = vmax.xlane.f32.xlu1 %v484_v12  ;;  %618 = vmatpush.bf16.msrb.mxu3 %v609_v42  ;;  %v685_v42 = vpack.c.bf16 %v456_v41, %v456_v41 }
  0x9c   : > { %v707_v44 = vpop.permute.xlu0 %706 }
  0x9f   : > { %v480_v13 = vpop.f32.mrf.mxu0 }
  0xa4   : > { %v625_v52 = vpop.permute.xlu0 %624 }
 0x10d   : > { %v486_v14 = vpop.xlane.xlu1 %485 }
 0x10e   : > { %v487_v15 = vsub.f32 %v483_v11, %v486_v14 }
 0x110   : > { %v488_v16 = vmul.f32 1.442695, %v487_v15  ;;  %v542_v17 = vpop.f32.mrf.mxu2 }
 0x111   : > { %v546_v18 = vsel %vm482_vm1, -1e+30, %v542_v17 }
 0x112   : > { %1020 = vpow2.f32 %v488_v16  ;;  %v547_v19 = vsel %vm462_vm0, %v546_v18, -inf }
 0x113   : > { %548 = vmax.xlane.f32.xlu2 %v547_v19 }
 0x118   : > { %v1021_v20 = vpop.eup %1020  ;;  %v544_v21 = vpop.f32.mrf.mxu2 }
 0x119   : > { %v490_v22 = vsel %vm462_vm0, %v1021_v20, 0.0 }
 0x11a   : > { %491 = vadd.xlane.f32.xlu1 %v490_v22 }
 0x133   : > { %708 = vrot.lane.b32.xlu1 %v460_v2, %s1065_s24 }
 0x186   : > { %v549_v26 = vpop.xlane.xlu2 %548 }
 0x187   : > { %v550_v27 = vsub.f32 %v546_v18, %v549_v26 }
 0x189   : > { %v551_v28 = vmul.f32 1.442695, %v550_v27 }
 0x18b   : > { %1022 = vpow2.f32 %v551_v28 }
 0x18d   : > { %v492_v29 = vpop.xlane.xlu1 %491 }
 0x18e   : > { %1024 = vrcp.f32 %v492_v29 }
 0x191   : > { %v1023_v30 = vpop.eup %1022 }
 0x192   : > { %v553_v31 = vsel %vm462_vm0, %v1023_v30, 0.0 }
 0x193   : > { %554 = vadd.xlane.f32.xlu2 %v553_v31 }
 0x194   : > { %v1025_v32 = vpop.eup %1024 }
 0x195   : > { %v494_v33 = vmul.f32 %v1025_v32, %v492_v29 }
 0x197   : > { %v495_v34 = vsub.f32 2.0, %v494_v33 }
 0x199   : > { %v496_v35 = vmul.f32 %v1025_v32, %v495_v34 }
 0x19b   : > { %v497_v36 = vmul.f32 %v1021_v20, %v496_v35 }
 0x19d   : > { %v498_v37 = vpack.c.bf16 %v497_v36, %v497_v36 }
 0x19f   : > { %976 = vmatmul.msk.bf16.vlgmr.msra.gmra.mxu1 %vm462_vm0, %v498_v37 }
 0x1a5   : > { %v709_v51 = vpop.permute.xlu1 %708 }
 0x1a6   : > { %v714_v55 = vsel %vm462_vm0, %v709_v51, 0 }
 0x1ab   : > { %626 = vrot.lane.b32.xlu2 %v460_v2, %s1066_s28 }
 0x206   : > { %v555_v43 = vpop.xlane.xlu2 %554 }
 0x207   : > { %1026 = vrcp.f32 %v555_v43 }
 0x20d   : > { %v1027_v45 = vpop.eup %1026 }
 0x20e   : > { %v557_v46 = vmul.f32 %v1027_v45, %v555_v43  ;;  %v627_v47 = vpop.permute.xlu2 %626  ;;  %v690_v43 = vsel %vm502_vm2, %v685_v42, 0 }
 0x20f   : > { %v632_v48 = vsel %vm462_vm0, %v627_v47, 0  ;;  %699 = vmatpush.bf16.msra.mxu1 %v690_v43 }
 0x210   : > { %v558_v49 = vsub.f32 2.0, %v557_v46  ;;  %641 = vmatpush.bf16.xpose.msrb.mxu0 %v632_v48 }
 0x212   : > { %v559_v50 = vmul.f32 %v1027_v45, %v558_v49 }
 0x214   : > { %v560_v53 = vmul.f32 %v1023_v30, %v559_v50 }
 0x216   : > { %v561_v54 = vpack.c.bf16 %v560_v53, %v560_v53 }
 0x217   : > { %981 = vmatmul.msk.bf16.vlgmr.msrb.gmra.mxu0 %vm462_vm0, %v625_v52 }
 0x218   : > { %978 = vmatmul.msk.bf16.vlgmr.msra.gmra.mxu3 %vm462_vm0, %v561_v54 }
 0x219   : > { %723 = vmatpush.bf16.xpose.msra.mxu3 %v714_v55 }
 0x21c   : > { %v515_v56 = vpop.f32.mrf.mxu1 }
 0x21d   : > { %v519_v58 = vpack.c.bf16 %v515_v56, %v515_v56 }
 0x224   : > { %v517_v57 = vpop.f32.mrf.mxu1 }
 0x225   : > { %v1017_v57 = vld [vmem:[%s1261_s5] ss:$0 sm:$0xff] }
 0x228   : > { %980 = vmatmul.msk.bf16.vlgmr.msrb.gmra.mxu3 %vm462_vm0, %v519_v58 }
 0x238   : > { %984 = vmatmul.msk.bf16.vlgmr.msra.gmra.mxu3 %vm462_vm0, %v707_v44  ;;  %v457_v44 = vld [vmem:[%s1260_s4 + $0x18] sm:$0xff] }
 0x239   : > { %v767_v45 = vpack.c.bf16 %v457_v44, %v457_v44 }
 0x23b   : > { %v772_v46 = vsel %vm502_vm2, %v767_v45, 0 }
 0x294   : > { %v643_v62 = vpop.f32.mrf.mxu0 }
 0x295   : > { %v647_v63 = vsel %vm482_vm1, -1e+30, %v643_v62 }
 0x296   : > { %v648_v0 = vsel %vm462_vm0, %v647_v63, -inf }
 0x297   : > { %649 = vmax.xlane.f32.xlu0 %v648_v0 }
 0x29b   : > { %v580_v1 = vpop.f32.mrf.mxu3 }
 0x29c   : > { %v584_v2 = vpack.c.bf16 %v580_v1, %v580_v1  ;;  %v645_v3 = vpop.f32.mrf.mxu0  ;;  %v1067_v1 = vmov 32.0  }
 0x29e   : > { %979 = vmatmul.msk.bf16.vlgmr.msrb.gmra.mxu1 %vm462_vm0, %v584_v2 }
 0x2a3   : > { %v582_v4 = vpop.f32.mrf.mxu3 }
 0x2ab   : > { %v1201_v5 = vpop.f32.mrf.mxu3  ;;  %663 = vrot.lane.b32.xlu0 %v1171_v24, %s1066_s28 }
 0x2b3   : > { %v622_v6 = vpop.f32.mrf.mxu3 }
 0x2bb   : > { %v725_v7 = vpop.f32.mrf.mxu3 }
 0x2bc   : > { %v729_v8 = vsel %vm482_vm1, -1e+30, %v725_v7 }
 0x2bd   : > { %v730_v10 = vsel %vm462_vm0, %v729_v8, -inf }
 0x2be   : > { %731 = vmax.xlane.f32.xlu2 %v730_v10 }
 0x2c3   : > { %v727_v11 = vpop.f32.mrf.mxu3 }
 0x30a   : > { %v650_v12 = vpop.xlane.xlu0 %649 }
 0x30b   : > { %v651_v13 = vsub.f32 %v647_v63, %v650_v12 }
 0x30d   : > { %v652_v14 = vmul.f32 1.442695, %v651_v13 }
 0x30f   : > { %1028 = vpow2.f32 %v652_v14 }
 0x315   : > { %v1029_v15 = vpop.eup %1028 }
 0x316   : > { %v654_v16 = vsel %vm462_vm0, %v1029_v15, 0.0 }
 0x317   : > { %655 = vadd.xlane.f32.xlu1 %v654_v16 }
 0x31b   : > { %v601_v17 = vpop.f32.mrf.mxu1 }
 0x31c   : > { %v621_v55 = vadd.f32 %v1201_v5, %v601_v17 }
 0x31d   : > { %v664_v23 = vpop.permute.xlu0 %663 }
 0x31e   : > { %v669_v25 = vsel %vm502_vm2, %v664_v23, 0 }
 0x31f   : > { %678 = vmatpush.bf16.msrb.mxu2 %v669_v25  ;;  %v1019_v25 = vld [vmem:[%s1264_s8] ss:$0 sm:$0xff] }
 0x323   : > { %v603_v18 = vpop.f32.mrf.mxu1  ;;  %781 = vmatpush.bf16.msra.mxu2 %v772_v46 }
 0x330   : > { %745 = vrot.lane.b32.xlu1 %v1171_v24, %s1065_s24  ;;  %s441_s24 = scalar_lea.vmem %s1262_s6, %s1136_s13 }
 0x331   : > { %v732_v19 = vpop.xlane.xlu2 %731  ;;  %v793_v60 = vld [vmem:[%s441_s24] sm:$0xff] }
 0x332   : > { %v733_v9 = vsub.f32 %v729_v8, %v732_v19 }
 0x334   : > { %v734_v20 = vmul.f32 1.442695, %v733_v9 }
 0x336   : > { %1030 = vpow2.f32 %v734_v20 }
 0x33c   : > { %v1031_v21 = vpop.eup %1030 }
 0x33d   : > { %v736_v22 = vsel %vm462_vm0, %v1031_v21, 0.0 }
 0x33e   : > { %737 = vadd.xlane.f32.xlu2 %v736_v22  ;;  %v1018_v22 = vld [vmem:[%s1263_s7] ss:$0 sm:$0xff] }
 0x38a   : > { %v656_v26 = vpop.xlane.xlu1 %655 }
 0x38b   : > { %1032 = vrcp.f32 %v656_v26 }
 0x391   : > { %v1033_v27 = vpop.eup %1032 }
 0x392   : > { %v658_v28 = vmul.f32 %v1033_v27, %v656_v26 }
 0x394   : > { %v659_v29 = vsub.f32 2.0, %v658_v28 }
 0x396   : > { %v660_v30 = vmul.f32 %v1033_v27, %v659_v29 }
 0x398   : > { %v661_v31 = vmul.f32 %v1029_v15, %v660_v30 }
 0x39a   : > { %v662_v24 = vpack.c.bf16 %v661_v31, %v661_v31 }
 0x39c   : > { %982 = vmatmul.msk.bf16.vlgmr.msrb.gmra.mxu2 %vm462_vm0, %v662_v24 }
 0x3a2   : > { %v746_v32 = vpop.permute.xlu1 %745 }
 0x3a3   : > { %v751_v33 = vsel %vm502_vm2, %v746_v32, 0 }
 0x3a4   : > { %760 = vmatpush.bf16.msra.mxu0 %v751_v33 }
 0x3b1   : > { %v738_v34 = vpop.xlane.xlu2 %737 }
 0x3b2   : > { %1034 = vrcp.f32 %v738_v34 }
 0x3b3   : > { %1036 = vrcp.f32 %v1067_v1 }
 0x3b8   : > { %v1035_v35 = vpop.eup %1034 }
 0x3b9   : > { %v740_v36 = vmul.f32 %v1035_v35, %v738_v34  ;;  %v1037_v2 = vpop.eup %1036 }
 0x3ba   : > { %v800_v3 = vmul.f32 32.0, %v1037_v2  ;;  %vm804_vm4 = vweird.f32 %v1037_v2 }
 0x3bb   : > { %v741_v37 = vsub.f32 2.0, %v740_v36 }
 0x3bc   : > { %v801_v4 = vsub.f32 1.0, %v800_v3 }
 0x3bd   : > { %v742_v38 = vmul.f32 %v1035_v35, %v741_v37 }
 0x3be   : > { %v802_v5 = vmul.f32 %v1037_v2, %v801_v4 }
 0x3bf   : > { %v743_v39 = vmul.f32 %v1031_v21, %v742_v38 }
 0x3c0   : > { %v803_v6 = vadd.f32 %v1037_v2, %v802_v5 }
 0x3c1   : > { %v744_v40 = vpack.c.bf16 %v743_v39, %v743_v39 }
 0x3c2   : > { %v805_v7 = vsel %vm804_vm4, %v1037_v2, %v803_v6 }
 0x3c3   : > { %985 = vmatmul.msk.bf16.vlgmr.msra.gmra.mxu0 %vm462_vm0, %v744_v40 }
 0x41f   : > { %v680_v47 = vpop.f32.mrf.mxu2 }
 0x420   : > { %v684_v48 = vpack.c.bf16 %v680_v47, %v680_v47 }
 0x422   : > { %983 = vmatmul.msk.bf16.vlgmr.msra.gmra.mxu1 %vm462_vm0, %v684_v48 }
 0x427   : > { %v682_v49 = vpop.f32.mrf.mxu2 }
 0x440   : > { %v762_v50 = vpop.f32.mrf.mxu0 }
 0x441   : > { %v766_v51 = vpack.c.bf16 %v762_v50, %v762_v50 }
 0x443   : > { %986 = vmatmul.msk.bf16.vlgmr.msra.gmra.mxu2 %vm462_vm0, %v766_v51 }
 0x448   : > { %v764_v52 = vpop.f32.mrf.mxu0 }
 0x49f   : > { %v701_v53 = vpop.f32.mrf.mxu1 }
 0x4a0   : > { %v705_v56 = vadd.f32 %v701_v53, %v621_v55 }
 0x4a7   : > { %v703_v54 = vpop.f32.mrf.mxu1 }
 0x4c6   : > { %v783_v58 = vpop.f32.mrf.mxu2 }
 0x4c7   : > { %v787_v59 = vadd.f32 %v783_v58, %v705_v56 }
 0x4c9   : > { %v792_v61 = vadd.f32 %v1017_v57, %v787_v59 }
 0x4cb   : > { %v794_v62 = vadd.f32 %v793_v60, %v792_v61 }
 0x4cd   : > { %v796_v63 = vsel %vm795_vm3, %v794_v62, 0.0 }
 0x4ce   : > { %797 = vadd.xlane.f32.xlu2 %v796_v63  ;;  %v785_v0 = vpop.f32.mrf.mxu2 }
 0x541   : > { %v798_v8 = vpop.xlane.xlu2 %797 }
 0x542   : > { %v806_v10 = vmul.f32 %v805_v7, %v798_v8 }
 0x544   : > { %v807_v11 = vsub.f32 %v794_v62, %v806_v10 }
 0x546   : > { %v808_v12 = vmul.f32 %v807_v11, %v807_v11 }
 0x548   : > { %v809_v13 = vsel %vm795_vm3, %v808_v12, 0.0 }
 0x549   : > { %810 = vadd.xlane.f32.xlu2 %v809_v13 }
 0x5bc   : > { %v811_v14 = vpop.xlane.xlu2 %810 }
 0x5bd   : > { %v812_v15 = vmul.f32 %v811_v14, %v805_v7 }
 0x5bf   : > { %v813_v16 = vadd.f32 1e-05, %v812_v15 }
 0x5c1   : > { %1038 = vrsqrt.f32 %v813_v16  ;;  %vm820_vm6 = vweird.f32 %v813_v16 }
 0x5c7   : > { %v1039_v17 = vpop.eup %1038 }
 0x5c8   : > { %v815_v18 = vmul.f32 %v1039_v17, %v813_v16  ;;  %vm821_vm5 = vweird.f32 %v1039_v17 }
 0x5c9   : > { %vm822_vm7 = vmor %vm820_vm6, %vm821_vm5 }
 0x5ca   : > { %v816_v19 = vmul.f32 %v1039_v17, %v815_v18 }
 0x5cc   : > { %v817_v9 = vmul.f32 0.5, %v816_v19 }
 0x5ce   : > { %v818_v20 = vsub.f32 1.5, %v817_v9 }
 0x5d0   : > { %v819_v21 = vmul.f32 %v1039_v17, %v818_v20 }
 0x5d2   : > { %v823_v23 = vsel %vm822_vm7, %v1039_v17, %v819_v21 }
 0x5d3   : > { %v824_v26 = vmul.f32 %v823_v23, %v807_v11 }
 0x5d5   : > { %v829_v27 = vmul.f32 %v1018_v22, %v824_v26 }
 0x5d7   : > { %v834_v28 = vadd.f32 %v1019_v25, %v829_v27 }
 0x5d9   : > { %835 = vst.msk [vmem:[%s448_s14] sm:$0xff] %vm795_vm3, %v834_v28 }
 0x5da PF: > { %s19_s11 = sadd.s32 1, %s1062_s11   ;;  %s1266_s30 = smov %s1058_s10 }
 0x5db   : > { %p16_p5 = scmp.ge.s32.totalorder %s19_s11, 4   ;;  %s1267_s10 = smov %s1269_s12 }
 0x5dd   :  { %18 = sbr.rel (!%p16_p5) target bundleno = 2 (0x2), region = 98 }

// kernel: decoder_forward.18
= control target key start
LH: loop header
LB: loop body
LE: loop exit
PB: predicated region body
PF: predicated region fallthrough
CT: control target
= control target key end

     0   :  { %15 = vsyncpa [#allocation6], 0  ;;  %s910_s30 = smov 0   ;;  %s912_s10 = smov 0   ;;  %s1013_s0 = inlined_call_operand.vmem [shape: f32[16,32], index: 0, kind: input, shape index: {}]   ;;  %s1014_s1 = inlined_call_operand.vmem [shape: f32[32,32], index: 1, kind: input, shape index: {}]   ;;  %s1015_s2 = inlined_call_operand.vmem [shape: f32[32,32], index: 2, kind: input, shape index: {}]   ;;  %s1016_s3 = inlined_call_operand.vmem [shape: f32[32,32], index: 3, kind: input, shape index: {}]   ;;  %s1017_s4 = inlined_call_operand.vmem [shape: f32[1,32], index: 4, kind: input, shape index: {}]   ;;  %s1018_s5 = inlined_call_operand.vmem [shape: f32[1,32], index: 5, kind: input, shape index: {}]   ;;  %s1019_s6 = inlined_call_operand.hbm [shape: f32[1,32], index: 6, kind: input, shape index: {}]   ;;  %s1020_s7 = inlined_call_operand.vmem [shape: f32[16,32], index: 7, kind: output, shape index: {0}]   ;;  %s1021_s8 = inlined_call_operand.vmem [shape: f32[16,32], index: 8, kind: output, shape index: {1}]   ;;  %s1022_s9 = inlined_call_operand.vmem [shape: f32[16,32], index: 9, kind: output, shape index: {2}]  }
   0x1   :  { %s914_s11 = smov 0  }
   0x2 LB: > { %s742_s12 = sadd.s32 4294967295, %s856_s11   ;;  %s33_s13 = sadd.s32 1, %s852_s10  ;;  %s856_s11 = sphi %s914_s11, %s21_s11   ;;  %s852_s10 = sphi %s912_s10, %s1024_s10   ;;  %s848_s30 = sphi %s910_s30, %s1023_s30  }
   0x3   : > { %p35_p0 = scmp.ge.s32.totalorder %s33_s13, 2  ;;  %p744_p1 = scmp.ge.s32.totalorder %s856_s11, 1 }
   0x4   : > { %p285_p2 = scmp.lt.s32.totalorder %s856_s11, 3  ;;  %p769_p4 = scmp.eq.s32.totalorder %s742_s12, 0 }
   0x5   : > { %s1026_s13 = smov (%p35_p0, %s33_s13), 0  ;;  %s330_s16 = sshll.u32 %s1019_s6, 4  ;;  %s331_s16 = int_to_ptr.hbm [resolvable:$true] %s330_s16 }
   0x6   : > { %p286_p3 = pnand %p744_p1, %p285_p2  ;;  %s858_s17 = smov [#allocation5]  }
   0x7   : > { %s332_s18 = sshll.u32 %s858_s17, 4  ;;  %s333_s18 = int_to_ptr.vmem [resolvable:$true] %s332_s18 }
   0x8   : > { %p765_p5 = pneg %p286_p3  ;;  %355 = sbr.rel (%p286_p3) target bundleno = 172 (0xac), region = 48 }
   0xa   : > { %p766_p6 = pnand %p769_p4, %p765_p5 }
   0xc   : > { %768 = dma.hbm_to_vmem [thread:$0]  (!%p766_p6), %s331_s16, 16, %s333_s18, [#allocation6]  }
   0xd   : > { %843 = dma.done.wait (%p769_p4), [#allocation6], 16  }
   0xe   : > { %845 = vsyncadd (%p769_p4), [#allocation6], 4294967280  ;;  %p416_p7 = scmp.lt.s32.totalorder %s848_s30, 1  ;;  %vm458_vm0 = vcmask 261120   ;;  %v859_v0 = vmov 0.0   ;;  %v467_v1 = vld [vmem:[%s1014_s1 + $0x10] sm:$0xff] }
   0xf   : > { %459 = vst.msk [vmem:[#allocation2] sm:$0xff] %vm458_vm0, %v859_v0  ;;  %v468_v2 = vld [vmem:[%s1014_s1 + $0x18] sm:$0xff]  ;;  %v493_v3 = vld [vmem:[%s1015_s2 + $0x10] sm:$0xff]  ;;  %v465_v10 = vld [vmem:[%s1014_s1] sm:$0xff] }
  0x10   : > { %s1028_s30 = smov (!%p416_p7, %s848_s30), 1  ;;  %460 = vst.msk [vmem:[#allocation3] sm:$0xff] %vm458_vm0, %v859_v0  ;;  %v470_v4 = vpack.c.bf16 %v468_v2, %v467_v1  ;;  %v494_v5 = vld [vmem:[%s1015_s2 + $0x18] sm:$0xff]  ;;  %v515_v6 = vld [vmem:[%s1016_s3 + $0x10] sm:$0xff]  ;;  %v466_v11 = vld [vmem:[%s1014_s1 + $0x8] sm:$0xff] }
  0x11   : > { %461 = vst.msk [vmem:[#allocation4] sm:$0xff] %vm458_vm0, %v859_v0  ;;  %s935_s19 = sshll.u32 %s1028_s30, 3  ;;  %v516_v7 = vld [vmem:[%s1016_s3 + $0x18] sm:$0xff]  ;;  %v496_v8 = vpack.c.bf16 %v494_v5, %v493_v3  ;;  %v491_v12 = vld [vmem:[%s1015_s2] sm:$0xff]  ;;  %v469_v13 = vpack.c.bf16 %v466_v11, %v465_v10  ;;  %v492_v14 = vld [vmem:[%s1015_s2 + $0x8] sm:$0xff] }
  0x12   : > { %s422_s16 = scalar_lea.vmem %s1013_s0, %s935_s19  ;;  %v518_v9 = vpack.c.bf16 %v516_v7, %v515_v6  ;;  %481 = vmatpush.bf16.msra.mxu0 %v470_v4  ;;  %v513_v15 = vld [vmem:[%s1016_s3] sm:$0xff]  ;;  %v514_v16 = vld [vmem:[%s1016_s3 + $0x8] sm:$0xff]  ;;  %v495_v17 = vpack.c.bf16 %v492_v14, %v491_v12  ;;  %s444_s18 = scalar_lea.vmem %s1020_s7, %s935_s19  ;;  %v799_v38 = vld [vmem:[#allocation5] ss:$0 sm:$0xff] }
  0x13   : > { %503 = vmatpush.bf16.msra.mxu1 %v496_v8  ;;  %v517_v18 = vpack.c.bf16 %v514_v16, %v513_v15  ;;  %v462_v19 = vld [vmem:[%s422_s16] sm:$0xff]  ;;  %s448_s22 = scalar_lea.vmem %s1021_s8, %s935_s19  ;;  %s452_s25 = scalar_lea.vmem %s1022_s9, %s935_s19 }
  0x14   : > { %525 = vmatpush.bf16.msra.mxu2 %v518_v9  ;;  %v463_v20 = vpack.c.bf16 %v462_v19, %v462_v19  ;;  %v797_v28 = vld [vmem:[%s1017_s4] ss:$0 sm:$0xff] }
  0x15   : > { %v798_v30 = vld [vmem:[%s1018_s5] ss:$0 sm:$0xff] }
  0x16   : > { %482 = vmatpush.bf16.msra.mxu0 %v469_v13  ;;  %v464_v21 = vld [vmem:[#allocation2] sm:$0xff] }
  0x17   : > { %504 = vmatpush.bf16.msra.mxu1 %v495_v17  ;;  %v490_v22 = vld [vmem:[#allocation3] sm:$0xff] }
  0x18   : > { %526 = vmatpush.bf16.msra.mxu2 %v517_v18  ;;  %v512_v27 = vld [vmem:[#allocation4] sm:$0xff] }
  0x19   : > { %756 = vmatmul.msk.bf16.vlgmr.msra.gmra.mxu0 %vm458_vm0, %v463_v20 }
  0x1a   : > { %757 = vmatmul.msk.bf16.vlgmr.msra.gmra.mxu1 %vm458_vm0, %v463_v20 }
  0x1b   : > { %758 = vmatmul.msk.bf16.vlgmr.msra.gmra.mxu2 %vm458_vm0, %v463_v20 }
  0x96   : > { %v484_v23 = vpop.f32.mrf.mxu0 }
  0x97   : > { %v488_v24 = vadd.f32 %v484_v23, %v464_v21  ;;  %v506_v25 = vpop.f32.mrf.mxu1 }
  0x98   : > { %v510_v26 = vadd.f32 %v506_v25, %v490_v22 }
  0x99   : > { %489 = vst.msk [vmem:[#allocation2] sm:$0xff] %vm458_vm0, %v488_v24 }
  0x9a   : > { %511 = vst.msk [vmem:[#allocation3] sm:$0xff] %vm458_vm0, %v510_v26 }
  0x9e   : > { %v528_v29 = vpop.f32.mrf.mxu2  ;;  %v486_v32 = vpop.f32.mrf.mxu0 }
  0x9f   : > { %v532_v31 = vadd.f32 %v528_v29, %v512_v27  ;;  %v508_v33 = vpop.f32.mrf.mxu1 }
  0xa0   : > { %v537_v34 = vld [vmem:[#allocation2] sm:$0xff] }
  0xa1   : > { %533 = vst.msk [vmem:[#allocation4] sm:$0xff] %vm458_vm0, %v532_v31  ;;  %v542_v35 = vadd.f32 %v797_v28, %v537_v34  ;;  %v544_v36 = vld [vmem:[#allocation3] sm:$0xff] }
  0xa2   : > { %v549_v37 = vadd.f32 %v798_v30, %v544_v36 }
  0xa3   : > { %543 = vst.msk [vmem:[%s444_s18] sm:$0xff] %vm458_vm0, %v542_v35 }
  0xa4   : > { %550 = vst.msk [vmem:[%s448_s22] sm:$0xff] %vm458_vm0, %v549_v37 }
  0xa6   : > { %v530_v39 = vpop.f32.mrf.mxu2 }
  0xa8   : > { %v551_v40 = vld [vmem:[#allocation4] sm:$0xff] }
  0xa9   : > { %v556_v41 = vadd.f32 %v799_v38, %v551_v40 }
  0xab   : > { %557 = vst.msk [vmem:[%s452_s25] sm:$0xff] %vm458_vm0, %v556_v41 }
  0xac PF: > { %s21_s11 = sadd.s32 1, %s856_s11   ;;  %s1023_s30 = smov %s852_s10 }
  0xad   : > { %p18_p8 = scmp.ge.s32.totalorder %s21_s11, 4   ;;  %s1024_s10 = smov %s1026_s13 }
  0xaf   :  { %20 = sbr.rel (!%p18_p8) target bundleno = 2 (0x2), region = 124 }
  0xb4   :  { %605 = vsyncpa [#allocation6], 1 }
  0xb5   :  { %607 = vsyncpa [#allocation6 + $0x1], 1 }

// kernel: decoder_forward.17
= control target key start
LH: loop header
LB: loop body
LE: loop exit
PB: predicated region body
PF: predicated region fallthrough
CT: control target
= control target key end

     0   :  { %s678_s24 = smov 0   ;;  %s680_s25 = smov 0   ;;  %s772_s0 = inlined_call_operand.vmem [shape: f32[16,32], index: 0, kind: input, shape index: {}]   ;;  %s773_s1 = inlined_call_operand.vmem [shape: f32[32,64], index: 1, kind: input, shape index: {}]   ;;  %s774_s2 = inlined_call_operand.vmem [shape: f32[1,64], index: 2, kind: input, shape index: {}]   ;;  %s775_s3 = inlined_call_operand.vmem [shape: f32[64,32], index: 3, kind: input, shape index: {}]   ;;  %s776_s4 = inlined_call_operand.vmem [shape: f32[1,32], index: 4, kind: input, shape index: {}]   ;;  %s777_s5 = inlined_call_operand.vmem [shape: f32[1,32], index: 5, kind: input, shape index: {}]   ;;  %s778_s6 = inlined_call_operand.vmem [shape: f32[1,32], index: 6, kind: input, shape index: {}]   ;;  %s779_s7 = inlined_call_operand.vmem [shape: f32[16,32], index: 7, kind: output, shape index: {}]  }
   0x1   :  { %s682_s26 = smov 0  }
   0x2 LB: > { %s29_s27 = sadd.s32 1, %s630_s25  ;;  %p571_p0 = scmp.ge.s32.totalorder %s634_s26, 1  ;;  %s634_s26 = sphi %s682_s26, %s17_s26   ;;  %s630_s25 = sphi %s680_s25, %s781_s25   ;;  %s626_s24 = sphi %s678_s24, %s780_s24  }
   0x3   : > { %p31_p1 = scmp.ge.s32.totalorder %s29_s27, 2  ;;  %p276_p2 = scmp.lt.s32.totalorder %s634_s26, 3 }
   0x5   : > { %s783_s27 = smov (%p31_p1, %s29_s27), 0  ;;  %p277_p3 = pnand %p571_p0, %p276_p2 }
   0x6   : > { %p318_p4 = scmp.lt.s32.totalorder (!%p277_p3), %s626_s24, 1 }
   0x7   : > { %280 = sbr.rel (%p277_p3) target bundleno = 563 (0x233), region = 48 }
   0xc   : > { %v350_v0 = vld [vmem:[%s773_s1 + $0x10] sm:$0xff]  ;;  %v351_v1 = vld [vmem:[%s773_s1 + $0x18] sm:$0xff]  ;;  %v348_v2 = vld [vmem:[%s773_s1] sm:$0xff]  ;;  %s785_s24 = smov (!%p318_p4, %s626_s24), 1  ;;  %vm344_vm0 = vcmask 261120   ;;  %v636_v20 = vmov 0.0  }
   0xd   : > { %v353_v3 = vpack.c.bf16 %v351_v1, %v350_v0  ;;  %v349_v4 = vld [vmem:[%s773_s1 + $0x8] sm:$0xff]  ;;  %v384_v5 = vld [vmem:[%s775_s3 + $0x30] sm:$0xff]  ;;  %v385_v6 = vld [vmem:[%s775_s3 + $0x38] sm:$0xff]  ;;  %s572_s21 = sshll.u32 %s785_s24, 3  ;;  %345 = vst.msk [vmem:[#allocation2] sm:$0xff] %vm344_vm0, %v636_v20  ;;  %vm390_vm1 = vcmask 523264  }
   0xe   : > { %v389_v7 = vpack.c.bf16 %v385_v6, %v384_v5  ;;  %v382_v8 = vld [vmem:[%s775_s3 + $0x20] sm:$0xff]  ;;  %v383_v9 = vld [vmem:[%s775_s3 + $0x28] sm:$0xff]  ;;  %v352_v10 = vpack.c.bf16 %v349_v4, %v348_v2  ;;  %s321_s28 = scalar_lea.vmem %s772_s0, %s572_s21  ;;  %v380_v14 = vld [vmem:[%s775_s3 + $0x10] sm:$0xff]  ;;  %v637_v36 = vmov 32.0   ;;  %s338_s29 = scalar_lea.vmem %s779_s7, %s572_s21 }
   0xf   : > { %368 = vmatpush.bf16.msra.mxu0 %v353_v3  ;;  %v388_v11 = vpack.c.bf16 %v383_v9, %v382_v8  ;;  %v346_v12 = vld [vmem:[%s321_s28] sm:$0xff]  ;;  %v381_v15 = vld [vmem:[%s775_s3 + $0x18] sm:$0xff]  ;;  %v379_v18 = vld [vmem:[%s775_s3 + $0x8] sm:$0xff]  ;;  %608 = vrcp.f32 %v637_v36 }
  0x10   : > { %398 = vmatpush.bf16.msra.mxu1 %v389_v7  ;;  %v347_v13 = vpack.c.bf16 %v346_v12, %v346_v12  ;;  %v387_v16 = vpack.c.bf16 %v381_v15, %v380_v14  ;;  %v378_v17 = vld [vmem:[%s775_s3] sm:$0xff] }
  0x11   : > { %v386_v19 = vpack.c.bf16 %v379_v18, %v378_v17  ;;  %v604_v21 = vld [vmem:[%s774_s2] ss:$0 sm:$0xff] }
  0x12   : > { %v605_v30 = vld [vmem:[%s776_s4] ss:$0 sm:$0xff] }
  0x13   : > { %369 = vmatpush.bf16.msra.mxu0 %v352_v10  ;;  %v606_v57 = vld [vmem:[%s777_s5] ss:$0 sm:$0xff] }
  0x14   : > { %399 = vmatpush.bf16.msra.mxu1 %v388_v11  ;;  %v376_v27 = vld [vmem:[#allocation2] sm:$0xff] }
  0x15   : > { %v609_v37 = vpop.eup %608  ;;  %v607_v59 = vld [vmem:[%s778_s6] ss:$0 sm:$0xff] }
  0x16   : > { %574 = vmatmul.msk.bf16.vlgmr.msra.gmra.mxu0 %vm344_vm0, %v347_v13  ;;  %v424_v38 = vmul.f32 32.0, %v609_v37  ;;  %vm428_vm2 = vweird.f32 %v609_v37 }
  0x18   : > { %400 = vmatpush.bf16.msra.mxu1 %v387_v16  ;;  %v425_v39 = vsub.f32 1.0, %v424_v38 }
  0x1a   : > { %v426_v40 = vmul.f32 %v609_v37, %v425_v39 }
  0x1c   : > { %401 = vmatpush.bf16.msra.mxu1 %v386_v19  ;;  %v427_v41 = vadd.f32 %v609_v37, %v426_v40 }
  0x1e   : > { %v429_v42 = vsel %vm428_vm2, %v609_v37, %v427_v41 }
  0x93   : > { %v371_v22 = vpop.f32.mrf.mxu0 }
  0x94   : > { %v372_v23 = vadd.f32 %v604_v21, %v371_v22 }
  0x96   : > { %v375_v24 = vmax.f32 %v372_v23, 0.0 }
  0x98   : > { %v377_v25 = vpack.c.bf16 %v375_v24, %v375_v24 }
  0x9a   : > { %575 = vmatmul.msk.bf16.vlgmr.msra.gmra.mxu1 %vm390_vm1, %v377_v25 }
  0x9b   : > { %v373_v26 = vpop.f32.mrf.mxu0 }
 0x117   : > { %v403_v28 = vpop.f32.mrf.mxu1 }
 0x118   : > { %v407_v29 = vadd.f32 %v403_v28, %v376_v27 }
 0x11a   : > { %408 = vst.msk [vmem:[#allocation2] sm:$0xff] %vm344_vm0, %v407_v29 }
 0x11f   : > { %v405_v31 = vpop.f32.mrf.mxu1 }
 0x121   : > { %v412_v32 = vld [vmem:[#allocation2] sm:$0xff] }
 0x122   : > { %v417_v33 = vadd.f32 %v605_v30, %v412_v32 }
 0x124   : > { %v419_v34 = vadd.f32 %v417_v33, %v346_v12 }
 0x126   : > { %v420_v35 = vsel %vm344_vm0, %v419_v34, 0.0 }
 0x127   : > { %421 = vadd.xlane.f32.xlu0 %v420_v35 }
 0x19a   : > { %v422_v43 = vpop.xlane.xlu0 %421 }
 0x19b   : > { %v430_v44 = vmul.f32 %v429_v42, %v422_v43 }
 0x19d   : > { %v431_v45 = vsub.f32 %v419_v34, %v430_v44 }
 0x19f   : > { %v432_v46 = vmul.f32 %v431_v45, %v431_v45 }
 0x1a1   : > { %v433_v47 = vsel %vm344_vm0, %v432_v46, 0.0 }
 0x1a2   : > { %434 = vadd.xlane.f32.xlu0 %v433_v47 }
 0x215   : > { %v435_v48 = vpop.xlane.xlu0 %434 }
 0x216   : > { %v436_v49 = vmul.f32 %v435_v48, %v429_v42 }
 0x218   : > { %v437_v50 = vadd.f32 1e-05, %v436_v49 }
 0x21a   : > { %610 = vrsqrt.f32 %v437_v50  ;;  %vm444_vm4 = vweird.f32 %v437_v50 }
 0x220   : > { %v611_v51 = vpop.eup %610 }
 0x221   : > { %v439_v52 = vmul.f32 %v611_v51, %v437_v50  ;;  %vm445_vm3 = vweird.f32 %v611_v51 }
 0x222   : > { %vm446_vm5 = vmor %vm444_vm4, %vm445_vm3 }
 0x223   : > { %v440_v53 = vmul.f32 %v611_v51, %v439_v52 }
 0x225   : > { %v441_v54 = vmul.f32 0.5, %v440_v53 }
 0x227   : > { %v442_v55 = vsub.f32 1.5, %v441_v54 }
 0x229   : > { %v443_v56 = vmul.f32 %v611_v51, %v442_v55 }
 0x22b   : > { %v447_v58 = vsel %vm446_vm5, %v611_v51, %v443_v56 }
 0x22c   : > { %v448_v60 = vmul.f32 %v447_v58, %v431_v45 }
 0x22e   : > { %v453_v61 = vmul.f32 %v606_v57, %v448_v60 }
 0x230   : > { %v458_v62 = vadd.f32 %v607_v59, %v453_v61 }
 0x232   : > { %459 = vst.msk [vmem:[%s338_s29] sm:$0xff] %vm344_vm0, %v458_v62 }
 0x233 PF: > { %s17_s26 = sadd.s32 1, %s634_s26   ;;  %s780_s24 = smov %s630_s25 }
 0x234   : > { %p14_p5 = scmp.ge.s32.totalorder %s17_s26, 4   ;;  %s781_s25 = smov %s783_s27 }
 0x236   :  { %16 = sbr.rel (!%p14_p5) target bundleno = 2 (0x2), region = 95 }

// kernel: decoder_forward.16
= control target key start
LH: loop header
LB: loop body
LE: loop exit
PB: predicated region body
PF: predicated region fallthrough
CT: control target
= control target key end

     0   :  { %s1106_s30 = smov 0   ;;  %s1108_s10 = smov 0   ;;  %s1253_s0 = inlined_call_operand.vmem [shape: f32[2,8,32], index: 0, kind: input, shape index: {}]   ;;  %s1254_s1 = inlined_call_operand.vmem [shape: f32[2,16,32], index: 1, kind: input, shape index: {}]   ;;  %s1255_s2 = inlined_call_operand.vmem [shape: f32[2,16,32], index: 2, kind: input, shape index: {}]   ;;  %s1256_s3 = inlined_call_operand.vmem [shape: s32[2,1,16], index: 3, kind: input, shape index: {}]   ;;  %s1257_s4 = inlined_call_operand.vmem [shape: f32[32,32], index: 4, kind: input, shape index: {}]   ;;  %s1258_s5 = inlined_call_operand.vmem [shape: f32[1,32], index: 5, kind: input, shape index: {}]   ;;  %s1259_s6 = inlined_call_operand.vmem [shape: f32[2,8,32], index: 6, kind: input, shape index: {}]   ;;  %s1260_s7 = inlined_call_operand.vmem [shape: f32[1,32], index: 7, kind: input, shape index: {}]   ;;  %s1261_s8 = inlined_call_operand.vmem [shape: f32[1,32], index: 8, kind: input, shape index: {}]   ;;  %s1262_s9 = inlined_call_operand.vmem [shape: f32[2,8,32], index: 9, kind: output, shape index: {}]  }
   0x1   :  { %s1110_s11 = smov 0  }
   0x2 LB: > { %s31_s12 = sadd.s32 1, %s1045_s10  ;;  %p951_p0 = scmp.ge.s32.totalorder %s1049_s11, 1  ;;  %s1049_s11 = sphi %s1110_s11, %s19_s11   ;;  %s1045_s10 = sphi %s1108_s10, %s1266_s10   ;;  %s1041_s30 = sphi %s1106_s30, %s1265_s30  }
   0x3   : > { %p33_p1 = scmp.ge.s32.totalorder %s31_s12, 2  ;;  %p347_p2 = scmp.lt.s32.totalorder %s1049_s11, 3 }
   0x5   : > { %s1268_s12 = smov (%p33_p1, %s31_s12), 0  ;;  %p348_p3 = pnand %p951_p0, %p347_p2 }
   0x6   : > { %p407_p4 = scmp.lt.s32.totalorder (!%p348_p3), %s1041_s30, 1  ;;  %s1051_s21 = smov (!%p348_p3), 120  }
   0x7   : > { %351 = sbr.rel (%p348_p3) target bundleno = 1498 (0x5da), region = 56  ;;  %s1053_s25 = smov (!%p348_p3), 104  }
   0x8   : > { %s1054_s29 = smov (!%p348_p3), 112  }
   0xc   : > { %s1270_s30 = smov (!%p407_p4, %s1041_s30), 1  ;;  %vm456_vm0 = vcmask 64512   ;;  %v1052_v11 = vmov 0   ;;  %vm481_vm3 = vcmask 130048   ;;  %v448_v44 = vld [vmem:[%s1257_s4] sm:$0xff]  ;;  %vm581_vm4 = vcmask 1043456  }
   0xd   : > { %s973_s13 = sshll.u32 %s1270_s30, 4  ;;  %s1128_s14 = sshll.u32 %s1270_s30, 3  ;;  %v514_v45 = vpack.c.bf16 %v448_v44, %v448_v44  ;;  %v449_v63 = vld [vmem:[%s1257_s4 + $0x8] sm:$0xff]  ;;  %vm784_vm5 = vcmask 261120  }
   0xe   : > { %s418_s17 = scalar_lea.vmem %s1254_s1, %s973_s13  ;;  %s413_s20 = scalar_lea.vmem %s1253_s0, %s1128_s14 }
   0xf   : > { %v444_v0 = vld [vmem:[%s418_s17] sm:$0xff]  ;;  %v445_v1 = vld [vmem:[%s418_s17 + $0x8] sm:$0xff]  ;;  %s426_s24 = scalar_lea.vmem %s1256_s3, %s1270_s30  ;;  %s423_s28 = scalar_lea.vmem %s1255_s2, %s973_s13  ;;  %v602_v46 = vsel %vm581_vm4, %v514_v45, 0 }
  0x10   : > { %v442_v2 = vld [vmem:[%s413_s20] sm:$0xff]  ;;  %v1139_v3 = vpack.c.bf16 %v445_v1, %v444_v0  ;;  %v447_v29 = vld [vmem:[%s423_s28 + $0x8] sm:$0xff]  ;;  %v577_v0 = vpack.c.bf16 %v449_v63, %v449_v63  ;;  %s440_s15 = scalar_lea.vmem %s1262_s9, %s1128_s14 }
  0x11   : > { %v443_v5 = vmul.f32 0.35355338, %v442_v2  ;;  %v452_v9 = vld [vmem:[%s426_s24] sm:$0x1] }
  0x12   : > { %519 = vrot.lane.b32.xlu0 %v1139_v3, %s1051_s21  ;;  %v461_v4 = vsel %vm456_vm0, %v1139_v3, 0  ;;  %vm476_vm1 = vcmp.eq.s32.totalorder %v452_v9, 0  ;;  %v446_v28 = vld [vmem:[%s423_s28] sm:$0xff]  ;;  %v583_v1 = vsel %vm581_vm4, %v577_v0, 0 }
  0x13   : > { %470 = vmatpush.bf16.xpose.msra.mxu0 %v461_v4  ;;  %v453_v6 = vpack.c.bf16 %v443_v5, %v443_v5  ;;  %v477_v12 = vsel %vm476_vm1, 1, %v1052_v11  ;;  %v1171_v30 = vpack.c.bf16 %v447_v29, %v446_v28 }
  0x14   : > { %v478_v13 = vperm.slane %v477_v12, 0 }
  0x15   : > { %507 = vmatpush.bf16.msra.mxu1 %v1171_v30 }
  0x16   : > { %vm1153_vm2 = vcmp.eq.s32.totalorder %v478_v13, 1 }
  0x19   : > { %592 = vmatpush.bf16.msrb.mxu1 %v583_v1 }
  0x1a   : > { %516 = vrot.lane.b32.xlu0 %v453_v6, %s1051_s21  ;;  %959 = vmatmul.msk.bf16.vlgmr.msra.gmra.mxu0 %vm456_vm0, %v453_v6 }
  0x22   : > { %557 = vrot.lane.b32.xlu0 %v1171_v30, %s1051_s21 }
  0x2a   : > { %697 = vrot.lane.b32.xlu0 %v453_v6, %s1053_s25 }
  0x32   : > { %617 = vrot.lane.b32.xlu0 %v453_v6, %s1054_s29 }
  0x84   : > { %v520_v7 = vpop.permute.xlu0 %519 }
  0x85   : > { %v525_v8 = vsel %vm456_vm0, %v520_v7, 0 }
  0x86   : > { %534 = vmatpush.bf16.xpose.msra.mxu2 %v525_v8 }
  0x8c   : > { %v517_v10 = vpop.permute.xlu0 %516 }
  0x8d   : > { %961 = vmatmul.msk.bf16.vlgmr.msra.gmra.mxu2 %vm456_vm0, %v517_v10 }
  0x94   : > { %v558_v43 = vpop.permute.xlu0 %557 }
  0x95   : > { %570 = vmatpush.bf16.msra.mxu3 %v558_v43  ;;  %v450_v43 = vld [vmem:[%s1257_s4 + $0x10] sm:$0xff] }
  0x96   : > { %v676_v44 = vpack.c.bf16 %v450_v43, %v450_v43 }
  0x97   : > { %v472_v15 = vpop.f32.mrf.mxu0 }
  0x98   : > { %v480_v16 = vsel %vm1153_vm2, -1e+30, %v472_v15  ;;  %v681_v45 = vsel %vm581_vm4, %v676_v44, 0 }
  0x99   : > { %v482_v17 = vsel %vm481_vm3, %v480_v16, -inf  ;;  %611 = vmatpush.bf16.msrb.mxu3 %v602_v46  ;;  %v451_v46 = vld [vmem:[%s1257_s4 + $0x18] sm:$0xff] }
  0x9a   : > { %483 = vmax.xlane.f32.xlu1 %v482_v17 }
  0x9c   : > { %v698_v48 = vpop.permute.xlu0 %697 }
  0x9f   : > { %v474_v18 = vpop.f32.mrf.mxu0 }
  0xa4   : > { %v618_v56 = vpop.permute.xlu0 %617 }
 0x10d   : > { %v484_v19 = vpop.xlane.xlu1 %483 }
 0x10e   : > { %v485_v20 = vsub.f32 %v480_v16, %v484_v19 }
 0x110   : > { %v486_v21 = vmul.f32 1.442695, %v485_v20  ;;  %v536_v22 = vpop.f32.mrf.mxu2 }
 0x111   : > { %v540_v23 = vsel %vm1153_vm2, -1e+30, %v536_v22 }
 0x112   : > { %1007 = vpow2.f32 %v486_v21  ;;  %v541_v24 = vsel %vm481_vm3, %v540_v23, -inf }
 0x113   : > { %542 = vmax.xlane.f32.xlu2 %v541_v24 }
 0x118   : > { %v1008_v25 = vpop.eup %1007  ;;  %v538_v26 = vpop.f32.mrf.mxu2 }
 0x119   : > { %v488_v27 = vsel %vm481_vm3, %v1008_v25, 0.0 }
 0x11a   : > { %489 = vadd.xlane.f32.xlu1 %v488_v27 }
 0x133   : > { %699 = vrot.lane.b32.xlu1 %v1139_v3, %s1053_s25 }
 0x186   : > { %v543_v31 = vpop.xlane.xlu2 %542 }
 0x187   : > { %v544_v32 = vsub.f32 %v540_v23, %v543_v31 }
 0x189   : > { %v545_v33 = vmul.f32 1.442695, %v544_v32 }
 0x18b   : > { %1009 = vpow2.f32 %v545_v33 }
 0x18d   : > { %v490_v34 = vpop.xlane.xlu1 %489 }
 0x18e   : > { %1011 = vrcp.f32 %v490_v34 }
 0x191   : > { %v1010_v35 = vpop.eup %1009 }
 0x192   : > { %v547_v36 = vsel %vm481_vm3, %v1010_v35, 0.0 }
 0x193   : > { %548 = vadd.xlane.f32.xlu2 %v547_v36 }
 0x194   : > { %v1012_v37 = vpop.eup %1011 }
 0x195   : > { %v492_v38 = vmul.f32 %v1012_v37, %v490_v34 }
 0x197   : > { %v493_v39 = vsub.f32 2.0, %v492_v38 }
 0x199   : > { %v494_v40 = vmul.f32 %v1012_v37, %v493_v39 }
 0x19b   : > { %v495_v41 = vmul.f32 %v1008_v25, %v494_v40 }
 0x19d   : > { %v496_v42 = vpack.c.bf16 %v495_v41, %v495_v41 }
 0x19f   : > { %960 = vmatmul.msk.bf16.vlgmr.msra.gmra.mxu1 %vm481_vm3, %v496_v42 }
 0x1a0   : > { %690 = vmatpush.bf16.msra.mxu1 %v681_v45 }
 0x1a5   : > { %v700_v55 = vpop.permute.xlu1 %699 }
 0x1a6   : > { %v705_v59 = vsel %vm456_vm0, %v700_v55, 0 }
 0x1ab   : > { %619 = vrot.lane.b32.xlu2 %v1139_v3, %s1054_s29 }
 0x206   : > { %v549_v47 = vpop.xlane.xlu2 %548 }
 0x207   : > { %1013 = vrcp.f32 %v549_v47 }
 0x20d   : > { %v1014_v49 = vpop.eup %1013 }
 0x20e   : > { %v551_v50 = vmul.f32 %v1014_v49, %v549_v47  ;;  %v620_v51 = vpop.permute.xlu2 %619  ;;  %v756_v47 = vpack.c.bf16 %v451_v46, %v451_v46 }
 0x20f   : > { %v625_v52 = vsel %vm456_vm0, %v620_v51, 0 }
 0x210   : > { %v552_v53 = vsub.f32 2.0, %v551_v50  ;;  %634 = vmatpush.bf16.xpose.msrb.mxu0 %v625_v52 }
 0x212   : > { %v553_v54 = vmul.f32 %v1014_v49, %v552_v53 }
 0x214   : > { %v554_v57 = vmul.f32 %v1010_v35, %v553_v54 }
 0x216   : > { %v555_v58 = vpack.c.bf16 %v554_v57, %v554_v57 }
 0x217   : > { %965 = vmatmul.msk.bf16.vlgmr.msrb.gmra.mxu0 %vm456_vm0, %v618_v56 }
 0x218   : > { %962 = vmatmul.msk.bf16.vlgmr.msra.gmra.mxu3 %vm481_vm3, %v555_v58 }
 0x219   : > { %714 = vmatpush.bf16.xpose.msra.mxu3 %v705_v59  ;;  %v1004_v59 = vld [vmem:[%s1258_s5] ss:$0 sm:$0xff] }
 0x21c   : > { %v509_v60 = vpop.f32.mrf.mxu1 }
 0x21d   : > { %v513_v62 = vpack.c.bf16 %v509_v60, %v509_v60 }
 0x224   : > { %v511_v61 = vpop.f32.mrf.mxu1 }
 0x228   : > { %964 = vmatmul.msk.bf16.vlgmr.msrb.gmra.mxu3 %vm456_vm0, %v513_v62 }
 0x238   : > { %968 = vmatmul.msk.bf16.vlgmr.msra.gmra.mxu3 %vm456_vm0, %v698_v48  ;;  %v761_v48 = vsel %vm581_vm4, %v756_v47, 0 }
 0x294   : > { %v636_v2 = vpop.f32.mrf.mxu0 }
 0x295   : > { %v640_v3 = vsel %vm1153_vm2, -1e+30, %v636_v2 }
 0x296   : > { %v641_v4 = vsel %vm481_vm3, %v640_v3, -inf }
 0x297   : > { %642 = vmax.xlane.f32.xlu0 %v641_v4 }
 0x29b   : > { %v572_v5 = vpop.f32.mrf.mxu3 }
 0x29c   : > { %v576_v6 = vpack.c.bf16 %v572_v5, %v572_v5  ;;  %v638_v7 = vpop.f32.mrf.mxu0 }
 0x29e   : > { %963 = vmatmul.msk.bf16.vlgmr.msrb.gmra.mxu1 %vm456_vm0, %v576_v6 }
 0x2a3   : > { %v574_v8 = vpop.f32.mrf.mxu3 }
 0x2ab   : > { %v1200_v9 = vpop.f32.mrf.mxu3  ;;  %656 = vrot.lane.b32.xlu0 %v1171_v30, %s1054_s29 }
 0x2b3   : > { %v615_v10 = vpop.f32.mrf.mxu3 }
 0x2bb   : > { %v716_v11 = vpop.f32.mrf.mxu3 }
 0x2bc   : > { %v720_v12 = vsel %vm1153_vm2, -1e+30, %v716_v11 }
 0x2bd   : > { %v721_v13 = vsel %vm481_vm3, %v720_v12, -inf }
 0x2be   : > { %722 = vmax.xlane.f32.xlu2 %v721_v13 }
 0x2c3   : > { %v718_v15 = vpop.f32.mrf.mxu3 }
 0x30a   : > { %v643_v16 = vpop.xlane.xlu0 %642 }
 0x30b   : > { %v644_v17 = vsub.f32 %v640_v3, %v643_v16  ;;  %v1055_v3 = vmov 32.0  }
 0x30d   : > { %v645_v18 = vmul.f32 1.442695, %v644_v17 }
 0x30f   : > { %1015 = vpow2.f32 %v645_v18 }
 0x315   : > { %v1016_v19 = vpop.eup %1015 }
 0x316   : > { %v647_v20 = vsel %vm481_vm3, %v1016_v19, 0.0 }
 0x317   : > { %648 = vadd.xlane.f32.xlu1 %v647_v20 }
 0x31b   : > { %v594_v21 = vpop.f32.mrf.mxu1 }
 0x31c   : > { %v614_v57 = vadd.f32 %v1200_v9, %v594_v21 }
 0x31d   : > { %v657_v27 = vpop.permute.xlu0 %656 }
 0x31e   : > { %669 = vmatpush.bf16.msrb.mxu2 %v657_v27 }
 0x322   : > { %770 = vmatpush.bf16.msra.mxu2 %v761_v48 }
 0x323   : > { %v596_v22 = vpop.f32.mrf.mxu1 }
 0x330   : > { %736 = vrot.lane.b32.xlu1 %v1171_v30, %s1053_s25  ;;  %s433_s25 = scalar_lea.vmem %s1259_s6, %s1128_s14 }
 0x331   : > { %v723_v23 = vpop.xlane.xlu2 %722  ;;  %v782_v62 = vld [vmem:[%s433_s25] sm:$0xff] }
 0x332   : > { %v724_v14 = vsub.f32 %v720_v12, %v723_v23 }
 0x334   : > { %v725_v24 = vmul.f32 1.442695, %v724_v14 }
 0x336   : > { %1017 = vpow2.f32 %v725_v24  ;;  %v1005_v24 = vld [vmem:[%s1260_s7] ss:$0 sm:$0xff] }
 0x33c   : > { %v1018_v25 = vpop.eup %1017 }
 0x33d   : > { %v727_v26 = vsel %vm481_vm3, %v1018_v25, 0.0 }
 0x33e   : > { %728 = vadd.xlane.f32.xlu2 %v727_v26  ;;  %v1006_v26 = vld [vmem:[%s1261_s8] ss:$0 sm:$0xff] }
 0x38a   : > { %v649_v28 = vpop.xlane.xlu1 %648 }
 0x38b   : > { %1019 = vrcp.f32 %v649_v28 }
 0x391   : > { %v1020_v29 = vpop.eup %1019 }
 0x392   : > { %v651_v31 = vmul.f32 %v1020_v29, %v649_v28 }
 0x394   : > { %v652_v32 = vsub.f32 2.0, %v651_v31 }
 0x396   : > { %v653_v33 = vmul.f32 %v1020_v29, %v652_v32 }
 0x398   : > { %v654_v34 = vmul.f32 %v1016_v19, %v653_v33 }
 0x39a   : > { %v655_v35 = vpack.c.bf16 %v654_v34, %v654_v34 }
 0x39c   : > { %966 = vmatmul.msk.bf16.vlgmr.msrb.gmra.mxu2 %vm481_vm3, %v655_v35 }
 0x3a2   : > { %v737_v30 = vpop.permute.xlu1 %736 }
 0x3a3   : > { %749 = vmatpush.bf16.msra.mxu0 %v737_v30 }
 0x3b1   : > { %v729_v36 = vpop.xlane.xlu2 %728 }
 0x3b2   : > { %1021 = vrcp.f32 %v729_v36 }
 0x3b3   : > { %1023 = vrcp.f32 %v1055_v3 }
 0x3b8   : > { %v1022_v37 = vpop.eup %1021 }
 0x3b9   : > { %v731_v38 = vmul.f32 %v1022_v37, %v729_v36  ;;  %v1024_v4 = vpop.eup %1023 }
 0x3ba   : > { %v789_v5 = vmul.f32 32.0, %v1024_v4  ;;  %vm793_vm6 = vweird.f32 %v1024_v4 }
 0x3bb   : > { %v732_v39 = vsub.f32 2.0, %v731_v38 }
 0x3bc   : > { %v790_v6 = vsub.f32 1.0, %v789_v5 }
 0x3bd   : > { %v733_v40 = vmul.f32 %v1022_v37, %v732_v39 }
 0x3be   : > { %v791_v7 = vmul.f32 %v1024_v4, %v790_v6 }
 0x3bf   : > { %v734_v41 = vmul.f32 %v1018_v25, %v733_v40 }
 0x3c0   : > { %v792_v8 = vadd.f32 %v1024_v4, %v791_v7 }
 0x3c1   : > { %v735_v42 = vpack.c.bf16 %v734_v41, %v734_v41 }
 0x3c2   : > { %v794_v9 = vsel %vm793_vm6, %v1024_v4, %v792_v8 }
 0x3c3   : > { %969 = vmatmul.msk.bf16.vlgmr.msra.gmra.mxu0 %vm481_vm3, %v735_v42 }
 0x41f   : > { %v671_v49 = vpop.f32.mrf.mxu2 }
 0x420   : > { %v675_v50 = vpack.c.bf16 %v671_v49, %v671_v49 }
 0x422   : > { %967 = vmatmul.msk.bf16.vlgmr.msra.gmra.mxu1 %vm456_vm0, %v675_v50 }
 0x427   : > { %v673_v51 = vpop.f32.mrf.mxu2 }
 0x440   : > { %v751_v52 = vpop.f32.mrf.mxu0 }
 0x441   : > { %v755_v53 = vpack.c.bf16 %v751_v52, %v751_v52 }
 0x443   : > { %970 = vmatmul.msk.bf16.vlgmr.msra.gmra.mxu2 %vm456_vm0, %v755_v53 }
 0x448   : > { %v753_v54 = vpop.f32.mrf.mxu0 }
 0x49f   : > { %v692_v55 = vpop.f32.mrf.mxu1 }
 0x4a0   : > { %v696_v58 = vadd.f32 %v692_v55, %v614_v57 }
 0x4a7   : > { %v694_v56 = vpop.f32.mrf.mxu1 }
 0x4c6   : > { %v772_v60 = vpop.f32.mrf.mxu2 }
 0x4c7   : > { %v776_v61 = vadd.f32 %v772_v60, %v696_v58 }
 0x4c9   : > { %v781_v63 = vadd.f32 %v1004_v59, %v776_v61 }
 0x4cb   : > { %v783_v0 = vadd.f32 %v782_v62, %v781_v63 }
 0x4cd   : > { %v785_v1 = vsel %vm784_vm5, %v783_v0, 0.0 }
 0x4ce   : > { %786 = vadd.xlane.f32.xlu2 %v785_v1  ;;  %v774_v2 = vpop.f32.mrf.mxu2 }
 0x541   : > { %v787_v10 = vpop.xlane.xlu2 %786 }
 0x542   : > { %v795_v11 = vmul.f32 %v794_v9, %v787_v10 }
 0x544   : > { %v796_v12 = vsub.f32 %v783_v0, %v795_v11 }
 0x546   : > { %v797_v13 = vmul.f32 %v796_v12, %v796_v12 }
 0x548   : > { %v798_v15 = vsel %vm784_vm5, %v797_v13, 0.0 }
 0x549   : > { %799 = vadd.xlane.f32.xlu2 %v798_v15 }
 0x5bc   : > { %v800_v16 = vpop.xlane.xlu2 %799 }
 0x5bd   : > { %v801_v17 = vmul.f32 %v800_v16, %v794_v9 }
 0x5bf   : > { %v802_v18 = vadd.f32 1e-05, %v801_v17 }
 0x5c1   : > { %1025 = vrsqrt.f32 %v802_v18  ;;  %vm809_vm8 = vweird.f32 %v802_v18 }
 0x5c7   : > { %v1026_v19 = vpop.eup %1025 }
 0x5c8   : > { %v804_v20 = vmul.f32 %v1026_v19, %v802_v18  ;;  %vm810_vm7 = vweird.f32 %v1026_v19 }
 0x5c9   : > { %vm811_vm9 = vmor %vm809_vm8, %vm810_vm7 }
 0x5ca   : > { %v805_v21 = vmul.f32 %v1026_v19, %v804_v20 }
 0x5cc   : > { %v806_v22 = vmul.f32 0.5, %v805_v21 }
 0x5ce   : > { %v807_v23 = vsub.f32 1.5, %v806_v22 }
 0x5d0   : > { %v808_v14 = vmul.f32 %v1026_v19, %v807_v23 }
 0x5d2   : > { %v812_v25 = vsel %vm811_vm9, %v1026_v19, %v808_v14 }
 0x5d3   : > { %v813_v27 = vmul.f32 %v812_v25, %v796_v12 }
 0x5d5   : > { %v818_v28 = vmul.f32 %v1005_v24, %v813_v27 }
 0x5d7   : > { %v823_v29 = vadd.f32 %v1006_v26, %v818_v28 }
 0x5d9   : > { %824 = vst.msk [vmem:[%s440_s15] sm:$0xff] %vm784_vm5, %v823_v29 }
 0x5da PF: > { %s19_s11 = sadd.s32 1, %s1049_s11   ;;  %s1265_s30 = smov %s1045_s10 }
 0x5db   : > { %p16_p5 = scmp.ge.s32.totalorder %s19_s11, 4   ;;  %s1266_s10 = smov %s1268_s12 }
 0x5dd   :  { %18 = sbr.rel (!%p16_p5) target bundleno = 2 (0x2), region = 98 }

// kernel: decoder_forward.19
= control target key start
LH: loop header
LB: loop body
LE: loop exit
PB: predicated region body
PF: predicated region fallthrough
CT: control target
= control target key end

     0   :  { %14 = vsyncpa [#allocation3], 0  ;;  %s1507_s0 = inlined_call_operand.vmem [shape: f32[2,8,32], index: 0, kind: input, shape index: {}]   ;;  %s1508_s1 = inlined_call_operand.vmem [shape: f32[2,8,32], index: 1, kind: input, shape index: {}]   ;;  %s1509_s2 = inlined_call_operand.vmem [shape: f32[2,8,32], index: 2, kind: input, shape index: {}]   ;;  %s1510_s3 = inlined_call_operand.vmem [shape: s32[2,8,8], index: 3, kind: input, shape index: {}]   ;;  %s1511_s4 = inlined_call_operand.vmem [shape: f32[32,32], index: 4, kind: input, shape index: {}]   ;;  %s1512_s5 = inlined_call_operand.hbm [shape: f32[1,32], index: 5, kind: input, shape index: {}]   ;;  %s1513_s6 = inlined_call_operand.vmem [shape: f32[2,8,32], index: 6, kind: input, shape index: {}]   ;;  %s1514_s7 = inlined_call_operand.hbm [shape: f32[1,32], index: 7, kind: input, shape index: {}]   ;;  %s1515_s8 = inlined_call_operand.hbm [shape: f32[1,32], index: 8, kind: input, shape index: {}]   ;;  %s1516_s9 = inlined_call_operand.vmem [shape: f32[2,8,32], index: 9, kind: output, shape index: {}]  }
   0x1   :  { %15 = vsyncpa [#allocation5], 0  ;;  %s1332_s30 = smov 0   ;;  %s1334_s10 = smov 0  }
   0x2   :  { %s1336_s11 = smov 0  }
   0x3 LB: > { %s313_s14 = sshll.u32 %s1514_s7, 4  ;;  %s1040_s15 = sadd.s32 4294967295, %s1273_s11   ;;  %s1273_s11 = sphi %s1336_s11, %s21_s11   ;;  %s1269_s10 = sphi %s1334_s10, %s1521_s10   ;;  %s1265_s30 = sphi %s1332_s30, %s1520_s30   ;;  %s314_s14 = int_to_ptr.hbm [resolvable:$true] %s313_s14 }
   0x4   : > { %p1042_p0 = scmp.ge.s32.totalorder %s1273_s11, 1  ;;  %p286_p1 = scmp.lt.s32.totalorder %s1273_s11, 3 }
   0x5   : > { %p1353_p2 = scmp.eq.s32.totalorder %s1040_s15, 0  ;;  %s1275_s18 = smov [#allocation4]  }
   0x6   : > { %p1357_p3 = pnand %p1042_p0, %p286_p1  ;;  %s315_s19 = sshll.u32 %s1275_s18, 4  ;;  %s316_s19 = int_to_ptr.vmem [resolvable:$true] %s315_s19 }
   0x7   : > { %s33_s21 = sadd.s32 1, %s1269_s10  ;;  %s301_s24 = sshll.u32 %s1512_s5, 4  ;;  %s302_s24 = int_to_ptr.hbm [resolvable:$true] %s301_s24 }
   0x8   : > { %p1083_p4 = pneg %p1357_p3  ;;  %p35_p6 = scmp.ge.s32.totalorder %s33_s21, 2 }
   0x9   : > { %s325_s27 = sshll.u32 %s1515_s8, 4  ;;  %s1276_s28 = smov [#allocation2]   ;;  %s326_s27 = int_to_ptr.hbm [resolvable:$true] %s325_s27 }
   0xa   : > { %p1365_p5 = pnand %p1353_p2, %p1083_p4  ;;  %s1523_s21 = smov (%p35_p6, %s33_s21), 0 }
   0xb   : > { %s303_s29 = sshll.u32 %s1276_s28, 4  ;;  %s1277_s12 = smov [#allocation6]   ;;  %s304_s29 = int_to_ptr.vmem [resolvable:$true] %s303_s29 }
   0xc   : > { %1089 = dma.hbm_to_vmem [thread:$0]  (!%p1365_p5), %s314_s14, 16, %s316_s19, [#allocation5]  }
   0xd   : > { %1086 = dma.hbm_to_vmem [thread:$0]  (!%p1365_p5), %s302_s24, 16, %s304_s29, [#allocation3]  }
   0xe   : > { %s327_s13 = sshll.u32 %s1277_s12, 4  ;;  %384 = sbr.rel (%p1357_p3) target bundleno = 1510 (0x5e6), region = 56  ;;  %s328_s13 = int_to_ptr.vmem [resolvable:$true] %s327_s13 }
   0xf   : > { %1092 = dma.hbm_to_vmem [thread:$0]  (!%p1365_p5), %s326_s27, 16, %s328_s13, [#allocation5]  }
  0x13   : > { %1256 = dma.done.wait (%p1353_p2), [#allocation3], 16  }
  0x14   : > { %1258 = vsyncadd (%p1353_p2), [#allocation3], 4294967280 }
  0x15   : > { %1260 = dma.done.wait (%p1353_p2), [#allocation5], 32  }
  0x16   : > { %1262 = vsyncadd (%p1353_p2), [#allocation5], 4294967264  ;;  %p457_p7 = scmp.lt.s32.totalorder %s1265_s30, 1  ;;  %vm506_vm0 = vcmask 64512   ;;  %s1278_s16 = smov 120   ;;  %vm546_vm2 = vcmask 1043456  }
  0x17   : > { %s1279_s25 = smov 104   ;;  %s1280_s29 = smov 112   ;;  %v498_v40 = vld [vmem:[%s1511_s4] sm:$0xff]  ;;  %v499_v59 = vld [vmem:[%s1511_s4 + $0x8] sm:$0xff]  ;;  %vm839_vm3 = vcmask 261120  }
  0x18   : > { %s1525_s30 = smov (!%p457_p7, %s1265_s30), 1  ;;  %v564_v41 = vpack.c.bf16 %v498_v40, %v498_v40  ;;  %v629_v60 = vpack.c.bf16 %v499_v59, %v499_v59 }
  0x19   : > { %s1396_s14 = sshll.u32 %s1525_s30, 3 }
  0x1a   : > { %s467_s18 = scalar_lea.vmem %s1508_s1, %s1396_s14  ;;  %s463_s22 = scalar_lea.vmem %s1507_s0, %s1396_s14  ;;  %v653_v42 = vsel %vm546_vm2, %v564_v41, 0  ;;  %v634_v61 = vsel %vm546_vm2, %v629_v60, 0  ;;  %v500_v41 = vld [vmem:[%s1511_s4 + $0x10] sm:$0xff] }
  0x1b   : > { %v496_v0 = vld [vmem:[%s467_s18] sm:$0xff]  ;;  %s478_s24 = scalar_lea.vmem %s1510_s3, %s1396_s14  ;;  %s471_s28 = scalar_lea.vmem %s1509_s2, %s1396_s14 }
  0x1c   : > { %v494_v1 = vld [vmem:[%s463_s22] sm:$0xff]  ;;  %v504_v2 = vpack.c.bf16 %v496_v0, %v496_v0  ;;  %s485_s23 = scalar_lea.vmem %s1513_s6, %s1396_s14  ;;  %s492_s26 = scalar_lea.vmem %s1516_s9, %s1396_s14 }
  0x1d   : > { %v495_v4 = vmul.f32 0.35355338, %v494_v1  ;;  %v1416_v9 = vld [vmem:[%s478_s24] sm:$0xff] }
  0x1e   : > { %569 = vrot.lane.b32.xlu0 %v504_v2, %s1278_s16  ;;  %v511_v3 = vsel %vm506_vm0, %v504_v2, 0  ;;  %vm526_vm1 = vcmp.eq.s32.totalorder %v1416_v9, 0  ;;  %v497_v23 = vld [vmem:[%s471_s28] sm:$0xff] }
  0x1f   : > { %520 = vmatpush.bf16.xpose.msra.mxu0 %v511_v3  ;;  %v503_v5 = vpack.c.bf16 %v495_v4, %v495_v4  ;;  %v1431_v24 = vpack.c.bf16 %v497_v23, %v497_v23  ;;  %v837_v60 = vld [vmem:[%s485_s23] sm:$0xff] }
  0x21   : > { %v548_v25 = vsel %vm546_vm2, %v1431_v24, 0 }
  0x22   : > { %557 = vmatpush.bf16.msra.mxu1 %v548_v25 }
  0x26   : > { %566 = vrot.lane.b32.xlu0 %v503_v5, %s1278_s16  ;;  %1057 = vmatmul.msk.bf16.vlgmr.msra.gmra.mxu0 %vm506_vm0, %v503_v5 }
  0x27   : > { %643 = vmatpush.bf16.msrb.mxu1 %v634_v61 }
  0x2e   : > { %607 = vrot.lane.b32.xlu0 %v1431_v24, %s1278_s16 }
  0x36   : > { %750 = vrot.lane.b32.xlu0 %v503_v5, %s1279_s25 }
  0x3e   : > { %668 = vrot.lane.b32.xlu0 %v503_v5, %s1280_s29 }
  0x90   : > { %v570_v6 = vpop.permute.xlu0 %569 }
  0x91   : > { %v575_v7 = vsel %vm506_vm0, %v570_v6, 0 }
  0x92   : > { %584 = vmatpush.bf16.xpose.msra.mxu2 %v575_v7 }
  0x98   : > { %v567_v8 = vpop.permute.xlu0 %566 }
  0x99   : > { %1059 = vmatmul.msk.bf16.vlgmr.msra.gmra.mxu2 %vm506_vm0, %v567_v8 }
  0xa0   : > { %v608_v38 = vpop.permute.xlu0 %607 }
  0xa1   : > { %v613_v39 = vsel %vm546_vm2, %v608_v38, 0 }
  0xa2   : > { %622 = vmatpush.bf16.msra.mxu3 %v613_v39 }
  0xa3   : > { %v522_v10 = vpop.f32.mrf.mxu0 }
  0xa4   : > { %v527_v11 = vsel %vm526_vm1, -1e+30, %v522_v10 }
  0xa5   : > { %v528_v12 = vsel %vm506_vm0, %v527_v11, -inf }
  0xa6   : > { %529 = vmax.xlane.f32.xlu1 %v528_v12  ;;  %662 = vmatpush.bf16.msrb.mxu3 %v653_v42  ;;  %v729_v42 = vpack.c.bf16 %v500_v41, %v500_v41 }
  0xa8   : > { %v751_v44 = vpop.permute.xlu0 %750 }
  0xab   : > { %v524_v13 = vpop.f32.mrf.mxu0 }
  0xb0   : > { %v669_v52 = vpop.permute.xlu0 %668 }
 0x119   : > { %v530_v14 = vpop.xlane.xlu1 %529 }
 0x11a   : > { %v531_v15 = vsub.f32 %v527_v11, %v530_v14 }
 0x11c   : > { %v532_v16 = vmul.f32 1.442695, %v531_v15  ;;  %v586_v17 = vpop.f32.mrf.mxu2 }
 0x11d   : > { %v590_v18 = vsel %vm526_vm1, -1e+30, %v586_v17 }
 0x11e   : > { %1133 = vpow2.f32 %v532_v16  ;;  %v591_v19 = vsel %vm506_vm0, %v590_v18, -inf }
 0x11f   : > { %592 = vmax.xlane.f32.xlu2 %v591_v19 }
 0x124   : > { %v1134_v20 = vpop.eup %1133  ;;  %v588_v21 = vpop.f32.mrf.mxu2 }
 0x125   : > { %v534_v22 = vsel %vm506_vm0, %v1134_v20, 0.0 }
 0x126   : > { %535 = vadd.xlane.f32.xlu1 %v534_v22 }
 0x13f   : > { %752 = vrot.lane.b32.xlu1 %v504_v2, %s1279_s25 }
 0x192   : > { %v593_v26 = vpop.xlane.xlu2 %592 }
 0x193   : > { %v594_v27 = vsub.f32 %v590_v18, %v593_v26 }
 0x195   : > { %v595_v28 = vmul.f32 1.442695, %v594_v27 }
 0x197   : > { %1135 = vpow2.f32 %v595_v28 }
 0x199   : > { %v536_v29 = vpop.xlane.xlu1 %535 }
 0x19a   : > { %1137 = vrcp.f32 %v536_v29 }
 0x19d   : > { %v1136_v30 = vpop.eup %1135 }
 0x19e   : > { %v597_v31 = vsel %vm506_vm0, %v1136_v30, 0.0 }
 0x19f   : > { %598 = vadd.xlane.f32.xlu2 %v597_v31 }
 0x1a0   : > { %v1138_v32 = vpop.eup %1137 }
 0x1a1   : > { %v538_v33 = vmul.f32 %v1138_v32, %v536_v29 }
 0x1a3   : > { %v539_v34 = vsub.f32 2.0, %v538_v33 }
 0x1a5   : > { %v540_v35 = vmul.f32 %v1138_v32, %v539_v34 }
 0x1a7   : > { %v541_v36 = vmul.f32 %v1134_v20, %v540_v35 }
 0x1a9   : > { %v542_v37 = vpack.c.bf16 %v541_v36, %v541_v36 }
 0x1ab   : > { %1058 = vmatmul.msk.bf16.vlgmr.msra.gmra.mxu1 %vm506_vm0, %v542_v37 }
 0x1b1   : > { %v753_v51 = vpop.permute.xlu1 %752 }
 0x1b2   : > { %v758_v55 = vsel %vm506_vm0, %v753_v51, 0 }
 0x1b7   : > { %670 = vrot.lane.b32.xlu2 %v504_v2, %s1280_s29 }
 0x212   : > { %v599_v43 = vpop.xlane.xlu2 %598 }
 0x213   : > { %1139 = vrcp.f32 %v599_v43 }
 0x219   : > { %v1140_v45 = vpop.eup %1139 }
 0x21a   : > { %v601_v46 = vmul.f32 %v1140_v45, %v599_v43  ;;  %v671_v47 = vpop.permute.xlu2 %670  ;;  %v734_v43 = vsel %vm546_vm2, %v729_v42, 0 }
 0x21b   : > { %v676_v48 = vsel %vm506_vm0, %v671_v47, 0  ;;  %743 = vmatpush.bf16.msra.mxu1 %v734_v43 }
 0x21c   : > { %v602_v49 = vsub.f32 2.0, %v601_v46  ;;  %685 = vmatpush.bf16.xpose.msrb.mxu0 %v676_v48 }
 0x21e   : > { %v603_v50 = vmul.f32 %v1140_v45, %v602_v49 }
 0x220   : > { %v604_v53 = vmul.f32 %v1136_v30, %v603_v50 }
 0x222   : > { %v605_v54 = vpack.c.bf16 %v604_v53, %v604_v53 }
 0x223   : > { %1063 = vmatmul.msk.bf16.vlgmr.msrb.gmra.mxu0 %vm506_vm0, %v669_v52 }
 0x224   : > { %1060 = vmatmul.msk.bf16.vlgmr.msra.gmra.mxu3 %vm506_vm0, %v605_v54 }
 0x225   : > { %767 = vmatpush.bf16.xpose.msra.mxu3 %v758_v55 }
 0x228   : > { %v559_v56 = vpop.f32.mrf.mxu1 }
 0x229   : > { %v563_v58 = vpack.c.bf16 %v559_v56, %v559_v56 }
 0x230   : > { %v561_v57 = vpop.f32.mrf.mxu1 }
 0x231   : > { %v1130_v57 = vld [vmem:[#allocation2] ss:$0 sm:$0xff] }
 0x234   : > { %1062 = vmatmul.msk.bf16.vlgmr.msrb.gmra.mxu3 %vm506_vm0, %v563_v58 }
 0x244   : > { %1066 = vmatmul.msk.bf16.vlgmr.msra.gmra.mxu3 %vm506_vm0, %v751_v44  ;;  %v501_v44 = vld [vmem:[%s1511_s4 + $0x18] sm:$0xff] }
 0x245   : > { %v811_v45 = vpack.c.bf16 %v501_v44, %v501_v44 }
 0x247   : > { %v816_v46 = vsel %vm546_vm2, %v811_v45, 0 }
 0x2a0   : > { %v687_v62 = vpop.f32.mrf.mxu0 }
 0x2a1   : > { %v691_v63 = vsel %vm526_vm1, -1e+30, %v687_v62 }
 0x2a2   : > { %v692_v0 = vsel %vm506_vm0, %v691_v63, -inf }
 0x2a3   : > { %693 = vmax.xlane.f32.xlu0 %v692_v0 }
 0x2a7   : > { %v624_v1 = vpop.f32.mrf.mxu3 }
 0x2a8   : > { %v628_v2 = vpack.c.bf16 %v624_v1, %v624_v1  ;;  %v689_v3 = vpop.f32.mrf.mxu0  ;;  %v1281_v1 = vmov 32.0  }
 0x2aa   : > { %1061 = vmatmul.msk.bf16.vlgmr.msrb.gmra.mxu1 %vm506_vm0, %v628_v2 }
 0x2af   : > { %v626_v4 = vpop.f32.mrf.mxu3 }
 0x2b7   : > { %v1461_v5 = vpop.f32.mrf.mxu3  ;;  %707 = vrot.lane.b32.xlu0 %v1431_v24, %s1280_s29 }
 0x2bf   : > { %v666_v6 = vpop.f32.mrf.mxu3 }
 0x2c7   : > { %v769_v7 = vpop.f32.mrf.mxu3 }
 0x2c8   : > { %v773_v8 = vsel %vm526_vm1, -1e+30, %v769_v7 }
 0x2c9   : > { %v774_v10 = vsel %vm506_vm0, %v773_v8, -inf }
 0x2ca   : > { %775 = vmax.xlane.f32.xlu2 %v774_v10 }
 0x2cf   : > { %v771_v11 = vpop.f32.mrf.mxu3 }
 0x316   : > { %v694_v12 = vpop.xlane.xlu0 %693 }
 0x317   : > { %v695_v13 = vsub.f32 %v691_v63, %v694_v12 }
 0x319   : > { %v696_v14 = vmul.f32 1.442695, %v695_v13 }
 0x31b   : > { %1141 = vpow2.f32 %v696_v14 }
 0x321   : > { %v1142_v15 = vpop.eup %1141 }
 0x322   : > { %v698_v16 = vsel %vm506_vm0, %v1142_v15, 0.0 }
 0x323   : > { %699 = vadd.xlane.f32.xlu1 %v698_v16 }
 0x327   : > { %v645_v17 = vpop.f32.mrf.mxu1 }
 0x328   : > { %v665_v55 = vadd.f32 %v1461_v5, %v645_v17 }
 0x329   : > { %v708_v23 = vpop.permute.xlu0 %707 }
 0x32a   : > { %v713_v25 = vsel %vm546_vm2, %v708_v23, 0 }
 0x32b   : > { %722 = vmatpush.bf16.msrb.mxu2 %v713_v25  ;;  %v1132_v25 = vld [vmem:[#allocation6] ss:$0 sm:$0xff] }
 0x32f   : > { %v647_v18 = vpop.f32.mrf.mxu1  ;;  %825 = vmatpush.bf16.msra.mxu2 %v816_v46 }
 0x33c   : > { %789 = vrot.lane.b32.xlu1 %v1431_v24, %s1279_s25 }
 0x33d   : > { %v776_v19 = vpop.xlane.xlu2 %775 }
 0x33e   : > { %v777_v9 = vsub.f32 %v773_v8, %v776_v19 }
 0x340   : > { %v778_v20 = vmul.f32 1.442695, %v777_v9 }
 0x342   : > { %1143 = vpow2.f32 %v778_v20 }
 0x348   : > { %v1144_v21 = vpop.eup %1143 }
 0x349   : > { %v780_v22 = vsel %vm506_vm0, %v1144_v21, 0.0 }
 0x34a   : > { %781 = vadd.xlane.f32.xlu2 %v780_v22  ;;  %v1131_v22 = vld [vmem:[#allocation4] ss:$0 sm:$0xff] }
 0x396   : > { %v700_v26 = vpop.xlane.xlu1 %699 }
 0x397   : > { %1145 = vrcp.f32 %v700_v26 }
 0x39d   : > { %v1146_v27 = vpop.eup %1145 }
 0x39e   : > { %v702_v28 = vmul.f32 %v1146_v27, %v700_v26 }
 0x3a0   : > { %v703_v29 = vsub.f32 2.0, %v702_v28 }
 0x3a2   : > { %v704_v30 = vmul.f32 %v1146_v27, %v703_v29 }
 0x3a4   : > { %v705_v31 = vmul.f32 %v1142_v15, %v704_v30 }
 0x3a6   : > { %v706_v24 = vpack.c.bf16 %v705_v31, %v705_v31 }
 0x3a8   : > { %1064 = vmatmul.msk.bf16.vlgmr.msrb.gmra.mxu2 %vm506_vm0, %v706_v24 }
 0x3ae   : > { %v790_v32 = vpop.permute.xlu1 %789 }
 0x3af   : > { %v795_v33 = vsel %vm546_vm2, %v790_v32, 0 }
 0x3b0   : > { %804 = vmatpush.bf16.msra.mxu0 %v795_v33 }
 0x3bd   : > { %v782_v34 = vpop.xlane.xlu2 %781 }
 0x3be   : > { %1147 = vrcp.f32 %v782_v34 }
 0x3bf   : > { %1149 = vrcp.f32 %v1281_v1 }
 0x3c4   : > { %v1148_v35 = vpop.eup %1147 }
 0x3c5   : > { %v784_v36 = vmul.f32 %v1148_v35, %v782_v34  ;;  %v1150_v2 = vpop.eup %1149 }
 0x3c6   : > { %v844_v3 = vmul.f32 32.0, %v1150_v2  ;;  %vm848_vm4 = vweird.f32 %v1150_v2 }
 0x3c7   : > { %v785_v37 = vsub.f32 2.0, %v784_v36 }
 0x3c8   : > { %v845_v4 = vsub.f32 1.0, %v844_v3 }
 0x3c9   : > { %v786_v38 = vmul.f32 %v1148_v35, %v785_v37 }
 0x3ca   : > { %v846_v5 = vmul.f32 %v1150_v2, %v845_v4 }
 0x3cb   : > { %v787_v39 = vmul.f32 %v1144_v21, %v786_v38 }
 0x3cc   : > { %v847_v6 = vadd.f32 %v1150_v2, %v846_v5 }
 0x3cd   : > { %v788_v40 = vpack.c.bf16 %v787_v39, %v787_v39 }
 0x3ce   : > { %v849_v7 = vsel %vm848_vm4, %v1150_v2, %v847_v6 }
 0x3cf   : > { %1067 = vmatmul.msk.bf16.vlgmr.msra.gmra.mxu0 %vm506_vm0, %v788_v40 }
 0x42b   : > { %v724_v47 = vpop.f32.mrf.mxu2 }
 0x42c   : > { %v728_v48 = vpack.c.bf16 %v724_v47, %v724_v47 }
 0x42e   : > { %1065 = vmatmul.msk.bf16.vlgmr.msra.gmra.mxu1 %vm506_vm0, %v728_v48 }
 0x433   : > { %v726_v49 = vpop.f32.mrf.mxu2 }
 0x44c   : > { %v806_v50 = vpop.f32.mrf.mxu0 }
 0x44d   : > { %v810_v51 = vpack.c.bf16 %v806_v50, %v806_v50 }
 0x44f   : > { %1068 = vmatmul.msk.bf16.vlgmr.msra.gmra.mxu2 %vm506_vm0, %v810_v51 }
 0x454   : > { %v808_v52 = vpop.f32.mrf.mxu0 }
 0x4ab   : > { %v745_v53 = vpop.f32.mrf.mxu1 }
 0x4ac   : > { %v749_v56 = vadd.f32 %v745_v53, %v665_v55 }
 0x4b3   : > { %v747_v54 = vpop.f32.mrf.mxu1 }
 0x4d2   : > { %v827_v58 = vpop.f32.mrf.mxu2 }
 0x4d3   : > { %v831_v59 = vadd.f32 %v827_v58, %v749_v56 }
 0x4d5   : > { %v836_v61 = vadd.f32 %v1130_v57, %v831_v59 }
 0x4d7   : > { %v838_v62 = vadd.f32 %v837_v60, %v836_v61 }
 0x4d9   : > { %v840_v63 = vsel %vm839_vm3, %v838_v62, 0.0 }
 0x4da   : > { %841 = vadd.xlane.f32.xlu2 %v840_v63  ;;  %v829_v0 = vpop.f32.mrf.mxu2 }
 0x54d   : > { %v842_v8 = vpop.xlane.xlu2 %841 }
 0x54e   : > { %v850_v10 = vmul.f32 %v849_v7, %v842_v8 }
 0x550   : > { %v851_v11 = vsub.f32 %v838_v62, %v850_v10 }
 0x552   : > { %v852_v12 = vmul.f32 %v851_v11, %v851_v11 }
 0x554   : > { %v853_v13 = vsel %vm839_vm3, %v852_v12, 0.0 }
 0x555   : > { %854 = vadd.xlane.f32.xlu2 %v853_v13 }
 0x5c8   : > { %v855_v14 = vpop.xlane.xlu2 %854 }
 0x5c9   : > { %v856_v15 = vmul.f32 %v855_v14, %v849_v7 }
 0x5cb   : > { %v857_v16 = vadd.f32 1e-05, %v856_v15 }
 0x5cd   : > { %1151 = vrsqrt.f32 %v857_v16  ;;  %vm864_vm6 = vweird.f32 %v857_v16 }
 0x5d3   : > { %v1152_v17 = vpop.eup %1151 }
 0x5d4   : > { %v859_v18 = vmul.f32 %v1152_v17, %v857_v16  ;;  %vm865_vm5 = vweird.f32 %v1152_v17 }
 0x5d5   : > { %vm866_vm7 = vmor %vm864_vm6, %vm865_vm5 }
 0x5d6   : > { %v860_v19 = vmul.f32 %v1152_v17, %v859_v18 }
 0x5d8   : > { %v861_v9 = vmul.f32 0.5, %v860_v19 }
 0x5da   : > { %v862_v20 = vsub.f32 1.5, %v861_v9 }
 0x5dc   : > { %v863_v21 = vmul.f32 %v1152_v17, %v862_v20 }
 0x5de   : > { %v867_v23 = vsel %vm866_vm7, %v1152_v17, %v863_v21 }
 0x5df   : > { %v868_v26 = vmul.f32 %v867_v23, %v851_v11 }
 0x5e1   : > { %v873_v27 = vmul.f32 %v1131_v22, %v868_v26 }
 0x5e3   : > { %v878_v28 = vadd.f32 %v1132_v25, %v873_v27 }
 0x5e5   : > { %879 = vst.msk [vmem:[%s492_s26] sm:$0xff] %vm839_vm3, %v878_v28 }
 0x5e6 PF: > { %s21_s11 = sadd.s32 1, %s1273_s11   ;;  %s1520_s30 = smov %s1269_s10 }
 0x5e7   : > { %p18_p8 = scmp.ge.s32.totalorder %s21_s11, 4   ;;  %s1521_s10 = smov %s1523_s21 }
 0x5e9   :  { %20 = sbr.rel (!%p18_p8) target bundleno = 3 (0x3), region = 111 }
 0x5ee   :  { %905 = vsyncpa [#allocation3], 1 }
 0x5ef   :  { %907 = vsyncpa [#allocation3 + $0x1], 1 }
 0x5f0   :  { %908 = vsyncpa [#allocation5], 1 }

// kernel: decoder_forward.21
= control target key start
LH: loop header
LB: loop body
LE: loop exit
PB: predicated region body
PF: predicated region fallthrough
CT: control target
= control target key end

     0   :  { %12 = vsyncpa [#allocation5], 0  ;;  %s1012_s0 = inlined_call_operand.vmem [shape: f32[32,32], index: 0, kind: input, shape index: {}]   ;;  %s1013_s1 = inlined_call_operand.hbm [shape: f32[32,32], index: 1, kind: input, shape index: {}]   ;;  %s1014_s2 = inlined_call_operand.hbm [shape: f32[32,32], index: 2, kind: input, shape index: {}]   ;;  %s1015_s3 = inlined_call_operand.hbm [shape: f32[1,32], index: 3, kind: input, shape index: {}]   ;;  %s1016_s4 = inlined_call_operand.hbm [shape: f32[1,32], index: 4, kind: input, shape index: {}]   ;;  %s1017_s5 = inlined_call_operand.vmem [shape: f32[32,32], index: 5, kind: output, shape index: {0}]   ;;  %s1018_s6 = inlined_call_operand.vmem [shape: f32[32,32], index: 6, kind: output, shape index: {1}]  }
   0x1   :  { %13 = vsyncpa [#allocation7], 0 }
   0x2   :  { %14 = vsyncpa [#allocation10], 0  ;;  %s903_s21 = smov 0   ;;  %s905_s22 = smov 0  }
   0x3   :  { %s907_s23 = smov 0  }
   0x4 LB: > { %s612_s24 = sadd.s32 4294967295, %s859_s23   ;;  %p614_p0 = scmp.ge.s32.totalorder %s859_s23, 1  ;;  %s859_s23 = sphi %s907_s23, %s20_s23   ;;  %s855_s22 = sphi %s905_s22, %s1023_s22   ;;  %s851_s21 = sphi %s903_s21, %s1022_s21  }
   0x5   : > { %p211_p1 = scmp.lt.s32.totalorder %s859_s23, 3  ;;  %p921_p2 = scmp.eq.s32.totalorder %s612_s24, 0 }
   0x6   : > { %s242_s28 = sshll.u32 %s1014_s2, 4  ;;  %s861_s30 = smov [#allocation6]   ;;  %s243_s28 = int_to_ptr.hbm [resolvable:$true] %s242_s28 }
   0x7   : > { %p928_p3 = pnand %p614_p0, %p211_p1  ;;  %s244_s7 = sshll.u32 %s861_s30, 4  ;;  %s245_s7 = int_to_ptr.vmem [resolvable:$true] %s244_s7 }
   0x8   : > { %s32_s9 = sadd.s32 1, %s855_s22  ;;  %s862_s10 = smov 128  }
   0x9   : > { %p651_p4 = pneg %p928_p3  ;;  %p34_p6 = scmp.ge.s32.totalorder %s32_s9, 2 }
   0xa   : > { %s863_s11 = smov 8   ;;  %s225_s14 = sshll.u32 %s1013_s1, 4  ;;  %s226_s14 = int_to_ptr.hbm [resolvable:$true] %s225_s14 }
   0xb   : > { %p936_p5 = pnand %p921_p2, %p651_p4  ;;  %s1025_s9 = smov (%p34_p6, %s32_s9), 0 }
   0xc   : > { %s864_s15 = smov [#allocation4]   ;;  %s257_s19 = sshll.u32 %s1015_s3, 4  ;;  %s258_s19 = int_to_ptr.hbm [resolvable:$true] %s257_s19 }
   0xd   : > { %657 = dma.hbm_to_vmem [thread:$0]  (!%p936_p5), %s243_s28, 512, %s245_s7, [#allocation7], %s862_s10, %s862_s10, %s863_s11  }
   0xe   : > { %s227_s16 = sshll.u32 %s864_s15, 4  ;;  %s865_s20 = smov [#allocation8]   ;;  %s228_s16 = int_to_ptr.vmem [resolvable:$true] %s227_s16 }
   0xf   : > { %654 = dma.hbm_to_vmem [thread:$0]  (!%p936_p5), %s226_s14, 512, %s228_s16, [#allocation5], %s862_s10, %s862_s10, %s863_s11  }
  0x10   : > { %s259_s24 = sshll.u32 %s865_s20, 4  ;;  %s269_s28 = sshll.u32 %s1016_s4, 4  ;;  %s260_s24 = int_to_ptr.vmem [resolvable:$true] %s259_s24  ;;  %s270_s28 = int_to_ptr.hbm [resolvable:$true] %s269_s28 }
  0x11   : > { %660 = dma.hbm_to_vmem [thread:$0]  (!%p936_p5), %s258_s19, 16, %s260_s24, [#allocation7]  }
  0x12   : > { %s866_s30 = smov [#allocation9]   ;;  %296 = sbr.rel (%p928_p3) target bundleno = 187 (0xbb), region = 40 }
  0x13   : > { %s271_s7 = sshll.u32 %s866_s30, 4  ;;  %s272_s7 = int_to_ptr.vmem [resolvable:$true] %s271_s7 }
  0x14   : > { %663 = dma.hbm_to_vmem [thread:$0]  (!%p936_p5), %s270_s28, 16, %s272_s7, [#allocation10]  }
  0x17   : > { %838 = dma.done.wait (%p921_p2), [#allocation5], 512  }
  0x18   : > { %840 = vsyncadd (%p921_p2), [#allocation5], 4294966784 }
  0x19   : > { %842 = dma.done.wait (%p921_p2), [#allocation7], 528  }
  0x1a   : > { %844 = vsyncadd (%p921_p2), [#allocation7], 4294966768 }
  0x1b   : > { %846 = dma.done.wait (%p921_p2), [#allocation10], 16  }
  0x1c   : > { %848 = vsyncadd (%p921_p2), [#allocation10], 4294967280  ;;  %s625_s29 = sshll.u32 %s851_s21, 1  ;;  %vm378_vm0 = vcmask 261120   ;;  %v867_v0 = vmov 0.0   ;;  %v390_v1 = vld [vmem:[#allocation4 + $0x10] sm:$0xff] }
  0x1d   : > { %p351_p7 = scmp.lt.s32.totalorder %s625_s29, 3  ;;  %379 = vst.msk [vmem:[#allocation2] sm:$0xff] %vm378_vm0, %v867_v0  ;;  %v391_v2 = vld [vmem:[#allocation4 + $0x18] sm:$0xff]  ;;  %v420_v3 = vld [vmem:[#allocation6 + $0x10] sm:$0xff]  ;;  %v388_v6 = vld [vmem:[#allocation4] sm:$0xff] }
  0x1e   : > { %380 = vst.msk [vmem:[#allocation2 + $0x8] sm:$0xff] %vm378_vm0, %v867_v0  ;;  %v393_v4 = vpack.c.bf16 %v391_v2, %v390_v1  ;;  %v421_v5 = vld [vmem:[#allocation6 + $0x18] sm:$0xff]  ;;  %v389_v7 = vld [vmem:[#allocation4 + $0x8] sm:$0xff]  ;;  %v418_v9 = vld [vmem:[#allocation6] sm:$0xff] }
  0x1f   : > { %s1027_s29 = smov (!%p351_p7, %s625_s29), 3  ;;  %381 = vst.msk [vmem:[#allocation3] sm:$0xff] %vm378_vm0, %v867_v0  ;;  %v423_v8 = vpack.c.bf16 %v421_v5, %v420_v3  ;;  %v419_v10 = vld [vmem:[#allocation6 + $0x8] sm:$0xff]  ;;  %v392_v11 = vpack.c.bf16 %v389_v7, %v388_v6  ;;  %v703_v23 = vld [vmem:[#allocation8] ss:$0 sm:$0xff] }
  0x20   : > { %382 = vst.msk [vmem:[#allocation3 + $0x8] sm:$0xff] %vm378_vm0, %v867_v0  ;;  %s979_s8 = sshll.u32 %s1027_s29, 3  ;;  %404 = vmatpush.bf16.msra.mxu0 %v393_v4  ;;  %v422_v14 = vpack.c.bf16 %v419_v10, %v418_v9  ;;  %v704_v25 = vld [vmem:[#allocation9] ss:$0 sm:$0xff] }
  0x21   : > { %s357_s10 = scalar_lea.vmem %s1012_s0, %s979_s8  ;;  %430 = vmatpush.bf16.msra.mxu1 %v423_v8  ;;  %s365_s13 = scalar_lea.vmem %s1017_s5, %s979_s8 }
  0x22   : > { %v383_v12 = vld [vmem:[%s357_s10] sm:$0xff]  ;;  %v384_v13 = vld [vmem:[%s357_s10 + $0x8] sm:$0xff]  ;;  %s371_s16 = scalar_lea.vmem %s1018_s6, %s979_s8 }
  0x23   : > { %v385_v15 = vpack.c.bf16 %v384_v13, %v383_v12 }
  0x24   : > { %405 = vmatpush.bf16.msra.mxu0 %v392_v11  ;;  %v386_v16 = vld [vmem:[#allocation2] sm:$0xff] }
  0x25   : > { %431 = vmatpush.bf16.msra.mxu1 %v422_v14  ;;  %v387_v22 = vld [vmem:[#allocation2 + $0x8] sm:$0xff] }
  0x26   : > { %v416_v17 = vld [vmem:[#allocation3] sm:$0xff] }
  0x27   : > { %631 = vmatmul.msk.bf16.vlgmr.msra.gmra.mxu0 %vm378_vm0, %v385_v15  ;;  %v417_v24 = vld [vmem:[#allocation3 + $0x8] sm:$0xff] }
  0x28   : > { %632 = vmatmul.msk.bf16.vlgmr.msra.gmra.mxu1 %vm378_vm0, %v385_v15 }
  0xa4   : > { %v407_v18 = vpop.f32.mrf.mxu0 }
  0xa5   : > { %v412_v19 = vadd.f32 %v407_v18, %v386_v16  ;;  %v433_v20 = vpop.f32.mrf.mxu1 }
  0xa6   : > { %v438_v21 = vadd.f32 %v433_v20, %v416_v17 }
  0xa7   : > { %414 = vst.msk [vmem:[#allocation2] sm:$0xff] %vm378_vm0, %v412_v19 }
  0xa8   : > { %440 = vst.msk [vmem:[#allocation3] sm:$0xff] %vm378_vm0, %v438_v21 }
  0xac   : > { %v409_v26 = vpop.f32.mrf.mxu0 }
  0xad   : > { %v413_v27 = vadd.f32 %v409_v26, %v387_v22  ;;  %v435_v28 = vpop.f32.mrf.mxu1 }
  0xae   : > { %v445_v29 = vld [vmem:[#allocation2] sm:$0xff]  ;;  %v439_v30 = vadd.f32 %v435_v28, %v417_v24 }
  0xaf   : > { %v451_v31 = vadd.f32 %v703_v23, %v445_v29  ;;  %v455_v32 = vld [vmem:[#allocation3] sm:$0xff]  ;;  %415 = vst.msk [vmem:[#allocation2 + $0x8] sm:$0xff] %vm378_vm0, %v413_v27 }
  0xb0   : > { %v461_v33 = vadd.f32 %v704_v25, %v455_v32  ;;  %441 = vst.msk [vmem:[#allocation3 + $0x8] sm:$0xff] %vm378_vm0, %v439_v30 }
  0xb1   : > { %453 = vst.msk [vmem:[%s365_s13] sm:$0xff] %vm378_vm0, %v451_v31 }
  0xb2   : > { %463 = vst.msk [vmem:[%s371_s16] sm:$0xff] %vm378_vm0, %v461_v33 }
  0xb6   : > { %v446_v34 = vld [vmem:[#allocation2 + $0x8] sm:$0xff] }
  0xb7   : > { %v452_v35 = vadd.f32 %v703_v23, %v446_v34  ;;  %v456_v36 = vld [vmem:[#allocation3 + $0x8] sm:$0xff] }
  0xb8   : > { %v462_v37 = vadd.f32 %v704_v25, %v456_v36 }
  0xb9   : > { %454 = vst.msk [vmem:[%s365_s13 + $0x8] sm:$0xff] %vm378_vm0, %v452_v35 }
  0xba   : > { %464 = vst.msk [vmem:[%s371_s16 + $0x8] sm:$0xff] %vm378_vm0, %v462_v37 }
  0xbb PF: > { %s20_s23 = sadd.s32 1, %s859_s23   ;;  %s1022_s21 = smov %s855_s22 }
  0xbc   : > { %p17_p8 = scmp.ge.s32.totalorder %s20_s23, 4   ;;  %s1023_s22 = smov %s1025_s9 }
  0xbe   :  { %19 = sbr.rel (!%p17_p8) target bundleno = 4 (0x4), region = 109 }
  0xc3   :  { %504 = vsyncpa [#allocation5], 1 }
  0xc4   :  { %506 = vsyncpa [#allocation5 + $0x1], 1 }
  0xc5   :  { %507 = vsyncpa [#allocation7], 1 }
  0xc6   :  { %508 = vsyncpa [#allocation10], 1 }

// kernel: decoder_forward.20
= control target key start
LH: loop header
LB: loop body
LE: loop exit
PB: predicated region body
PF: predicated region fallthrough
CT: control target
= control target key end

     0   :  { %8 = vsyncpa [#allocation4], 0  ;;  %s493_s12 = smov 0   ;;  %s495_s13 = smov 0   ;;  %s546_s0 = inlined_call_operand.vmem [shape: f32[16,32], index: 0, kind: input, shape index: {}]   ;;  %s547_s1 = inlined_call_operand.vmem [shape: f32[32,32], index: 1, kind: input, shape index: {}]   ;;  %s548_s2 = inlined_call_operand.hbm [shape: f32[1,32], index: 2, kind: input, shape index: {}]   ;;  %s549_s3 = inlined_call_operand.vmem [shape: f32[16,32], index: 3, kind: output, shape index: {}]  }
   0x1   :  { %s497_s14 = smov 0  }
   0x2 LB: > { %s363_s15 = sadd.s32 4294967295, %s469_s14   ;;  %s26_s16 = sadd.s32 1, %s465_s13  ;;  %s469_s14 = sphi %s497_s14, %s14_s14   ;;  %s465_s13 = sphi %s495_s13, %s551_s13   ;;  %s461_s12 = sphi %s493_s12, %s550_s12  }
   0x3   : > { %p28_p0 = scmp.ge.s32.totalorder %s26_s16, 2  ;;  %p365_p1 = scmp.ge.s32.totalorder %s469_s14, 1 }
   0x4   : > { %p132_p2 = scmp.lt.s32.totalorder %s469_s14, 3  ;;  %p384_p4 = scmp.eq.s32.totalorder %s363_s15, 0 }
   0x5   : > { %s553_s16 = smov (%p28_p0, %s26_s16), 0  ;;  %s153_s19 = sshll.u32 %s548_s2, 4  ;;  %s154_s19 = int_to_ptr.hbm [resolvable:$true] %s153_s19 }
   0x6   : > { %p133_p3 = pnand %p365_p1, %p132_p2  ;;  %s471_s20 = smov [#allocation3]  }
   0x7   : > { %s155_s21 = sshll.u32 %s471_s20, 4  ;;  %s156_s21 = int_to_ptr.vmem [resolvable:$true] %s155_s21 }
   0x8   : > { %p380_p5 = pneg %p133_p3  ;;  %178 = sbr.rel (%p133_p3) target bundleno = 164 (0xa4), region = 32 }
   0xa   : > { %p381_p6 = pnand %p384_p4, %p380_p5 }
   0xc   : > { %383 = dma.hbm_to_vmem [thread:$0]  (!%p381_p6), %s154_s19, 16, %s156_s21, [#allocation4]  }
   0xd   : > { %456 = dma.done.wait (%p384_p4), [#allocation4], 16  }
   0xe   : > { %458 = vsyncadd (%p384_p4), [#allocation4], 4294967280  ;;  %p209_p7 = scmp.lt.s32.totalorder %s461_s12, 1  ;;  %vm231_vm0 = vcmask 261120   ;;  %v472_v0 = vmov 0.0   ;;  %v238_v1 = vld [vmem:[%s547_s1 + $0x10] sm:$0xff] }
   0xf   : > { %232 = vst.msk [vmem:[#allocation2] sm:$0xff] %vm231_vm0, %v472_v0  ;;  %v239_v2 = vld [vmem:[%s547_s1 + $0x18] sm:$0xff]  ;;  %v236_v3 = vld [vmem:[%s547_s1] sm:$0xff]  ;;  %v237_v5 = vld [vmem:[%s547_s1 + $0x8] sm:$0xff] }
  0x10   : > { %s555_s12 = smov (!%p209_p7, %s461_s12), 1  ;;  %v241_v4 = vpack.c.bf16 %v239_v2, %v238_v1  ;;  %v240_v6 = vpack.c.bf16 %v237_v5, %v236_v3  ;;  %v412_v12 = vld [vmem:[#allocation3] ss:$0 sm:$0xff] }
  0x11   : > { %s371_s22 = sshll.u32 %s555_s12, 3 }
  0x12   : > { %s215_s4 = scalar_lea.vmem %s546_s0, %s371_s22  ;;  %252 = vmatpush.bf16.msra.mxu0 %v241_v4  ;;  %s225_s9 = scalar_lea.vmem %s549_s3, %s371_s22 }
  0x13   : > { %v233_v7 = vld [vmem:[%s215_s4] sm:$0xff] }
  0x14   : > { %v234_v8 = vpack.c.bf16 %v233_v7, %v233_v7 }
  0x16   : > { %253 = vmatpush.bf16.msra.mxu0 %v240_v6  ;;  %v235_v9 = vld [vmem:[#allocation2] sm:$0xff] }
  0x19   : > { %373 = vmatmul.msk.bf16.vlgmr.msra.gmra.mxu0 %vm231_vm0, %v234_v8 }
  0x96   : > { %v255_v10 = vpop.f32.mrf.mxu0 }
  0x97   : > { %v259_v11 = vadd.f32 %v255_v10, %v235_v9 }
  0x99   : > { %260 = vst.msk [vmem:[#allocation2] sm:$0xff] %vm231_vm0, %v259_v11 }
  0x9e   : > { %v257_v13 = vpop.f32.mrf.mxu0 }
  0xa0   : > { %v264_v14 = vld [vmem:[#allocation2] sm:$0xff] }
  0xa1   : > { %v269_v15 = vadd.f32 %v412_v12, %v264_v14 }
  0xa3   : > { %270 = vst.msk [vmem:[%s225_s9] sm:$0xff] %vm231_vm0, %v269_v15 }
  0xa4 PF: > { %s14_s14 = sadd.s32 1, %s469_s14   ;;  %s550_s12 = smov %s465_s13 }
  0xa5   : > { %p11_p8 = scmp.ge.s32.totalorder %s14_s14, 4   ;;  %s551_s13 = smov %s553_s16 }
  0xa7   :  { %13 = sbr.rel (!%p11_p8) target bundleno = 2 (0x2), region = 78 }
  0xac   :  { %290 = vsyncpa [#allocation4], 1 }
  0xad   :  { %292 = vsyncpa [#allocation4 + $0x1], 1 }

// kernel: decoder_forward.22
= control target key start
LH: loop header
LB: loop body
LE: loop exit
PB: predicated region body
PF: predicated region fallthrough
CT: control target
= control target key end

     0   :  { %14 = vsyncpa [#allocation3], 0  ;;  %s1579_s0 = inlined_call_operand.vmem [shape: f32[2,8,32], index: 0, kind: input, shape index: {}]   ;;  %s1580_s1 = inlined_call_operand.vmem [shape: f32[2,16,32], index: 1, kind: input, shape index: {}]   ;;  %s1581_s2 = inlined_call_operand.vmem [shape: f32[2,16,32], index: 2, kind: input, shape index: {}]   ;;  %s1582_s3 = inlined_call_operand.vmem [shape: s32[2,1,16], index: 3, kind: input, shape index: {}]   ;;  %s1583_s4 = inlined_call_operand.hbm [shape: f32[32,32], index: 4, kind: input, shape index: {}]   ;;  %s1584_s5 = inlined_call_operand.hbm [shape: f32[1,32], index: 5, kind: input, shape index: {}]   ;;  %s1585_s6 = inlined_call_operand.vmem [shape: f32[2,8,32], index: 6, kind: input, shape index: {}]   ;;  %s1586_s7 = inlined_call_operand.hbm [shape: f32[1,32], index: 7, kind: input, shape index: {}]   ;;  %s1587_s8 = inlined_call_operand.hbm [shape: f32[1,32], index: 8, kind: input, shape index: {}]   ;;  %s1588_s9 = inlined_call_operand.vmem [shape: f32[2,8,32], index: 9, kind: output, shape index: {}]  }
   0x1   :  { %15 = vsyncpa [#allocation5], 0 }
   0x2   :  { %16 = vsyncpa [#allocation8], 0  ;;  %s1398_s30 = smov 0   ;;  %s1400_s10 = smov 0  }
   0x3   :  { %s1402_s11 = smov 0  }
   0x4 LB: > { %s311_s14 = sshll.u32 %s1584_s5, 4  ;;  %s1050_s15 = sadd.s32 4294967295, %s1335_s11   ;;  %s1335_s11 = sphi %s1402_s11, %s22_s11   ;;  %s1331_s10 = sphi %s1400_s10, %s1595_s10   ;;  %s1327_s30 = sphi %s1398_s30, %s1594_s30   ;;  %s312_s14 = int_to_ptr.hbm [resolvable:$true] %s311_s14 }
   0x5   : > { %p1052_p0 = scmp.ge.s32.totalorder %s1335_s11, 1  ;;  %p285_p1 = scmp.lt.s32.totalorder %s1335_s11, 3 }
   0x6   : > { %p1419_p2 = scmp.eq.s32.totalorder %s1050_s15, 0  ;;  %s1337_s18 = smov [#allocation4]  }
   0x7   : > { %p1423_p3 = pnand %p1052_p0, %p285_p1  ;;  %s313_s19 = sshll.u32 %s1337_s18, 4  ;;  %s314_s19 = int_to_ptr.vmem [resolvable:$true] %s313_s19 }
   0x8   : > { %s34_s21 = sadd.s32 1, %s1331_s10  ;;  %s296_s24 = sshll.u32 %s1583_s4, 4  ;;  %s297_s24 = int_to_ptr.hbm [resolvable:$true] %s296_s24 }
   0x9   : > { %p1102_p4 = pneg %p1423_p3  ;;  %p36_p6 = scmp.ge.s32.totalorder %s34_s21, 2 }
   0xa   : > { %s1338_s25 = smov [#allocation2]   ;;  %s323_s29 = sshll.u32 %s1586_s7, 4  ;;  %s324_s29 = int_to_ptr.hbm [resolvable:$true] %s323_s29 }
   0xb   : > { %p1431_p5 = pnand %p1419_p2, %p1102_p4  ;;  %s1597_s21 = smov (%p36_p6, %s34_s21), 0 }
   0xc   : > { %s298_s26 = sshll.u32 %s1338_s25, 4  ;;  %s1339_s12 = smov 128   ;;  %s299_s26 = int_to_ptr.vmem [resolvable:$true] %s298_s26 }
   0xd   : > { %1108 = dma.hbm_to_vmem [thread:$0]  (!%p1431_p5), %s312_s14, 16, %s314_s19, [#allocation5]  }
   0xe   : > { %s1340_s13 = smov 8   ;;  %s1341_s15 = smov [#allocation6]  }
   0xf   : > { %1105 = dma.hbm_to_vmem [thread:$0]  (!%p1431_p5), %s297_s24, 512, %s299_s26, [#allocation3], %s1339_s12, %s1339_s12, %s1340_s13  }
  0x10   : > { %s325_s18 = sshll.u32 %s1341_s15, 4  ;;  %s335_s14 = sshll.u32 %s1587_s8, 4  ;;  %s326_s18 = int_to_ptr.vmem [resolvable:$true] %s325_s18  ;;  %s336_s14 = int_to_ptr.hbm [resolvable:$true] %s335_s14 }
  0x11   : > { %1111 = dma.hbm_to_vmem [thread:$0]  (!%p1431_p5), %s324_s29, 16, %s326_s18, [#allocation5]  }
  0x12   : > { %s1342_s19 = smov [#allocation7]   ;;  %392 = sbr.rel (%p1423_p3) target bundleno = 1516 (0x5ec), region = 56 }
  0x13   : > { %s337_s25 = sshll.u32 %s1342_s19, 4  ;;  %s338_s25 = int_to_ptr.vmem [resolvable:$true] %s337_s25 }
  0x14   : > { %1114 = dma.hbm_to_vmem [thread:$0]  (!%p1431_p5), %s336_s14, 16, %s338_s25, [#allocation8]  }
  0x17   : > { %1314 = dma.done.wait (%p1419_p2), [#allocation3], 512  }
  0x18   : > { %1316 = vsyncadd (%p1419_p2), [#allocation3], 4294966784 }
  0x19   : > { %1318 = dma.done.wait (%p1419_p2), [#allocation5], 32  }
  0x1a   : > { %1320 = vsyncadd (%p1419_p2), [#allocation5], 4294967264 }
  0x1b   : > { %1322 = dma.done.wait (%p1419_p2), [#allocation8], 16  }
  0x1c   : > { %1324 = vsyncadd (%p1419_p2), [#allocation8], 4294967280  ;;  %p468_p7 = scmp.lt.s32.totalorder %s1327_s30, 1  ;;  %vm517_vm0 = vcmask 64512   ;;  %s1343_s12 = smov 120   ;;  %v1344_v11 = vmov 0  }
  0x1d   : > { %vm542_vm3 = vcmask 130048   ;;  %s1345_s22 = smov 104   ;;  %s1346_s25 = smov 112   ;;  %v509_v44 = vld [vmem:[#allocation2] sm:$0xff]  ;;  %vm642_vm4 = vcmask 1043456   ;;  %v510_v63 = vld [vmem:[#allocation2 + $0x8] sm:$0xff] }
  0x1e   : > { %s1599_s30 = smov (!%p468_p7, %s1327_s30), 1  ;;  %v575_v45 = vpack.c.bf16 %v509_v44, %v509_v44  ;;  %vm845_vm5 = vcmask 261120  }
  0x1f   : > { %s1084_s17 = sshll.u32 %s1599_s30, 4  ;;  %s1475_s20 = sshll.u32 %s1599_s30, 3 }
  0x20   : > { %s479_s27 = scalar_lea.vmem %s1580_s1, %s1084_s17  ;;  %s474_s29 = scalar_lea.vmem %s1579_s0, %s1475_s20  ;;  %v663_v46 = vsel %vm642_vm4, %v575_v45, 0 }
  0x21   : > { %v505_v0 = vld [vmem:[%s479_s27] sm:$0xff]  ;;  %v506_v1 = vld [vmem:[%s479_s27 + $0x8] sm:$0xff]  ;;  %s487_s18 = scalar_lea.vmem %s1582_s3, %s1599_s30  ;;  %s484_s19 = scalar_lea.vmem %s1581_s2, %s1084_s17 }
  0x22   : > { %v503_v2 = vld [vmem:[%s474_s29] sm:$0xff]  ;;  %v1486_v3 = vpack.c.bf16 %v506_v1, %v505_v0  ;;  %v508_v29 = vld [vmem:[%s484_s19 + $0x8] sm:$0xff]  ;;  %v638_v0 = vpack.c.bf16 %v510_v63, %v510_v63  ;;  %s494_s24 = scalar_lea.vmem %s1585_s6, %s1475_s20  ;;  %s501_s28 = scalar_lea.vmem %s1588_s9, %s1475_s20 }
  0x23   : > { %v504_v5 = vmul.f32 0.35355338, %v503_v2  ;;  %v513_v9 = vld [vmem:[%s487_s18] sm:$0x1] }
  0x24   : > { %580 = vrot.lane.b32.xlu0 %v1486_v3, %s1343_s12  ;;  %v522_v4 = vsel %vm517_vm0, %v1486_v3, 0  ;;  %vm537_vm1 = vcmp.eq.s32.totalorder %v513_v9, 0  ;;  %v507_v28 = vld [vmem:[%s484_s19] sm:$0xff]  ;;  %v644_v1 = vsel %vm642_vm4, %v638_v0, 0 }
  0x25   : > { %531 = vmatpush.bf16.xpose.msra.mxu0 %v522_v4  ;;  %v514_v6 = vpack.c.bf16 %v504_v5, %v504_v5  ;;  %v538_v12 = vsel %vm537_vm1, 1, %v1344_v11  ;;  %v1518_v30 = vpack.c.bf16 %v508_v29, %v507_v28 }
  0x26   : > { %v539_v13 = vperm.slane %v538_v12, 0 }
  0x27   : > { %568 = vmatpush.bf16.msra.mxu1 %v1518_v30 }
  0x28   : > { %vm1500_vm2 = vcmp.eq.s32.totalorder %v539_v13, 1 }
  0x2b   : > { %653 = vmatpush.bf16.msrb.mxu1 %v644_v1 }
  0x2c   : > { %577 = vrot.lane.b32.xlu0 %v514_v6, %s1343_s12  ;;  %1070 = vmatmul.msk.bf16.vlgmr.msra.gmra.mxu0 %vm517_vm0, %v514_v6 }
  0x34   : > { %618 = vrot.lane.b32.xlu0 %v1518_v30, %s1343_s12 }
  0x3c   : > { %758 = vrot.lane.b32.xlu0 %v514_v6, %s1345_s22 }
  0x44   : > { %678 = vrot.lane.b32.xlu0 %v514_v6, %s1346_s25 }
  0x96   : > { %v581_v7 = vpop.permute.xlu0 %580 }
  0x97   : > { %v586_v8 = vsel %vm517_vm0, %v581_v7, 0 }
  0x98   : > { %595 = vmatpush.bf16.xpose.msra.mxu2 %v586_v8 }
  0x9e   : > { %v578_v10 = vpop.permute.xlu0 %577 }
  0x9f   : > { %1072 = vmatmul.msk.bf16.vlgmr.msra.gmra.mxu2 %vm517_vm0, %v578_v10 }
  0xa6   : > { %v619_v43 = vpop.permute.xlu0 %618 }
  0xa7   : > { %631 = vmatpush.bf16.msra.mxu3 %v619_v43  ;;  %v511_v43 = vld [vmem:[#allocation2 + $0x10] sm:$0xff] }
  0xa8   : > { %v737_v44 = vpack.c.bf16 %v511_v43, %v511_v43 }
  0xa9   : > { %v533_v15 = vpop.f32.mrf.mxu0 }
  0xaa   : > { %v541_v16 = vsel %vm1500_vm2, -1e+30, %v533_v15  ;;  %v742_v45 = vsel %vm642_vm4, %v737_v44, 0 }
  0xab   : > { %v543_v17 = vsel %vm542_vm3, %v541_v16, -inf  ;;  %672 = vmatpush.bf16.msrb.mxu3 %v663_v46  ;;  %v512_v46 = vld [vmem:[#allocation2 + $0x18] sm:$0xff] }
  0xac   : > { %544 = vmax.xlane.f32.xlu1 %v543_v17 }
  0xae   : > { %v759_v48 = vpop.permute.xlu0 %758 }
  0xb1   : > { %v535_v18 = vpop.f32.mrf.mxu0 }
  0xb6   : > { %v679_v56 = vpop.permute.xlu0 %678 }
 0x11f   : > { %v545_v19 = vpop.xlane.xlu1 %544 }
 0x120   : > { %v546_v20 = vsub.f32 %v541_v16, %v545_v19 }
 0x122   : > { %v547_v21 = vmul.f32 1.442695, %v546_v20  ;;  %v597_v22 = vpop.f32.mrf.mxu2 }
 0x123   : > { %v601_v23 = vsel %vm1500_vm2, -1e+30, %v597_v22 }
 0x124   : > { %1161 = vpow2.f32 %v547_v21  ;;  %v602_v24 = vsel %vm542_vm3, %v601_v23, -inf }
 0x125   : > { %603 = vmax.xlane.f32.xlu2 %v602_v24 }
 0x12a   : > { %v1162_v25 = vpop.eup %1161  ;;  %v599_v26 = vpop.f32.mrf.mxu2 }
 0x12b   : > { %v549_v27 = vsel %vm542_vm3, %v1162_v25, 0.0 }
 0x12c   : > { %550 = vadd.xlane.f32.xlu1 %v549_v27 }
 0x145   : > { %760 = vrot.lane.b32.xlu1 %v1486_v3, %s1345_s22 }
 0x198   : > { %v604_v31 = vpop.xlane.xlu2 %603 }
 0x199   : > { %v605_v32 = vsub.f32 %v601_v23, %v604_v31 }
 0x19b   : > { %v606_v33 = vmul.f32 1.442695, %v605_v32 }
 0x19d   : > { %1163 = vpow2.f32 %v606_v33 }
 0x19f   : > { %v551_v34 = vpop.xlane.xlu1 %550 }
 0x1a0   : > { %1165 = vrcp.f32 %v551_v34 }
 0x1a3   : > { %v1164_v35 = vpop.eup %1163 }
 0x1a4   : > { %v608_v36 = vsel %vm542_vm3, %v1164_v35, 0.0 }
 0x1a5   : > { %609 = vadd.xlane.f32.xlu2 %v608_v36 }
 0x1a6   : > { %v1166_v37 = vpop.eup %1165 }
 0x1a7   : > { %v553_v38 = vmul.f32 %v1166_v37, %v551_v34 }
 0x1a9   : > { %v554_v39 = vsub.f32 2.0, %v553_v38 }
 0x1ab   : > { %v555_v40 = vmul.f32 %v1166_v37, %v554_v39 }
 0x1ad   : > { %v556_v41 = vmul.f32 %v1162_v25, %v555_v40 }
 0x1af   : > { %v557_v42 = vpack.c.bf16 %v556_v41, %v556_v41 }
 0x1b1   : > { %1071 = vmatmul.msk.bf16.vlgmr.msra.gmra.mxu1 %vm542_vm3, %v557_v42 }
 0x1b2   : > { %751 = vmatpush.bf16.msra.mxu1 %v742_v45 }
 0x1b7   : > { %v761_v55 = vpop.permute.xlu1 %760 }
 0x1b8   : > { %v766_v59 = vsel %vm517_vm0, %v761_v55, 0 }
 0x1bd   : > { %680 = vrot.lane.b32.xlu2 %v1486_v3, %s1346_s25 }
 0x218   : > { %v610_v47 = vpop.xlane.xlu2 %609 }
 0x219   : > { %1167 = vrcp.f32 %v610_v47 }
 0x21f   : > { %v1168_v49 = vpop.eup %1167 }
 0x220   : > { %v612_v50 = vmul.f32 %v1168_v49, %v610_v47  ;;  %v681_v51 = vpop.permute.xlu2 %680  ;;  %v817_v47 = vpack.c.bf16 %v512_v46, %v512_v46 }
 0x221   : > { %v686_v52 = vsel %vm517_vm0, %v681_v51, 0 }
 0x222   : > { %v613_v53 = vsub.f32 2.0, %v612_v50  ;;  %695 = vmatpush.bf16.xpose.msrb.mxu0 %v686_v52 }
 0x224   : > { %v614_v54 = vmul.f32 %v1168_v49, %v613_v53 }
 0x226   : > { %v615_v57 = vmul.f32 %v1164_v35, %v614_v54 }
 0x228   : > { %v616_v58 = vpack.c.bf16 %v615_v57, %v615_v57 }
 0x229   : > { %1076 = vmatmul.msk.bf16.vlgmr.msrb.gmra.mxu0 %vm517_vm0, %v679_v56 }
 0x22a   : > { %1073 = vmatmul.msk.bf16.vlgmr.msra.gmra.mxu3 %vm542_vm3, %v616_v58 }
 0x22b   : > { %775 = vmatpush.bf16.xpose.msra.mxu3 %v766_v59  ;;  %v1158_v59 = vld [vmem:[#allocation4] ss:$0 sm:$0xff] }
 0x22e   : > { %v570_v60 = vpop.f32.mrf.mxu1 }
 0x22f   : > { %v574_v62 = vpack.c.bf16 %v570_v60, %v570_v60 }
 0x236   : > { %v572_v61 = vpop.f32.mrf.mxu1 }
 0x23a   : > { %1075 = vmatmul.msk.bf16.vlgmr.msrb.gmra.mxu3 %vm517_vm0, %v574_v62  ;;  %v843_v62 = vld [vmem:[%s494_s24] sm:$0xff] }
 0x24a   : > { %1079 = vmatmul.msk.bf16.vlgmr.msra.gmra.mxu3 %vm517_vm0, %v759_v48  ;;  %v822_v48 = vsel %vm642_vm4, %v817_v47, 0 }
 0x2a6   : > { %v697_v2 = vpop.f32.mrf.mxu0 }
 0x2a7   : > { %v701_v3 = vsel %vm1500_vm2, -1e+30, %v697_v2 }
 0x2a8   : > { %v702_v4 = vsel %vm542_vm3, %v701_v3, -inf }
 0x2a9   : > { %703 = vmax.xlane.f32.xlu0 %v702_v4 }
 0x2ad   : > { %v633_v5 = vpop.f32.mrf.mxu3 }
 0x2ae   : > { %v637_v6 = vpack.c.bf16 %v633_v5, %v633_v5  ;;  %v699_v7 = vpop.f32.mrf.mxu0 }
 0x2b0   : > { %1074 = vmatmul.msk.bf16.vlgmr.msrb.gmra.mxu1 %vm517_vm0, %v637_v6 }
 0x2b5   : > { %v635_v8 = vpop.f32.mrf.mxu3 }
 0x2bd   : > { %v1541_v9 = vpop.f32.mrf.mxu3  ;;  %717 = vrot.lane.b32.xlu0 %v1518_v30, %s1346_s25 }
 0x2c5   : > { %v676_v10 = vpop.f32.mrf.mxu3 }
 0x2cd   : > { %v777_v11 = vpop.f32.mrf.mxu3 }
 0x2ce   : > { %v781_v12 = vsel %vm1500_vm2, -1e+30, %v777_v11 }
 0x2cf   : > { %v782_v13 = vsel %vm542_vm3, %v781_v12, -inf }
 0x2d0   : > { %783 = vmax.xlane.f32.xlu2 %v782_v13 }
 0x2d5   : > { %v779_v15 = vpop.f32.mrf.mxu3 }
 0x31c   : > { %v704_v16 = vpop.xlane.xlu0 %703 }
 0x31d   : > { %v705_v17 = vsub.f32 %v701_v3, %v704_v16  ;;  %v1347_v3 = vmov 32.0  }
 0x31f   : > { %v706_v18 = vmul.f32 1.442695, %v705_v17 }
 0x321   : > { %1169 = vpow2.f32 %v706_v18 }
 0x327   : > { %v1170_v19 = vpop.eup %1169 }
 0x328   : > { %v708_v20 = vsel %vm542_vm3, %v1170_v19, 0.0 }
 0x329   : > { %709 = vadd.xlane.f32.xlu1 %v708_v20 }
 0x32d   : > { %v655_v21 = vpop.f32.mrf.mxu1 }
 0x32e   : > { %v675_v57 = vadd.f32 %v1541_v9, %v655_v21 }
 0x32f   : > { %v718_v27 = vpop.permute.xlu0 %717 }
 0x330   : > { %730 = vmatpush.bf16.msrb.mxu2 %v718_v27 }
 0x334   : > { %831 = vmatpush.bf16.msra.mxu2 %v822_v48 }
 0x335   : > { %v657_v22 = vpop.f32.mrf.mxu1 }
 0x342   : > { %797 = vrot.lane.b32.xlu1 %v1518_v30, %s1345_s22 }
 0x343   : > { %v784_v23 = vpop.xlane.xlu2 %783 }
 0x344   : > { %v785_v14 = vsub.f32 %v781_v12, %v784_v23 }
 0x346   : > { %v786_v24 = vmul.f32 1.442695, %v785_v14 }
 0x348   : > { %1171 = vpow2.f32 %v786_v24  ;;  %v1159_v24 = vld [vmem:[#allocation6] ss:$0 sm:$0xff] }
 0x34e   : > { %v1172_v25 = vpop.eup %1171 }
 0x34f   : > { %v788_v26 = vsel %vm542_vm3, %v1172_v25, 0.0 }
 0x350   : > { %789 = vadd.xlane.f32.xlu2 %v788_v26  ;;  %v1160_v26 = vld [vmem:[#allocation7] ss:$0 sm:$0xff] }
 0x39c   : > { %v710_v28 = vpop.xlane.xlu1 %709 }
 0x39d   : > { %1173 = vrcp.f32 %v710_v28 }
 0x3a3   : > { %v1174_v29 = vpop.eup %1173 }
 0x3a4   : > { %v712_v31 = vmul.f32 %v1174_v29, %v710_v28 }
 0x3a6   : > { %v713_v32 = vsub.f32 2.0, %v712_v31 }
 0x3a8   : > { %v714_v33 = vmul.f32 %v1174_v29, %v713_v32 }
 0x3aa   : > { %v715_v34 = vmul.f32 %v1170_v19, %v714_v33 }
 0x3ac   : > { %v716_v35 = vpack.c.bf16 %v715_v34, %v715_v34 }
 0x3ae   : > { %1077 = vmatmul.msk.bf16.vlgmr.msrb.gmra.mxu2 %vm542_vm3, %v716_v35 }
 0x3b4   : > { %v798_v30 = vpop.permute.xlu1 %797 }
 0x3b5   : > { %810 = vmatpush.bf16.msra.mxu0 %v798_v30 }
 0x3c3   : > { %v790_v36 = vpop.xlane.xlu2 %789 }
 0x3c4   : > { %1175 = vrcp.f32 %v790_v36 }
 0x3c5   : > { %1177 = vrcp.f32 %v1347_v3 }
 0x3ca   : > { %v1176_v37 = vpop.eup %1175 }
 0x3cb   : > { %v792_v38 = vmul.f32 %v1176_v37, %v790_v36  ;;  %v1178_v4 = vpop.eup %1177 }
 0x3cc   : > { %v850_v5 = vmul.f32 32.0, %v1178_v4  ;;  %vm854_vm6 = vweird.f32 %v1178_v4 }
 0x3cd   : > { %v793_v39 = vsub.f32 2.0, %v792_v38 }
 0x3ce   : > { %v851_v6 = vsub.f32 1.0, %v850_v5 }
 0x3cf   : > { %v794_v40 = vmul.f32 %v1176_v37, %v793_v39 }
 0x3d0   : > { %v852_v7 = vmul.f32 %v1178_v4, %v851_v6 }
 0x3d1   : > { %v795_v41 = vmul.f32 %v1172_v25, %v794_v40 }
 0x3d2   : > { %v853_v8 = vadd.f32 %v1178_v4, %v852_v7 }
 0x3d3   : > { %v796_v42 = vpack.c.bf16 %v795_v41, %v795_v41 }
 0x3d4   : > { %v855_v9 = vsel %vm854_vm6, %v1178_v4, %v853_v8 }
 0x3d5   : > { %1080 = vmatmul.msk.bf16.vlgmr.msra.gmra.mxu0 %vm542_vm3, %v796_v42 }
 0x431   : > { %v732_v49 = vpop.f32.mrf.mxu2 }
 0x432   : > { %v736_v50 = vpack.c.bf16 %v732_v49, %v732_v49 }
 0x434   : > { %1078 = vmatmul.msk.bf16.vlgmr.msra.gmra.mxu1 %vm517_vm0, %v736_v50 }
 0x439   : > { %v734_v51 = vpop.f32.mrf.mxu2 }
 0x452   : > { %v812_v52 = vpop.f32.mrf.mxu0 }
 0x453   : > { %v816_v53 = vpack.c.bf16 %v812_v52, %v812_v52 }
 0x455   : > { %1081 = vmatmul.msk.bf16.vlgmr.msra.gmra.mxu2 %vm517_vm0, %v816_v53 }
 0x45a   : > { %v814_v54 = vpop.f32.mrf.mxu0 }
 0x4b1   : > { %v753_v55 = vpop.f32.mrf.mxu1 }
 0x4b2   : > { %v757_v58 = vadd.f32 %v753_v55, %v675_v57 }
 0x4b9   : > { %v755_v56 = vpop.f32.mrf.mxu1 }
 0x4d8   : > { %v833_v60 = vpop.f32.mrf.mxu2 }
 0x4d9   : > { %v837_v61 = vadd.f32 %v833_v60, %v757_v58 }
 0x4db   : > { %v842_v63 = vadd.f32 %v1158_v59, %v837_v61 }
 0x4dd   : > { %v844_v0 = vadd.f32 %v843_v62, %v842_v63 }
 0x4df   : > { %v846_v1 = vsel %vm845_vm5, %v844_v0, 0.0 }
 0x4e0   : > { %847 = vadd.xlane.f32.xlu2 %v846_v1  ;;  %v835_v2 = vpop.f32.mrf.mxu2 }
 0x553   : > { %v848_v10 = vpop.xlane.xlu2 %847 }
 0x554   : > { %v856_v11 = vmul.f32 %v855_v9, %v848_v10 }
 0x556   : > { %v857_v12 = vsub.f32 %v844_v0, %v856_v11 }
 0x558   : > { %v858_v13 = vmul.f32 %v857_v12, %v857_v12 }
 0x55a   : > { %v859_v15 = vsel %vm845_vm5, %v858_v13, 0.0 }
 0x55b   : > { %860 = vadd.xlane.f32.xlu2 %v859_v15 }
 0x5ce   : > { %v861_v16 = vpop.xlane.xlu2 %860 }
 0x5cf   : > { %v862_v17 = vmul.f32 %v861_v16, %v855_v9 }
 0x5d1   : > { %v863_v18 = vadd.f32 1e-05, %v862_v17 }
 0x5d3   : > { %1179 = vrsqrt.f32 %v863_v18  ;;  %vm870_vm8 = vweird.f32 %v863_v18 }
 0x5d9   : > { %v1180_v19 = vpop.eup %1179 }
 0x5da   : > { %v865_v20 = vmul.f32 %v1180_v19, %v863_v18  ;;  %vm871_vm7 = vweird.f32 %v1180_v19 }
 0x5db   : > { %vm872_vm9 = vmor %vm870_vm8, %vm871_vm7 }
 0x5dc   : > { %v866_v21 = vmul.f32 %v1180_v19, %v865_v20 }
 0x5de   : > { %v867_v22 = vmul.f32 0.5, %v866_v21 }
 0x5e0   : > { %v868_v23 = vsub.f32 1.5, %v867_v22 }
 0x5e2   : > { %v869_v14 = vmul.f32 %v1180_v19, %v868_v23 }
 0x5e4   : > { %v873_v25 = vsel %vm872_vm9, %v1180_v19, %v869_v14 }
 0x5e5   : > { %v874_v27 = vmul.f32 %v873_v25, %v857_v12 }
 0x5e7   : > { %v879_v28 = vmul.f32 %v1159_v24, %v874_v27 }
 0x5e9   : > { %v884_v29 = vadd.f32 %v1160_v26, %v879_v28 }
 0x5eb   : > { %885 = vst.msk [vmem:[%s501_s28] sm:$0xff] %vm845_vm5, %v884_v29 }
 0x5ec PF: > { %s22_s11 = sadd.s32 1, %s1335_s11   ;;  %s1594_s30 = smov %s1331_s10 }
 0x5ed   : > { %p19_p8 = scmp.ge.s32.totalorder %s22_s11, 4   ;;  %s1595_s10 = smov %s1597_s21 }
 0x5ef   :  { %21 = sbr.rel (!%p19_p8) target bundleno = 4 (0x4), region = 115 }
 0x5f4   :  { %911 = vsyncpa [#allocation3], 1 }
 0x5f5   :  { %913 = vsyncpa [#allocation3 + $0x1], 1 }
 0x5f6   :  { %914 = vsyncpa [#allocation5], 1 }
 0x5f7   :  { %915 = vsyncpa [#allocation8], 1 }

// kernel: decoder_forward.23
= control target key start
LH: loop header
LB: loop body
LE: loop exit
PB: predicated region body
PF: predicated region fallthrough
CT: control target
= control target key end

     0   :  { %12 = vsyncpa [#allocation4], 0  ;;  %s939_s0 = inlined_call_operand.vmem [shape: f32[16,32], index: 0, kind: input, shape index: {}]   ;;  %s940_s1 = inlined_call_operand.vmem [shape: f32[32,64], index: 1, kind: input, shape index: {}]   ;;  %s941_s2 = inlined_call_operand.vmem [shape: f32[1,64], index: 2, kind: input, shape index: {}]   ;;  %s942_s3 = inlined_call_operand.vmem [shape: f32[64,32], index: 3, kind: input, shape index: {}]   ;;  %s943_s4 = inlined_call_operand.vmem [shape: f32[1,32], index: 4, kind: input, shape index: {}]   ;;  %s944_s5 = inlined_call_operand.vmem [shape: f32[1,32], index: 5, kind: input, shape index: {}]   ;;  %s945_s6 = inlined_call_operand.vmem [shape: f32[1,32], index: 6, kind: input, shape index: {}]   ;;  %s946_s7 = inlined_call_operand.hbm [shape: f32[16,32], index: 7, kind: output, shape index: {}]  }
   0x1   :  { %14 = vsyncpa [#allocation4 + $0x1], 0  ;;  %s788_s24 = smov 0   ;;  %s790_s25 = smov 0  }
   0x2   :  { %s792_s26 = smov 0   ;;  %s794_s27 = smov 0  }
   0x3   :  { %s796_s28 = smov 0   ;;  %s798_s29 = smov 0  }
   0x4 LB: > { %s585_s30 = sadd.s32 4294967295, %s744_s29   ;;  %s586_s8 = sadd.s32 4294967294, %s744_s29   ;;  %s744_s29 = sphi %s798_s29, %s20_s29   ;;  %s740_s28 = sphi %s796_s28, %s953_s28   ;;  %s736_s27 = sphi %s794_s27, %s952_s27   ;;  %s732_s26 = sphi %s792_s26, %s951_s26   ;;  %s728_s25 = sphi %s790_s25, %s950_s25   ;;  %s724_s24 = sphi %s788_s24, %s949_s24  }
   0x5   : > { %s32_s9 = sadd.s32 1, %s740_s28  ;;  %s206_s10 = sadd.s32 1, %s732_s26 }
   0x6   : > { %p34_p0 = scmp.ge.s32.totalorder %s32_s9, 2  ;;  %p216_p1 = scmp.ne.s32.totalorder %s732_s26, %s728_s25 }
   0x7   : > { %p217_p2 = scmp.eq.s32.totalorder %s585_s30, 1  ;;  %p222_p3 = scmp.ne.s32.totalorder %s728_s25, %s724_s24 }
   0x8   : > { %s955_s9 = smov (%p34_p0, %s32_s9), 0  ;;  %p223_p5 = scmp.eq.s32.totalorder %s586_s8, 1 }
   0x9   : > { %p828_p4 = por %p217_p2, %p216_p1  ;;  %s203_s12 = ssub.s32 %s740_s28, %s955_s9 }
   0xa   : > { %p592_p6 = scmp.ge.s32.totalorder %s744_s29, 1  ;;  %p204_p7 = scmp.eq.s32.totalorder %s203_s12, 0 }
   0xb   : > { %p835_p8 = por %p223_p5, %p222_p3  ;;  %p279_p9 = scmp.lt.s32.totalorder %s744_s29, 3 }
   0xc   : > { %s841_s14 = scalar_select %p204_p7, %s732_s26, %s206_s10  }
   0xd   : > { %p280_p10 = pnand %p592_p6, %p279_p9 }
   0xe   : > { %p322_p11 = scmp.lt.s32.totalorder (!%p280_p10), %s736_s27, 1  ;;  %s598_s30 = sshll.u32 (!%p280_p10), %s736_s27, 3 }
   0xf   : > { %283 = sbr.rel (%p280_p10) target bundleno = 573 (0x23d), region = 48  ;;  %s471_s16 = scalar_lea.hbm (!%p280_p10), %s946_s7, %s598_s30 }
  0x10   : > { %s475_s20 = sshll.u32 (!%p280_p10), %s471_s16, 4  ;;  %s476_s20 = int_to_ptr.hbm [resolvable:$true] %s475_s20 }
  0x11   : > { %s680_s8 = sshra.s32 (!%p280_p10), %s476_s20, 4  ;;  %s681_s8 = int_to_ptr.hbm [resolvable:$true] %s680_s8 }
  0x12   : > { %s682_s30 = scalar_lea.hbm (!%p280_p10), %s681_s8, 8  ;;  %p687_p1 = scmp.lt.s32.totalorder (!%p280_p10), %s681_s8, %s946_s7 }
  0x13   : > { %p683_p12 = scmp.ne.s32.totalorder (!%p280_p10), %s681_s8, %s682_s30 }
  0x14   : > { %v350_v0 = vld [vmem:[%s940_s1 + $0x10] sm:$0xff]  ;;  %v351_v1 = vld [vmem:[%s940_s1 + $0x18] sm:$0xff]  ;;  %v348_v2 = vld [vmem:[%s940_s1] sm:$0xff]  ;;  %s323_s12 = scalar_select %p322_p11, %s736_s27, 1  ;;  %vm344_vm0 = vcmask 261120   ;;  %v746_v20 = vmov 0.0  }
  0x15   : > { %v353_v3 = vpack.c.bf16 %v351_v1, %v350_v0  ;;  %v349_v4 = vld [vmem:[%s940_s1 + $0x8] sm:$0xff]  ;;  %v384_v5 = vld [vmem:[%s942_s3 + $0x30] sm:$0xff]  ;;  %v385_v6 = vld [vmem:[%s942_s3 + $0x38] sm:$0xff]  ;;  %345 = vst.msk [vmem:[#allocation2] sm:$0xff] %vm344_vm0, %v746_v20  ;;  %vm390_vm1 = vcmask 523264   ;;  %v747_v36 = vmov 32.0   ;;  %p684_p13 = pnand %p683_p12, %p828_p4 }
  0x16   : > { %v389_v7 = vpack.c.bf16 %v385_v6, %v384_v5  ;;  %v382_v8 = vld [vmem:[%s942_s3 + $0x20] sm:$0xff]  ;;  %v383_v9 = vld [vmem:[%s942_s3 + $0x28] sm:$0xff]  ;;  %v352_v10 = vpack.c.bf16 %v349_v4, %v348_v2  ;;  %s594_s19 = sshll.u32 %s323_s12, 3  ;;  %v380_v14 = vld [vmem:[%s942_s3 + $0x10] sm:$0xff]  ;;  %662 = vrcp.f32 %v747_v36 }
  0x17   : > { %368 = vmatpush.bf16.msra.mxu0 %v353_v3  ;;  %v388_v11 = vpack.c.bf16 %v383_v9, %v382_v8  ;;  %s325_s22 = scalar_lea.vmem %s939_s0, %s594_s19  ;;  %v381_v15 = vld [vmem:[%s942_s3 + $0x18] sm:$0xff]  ;;  %v378_v17 = vld [vmem:[%s942_s3] sm:$0xff]  ;;  %v379_v18 = vld [vmem:[%s942_s3 + $0x8] sm:$0xff]  ;;  %p685_p0 = pneg %p684_p13 }
  0x18   : > { %398 = vmatpush.bf16.msra.mxu1 %v389_v7  ;;  %v346_v12 = vld [vmem:[%s325_s22] sm:$0xff]  ;;  %v387_v16 = vpack.c.bf16 %v381_v15, %v380_v14  ;;  %v386_v19 = vpack.c.bf16 %v379_v18, %v378_v17  ;;  %s319_s22 = sand.u32 1, %s728_s25  }
  0x19   : > { %v347_v13 = vpack.c.bf16 %v346_v12, %v346_v12  ;;  %v658_v21 = vld [vmem:[%s941_s2] ss:$0 sm:$0xff]  ;;  %s593_s23 = sshll.u32 %s319_s22, 3  ;;  %s461_s21 = scalar_lea.sflag [#allocation4], %s319_s22 }
  0x1a   : > { %v659_v30 = vld [vmem:[%s943_s4] ss:$0 sm:$0xff]  ;;  %s321_s19 = scalar_lea.vmem [#allocation3], %s593_s23  ;;  %s686_s23 = scalar_lea.hbm %s946_s7, 16 }
  0x1b   : > { %369 = vmatpush.bf16.msra.mxu0 %v352_v10  ;;  %v660_v57 = vld [vmem:[%s944_s5] ss:$0 sm:$0xff]  ;;  %s473_s27 = sshll.u32 %s321_s19, 4  ;;  %p688_p2 = scmp.lt.s32.totalorder %s686_s23, %s682_s30  ;;  %s474_s27 = int_to_ptr.vmem [resolvable:$true] %s473_s27 }
  0x1c   : > { %399 = vmatpush.bf16.msra.mxu1 %v388_v11  ;;  %v376_v27 = vld [vmem:[#allocation2] sm:$0xff]  ;;  %v663_v37 = vpop.eup %662 }
  0x1d   : > { %v424_v38 = vmul.f32 32.0, %v663_v37  ;;  %vm428_vm2 = vweird.f32 %v663_v37  ;;  %v661_v60 = vld [vmem:[%s945_s6] ss:$0 sm:$0xff]  ;;  %p689_p3 = por %p688_p2, %p687_p1 }
  0x1e   : > { %595 = vmatmul.msk.bf16.vlgmr.msra.gmra.mxu0 %vm344_vm0, %v347_v13 }
  0x1f   : > { %v425_v39 = vsub.f32 1.0, %v424_v38  ;;  %p690_p5 = pnand %p689_p3, %p685_p0 }
  0x20   : > { %400 = vmatpush.bf16.msra.mxu1 %v387_v16 }
  0x21   : > { %v426_v40 = vmul.f32 %v663_v37, %v425_v39 }
  0x23   : > { %v427_v41 = vadd.f32 %v663_v37, %v426_v40 }
  0x24   : > { %401 = vmatpush.bf16.msra.mxu1 %v386_v19 }
  0x25   : > { %v429_v42 = vsel %vm428_vm2, %v663_v37, %v427_v41 }
  0x9b   : > { %v371_v22 = vpop.f32.mrf.mxu0 }
  0x9c   : > { %v372_v23 = vadd.f32 %v658_v21, %v371_v22 }
  0x9e   : > { %v375_v24 = vmax.f32 %v372_v23, 0.0 }
  0xa0   : > { %v377_v25 = vpack.c.bf16 %v375_v24, %v375_v24 }
  0xa2   : > { %596 = vmatmul.msk.bf16.vlgmr.msra.gmra.mxu1 %vm390_vm1, %v377_v25 }
  0xa3   : > { %v373_v26 = vpop.f32.mrf.mxu0 }
 0x11f   : > { %v403_v28 = vpop.f32.mrf.mxu1 }
 0x120   : > { %v407_v29 = vadd.f32 %v403_v28, %v376_v27 }
 0x122   : > { %408 = vst.msk [vmem:[#allocation2] sm:$0xff] %vm344_vm0, %v407_v29 }
 0x127   : > { %v405_v31 = vpop.f32.mrf.mxu1 }
 0x129   : > { %v412_v32 = vld [vmem:[#allocation2] sm:$0xff] }
 0x12a   : > { %v417_v33 = vadd.f32 %v659_v30, %v412_v32 }
 0x12c   : > { %v419_v34 = vadd.f32 %v417_v33, %v346_v12 }
 0x12e   : > { %v420_v35 = vsel %vm344_vm0, %v419_v34, 0.0 }
 0x12f   : > { %421 = vadd.xlane.f32.xlu0 %v420_v35 }
 0x1a2   : > { %v422_v43 = vpop.xlane.xlu0 %421 }
 0x1a3   : > { %v430_v44 = vmul.f32 %v429_v42, %v422_v43 }
 0x1a5   : > { %v431_v45 = vsub.f32 %v419_v34, %v430_v44 }
 0x1a7   : > { %v432_v46 = vmul.f32 %v431_v45, %v431_v45 }
 0x1a9   : > { %v433_v47 = vsel %vm344_vm0, %v432_v46, 0.0 }
 0x1aa   : > { %434 = vadd.xlane.f32.xlu0 %v433_v47 }
 0x21d   : > { %v435_v48 = vpop.xlane.xlu0 %434 }
 0x21e   : > { %v436_v49 = vmul.f32 %v435_v48, %v429_v42 }
 0x220   : > { %v437_v50 = vadd.f32 1e-05, %v436_v49 }
 0x222   : > { %664 = vrsqrt.f32 %v437_v50  ;;  %vm444_vm4 = vweird.f32 %v437_v50 }
 0x228   : > { %v665_v51 = vpop.eup %664 }
 0x229   : > { %v439_v52 = vmul.f32 %v665_v51, %v437_v50  ;;  %vm445_vm3 = vweird.f32 %v665_v51 }
 0x22a   : > { %vm446_vm5 = vmor %vm444_vm4, %vm445_vm3 }
 0x22b   : > { %v440_v53 = vmul.f32 %v665_v51, %v439_v52 }
 0x22d   : > { %v441_v54 = vmul.f32 0.5, %v440_v53 }
 0x22f   : > { %v442_v55 = vsub.f32 1.5, %v441_v54 }
 0x231   : > { %v443_v56 = vmul.f32 %v665_v51, %v442_v55 }
 0x233   : > { %v447_v58 = vsel %vm446_vm5, %v665_v51, %v443_v56 }
 0x234   : > { %v448_v59 = vmul.f32 %v447_v58, %v431_v45 }
 0x236   : > { %v453_v61 = vmul.f32 %v660_v57, %v448_v59 }
 0x238   : > { %v458_v62 = vadd.f32 %v661_v60, %v453_v61 }
 0x23a   : > { %459 = vst.msk [vmem:[%s321_s19] sm:$0xff] %vm344_vm0, %v458_v62 }
 0x23b   : > { %693 = shalt.err (!%p690_p5)
}
 0x23c   : > { %601 = dma.vmem_to_hbm [thread:$0]  (%p828_p4), %s474_s27, 128, %s476_s20, %s461_s21  }
 0x23d PF: > { %p607_p6 = scmp.ge.s32.totalorder %s744_s29, 2  ;;  %s487_s22 = sand.u32 1, %s724_s24  }
 0x23e   : > { %s488_s17 = scalar_lea.sflag [#allocation4], %s487_s22 }
 0x23f   : > { %p604_p7 = pnand %p607_p6, %p835_p8 }
 0x241   : > { %p605_p9 = pneg %p604_p7 }
 0x243   : > { %719 = dma.done.wait (%p605_p9), %s488_s17, 128  }
 0x244   : > { %721 = vsyncadd (%p605_p9), %s488_s17, 4294967168  ;;  %s20_s29 = sadd.s32 1, %s744_s29   ;;  %s949_s24 = smov %s728_s25 }
 0x245   : > { %p17_p10 = scmp.ge.s32.totalorder %s20_s29, 4   ;;  %s950_s25 = smov %s732_s26 }
 0x246   : > { %s951_s26 = smov %s841_s14  ;;  %s952_s27 = smov %s740_s28 }
 0x247   : > { %s953_s28 = smov %s955_s9  ;;  %19 = sbr.rel (!%p17_p10) target bundleno = 4 (0x4), region = 100 }
 0x24c   :  { %494 = vsyncpa [#allocation4], 1 }
 0x24d   :  { %496 = vsyncpa [#allocation4 + $0x1], 1 }

</bundles_post_ra>
